<compile_context>
chip_gen: v7x
topology: tpu7x:2x2x1
jax: 0.10.0
libtpu: 0.0.40
codegen_flags: <defaults>
</compile_context>

<pallas_src>
import jax
import jax.numpy as jnp
from jax import lax
from jax.experimental import pallas as pl
from jax.experimental.pallas import tpu as pltpu

EPS = 1e-5


def _embed_mean_layernorm_kernel(ids_ref, emb_ref, gamma_ref, beta_ref, out_ref):
    ids = ids_ref[...]                      # (TB, L) int32
    TB, L = ids.shape
    V = emb_ref.shape[0]

    # (1, V) bucket iota, hoisted once; broadcast inside the compare.
    vocab_iota = lax.broadcasted_iota(jnp.int32, (1, V), 1)

    # counts[b, v] = #occurrences of bucket v in ids[b, :].
    # Stream the (small, static) sequence dim; only (TB, V) stays live.
    counts = jnp.zeros((TB, V), dtype=jnp.float32)
    for l in range(L):                      # static unroll (L known at trace time)
        counts = counts + (ids[:, l:l + 1] == vocab_iota).astype(jnp.float32)

    # sum over seq of embedding lookups == counts @ table  (MXU matmul).
    # The table dtype selects the MXU path (bf16 recommended on v6e/v7x);
    # counts <= L are exactly representable in bf16.  Accumulate in f32.
    emb = emb_ref[...]
    sum_emb = jnp.dot(counts.astype(emb.dtype), emb,
                      preferred_element_type=jnp.float32)        # (TB, E)

    # LayerNorm over E of (sum_emb / L), with the 1/L folded into eps:
    #   LN(x / L) == (x - mean(x)) * rsqrt(var(x) + eps * L^2)
    mu = jnp.mean(sum_emb, axis=-1, keepdims=True)
    xc = sum_emb - mu
    var = jnp.mean(xc * xc, axis=-1, keepdims=True)
    inv = lax.rsqrt(var + EPS * float(L * L))
    out_ref[...] = (xc * inv * gamma_ref[...] + beta_ref[...]).astype(out_ref.dtype)


def element_embedder_forward(ids, embed_table, gamma, beta, *,
                             batch_tile=128, vmem_limit_bytes=None):
    """ids: (B, L) int32; embed_table: (V, E); gamma/beta: (E,) -> (B, E) f32.

    batch_tile: 128 works on all chips; 256 recommended on v6e/v7x.
    Pass `embed_table` as bfloat16 on v6e/v7x to use the full-rate MXU path.
    """
    B, L = ids.shape
    V, E = embed_table.shape

    # Enforce nn.Embedding(padding_idx=0) semantics: padded positions (id 0)
    # must contribute exactly zero to the mean.
    embed_table = embed_table.at[0].set(0)

    # Pad the batch to a multiple of the tile (padded rows are all-zero ids
    # and are sliced off the output).
    padded_B = ((B + batch_tile - 1) // batch_tile) * batch_tile
    if padded_B != B:
        ids = jnp.pad(ids, ((0, padded_B - B), (0, 0)))

    gamma2 = gamma.reshape(1, E).astype(jnp.float32)
    beta2 = beta.reshape(1, E).astype(jnp.float32)

    cp_kwargs = dict(dimension_semantics=("parallel",))
    if vmem_limit_bytes is not None:
        cp_kwargs["vmem_limit_bytes"] = vmem_limit_bytes

    grid = (padded_B // batch_tile,)
    out = pl.pallas_call(
        _embed_mean_layernorm_kernel,
        out_shape=jax.ShapeDtypeStruct((padded_B, E), jnp.float32),
        grid_spec=pltpu.PrefetchScalarGridSpec(
            num_scalar_prefetch=0,
            grid=grid,
            in_specs=[
                pl.BlockSpec((batch_tile, L), lambda i: (i, 0)),   # ids tile
                pl.BlockSpec((V, E), lambda i: (0, 0)),            # full table (resident)
                pl.BlockSpec((1, E), lambda i: (0, 0)),            # gamma
                pl.BlockSpec((1, E), lambda i: (0, 0)),            # beta
            ],
            out_specs=pl.BlockSpec((batch_tile, E), lambda i: (i, 0)),
        ),
        compiler_params=pltpu.CompilerParams(**cp_kwargs),
    )(ids, embed_table, gamma2, beta2)

    return out[:B] if padded_B != B else out


def _reference(ids, embed_table, gamma, beta):
    embed_table = embed_table.at[0].set(0)
    x = jnp.take(embed_table, ids, axis=0)          # (B, L, E)
    m = jnp.mean(x, axis=1)                         # (B, E)
    mu = jnp.mean(m, axis=-1, keepdims=True)
    var = jnp.mean((m - mu) ** 2, axis=-1, keepdims=True)
    return (m - mu) * lax.rsqrt(var + EPS) * gamma + beta


if __name__ == "__main__":
    # Deterministic synthetic setup consistent with the module:
    #   num_buckets (V) = 512, max_len (L) = 16, emb_size (E) = 128, batch (B) = 256
    # batch_tile=128 -> grid of 2 "parallel" steps (both v7x TensorCores busy).
    key = jax.random.PRNGKey(0)
    k_ids, k_emb = jax.random.split(key)

    B, L, V, E = 256, 16, 512, 128

    # ids: subword bucket indices, 0 = padding (as produced by create_fixed_length)
    ids = jax.random.randint(k_ids, (B, L), minval=0, maxval=V, dtype=jnp.int32)
    pad_mask = jnp.arange(L)[None, :] < (L - 4)     # simulate padded tails
    ids = jnp.where(pad_mask, ids, 0)

    # nn.Embedding(num_buckets, emb_size, padding_idx=0): N(0,1) init, row 0 zero
    embed_table = jax.random.normal(k_emb, (V, E), dtype=jnp.float32)
    embed_table = embed_table.at[0].set(0.0)

    # nn.LayerNorm(emb_size) default affine params
    gamma = jnp.ones((E,), dtype=jnp.float32)
    beta = jnp.zeros((E,), dtype=jnp.float32)

    out = element_embedder_forward(ids, embed_table, gamma, beta, batch_tile=128)
    out = jax.block_until_ready(out)

    ref = _reference(ids, embed_table, gamma, beta)
    assert out.shape == (B, E)
    assert jnp.allclose(out, ref, atol=1e-4, rtol=1e-4), "mismatch vs reference"

    print("KERNEL_OK")
</pallas_src>

<mosaic_0001>
module attributes {stable_mosaic.version = 11 : i64} {
  func.func @_embed_mean_layernorm_kernel(%arg0: i32, %arg1: memref<128x16xi32, #tpu.memory_space<vmem>>, %arg2: memref<512x128xf32, #tpu.memory_space<vmem>>, %arg3: memref<1x128xf32, #tpu.memory_space<vmem>>, %arg4: memref<1x128xf32, #tpu.memory_space<vmem>>, %arg5: memref<128x128xf32, #tpu.memory_space<vmem>>) attributes {dimension_semantics = [#tpu.dimension_semantics<parallel>], iteration_bounds = array<i64: 2>, scalar_prefetch = 0 : i64, scratch_operands = 0 : i64, tpu.core_type = #tpu.core_type<tc>, window_params = [{transform_indices = @transform_0, window_bounds = array<i64: 128, 16>}, {pipeline_mode = #tpu.pipeline_mode<synchronous>, transform_indices = @transform_1, window_bounds = array<i64: 512, 128>}, {pipeline_mode = #tpu.pipeline_mode<synchronous>, transform_indices = @transform_2, window_bounds = array<i64: 1, 128>}, {pipeline_mode = #tpu.pipeline_mode<synchronous>, transform_indices = @transform_3, window_bounds = array<i64: 1, 128>}, {transform_indices = @transform_4, window_bounds = array<i64: 128, 128>}]} {
    %c0 = arith.constant 0 : index
    %c0_0 = arith.constant 0 : index
    %0 = vector.load %arg1[%c0, %c0_0] : memref<128x16xi32, #tpu.memory_space<vmem>>, vector<128x16xi32>
    %1 = tpu.iota {dimensions = array<i32: 1>} : vector<1x512xi32>
    %cst = arith.constant 0.000000e+00 : f32
    %2 = vector.broadcast %cst : f32 to vector<128x512xf32>
    %3 = vector.extract_strided_slice %0 {offsets = [0, 0], sizes = [128, 1], strides = [1, 1]} : vector<128x16xi32> to vector<128x1xi32>
    %4 = vector.broadcast %3 : vector<128x1xi32> to vector<128x512xi32>
    %5 = vector.broadcast %1 : vector<1x512xi32> to vector<128x512xi32>
    %6 = arith.cmpi eq, %4, %5 : vector<128x512xi32>
    %7 = arith.extui %6 : vector<128x512xi1> to vector<128x512xi32>
    %8 = arith.sitofp %7 : vector<128x512xi32> to vector<128x512xf32>
    %9 = arith.addf %2, %8 : vector<128x512xf32>
    %10 = vector.extract_strided_slice %0 {offsets = [0, 1], sizes = [128, 1], strides = [1, 1]} : vector<128x16xi32> to vector<128x1xi32>
    %11 = vector.broadcast %10 : vector<128x1xi32> to vector<128x512xi32>
    %12 = vector.broadcast %1 : vector<1x512xi32> to vector<128x512xi32>
    %13 = arith.cmpi eq, %11, %12 : vector<128x512xi32>
    %14 = arith.extui %13 : vector<128x512xi1> to vector<128x512xi32>
    %15 = arith.sitofp %14 : vector<128x512xi32> to vector<128x512xf32>
    %16 = arith.addf %9, %15 : vector<128x512xf32>
    %17 = vector.extract_strided_slice %0 {offsets = [0, 2], sizes = [128, 1], strides = [1, 1]} : vector<128x16xi32> to vector<128x1xi32>
    %18 = vector.broadcast %17 : vector<128x1xi32> to vector<128x512xi32>
    %19 = vector.broadcast %1 : vector<1x512xi32> to vector<128x512xi32>
    %20 = arith.cmpi eq, %18, %19 : vector<128x512xi32>
    %21 = arith.extui %20 : vector<128x512xi1> to vector<128x512xi32>
    %22 = arith.sitofp %21 : vector<128x512xi32> to vector<128x512xf32>
    %23 = arith.addf %16, %22 : vector<128x512xf32>
    %24 = vector.extract_strided_slice %0 {offsets = [0, 3], sizes = [128, 1], strides = [1, 1]} : vector<128x16xi32> to vector<128x1xi32>
    %25 = vector.broadcast %24 : vector<128x1xi32> to vector<128x512xi32>
    %26 = vector.broadcast %1 : vector<1x512xi32> to vector<128x512xi32>
    %27 = arith.cmpi eq, %25, %26 : vector<128x512xi32>
    %28 = arith.extui %27 : vector<128x512xi1> to vector<128x512xi32>
    %29 = arith.sitofp %28 : vector<128x512xi32> to vector<128x512xf32>
    %30 = arith.addf %23, %29 : vector<128x512xf32>
    %31 = vector.extract_strided_slice %0 {offsets = [0, 4], sizes = [128, 1], strides = [1, 1]} : vector<128x16xi32> to vector<128x1xi32>
    %32 = vector.broadcast %31 : vector<128x1xi32> to vector<128x512xi32>
    %33 = vector.broadcast %1 : vector<1x512xi32> to vector<128x512xi32>
    %34 = arith.cmpi eq, %32, %33 : vector<128x512xi32>
    %35 = arith.extui %34 : vector<128x512xi1> to vector<128x512xi32>
    %36 = arith.sitofp %35 : vector<128x512xi32> to vector<128x512xf32>
    %37 = arith.addf %30, %36 : vector<128x512xf32>
    %38 = vector.extract_strided_slice %0 {offsets = [0, 5], sizes = [128, 1], strides = [1, 1]} : vector<128x16xi32> to vector<128x1xi32>
    %39 = vector.broadcast %38 : vector<128x1xi32> to vector<128x512xi32>
    %40 = vector.broadcast %1 : vector<1x512xi32> to vector<128x512xi32>
    %41 = arith.cmpi eq, %39, %40 : vector<128x512xi32>
    %42 = arith.extui %41 : vector<128x512xi1> to vector<128x512xi32>
    %43 = arith.sitofp %42 : vector<128x512xi32> to vector<128x512xf32>
    %44 = arith.addf %37, %43 : vector<128x512xf32>
    %45 = vector.extract_strided_slice %0 {offsets = [0, 6], sizes = [128, 1], strides = [1, 1]} : vector<128x16xi32> to vector<128x1xi32>
    %46 = vector.broadcast %45 : vector<128x1xi32> to vector<128x512xi32>
    %47 = vector.broadcast %1 : vector<1x512xi32> to vector<128x512xi32>
    %48 = arith.cmpi eq, %46, %47 : vector<128x512xi32>
    %49 = arith.extui %48 : vector<128x512xi1> to vector<128x512xi32>
    %50 = arith.sitofp %49 : vector<128x512xi32> to vector<128x512xf32>
    %51 = arith.addf %44, %50 : vector<128x512xf32>
    %52 = vector.extract_strided_slice %0 {offsets = [0, 7], sizes = [128, 1], strides = [1, 1]} : vector<128x16xi32> to vector<128x1xi32>
    %53 = vector.broadcast %52 : vector<128x1xi32> to vector<128x512xi32>
    %54 = vector.broadcast %1 : vector<1x512xi32> to vector<128x512xi32>
    %55 = arith.cmpi eq, %53, %54 : vector<128x512xi32>
    %56 = arith.extui %55 : vector<128x512xi1> to vector<128x512xi32>
    %57 = arith.sitofp %56 : vector<128x512xi32> to vector<128x512xf32>
    %58 = arith.addf %51, %57 : vector<128x512xf32>
    %59 = vector.extract_strided_slice %0 {offsets = [0, 8], sizes = [128, 1], strides = [1, 1]} : vector<128x16xi32> to vector<128x1xi32>
    %60 = vector.broadcast %59 : vector<128x1xi32> to vector<128x512xi32>
    %61 = vector.broadcast %1 : vector<1x512xi32> to vector<128x512xi32>
    %62 = arith.cmpi eq, %60, %61 : vector<128x512xi32>
    %63 = arith.extui %62 : vector<128x512xi1> to vector<128x512xi32>
    %64 = arith.sitofp %63 : vector<128x512xi32> to vector<128x512xf32>
    %65 = arith.addf %58, %64 : vector<128x512xf32>
    %66 = vector.extract_strided_slice %0 {offsets = [0, 9], sizes = [128, 1], strides = [1, 1]} : vector<128x16xi32> to vector<128x1xi32>
    %67 = vector.broadcast %66 : vector<128x1xi32> to vector<128x512xi32>
    %68 = vector.broadcast %1 : vector<1x512xi32> to vector<128x512xi32>
    %69 = arith.cmpi eq, %67, %68 : vector<128x512xi32>
    %70 = arith.extui %69 : vector<128x512xi1> to vector<128x512xi32>
    %71 = arith.sitofp %70 : vector<128x512xi32> to vector<128x512xf32>
    %72 = arith.addf %65, %71 : vector<128x512xf32>
    %73 = vector.extract_strided_slice %0 {offsets = [0, 10], sizes = [128, 1], strides = [1, 1]} : vector<128x16xi32> to vector<128x1xi32>
    %74 = vector.broadcast %73 : vector<128x1xi32> to vector<128x512xi32>
    %75 = vector.broadcast %1 : vector<1x512xi32> to vector<128x512xi32>
    %76 = arith.cmpi eq, %74, %75 : vector<128x512xi32>
    %77 = arith.extui %76 : vector<128x512xi1> to vector<128x512xi32>
    %78 = arith.sitofp %77 : vector<128x512xi32> to vector<128x512xf32>
    %79 = arith.addf %72, %78 : vector<128x512xf32>
    %80 = vector.extract_strided_slice %0 {offsets = [0, 11], sizes = [128, 1], strides = [1, 1]} : vector<128x16xi32> to vector<128x1xi32>
    %81 = vector.broadcast %80 : vector<128x1xi32> to vector<128x512xi32>
    %82 = vector.broadcast %1 : vector<1x512xi32> to vector<128x512xi32>
    %83 = arith.cmpi eq, %81, %82 : vector<128x512xi32>
    %84 = arith.extui %83 : vector<128x512xi1> to vector<128x512xi32>
    %85 = arith.sitofp %84 : vector<128x512xi32> to vector<128x512xf32>
    %86 = arith.addf %79, %85 : vector<128x512xf32>
    %87 = vector.extract_strided_slice %0 {offsets = [0, 12], sizes = [128, 1], strides = [1, 1]} : vector<128x16xi32> to vector<128x1xi32>
    %88 = vector.broadcast %87 : vector<128x1xi32> to vector<128x512xi32>
    %89 = vector.broadcast %1 : vector<1x512xi32> to vector<128x512xi32>
    %90 = arith.cmpi eq, %88, %89 : vector<128x512xi32>
    %91 = arith.extui %90 : vector<128x512xi1> to vector<128x512xi32>
    %92 = arith.sitofp %91 : vector<128x512xi32> to vector<128x512xf32>
    %93 = arith.addf %86, %92 : vector<128x512xf32>
    %94 = vector.extract_strided_slice %0 {offsets = [0, 13], sizes = [128, 1], strides = [1, 1]} : vector<128x16xi32> to vector<128x1xi32>
    %95 = vector.broadcast %94 : vector<128x1xi32> to vector<128x512xi32>
    %96 = vector.broadcast %1 : vector<1x512xi32> to vector<128x512xi32>
    %97 = arith.cmpi eq, %95, %96 : vector<128x512xi32>
    %98 = arith.extui %97 : vector<128x512xi1> to vector<128x512xi32>
    %99 = arith.sitofp %98 : vector<128x512xi32> to vector<128x512xf32>
    %100 = arith.addf %93, %99 : vector<128x512xf32>
    %101 = vector.extract_strided_slice %0 {offsets = [0, 14], sizes = [128, 1], strides = [1, 1]} : vector<128x16xi32> to vector<128x1xi32>
    %102 = vector.broadcast %101 : vector<128x1xi32> to vector<128x512xi32>
    %103 = vector.broadcast %1 : vector<1x512xi32> to vector<128x512xi32>
    %104 = arith.cmpi eq, %102, %103 : vector<128x512xi32>
    %105 = arith.extui %104 : vector<128x512xi1> to vector<128x512xi32>
    %106 = arith.sitofp %105 : vector<128x512xi32> to vector<128x512xf32>
    %107 = arith.addf %100, %106 : vector<128x512xf32>
    %108 = vector.extract_strided_slice %0 {offsets = [0, 15], sizes = [128, 1], strides = [1, 1]} : vector<128x16xi32> to vector<128x1xi32>
    %109 = vector.broadcast %108 : vector<128x1xi32> to vector<128x512xi32>
    %110 = vector.broadcast %1 : vector<1x512xi32> to vector<128x512xi32>
    %111 = arith.cmpi eq, %109, %110 : vector<128x512xi32>
    %112 = arith.extui %111 : vector<128x512xi1> to vector<128x512xi32>
    %113 = arith.sitofp %112 : vector<128x512xi32> to vector<128x512xf32>
    %114 = arith.addf %107, %113 : vector<128x512xf32>
    %c0_1 = arith.constant 0 : index
    %c0_2 = arith.constant 0 : index
    %115 = vector.load %arg2[%c0_1, %c0_2] : memref<512x128xf32, #tpu.memory_space<vmem>>, vector<512x128xf32>
    %cst_3 = arith.constant dense<0.000000e+00> : vector<128x128xf32>
    %116 = tpu.matmul %114, %115, %cst_3 {dimension_numbers = #tpu.dot_dimension_numbers<[1], [0], [0], [1], [0, 0, 1, 1], [], []>} : vector<128x512xf32>, vector<512x128xf32>, vector<128x128xf32> -> vector<128x128xf32>
    %cst_4 = arith.constant dense<0.000000e+00> : vector<128xf32>
    %117 = vector.multi_reduction <add>, %116, %cst_4 [1] : vector<128x128xf32> to vector<128xf32>
    %118 = vector.shape_cast %117 : vector<128xf32> to vector<128x1xf32>
    %cst_5 = arith.constant 1.280000e+02 : f32
    %119 = vector.broadcast %cst_5 : f32 to vector<128x1xf32>
    %120 = arith.divf %118, %119 : vector<128x1xf32>
    %121 = vector.broadcast %120 : vector<128x1xf32> to vector<128x128xf32>
    %122 = arith.subf %116, %121 : vector<128x128xf32>
    %123 = arith.mulf %122, %122 : vector<128x128xf32>
    %cst_6 = arith.constant dense<0.000000e+00> : vector<128xf32>
    %124 = vector.multi_reduction <add>, %123, %cst_6 [1] : vector<128x128xf32> to vector<128xf32>
    %125 = vector.shape_cast %124 : vector<128xf32> to vector<128x1xf32>
    %cst_7 = arith.constant 1.280000e+02 : f32
    %126 = vector.broadcast %cst_7 : f32 to vector<128x1xf32>
    %127 = arith.divf %125, %126 : vector<128x1xf32>
    %cst_8 = arith.constant 2.560000e-03 : f32
    %128 = vector.broadcast %cst_8 : f32 to vector<128x1xf32>
    %129 = arith.addf %127, %128 : vector<128x1xf32>
    %130 = math.rsqrt %129 : vector<128x1xf32>
    %131 = vector.broadcast %130 : vector<128x1xf32> to vector<128x128xf32>
    %132 = arith.mulf %122, %131 : vector<128x128xf32>
    %c0_9 = arith.constant 0 : index
    %c0_10 = arith.constant 0 : index
    %133 = vector.load %arg3[%c0_9, %c0_10] : memref<1x128xf32, #tpu.memory_space<vmem>>, vector<1x128xf32>
    %134 = vector.broadcast %133 : vector<1x128xf32> to vector<128x128xf32>
    %135 = arith.mulf %132, %134 : vector<128x128xf32>
    %c0_11 = arith.constant 0 : index
    %c0_12 = arith.constant 0 : index
    %136 = vector.load %arg4[%c0_11, %c0_12] : memref<1x128xf32, #tpu.memory_space<vmem>>, vector<1x128xf32>
    %137 = vector.broadcast %136 : vector<1x128xf32> to vector<128x128xf32>
    %138 = arith.addf %135, %137 : vector<128x128xf32>
    %c0_13 = arith.constant 0 : index
    %c0_14 = arith.constant 0 : index
    %139 = vector.load %arg5[%c0_13, %c0_14] : memref<128x128xf32, #tpu.memory_space<vmem>>, vector<128x128xf32>
    tpu.vector_store %arg5[%c0_13, %c0_14], %138 {strides = array<i32>} : memref<128x128xf32, #tpu.memory_space<vmem>>, vector<128x128xf32>,
    return
  }
  func.func @transform_0(%arg0: i32) -> (i32, i32) {
    %c0_i32 = arith.constant 0 : i32
    %c0_i32_0 = arith.constant 0 : i32
    return %arg0, %c0_i32 : i32, i32
  }
  func.func @transform_1(%arg0: i32) -> (i32, i32) {
    %c0_i32 = arith.constant 0 : i32
    %c0_i32_0 = arith.constant 0 : i32
    %c0_i32_1 = arith.constant 0 : i32
    return %c0_i32, %c0_i32_0 : i32, i32
  }
  func.func @transform_2(%arg0: i32) -> (i32, i32) {
    %c0_i32 = arith.constant 0 : i32
    %c0_i32_0 = arith.constant 0 : i32
    %c0_i32_1 = arith.constant 0 : i32
    return %c0_i32, %c0_i32_0 : i32, i32
  }
  func.func @transform_3(%arg0: i32) -> (i32, i32) {
    %c0_i32 = arith.constant 0 : i32
    %c0_i32_0 = arith.constant 0 : i32
    %c0_i32_1 = arith.constant 0 : i32
    return %c0_i32, %c0_i32_0 : i32, i32
  }
  func.func @transform_4(%arg0: i32) -> (i32, i32) {
    %c0_i32 = arith.constant 0 : i32
    %c0_i32_0 = arith.constant 0 : i32
    return %arg0, %c0_i32 : i32, i32
  }
}

</mosaic_0001>

<bundles_post_ra>
// kernel: tpu_custom_call.1
= control target key start
LH: loop header
LB: loop body
LE: loop exit
PB: predicated region body
PF: predicated region fallthrough
CT: control target
= control target key end

     0   :  { %9 = vsyncpa [#allocation3], 0  ;;  %s15012_s0 = inlined_call_operand.vmem [shape: s32[256,16], index: 0, kind: input, shape index: {}]   ;;  %s15013_s1 = inlined_call_operand.hbm [shape: f32[512,128], index: 1, kind: input, shape index: {}]   ;;  %s15014_s2 = inlined_call_operand.vmem [shape: f32[1,128], index: 2, kind: input, shape index: {}]   ;;  %s15015_s3 = inlined_call_operand.vmem [shape: f32[1,128], index: 3, kind: input, shape index: {}]   ;;  %s15016_s4 = inlined_call_operand.hbm [shape: f32[256,128], index: 4, kind: output, shape index: {}]  }
   0x1   :  { %10 = vsyncpa [#allocation4], 0 }
   0x2   :  { %12 = vsyncpa [#allocation4 + $0x1], 0  ;;  %s7443_s15 = smov 0   ;;  %s7445_s16 = smov 0  }
   0x3   :  { %s7447_s17 = smov 0   ;;  %s7449_s18 = smov 0  }
   0x4 LB: > { %s7464_s19 = sadd.s32 4294967295, %s7393_s18   ;;  %s5780_s20 = sadd.s32 4294967294, %s7393_s18   ;;  %s7393_s18 = sphi %s7449_s18, %s16066_s18   ;;  %s7389_s17 = sphi %s7447_s17, %s16065_s17   ;;  %s7385_s16 = sphi %s7445_s16, %s16064_s16   ;;  %s7381_s15 = sphi %s7443_s15, %s16063_s15  }
   0x5   : > { %s7468_s21 = sadd.s32 1, %s7393_s18   ;;  %s114_s22 = sadd.s32 1, %s7389_s17 }
   0x6   : > { %s111_s23 = ssub.s32 %s7393_s18, %s7468_s21  ;;  %p124_p0 = scmp.ne.s32.totalorder %s7389_s17, %s7385_s16 }
   0x7   : > { %p112_p1 = scmp.eq.s32.totalorder %s111_s23, 0  ;;  %p125_p2 = scmp.eq.s32.totalorder %s7464_s19, 1 }
   0x8   : > { %p130_p3 = scmp.ne.s32.totalorder %s7385_s16, %s7381_s15  ;;  %p131_p4 = scmp.eq.s32.totalorder %s5780_s20, 1 }
   0x9   : > { %s7479_s24 = scalar_select %p112_p1, %s7389_s17, %s114_s22  }
   0xa   : > { %p7481_p5 = por %p125_p2, %p124_p0  ;;  %p7485_p6 = por %p131_p4, %p130_p3 }
   0xb   : > { %p5781_p7 = scmp.ge.s32.totalorder %s7393_s18, 1  ;;  %p138_p8 = scmp.lt.s32.totalorder %s7393_s18, 3 }
   0xc   : > { %s15148_s25 = scalar_select %p7481_p5, 1, 0 }
   0xd   : > { %s15149_s26 = scalar_select %p7485_p6, 1, 0 }
   0xe   : > { %p15017_p9 = scmp.eq.s32.totalorder %s7464_s19, 0  ;;  %p7492_p10 = pnand %p5781_p7, %p138_p8 }
   0xf   : > { %s7395_s28 = smov [#allocation2]   ;;  %s7299_s7 = scalar_lea.hbm %s15013_s1, 8192 }
  0x10   : > { %s15150_s27 = scalar_select %p7492_p10, 1, 0 }
  0x11   : > { %s150_s29 = sshll.u32 %s7395_s28, 4  ;;  %p7051_p11 = pneg %p7492_p10  ;;  %s151_s29 = int_to_ptr.vmem [resolvable:$true] %s150_s29 }
  0x12   : > { %p7300_p13 = scmp.ne.s32.totalorder %s15013_s1, %s7299_s7  ;;  %p7306_p3 = scmp.lt.u32.totalorder %s7299_s7, %s15013_s1 }
  0x13   : > { %p7500_p12 = pnand %p15017_p9, %p7051_p11 }
  0x15   : > { %p7301_p0 = pneg %p7500_p12 }
  0x17   : > { %p7302_p1 = pnand %p7301_p0, %p7300_p13 }
  0x19   : > { %p7303_p2 = pneg %p7302_p1 }
  0x1b   : > { %p7308_p4 = pnand %p7306_p3, %p7303_p2 }
  0x1d   : > { %7311 = shalt.err (!%p7308_p4)
}
  0x1e   : > { %s7312_s12 = scalar_lea.vmem %s151_s29, 8192  ;;  %p7320_p9 = scmp.lt.s32.totalorder %s151_s29, %s151_s29 }
  0x1f   : > { %p7313_p7 = scmp.ne.s32.totalorder %s151_s29, %s7312_s12  ;;  %p7321_p6 = scmp.lt.s32.totalorder %s7312_s12, %s7312_s12 }
  0x21   : > { %p7315_p8 = pnand %p7313_p7, %p7301_p0  ;;  %p7322_p5 = por %p7321_p6, %p7320_p9 }
  0x23   : > { %p7316_p11 = pneg %p7315_p8 }
  0x25   : > { %p7323_p10 = pnand %p7322_p5, %p7316_p11 }
  0x27   : > { %7326 = shalt.err (!%p7323_p10)
}
  0x28   : > { %s7396_s13 = smov 128   ;;  %s7397_s14 = smov 8  }
  0x29   : > { %7054 = dma.hbm_to_vmem [thread:$0]  (!%p7500_p12), %s15013_s1, 8192, %s151_s29, [#allocation3], %s7396_s13, %s7396_s13, %s7397_s14  }
  0x2a   : > { %p15152_p13 = scmp.ne.s32.totalorder %s15150_s27, 0 }
  0x2c   : > { %181 = sbr.rel (%p15152_p13) target bundleno = 1539 (0x603), region = 36 }
  0x33   : > { %p15153_p1 = scmp.eq.s32.totalorder %s7464_s19, 0 }
  0x35   : > { %7372 = dma.done.wait (%p15153_p1), [#allocation3], 8192   ;;  %p15154_p0 = pmov %p15153_p1 }
  0x36   : > { %s5787_s23 = sshll.u32 %s7464_s19, 4  ;;  %v7398_v0 = vmov 0   ;;  %v7399_v17 = vmov 1   ;;  %v7400_v18 = vmov 2   ;;  %v7401_v19 = vmov 3   ;;  %s204_s27 = sand.u32 1, %s7385_s16  }
  0x37   : > { %7374 = vsyncadd (%p15154_p0), [#allocation3], 4294959104  ;;  %7117 = vset.pattern.permute.xlu1 %v7398_v0  ;;  %7116 = vset.pattern.permute.xlu0 %v7398_v0  ;;  %p208_p5 = scmp.lt.s32.totalorder %s5787_s23, 31  ;;  %v7402_v21 = vmov 4   ;;  %v230_v31 = vlaneseq  ;;  %v15020_v42 = vmov 5   ;;  %v15036_v43 = vmov 0.0  }
  0x38   : > { %s5786_s8 = sshll.u32 %s204_s27, 7  ;;  %s6820_s12 = sshll.u32 %s7464_s19, 11 }
  0x39   : > { %s16068_s23 = smov (!%p208_p5, %s5787_s23), 31  ;;  %v7672_v34 = vand.u32 127, %v230_v31  ;;  %s14899_s11 = scalar_lea.vmem [#allocation5], %s5786_s8 }
  0x3a   : > { %s5788_s28 = sshll.u32 %s16068_s23, 3  ;;  %s5706_s13 = sshll.u32 %s14899_s11, 4  ;;  %s14965_s13 = int_to_ptr.vmem [resolvable:$true] %s5706_s13 }
  0x3b   : > { %s7530_s29 = scalar_lea.vmem %s15012_s0, %s5788_s28  ;;  %v7681_v37 = vadd.s32 128, %v7672_v34  ;;  %v7684_v38 = vadd.s32 256, %v7672_v34  ;;  %v7688_v39 = vadd.s32 384, %v7672_v34  ;;  %s14963_s22 = scalar_lea.hbm %s15016_s4, %s6820_s12 }
  0x3c   : > { %v7533_v1 = vld [vmem:[%s7530_s29 + $0x10] sm:$0xff]  ;;  %v7536_v2 = vld [vmem:[%s7530_s29] sm:$0xff]  ;;  %v7541_v3 = vld [vmem:[%s7530_s29 + $0x18] sm:$0xff]  ;;  %s14971_s23 = scalar_lea.sflag [#allocation4], %s204_s27  ;;  %s7327_s19 = scalar_lea.vmem %s14965_s13, 2048 }
  0x3d   : > { %242 = vperm.xlu1 %7117, %v7533_v1   ;;  %236 = vperm.xlu0 %7116, %v7536_v2   ;;  %15155 = vst [vmem:[#allocation8_spill] sm:$0xff] %v7541_v3  ;;  %v7544_v4 = vld [vmem:[%s7530_s29 + $0x8] sm:$0xff]  ;;  %v7552_v6 = vld [vmem:[%s7530_s29 + $0x20] sm:$0xff]  ;;  %v7557_v7 = vld [vmem:[%s7530_s29 + $0x38] sm:$0xff]  ;;  %p7328_p6 = scmp.ne.s32.totalorder %s14965_s13, %s7327_s19  ;;  %p16061_p9 = scmp.ne.s32.totalorder %s15148_s25, 0 }
  0x3e   : > { %v7549_v5 = vld [vmem:[%s7530_s29 + $0x28] sm:$0xff]  ;;  %15157 = vst [vmem:[#allocation10_spill] sm:$0xff] %v7557_v7  ;;  %v7560_v8 = vld [vmem:[%s7530_s29 + $0x30] sm:$0xff]  ;;  %v7568_v10 = vld [vmem:[%s7530_s29 + $0x40] sm:$0xff]  ;;  %s7415_s28 = smov [#allocation5]  }
  0x3f   : > { %15156 = vst [vmem:[#allocation9_spill] sm:$0xff] %v7549_v5  ;;  %v7565_v9 = vld [vmem:[%s7530_s29 + $0x48] sm:$0xff]  ;;  %v7573_v11 = vld [vmem:[%s7530_s29 + $0x58] sm:$0xff]  ;;  %v7576_v12 = vld [vmem:[%s7530_s29 + $0x50] sm:$0xff]  ;;  %p7329_p10 = pnand %p7328_p6, %p16061_p9  ;;  %s7331_s30 = sshll.u32 %s7415_s28, 4  ;;  %s7332_s30 = int_to_ptr.vmem [resolvable:$false] %s7331_s30 }
  0x40   : > { %15158 = vst [vmem:[#allocation11_spill] sm:$0xff] %v7565_v9  ;;  %15159 = vst [vmem:[#allocation12_spill] sm:$0xff] %v7573_v11  ;;  %v7581_v13 = vld [vmem:[%s7530_s29 + $0x68] sm:$0xff]  ;;  %v7584_v14 = vld [vmem:[%s7530_s29 + $0x60] sm:$0xff]  ;;  %s7333_s5 = scalar_lea.vmem %s7332_s30, 4096  ;;  %p7334_p2 = scmp.lt.s32.totalorder %s14965_s13, %s7332_s30 }
  0x41   : > { %245 = vperm.xlu1 %7117, %v7541_v3   ;;  %239 = vperm.xlu0 %7116, %v7544_v4   ;;  %15160 = vst [vmem:[#allocation13_spill] sm:$0xff] %v7581_v13  ;;  %v7589_v15 = vld [vmem:[%s7530_s29 + $0x78] sm:$0xff]  ;;  %v7592_v16 = vld [vmem:[%s7530_s29 + $0x70] sm:$0xff]  ;;  %p7330_p12 = pneg %p7329_p10  ;;  %p7335_p3 = scmp.lt.s32.totalorder %s7333_s5, %s7327_s19 }
  0x42   : > { %15161 = vst [vmem:[#allocation14_spill] sm:$0xff] %v7589_v15 }
  0x43   : > { %p7336_p4 = por %p7335_p3, %p7334_p2 }
  0x45   : > { %251 = vperm.xlu1 %7117, %v7549_v5   ;;  %248 = vperm.xlu0 %7116, %v7552_v6   ;;  %p7337_p7 = pnand %p7336_p4, %p7330_p12 }
  0x49   : > { %257 = vperm.xlu1 %7117, %v7557_v7   ;;  %254 = vperm.xlu0 %7116, %v7560_v8  }
  0x4d   : > { %263 = vperm.xlu1 %7117, %v7565_v9   ;;  %260 = vperm.xlu0 %7116, %v7568_v10  }
  0x51   : > { %269 = vperm.xlu1 %7117, %v7573_v11   ;;  %266 = vperm.xlu0 %7116, %v7576_v12  }
  0x55   : > { %275 = vperm.xlu1 %7117, %v7581_v13   ;;  %272 = vperm.xlu0 %7116, %v7584_v14  }
  0x59   : > { %281 = vperm.xlu1 %7117, %v7589_v15   ;;  %278 = vperm.xlu0 %7116, %v7592_v16  }
  0x5d   : > { %7119 = vset.pattern.permute.xlu1 %v7399_v17  ;;  %7118 = vset.pattern.permute.xlu0 %v7399_v17 }
  0x5e   : > { %543 = vperm.xlu1 %7119, %v7544_v4   ;;  %540 = vperm.xlu0 %7118, %v7536_v2  }
  0x62   : > { %546 = vperm.xlu1 %7119, %v7533_v1   ;;  %549 = vperm.xlu0 %7118, %v7541_v3  }
  0x66   : > { %552 = vperm.xlu1 %7119, %v7552_v6   ;;  %555 = vperm.xlu0 %7118, %v7549_v5  }
  0x6a   : > { %558 = vperm.xlu1 %7119, %v7560_v8   ;;  %561 = vperm.xlu0 %7118, %v7557_v7  }
  0x6e   : > { %564 = vperm.xlu1 %7119, %v7568_v10   ;;  %567 = vperm.xlu0 %7118, %v7565_v9  }
  0x72   : > { %570 = vperm.xlu1 %7119, %v7576_v12   ;;  %573 = vperm.xlu0 %7118, %v7573_v11  }
  0x76   : > { %576 = vperm.xlu1 %7119, %v7584_v14   ;;  %579 = vperm.xlu0 %7118, %v7581_v13  }
  0x7a   : > { %582 = vperm.xlu1 %7119, %v7592_v16   ;;  %585 = vperm.xlu0 %7118, %v7589_v15  }
  0x7e   : > { %7120 = vset.pattern.permute.xlu1 %v7400_v18  ;;  %7121 = vset.pattern.permute.xlu0 %v7400_v18 }
  0x7f   : > { %844 = vperm.xlu1 %7120, %v7536_v2   ;;  %847 = vperm.xlu0 %7121, %v7544_v4  }
  0x83   : > { %850 = vperm.xlu1 %7120, %v7533_v1   ;;  %856 = vperm.xlu0 %7121, %v7552_v6  }
  0x87   : > { %853 = vperm.xlu1 %7120, %v7541_v3   ;;  %862 = vperm.xlu0 %7121, %v7560_v8  }
  0x8b   : > { %859 = vperm.xlu1 %7120, %v7549_v5   ;;  %868 = vperm.xlu0 %7121, %v7568_v10  }
  0x8f   : > { %865 = vperm.xlu1 %7120, %v7557_v7   ;;  %874 = vperm.xlu0 %7121, %v7576_v12  }
  0x93   : > { %871 = vperm.xlu1 %7120, %v7565_v9   ;;  %880 = vperm.xlu0 %7121, %v7584_v14  }
  0x97   : > { %877 = vperm.xlu1 %7120, %v7573_v11   ;;  %886 = vperm.xlu0 %7121, %v7592_v16  }
  0x9b   : > { %883 = vperm.xlu1 %7120, %v7581_v13   ;;  %7122 = vset.pattern.permute.xlu0 %v7401_v19 }
  0x9c   : > { %1148 = vperm.xlu0 %7122, %v7536_v2  }
  0x9f   : > { %889 = vperm.xlu1 %7120, %v7589_v15  }
  0xa0   : > { %1157 = vperm.xlu0 %7122, %v7541_v3  }
  0xa3   : > { %7123 = vset.pattern.permute.xlu1 %v7401_v19 }
  0xa4   : > { %1151 = vperm.xlu1 %7123, %v7544_v4   ;;  %1163 = vperm.xlu0 %7122, %v7549_v5  }
  0xa8   : > { %1154 = vperm.xlu1 %7123, %v7533_v1   ;;  %1169 = vperm.xlu0 %7122, %v7557_v7  }
  0xac   : > { %1160 = vperm.xlu1 %7123, %v7552_v6   ;;  %1175 = vperm.xlu0 %7122, %v7565_v9  }
  0xb0   : > { %1166 = vperm.xlu1 %7123, %v7560_v8   ;;  %1181 = vperm.xlu0 %7122, %v7573_v11  }
  0xb4   : > { %1172 = vperm.xlu1 %7123, %v7568_v10   ;;  %1187 = vperm.xlu0 %7122, %v7581_v13  }
  0xb8   : > { %1178 = vperm.xlu1 %7123, %v7576_v12   ;;  %1193 = vperm.xlu0 %7122, %v7589_v15  }
  0xbc   : > { %v243_v20 = vpop.permute.xlu1 %242  ;;  %1184 = vperm.xlu1 %7123, %v7584_v14   ;;  %7125 = vset.pattern.permute.xlu0 %v7402_v21  ;;  %v237_v22 = vpop.permute.xlu0 %236 }
  0xbd   : > { %1455 = vperm.xlu0 %7125, %v7544_v4   ;;  %vm291_vm0 = vcmp.eq.s32.totalorder %v243_v20, %v7672_v34  ;;  %vm292_vm1 = vcmp.eq.s32.totalorder %v243_v20, %v7681_v37  ;;  %vm293_vm2 = vcmp.eq.s32.totalorder %v243_v20, %v7684_v38  ;;  %vm294_vm3 = vcmp.eq.s32.totalorder %v243_v20, %v7688_v39 }
  0xbe   : > { %vm283_vm4 = vcmp.eq.s32.totalorder %v237_v22, %v7672_v34  ;;  %vm284_vm5 = vcmp.eq.s32.totalorder %v237_v22, %v7681_v37  ;;  %v7704_v44 = vsel %vm291_vm0, 1.0, %v15036_v43  ;;  %vm285_vm6 = vcmp.eq.s32.totalorder %v237_v22, %v7684_v38 }
  0xbf   : > { %vm286_vm7 = vcmp.eq.s32.totalorder %v237_v22, %v7688_v39  ;;  %v7710_v45 = vsel %vm292_vm1, 1.0, %v15036_v43  ;;  %v7713_v46 = vsel %vm293_vm2, 1.0, %v15036_v43  ;;  %v7720_v47 = vsel %vm294_vm3, 1.0, %v15036_v43 }
  0xc0   : > { %v7644_v23 = vpop.permute.xlu1 %245  ;;  %1190 = vperm.xlu1 %7123, %v7592_v16   ;;  %v7647_v24 = vpop.permute.xlu0 %239  ;;  %v7723_v48 = vsel %vm283_vm4, 1.0, %v15036_v43  ;;  %v7726_v49 = vsel %vm284_vm5, 1.0, %v15036_v43  ;;  %v7736_v52 = vsel %vm285_vm6, 1.0, %v15036_v43  ;;  %v7739_v53 = vsel %vm286_vm7, 1.0, %v15036_v43 }
  0xc1   : > { %1464 = vperm.xlu0 %7125, %v7552_v6   ;;  %vm295_vm8 = vcmp.eq.s32.totalorder %v7644_v23, %v7672_v34  ;;  %vm296_vm9 = vcmp.eq.s32.totalorder %v7644_v23, %v7681_v37  ;;  %vm297_vm10 = vcmp.eq.s32.totalorder %v7644_v23, %v7684_v38  ;;  %vm298_vm11 = vcmp.eq.s32.totalorder %v7644_v23, %v7688_v39 }
  0xc2   : > { %vm287_vm12 = vcmp.eq.s32.totalorder %v7647_v24, %v7672_v34  ;;  %v7746_v54 = vsel %vm295_vm8, 1.0, %v15036_v43  ;;  %v7749_v55 = vsel %vm296_vm9, 1.0, %v15036_v43  ;;  %vm288_vm13 = vcmp.eq.s32.totalorder %v7647_v24, %v7681_v37 }
  0xc3   : > { %vm289_vm14 = vcmp.eq.s32.totalorder %v7647_v24, %v7684_v38  ;;  %v7757_v56 = vsel %vm297_vm10, 1.0, %v15036_v43  ;;  %vm290_vm15 = vcmp.eq.s32.totalorder %v7647_v24, %v7688_v39  ;;  %v7766_v57 = vsel %vm298_vm11, 1.0, %v15036_v43 }
  0xc4   : > { %v7650_v25 = vpop.permute.xlu1 %251  ;;  %7124 = vset.pattern.permute.xlu1 %v7402_v21  ;;  %v7652_v26 = vpop.permute.xlu0 %248  ;;  %v7769_v58 = vsel %vm287_vm12, 1.0, %v15036_v43  ;;  %v7781_v61 = vsel %vm288_vm13, 1.0, %v15036_v43  ;;  %v7784_v62 = vsel %vm289_vm14, 1.0, %v15036_v43  ;;  %v7791_v63 = vsel %vm290_vm15, 1.0, %v15036_v43 }
  0xc5   : > { %1452 = vperm.xlu1 %7124, %v7536_v2   ;;  %1470 = vperm.xlu0 %7125, %v7560_v8   ;;  %vm303_vm0 = vcmp.eq.s32.totalorder %v7650_v25, %v7672_v34  ;;  %vm304_vm1 = vcmp.eq.s32.totalorder %v7650_v25, %v7681_v37  ;;  %vm305_vm2 = vcmp.eq.s32.totalorder %v7650_v25, %v7684_v38 }
  0xc6   : > { %vm306_vm3 = vcmp.eq.s32.totalorder %v7650_v25, %v7688_v39  ;;  %vm299_vm4 = vcmp.eq.s32.totalorder %v7652_v26, %v7672_v34  ;;  %vm300_vm5 = vcmp.eq.s32.totalorder %v7652_v26, %v7681_v37  ;;  %v7794_v0 = vsel %vm303_vm0, 1.0, %v15036_v43 }
  0xc7   : > { %v7797_v17 = vsel %vm304_vm1, 1.0, %v15036_v43  ;;  %vm301_vm6 = vcmp.eq.s32.totalorder %v7652_v26, %v7684_v38  ;;  %v7803_v18 = vsel %vm305_vm2, 1.0, %v15036_v43  ;;  %v7806_v19 = vsel %vm306_vm3, 1.0, %v15036_v43 }
  0xc8   : > { %v7656_v27 = vpop.permute.xlu1 %257  ;;  %v7658_v28 = vpop.permute.xlu0 %254  ;;  %vm302_vm7 = vcmp.eq.s32.totalorder %v7652_v26, %v7688_v39  ;;  %v7813_v20 = vsel %vm299_vm4, 1.0, %v15036_v43  ;;  %v7816_v21 = vsel %vm300_vm5, 1.0, %v15036_v43  ;;  %v7828_v24 = vsel %vm301_vm6, 1.0, %v15036_v43 }
  0xc9   : > { %1458 = vperm.xlu1 %7124, %v7533_v1   ;;  %1476 = vperm.xlu0 %7125, %v7568_v10   ;;  %vm311_vm8 = vcmp.eq.s32.totalorder %v7656_v27, %v7672_v34  ;;  %vm312_vm9 = vcmp.eq.s32.totalorder %v7656_v27, %v7681_v37  ;;  %vm313_vm10 = vcmp.eq.s32.totalorder %v7656_v27, %v7684_v38  ;;  %v7837_v25 = vsel %vm302_vm7, 1.0, %v15036_v43 }
  0xca   : > { %vm314_vm11 = vcmp.eq.s32.totalorder %v7656_v27, %v7688_v39  ;;  %vm307_vm12 = vcmp.eq.s32.totalorder %v7658_v28, %v7672_v34  ;;  %vm308_vm13 = vcmp.eq.s32.totalorder %v7658_v28, %v7681_v37  ;;  %v7840_v26 = vsel %vm311_vm8, 1.0, %v15036_v43 }
  0xcb   : > { %15162 = vst [vmem:[#allocation15_spill] sm:$0xff] %v7840_v26  ;;  %vm309_vm14 = vcmp.eq.s32.totalorder %v7658_v28, %v7684_v38  ;;  %vm310_vm15 = vcmp.eq.s32.totalorder %v7658_v28, %v7688_v39  ;;  %v7848_v27 = vsel %vm312_vm9, 1.0, %v15036_v43  ;;  %v7851_v31 = vsel %vm313_vm10, 1.0, %v15036_v43 }
  0xcc   : > { %v7662_v29 = vpop.permute.xlu1 %263  ;;  %v7664_v30 = vpop.permute.xlu0 %260  ;;  %15163 = vst [vmem:[#allocation16_spill] sm:$0xff] %v7848_v27  ;;  %15164 = vst [vmem:[#allocation17_spill] sm:$0xff] %v7851_v31  ;;  %v7864_v28 = vsel %vm308_vm13, 1.0, %v15036_v43  ;;  %v7874_v27 = vsel %vm309_vm14, 1.0, %v15036_v43 }
  0xcd   : > { %1461 = vperm.xlu1 %7124, %v7541_v3   ;;  %1482 = vperm.xlu0 %7125, %v7576_v12   ;;  %vm319_vm0 = vcmp.eq.s32.totalorder %v7662_v29, %v7672_v34  ;;  %vm320_vm1 = vcmp.eq.s32.totalorder %v7662_v29, %v7681_v37  ;;  %vm321_vm2 = vcmp.eq.s32.totalorder %v7662_v29, %v7684_v38 }
  0xce   : > { %vm322_vm3 = vcmp.eq.s32.totalorder %v7662_v29, %v7688_v39  ;;  %vm315_vm4 = vcmp.eq.s32.totalorder %v7664_v30, %v7672_v34  ;;  %v7885_v26 = vsel %vm319_vm0, 1.0, %v15036_v43  ;;  %vm316_vm5 = vcmp.eq.s32.totalorder %v7664_v30, %v7681_v37 }
  0xcf   : > { %15168 = vst [vmem:[#allocation20_spill] sm:$0xff] %v7885_v26  ;;  %vm317_vm6 = vcmp.eq.s32.totalorder %v7664_v30, %v7684_v38  ;;  %v7896_v29 = vsel %vm321_vm2, 1.0, %v15036_v43  ;;  %vm318_vm7 = vcmp.eq.s32.totalorder %v7664_v30, %v7688_v39  ;;  %v7908_v26 = vsel %vm315_vm4, 1.0, %v15036_v43 }
  0xd0   : > { %v7668_v32 = vpop.permute.xlu1 %269  ;;  %v7670_v33 = vpop.permute.xlu0 %266  ;;  %15170 = vst [vmem:[#allocation22_spill] sm:$0xff] %v7896_v29  ;;  %15172 = vst [vmem:[#allocation24_spill] sm:$0xff] %v7908_v26  ;;  %v7919_v29 = vsel %vm316_vm5, 1.0, %v15036_v43 }
  0xd1   : > { %1467 = vperm.xlu1 %7124, %v7549_v5   ;;  %1488 = vperm.xlu0 %7125, %v7584_v14   ;;  %vm327_vm8 = vcmp.eq.s32.totalorder %v7668_v32, %v7672_v34  ;;  %vm328_vm9 = vcmp.eq.s32.totalorder %v7668_v32, %v7681_v37  ;;  %vm329_vm10 = vcmp.eq.s32.totalorder %v7668_v32, %v7684_v38 }
  0xd2   : > { %15173 = vst [vmem:[#allocation25_spill] sm:$0xff] %v7919_v29  ;;  %vm324_vm13 = vcmp.eq.s32.totalorder %v7670_v33, %v7681_v37  ;;  %v7936_v26 = vsel %vm328_vm9, 1.0, %v15036_v43  ;;  %vm325_vm14 = vcmp.eq.s32.totalorder %v7670_v33, %v7684_v38 }
  0xd3   : > { %15176 = vst [vmem:[#allocation28_spill] sm:$0xff] %v7936_v26  ;;  %v7955_v26 = vsel %vm324_vm13, 1.0, %v15036_v43 }
  0xd4   : > { %v7676_v35 = vpop.permute.xlu1 %275  ;;  %v7678_v36 = vpop.permute.xlu0 %272  ;;  %15180 = vst [vmem:[#allocation32_spill] sm:$0xff] %v7955_v26 }
  0xd5   : > { %1473 = vperm.xlu1 %7124, %v7557_v7   ;;  %1494 = vperm.xlu0 %7125, %v7592_v16   ;;  %vm335_vm0 = vcmp.eq.s32.totalorder %v7676_v35, %v7672_v34  ;;  %vm337_vm2 = vcmp.eq.s32.totalorder %v7676_v35, %v7684_v38  ;;  %vm331_vm4 = vcmp.eq.s32.totalorder %v7678_v36, %v7672_v34 }
  0xd6   : > { %vm332_vm5 = vcmp.eq.s32.totalorder %v7678_v36, %v7681_v37  ;;  %v7979_v26 = vsel %vm335_vm0, 1.0, %v15036_v43 }
  0xd7   : > { %15183 = vst [vmem:[#allocation35_spill] sm:$0xff] %v7979_v26 }
  0xd8   : > { %v7692_v40 = vpop.permute.xlu1 %281  ;;  %v7694_v41 = vpop.permute.xlu0 %278 }
  0xd9   : > { %1479 = vperm.xlu1 %7124, %v7565_v9   ;;  %7126 = vset.pattern.permute.xlu0 %v15020_v42  ;;  %v7858_v42 = vsel %vm314_vm11, 1.0, %v15036_v43  ;;  %vm330_vm11 = vcmp.eq.s32.totalorder %v7668_v32, %v7688_v39  ;;  %v7930_v32 = vsel %vm318_vm7, 1.0, %v15036_v43  ;;  %vm334_vm7 = vcmp.eq.s32.totalorder %v7678_v36, %v7688_v39 }
  0xda   : > { %1756 = vperm.xlu0 %7126, %v7536_v2   ;;  %15165 = vst [vmem:[#allocation18_spill] sm:$0xff] %v7858_v42  ;;  %v7877_v42 = vsel %vm310_vm15, 1.0, %v15036_v43  ;;  %v7945_v29 = vsel %vm330_vm11, 1.0, %v15036_v43  ;;  %vm326_vm15 = vcmp.eq.s32.totalorder %v7670_v33, %v7688_v39  ;;  %vm344_vm9 = vcmp.eq.s32.totalorder %v7692_v40, %v7681_v37 }
  0xdb   : > { %15167 = vst [vmem:[#allocation19_spill] sm:$0xff] %v7877_v42  ;;  %v7922_v42 = vsel %vm317_vm6, 1.0, %v15036_v43  ;;  %15178 = vst [vmem:[#allocation30_spill] sm:$0xff] %v7945_v29  ;;  %vm333_vm6 = vcmp.eq.s32.totalorder %v7678_v36, %v7684_v38  ;;  %v8003_v36 = vsel %vm332_vm5, 1.0, %v15036_v43  ;;  %vm346_vm11 = vcmp.eq.s32.totalorder %v7692_v40, %v7688_v39 }
  0xdc   : > { %15174 = vst [vmem:[#allocation26_spill] sm:$0xff] %v7922_v42  ;;  %v7942_v42 = vsel %vm329_vm10, 1.0, %v15036_v43  ;;  %15188 = vst [vmem:[#allocation40_spill] sm:$0xff] %v8003_v36  ;;  %vm345_vm10 = vcmp.eq.s32.totalorder %v7692_v40, %v7684_v38  ;;  %v8026_v36 = vsel %vm344_vm9, 1.0, %v15036_v43  ;;  %vm340_vm13 = vcmp.eq.s32.totalorder %v7694_v41, %v7681_v37 }
  0xdd   : > { %v7730_v50 = vpop.permute.xlu1 %543  ;;  %1485 = vperm.xlu1 %7124, %v7573_v11   ;;  %v7733_v51 = vpop.permute.xlu0 %540  ;;  %15177 = vst [vmem:[#allocation29_spill] sm:$0xff] %v7942_v42  ;;  %v7976_v42 = vsel %vm326_vm15, 1.0, %v15036_v43  ;;  %15194 = vst [vmem:[#allocation46_spill] sm:$0xff] %v8026_v36  ;;  %vm342_vm15 = vcmp.eq.s32.totalorder %v7694_v41, %v7688_v39  ;;  %v8043_v36 = vsel %vm346_vm11, 1.0, %v15036_v43 }
  0xde   : > { %1765 = vperm.xlu0 %7126, %v7541_v3   ;;  %v15166_v3 = vmov 5   ;;  %15182 = vst [vmem:[#allocation34_spill] sm:$0xff] %v7976_v42  ;;  %v8000_v42 = vsel %vm331_vm4, 1.0, %v15036_v43  ;;  %vm591_vm0 = vcmp.eq.s32.totalorder %v7730_v50, %v7672_v34  ;;  %15196 = vst [vmem:[#allocation48_spill] sm:$0xff] %v8043_v36  ;;  %vm587_vm4 = vcmp.eq.s32.totalorder %v7733_v51, %v7672_v34 }
  0xdf   : > { %15187 = vst [vmem:[#allocation39_spill] sm:$0xff] %v8000_v42  ;;  %vm588_vm5 = vcmp.eq.s32.totalorder %v7733_v51, %v7681_v37  ;;  %v5857_v36 = vsel %vm591_vm0, 1.0, %v15036_v43 }
  0xe1   : > { %v7775_v59 = vpop.permute.xlu1 %546  ;;  %1491 = vperm.xlu1 %7124, %v7581_v13   ;;  %v7778_v60 = vpop.permute.xlu0 %549 }
  0xe2   : > { %1771 = vperm.xlu0 %7126, %v7549_v5   ;;  %v7861_v5 = vsel %vm307_vm12, 1.0, %v15036_v43  ;;  %vm323_vm12 = vcmp.eq.s32.totalorder %v7670_v33, %v7672_v34  ;;  %v7966_v33 = vsel %vm325_vm14, 1.0, %v15036_v43  ;;  %vm341_vm14 = vcmp.eq.s32.totalorder %v7694_v41, %v7684_v38 }
  0xe3   : > { %15181 = vst [vmem:[#allocation33_spill] sm:$0xff] %v7966_v33  ;;  %v7990_v33 = vsel %vm337_vm2, 1.0, %v15036_v43  ;;  %vm593_vm2 = vcmp.eq.s32.totalorder %v7730_v50, %v7684_v38  ;;  %vm596_vm9 = vcmp.eq.s32.totalorder %v7775_v59, %v7681_v37  ;;  %vm598_vm11 = vcmp.eq.s32.totalorder %v7775_v59, %v7688_v39 }
  0xe4   : > { %15185 = vst [vmem:[#allocation37_spill] sm:$0xff] %v7990_v33 }
  0xe5   : > { %v7822_v22 = vpop.permute.xlu1 %552  ;;  %1497 = vperm.xlu1 %7124, %v7589_v15   ;;  %v7825_v23 = vpop.permute.xlu0 %555 }
  0xe6   : > { %1777 = vperm.xlu0 %7126, %v7557_v7   ;;  %vm603_vm0 = vcmp.eq.s32.totalorder %v7822_v22, %v7672_v34 }
  0xe9   : > { %v7868_v7 = vpop.permute.xlu1 %558  ;;  %7127 = vset.pattern.permute.xlu1 %v15166_v3  ;;  %v7871_v31 = vpop.permute.xlu0 %561  ;;  %v7888_v3 = vsel %vm320_vm1, 1.0, %v15036_v43  ;;  %vm336_vm1 = vcmp.eq.s32.totalorder %v7676_v35, %v7681_v37 }
  0xea   : > { %1759 = vperm.xlu1 %7127, %v7544_v4   ;;  %15169 = vst [vmem:[#allocation21_spill] sm:$0xff] %v7888_v3  ;;  %1783 = vperm.xlu0 %7126, %v7565_v9   ;;  %v7905_v3 = vsel %vm322_vm3, 1.0, %v15036_v43  ;;  %vm338_vm3 = vcmp.eq.s32.totalorder %v7676_v35, %v7688_v39  ;;  %v7987_v35 = vsel %vm336_vm1, 1.0, %v15036_v43  ;;  %vm592_vm1 = vcmp.eq.s32.totalorder %v7730_v50, %v7681_v37 }
  0xeb   : > { %15171 = vst [vmem:[#allocation23_spill] sm:$0xff] %v7905_v3  ;;  %v7933_v3 = vsel %vm327_vm8, 1.0, %v15036_v43  ;;  %15184 = vst [vmem:[#allocation36_spill] sm:$0xff] %v7987_v35  ;;  %vm343_vm8 = vcmp.eq.s32.totalorder %v7692_v40, %v7672_v34  ;;  %v7997_v26 = vsel %vm338_vm3, 1.0, %v15036_v43  ;;  %v8012_v35 = vsel %vm333_vm6, 1.0, %v15036_v43 }
  0xec   : > { %15175 = vst [vmem:[#allocation27_spill] sm:$0xff] %v7933_v3  ;;  %v7952_v3 = vsel %vm323_vm12, 1.0, %v15036_v43  ;;  %15186 = vst [vmem:[#allocation38_spill] sm:$0xff] %v7997_v26  ;;  %vm339_vm12 = vcmp.eq.s32.totalorder %v7694_v41, %v7672_v34  ;;  %v8023_v26 = vsel %vm343_vm8, 1.0, %v15036_v43  ;;  %v8034_v40 = vsel %vm345_vm10, 1.0, %v15036_v43 }
  0xed   : > { %v7914_v9 = vpop.permute.xlu1 %564  ;;  %v7916_v30 = vpop.permute.xlu0 %567  ;;  %15179 = vst [vmem:[#allocation31_spill] sm:$0xff] %v7952_v3  ;;  %15191 = vst [vmem:[#allocation43_spill] sm:$0xff] %v8012_v35  ;;  %v8015_v3 = vsel %vm334_vm7, 1.0, %v15036_v43  ;;  %vm594_vm3 = vcmp.eq.s32.totalorder %v7730_v50, %v7688_v39  ;;  %v8068_v50 = vsel %vm342_vm15, 1.0, %v15036_v43  ;;  %vm589_vm6 = vcmp.eq.s32.totalorder %v7733_v51, %v7684_v38 }
  0xee   : > { %1762 = vperm.xlu1 %7127, %v7533_v1   ;;  %1789 = vperm.xlu0 %7126, %v7573_v11   ;;  %15192 = vst [vmem:[#allocation44_spill] sm:$0xff] %v8015_v3  ;;  %15193 = vst [vmem:[#allocation45_spill] sm:$0xff] %v8023_v26  ;;  %v8046_v26 = vsel %vm339_vm12, 1.0, %v15036_v43  ;;  %v8060_v3 = vsel %vm341_vm14, 1.0, %v15036_v43  ;;  %vm590_vm7 = vcmp.eq.s32.totalorder %v7733_v51, %v7688_v39  ;;  %v5854_v35 = vsel %vm588_vm5, 1.0, %v15036_v43 }
  0xef   : > { %15195 = vst [vmem:[#allocation47_spill] sm:$0xff] %v8034_v40  ;;  %15197 = vst [vmem:[#allocation49_spill] sm:$0xff] %v8046_v26  ;;  %v5858_v26 = vsel %vm592_vm1, 1.0, %v15036_v43  ;;  %vm595_vm8 = vcmp.eq.s32.totalorder %v7775_v59, %v7672_v34  ;;  %vm597_vm10 = vcmp.eq.s32.totalorder %v7775_v59, %v7684_v38  ;;  %vm599_vm12 = vcmp.eq.s32.totalorder %v7778_v60, %v7672_v34 }
  0xf0   : > { %15201 = vst [vmem:[#allocation53_spill] sm:$0xff] %v8060_v3  ;;  %15202 = vst [vmem:[#allocation54_spill] sm:$0xff] %v8068_v50  ;;  %v5859_v3 = vsel %vm593_vm2, 1.0, %v15036_v43  ;;  %v5853_v50 = vsel %vm587_vm4, 1.0, %v15036_v43  ;;  %v8092_v42 = vadd.f32 %v5858_v26, %v7781_v61  ;;  %v5856_v61 = vsel %vm590_vm7, 1.0, %v15036_v43 }
  0xf1   : > { %v7961_v11 = vpop.permute.xlu1 %570  ;;  %v7963_v29 = vpop.permute.xlu0 %573  ;;  %v5861_v26 = vsel %vm595_vm8, 1.0, %v15036_v43  ;;  %vm601_vm14 = vcmp.eq.s32.totalorder %v7778_v60, %v7684_v38  ;;  %vm602_vm15 = vcmp.eq.s32.totalorder %v7778_v60, %v7688_v39  ;;  %vm604_vm1 = vcmp.eq.s32.totalorder %v7822_v22, %v7681_v37 }
  0xf2   : > { %1768 = vperm.xlu1 %7127, %v7552_v6   ;;  %1795 = vperm.xlu0 %7126, %v7581_v13   ;;  %15203 = vst [vmem:[#allocation55_spill] sm:$0xff] %v8092_v42  ;;  %v8120_v42 = vadd.f32 %v5854_v35, %v7726_v49  ;;  %v8137_v49 = vadd.f32 %v5861_v26, %v7704_v44 }
  0xf3   : > { %vm605_vm2 = vcmp.eq.s32.totalorder %v7822_v22, %v7684_v38  ;;  %vm607_vm4 = vcmp.eq.s32.totalorder %v7825_v23, %v7672_v34  ;;  %vm608_vm5 = vcmp.eq.s32.totalorder %v7825_v23, %v7681_v37  ;;  %vm610_vm7 = vcmp.eq.s32.totalorder %v7825_v23, %v7688_v39 }
  0xf4   : > { %vm611_vm8 = vcmp.eq.s32.totalorder %v7868_v7, %v7672_v34 }
  0xf5   : > { %v8007_v13 = vpop.permute.xlu1 %576  ;;  %v8009_v33 = vpop.permute.xlu0 %579 }
  0xf6   : > { %15189 = vst [vmem:[#allocation41_spill] sm:$0xff] %v8007_v13  ;;  %15190 = vst [vmem:[#allocation42_spill] sm:$0xff] %v8009_v33  ;;  %1774 = vperm.xlu1 %7127, %v7560_v8   ;;  %1801 = vperm.xlu0 %7126, %v7589_v15   ;;  %v8057_v15 = vsel %vm340_vm13, 1.0, %v15036_v43  ;;  %v8103_v13 = vadd.f32 %v5859_v3, %v7784_v62  ;;  %v5862_v62 = vsel %vm596_vm9, 1.0, %v15036_v43  ;;  %v5864_v3 = vsel %vm598_vm11, 1.0, %v15036_v43 }
  0xf7   : > { %15200 = vst [vmem:[#allocation52_spill] sm:$0xff] %v8057_v15  ;;  %v15032_v15 = vmov 6   ;;  %vm600_vm13 = vcmp.eq.s32.totalorder %v7778_v60, %v7681_v37  ;;  %v8149_v59 = vadd.f32 %v5862_v62, %v7710_v45  ;;  %v8159_v44 = vadd.f32 %v5864_v3, %v7720_v47 }
  0xf8   : > { %v5865_v60 = vsel %vm599_vm12, 1.0, %v15036_v43  ;;  %v5866_v35 = vsel %vm600_vm13, 1.0, %v15036_v43  ;;  %v5867_v45 = vsel %vm601_vm14, 1.0, %v15036_v43  ;;  %v5869_v47 = vsel %vm603_vm0, 1.0, %v15036_v43 }
  0xf9   : > { %v8052_v40 = vpop.permute.xlu1 %582  ;;  %v8054_v41 = vpop.permute.xlu0 %585  ;;  %v8193_v26 = vadd.f32 %v5867_v45, %v7757_v56  ;;  %v5873_v3 = vsel %vm607_vm4, 1.0, %v15036_v43  ;;  %v5874_v56 = vsel %vm608_vm5, 1.0, %v15036_v43  ;;  %vm612_vm9 = vcmp.eq.s32.totalorder %v7868_v7, %v7681_v37 }
  0xfa   : > { %15198 = vst [vmem:[#allocation50_spill] sm:$0xff] %v8052_v40  ;;  %15199 = vst [vmem:[#allocation51_spill] sm:$0xff] %v8054_v41  ;;  %1780 = vperm.xlu1 %7127, %v7568_v10   ;;  %7129 = vset.pattern.permute.xlu0 %v15032_v15  ;;  %v5860_v41 = vsel %vm594_vm3, 1.0, %v15036_v43  ;;  %v8089_v15 = vadd.f32 %v5857_v36, %v7769_v58  ;;  %v5855_v40 = vsel %vm589_vm6, 1.0, %v15036_v43 }
  0xfb   : > { %2063 = vperm.xlu0 %7129, %v7544_v4   ;;  %v8106_v58 = vadd.f32 %v5860_v41, %v7791_v63  ;;  %v8117_v36 = vadd.f32 %v5853_v50, %v7723_v48  ;;  %v5863_v63 = vsel %vm597_vm10, 1.0, %v15036_v43  ;;  %v8126_v51 = vadd.f32 %v5855_v40, %v7736_v52 }
  0xfc   : > { %v8134_v48 = vadd.f32 %v5856_v61, %v7739_v53  ;;  %v8152_v53 = vadd.f32 %v5863_v63, %v7713_v46  ;;  %v5868_v46 = vsel %vm602_vm15, 1.0, %v15036_v43  ;;  %vm606_vm3 = vcmp.eq.s32.totalorder %v7822_v22, %v7688_v39 }
  0xfd   : > { %v5870_v40 = vsel %vm604_vm1, 1.0, %v15036_v43  ;;  %vm609_vm6 = vcmp.eq.s32.totalorder %v7825_v23, %v7684_v38  ;;  %v8184_v22 = vadd.f32 %v5865_v60, %v7746_v54  ;;  %v8187_v50 = vadd.f32 %v5866_v35, %v7749_v55 }
  0xfe   : > { %1786 = vperm.xlu1 %7127, %v7576_v12   ;;  %v8098_v4 = vpop.permute.xlu1 %844  ;;  %v8100_v33 = vpop.permute.xlu0 %847  ;;  %v5871_v61 = vsel %vm605_vm2, 1.0, %v15036_v43  ;;  %v8196_v62 = vadd.f32 %v5868_v46, %v7766_v57  ;;  %v5872_v63 = vsel %vm606_vm3, 1.0, %v15036_v43  ;;  %v8202_v54 = vadd.f32 %v5869_v47, %v7813_v20 }
  0xff   : > { %2072 = vperm.xlu0 %7129, %v7552_v6   ;;  %v8205_v55 = vadd.f32 %v5870_v40, %v7816_v21  ;;  %v5875_v57 = vsel %vm609_vm6, 1.0, %v15036_v43  ;;  %v8216_v60 = vadd.f32 %v5871_v61, %v7828_v24  ;;  %v15204_v20 = vmov 6  }
 0x100   : > { %v8229_v23 = vadd.f32 %v5872_v63, %v7837_v25  ;;  %v8232_v24 = vadd.f32 %v5873_v3, %v7794_v0  ;;  %vm613_vm10 = vcmp.eq.s32.totalorder %v7868_v7, %v7684_v38  ;;  %vm614_vm11 = vcmp.eq.s32.totalorder %v7868_v7, %v7688_v39 }
 0x101   : > { %v8240_v45 = vadd.f32 %v5874_v56, %v7797_v17  ;;  %v8243_v46 = vadd.f32 %v5875_v57, %v7803_v18  ;;  %vm615_vm12 = vcmp.eq.s32.totalorder %v7871_v31, %v7672_v34  ;;  %vm616_vm13 = vcmp.eq.s32.totalorder %v7871_v31, %v7681_v37  ;;  %v15206_v57 = vld [vmem:[#allocation19_spill] sm:$0xff] }
 0x102   : > { %1792 = vperm.xlu1 %7127, %v7584_v14   ;;  %v8144_v6 = vpop.permute.xlu1 %850  ;;  %v8146_v52 = vpop.permute.xlu0 %856  ;;  %v5877_v17 = vsel %vm611_vm8, 1.0, %v15036_v43  ;;  %v5878_v18 = vsel %vm612_vm9, 1.0, %v15036_v43  ;;  %vm617_vm14 = vcmp.eq.s32.totalorder %v7871_v31, %v7684_v38  ;;  %v5879_v25 = vsel %vm613_vm10, 1.0, %v15036_v43 }
 0x103   : > { %2078 = vperm.xlu0 %7129, %v7560_v8   ;;  %vm618_vm15 = vcmp.eq.s32.totalorder %v7871_v31, %v7688_v39  ;;  %vm619_vm0 = vcmp.eq.s32.totalorder %v7914_v9, %v7672_v34  ;;  %v5881_v47 = vsel %vm615_vm12, 1.0, %v15036_v43  ;;  %v5882_v7 = vsel %vm616_vm13, 1.0, %v15036_v43 }
 0x104   : > { %vm620_vm1 = vcmp.eq.s32.totalorder %v7914_v9, %v7681_v37  ;;  %vm621_vm2 = vcmp.eq.s32.totalorder %v7914_v9, %v7684_v38  ;;  %v8281_v61 = vadd.f32 %v5877_v17, %v7861_v5  ;;  %v8284_v63 = vadd.f32 %v5878_v18, %v7864_v28  ;;  %v15207_v28 = vld [vmem:[#allocation15_spill] sm:$0xff] }
 0x105   : > { %v5883_v3 = vsel %vm617_vm14, 1.0, %v15036_v43  ;;  %vm622_vm3 = vcmp.eq.s32.totalorder %v7914_v9, %v7688_v39  ;;  %v8291_v56 = vadd.f32 %v5879_v25, %v7874_v27  ;;  %v5885_v5 = vsel %vm619_vm0, 1.0, %v15036_v43  ;;  %v15214_v9 = vld [vmem:[#allocation8_spill] sm:$0xff] }
 0x106   : > { %1798 = vperm.xlu1 %7127, %v7592_v16   ;;  %v8179_v8 = vpop.permute.xlu1 %853  ;;  %v8181_v41 = vpop.permute.xlu0 %862  ;;  %v5886_v27 = vsel %vm620_vm1, 1.0, %v15036_v43  ;;  %v5887_v18 = vsel %vm621_vm2, 1.0, %v15036_v43  ;;  %vm623_vm4 = vcmp.eq.s32.totalorder %v7916_v30, %v7672_v34  ;;  %vm624_vm5 = vcmp.eq.s32.totalorder %v7916_v30, %v7681_v37 }
 0x107   : > { %2084 = vperm.xlu0 %7129, %v7568_v10   ;;  %v5876_v10 = vsel %vm610_vm7, 1.0, %v15036_v43  ;;  %vm625_vm6 = vcmp.eq.s32.totalorder %v7916_v30, %v7684_v38  ;;  %vm626_vm7 = vcmp.eq.s32.totalorder %v7916_v30, %v7688_v39  ;;  %vm627_vm8 = vcmp.eq.s32.totalorder %v7961_v11, %v7672_v34 }
 0x108   : > { %v8251_v0 = vadd.f32 %v5876_v10, %v7806_v19  ;;  %vm628_vm9 = vcmp.eq.s32.totalorder %v7961_v11, %v7681_v37  ;;  %v15223_v30 = vmov 0.0   ;;  %vm629_vm10 = vcmp.eq.s32.totalorder %v7961_v11, %v7684_v38 }
 0x109   : > { %vm631_vm12 = vcmp.eq.s32.totalorder %v7963_v29, %v7672_v34  ;;  %vm632_vm13 = vcmp.eq.s32.totalorder %v7963_v29, %v7681_v37  ;;  %vm633_vm14 = vcmp.eq.s32.totalorder %v7963_v29, %v7684_v38 }
 0x10a   : > { %7128 = vset.pattern.permute.xlu1 %v15204_v20  ;;  %v8224_v21 = vpop.permute.xlu1 %859  ;;  %v8226_v35 = vpop.permute.xlu0 %868  ;;  %v8305_v20 = vadd.f32 %v5881_v47, %v15207_v28  ;;  %v15215_v47 = vld [vmem:[#allocation18_spill] sm:$0xff]  ;;  %v15217_v28 = vld [vmem:[#allocation24_spill] sm:$0xff] }
 0x10b   : > { %2060 = vperm.xlu1 %7128, %v7536_v2   ;;  %2090 = vperm.xlu0 %7129, %v7576_v12   ;;  %v5880_v12 = vsel %vm614_vm11, 1.0, %v15036_v43  ;;  %vm630_vm11 = vcmp.eq.s32.totalorder %v7961_v11, %v7688_v39  ;;  %v5899_v11 = vsel %vm633_vm14, 1.0, %v15223_v30 }
 0x10c   : > { %v8294_v10 = vadd.f32 %v5880_v12, %v15206_v57  ;;  %15208 = vst [vmem:[#allocation19_spill] sm:$0xff] %v8305_v20  ;;  %v15212_v12 = vld [vmem:[#allocation17_spill] sm:$0xff]  ;;  %v5888_v57 = vsel %vm622_vm3, 1.0, %v15036_v43  ;;  %v5895_v20 = vsel %vm629_vm10, 1.0, %v15223_v30 }
 0x10d   : > { %v8315_v31 = vadd.f32 %v5883_v3, %v15212_v12  ;;  %v15218_v3 = vld [vmem:[#allocation25_spill] sm:$0xff] }
 0x10e   : > { %v8269_v19 = vpop.permute.xlu1 %865  ;;  %v8277_v40 = vpop.permute.xlu0 %874  ;;  %v8335_v12 = vadd.f32 %v5886_v27, %v15218_v3  ;;  %v5891_v27 = vsel %vm625_vm6, 1.0, %v15223_v30  ;;  %v15042_v3 = vmov 7  }
 0x10f   : > { %15205 = vst [vmem:[#allocation56_spill] sm:$0xff] %v8277_v40  ;;  %2066 = vperm.xlu1 %7128, %v7533_v1   ;;  %2096 = vperm.xlu0 %7129, %v7584_v14   ;;  %v5884_v1 = vsel %vm618_vm15, 1.0, %v15036_v43  ;;  %v15209_v14 = vld [vmem:[#allocation16_spill] sm:$0xff]  ;;  %15213 = vst [vmem:[#allocation17_spill] sm:$0xff] %v8315_v31  ;;  %v15219_v43 = vld [vmem:[#allocation26_spill] sm:$0xff]  ;;  %vm634_vm15 = vcmp.eq.s32.totalorder %v7963_v29, %v7688_v39 }
 0x110   : > { %v8308_v17 = vadd.f32 %v5882_v7, %v15209_v14  ;;  %v8324_v7 = vadd.f32 %v5884_v1, %v15215_v47  ;;  %v8327_v14 = vadd.f32 %v5885_v5, %v15217_v28  ;;  %v8338_v31 = vadd.f32 %v5887_v18, %v15219_v43  ;;  %v15232_v40 = vld [vmem:[#allocation23_spill] sm:$0xff] }
 0x111   : > { %v8347_v5 = vadd.f32 %v5888_v57, %v7930_v32  ;;  %v5889_v47 = vsel %vm623_vm4, 1.0, %v15223_v30  ;;  %v5892_v18 = vsel %vm626_vm7, 1.0, %v15223_v30  ;;  %v15225_v32 = vld [vmem:[#allocation9_spill] sm:$0xff]  ;;  %v5893_v57 = vsel %vm627_vm8, 1.0, %v15223_v30  ;;  %v15244_v29 = vld [vmem:[#allocation27_spill] sm:$0xff] }
 0x112   : > { %15210 = vst [vmem:[#allocation15_spill] sm:$0xff] %v8308_v17  ;;  %v8312_v25 = vpop.permute.xlu1 %871  ;;  %15216 = vst [vmem:[#allocation8_spill] sm:$0xff] %v8324_v7  ;;  %v8344_v1 = vpop.permute.xlu0 %880  ;;  %v5894_v28 = vsel %vm628_vm9, 1.0, %v15223_v30  ;;  %v15228_v7 = vld [vmem:[#allocation21_spill] sm:$0xff] }
 0x113   : > { %15211 = vst [vmem:[#allocation16_spill] sm:$0xff] %v8312_v25  ;;  %2069 = vperm.xlu1 %7128, %v15214_v9   ;;  %2102 = vperm.xlu0 %7129, %v7592_v16   ;;  %15220 = vst [vmem:[#allocation18_spill] sm:$0xff] %v8338_v31  ;;  %v5890_v16 = vsel %vm624_vm5, 1.0, %v15223_v30  ;;  %v15230_v25 = vld [vmem:[#allocation22_spill] sm:$0xff]  ;;  %v8383_v31 = vadd.f32 %v5892_v18, %v15232_v40  ;;  %v5898_v40 = vsel %vm632_vm13, 1.0, %v15223_v30 }
 0x114   : > { %15221 = vst [vmem:[#allocation24_spill] sm:$0xff] %v8344_v1  ;;  %15222 = vst [vmem:[#allocation25_spill] sm:$0xff] %v8347_v5  ;;  %v8373_v17 = vadd.f32 %v5890_v16, %v15228_v7  ;;  %v8380_v5 = vadd.f32 %v5891_v27, %v15230_v25  ;;  %v5897_v7 = vsel %vm631_vm12, 1.0, %v15223_v30  ;;  %v15236_v25 = vld [vmem:[#allocation32_spill] sm:$0xff] }
 0x115   : > { %15233 = vst [vmem:[#allocation22_spill] sm:$0xff] %v8383_v31  ;;  %v8399_v27 = vadd.f32 %v5894_v28, %v15236_v25  ;;  %v5900_v28 = vsel %vm634_vm15, 1.0, %v15223_v30  ;;  %v15242_v25 = vld [vmem:[#allocation34_spill] sm:$0xff] }
 0x116   : > { %v8353_v43 = vpop.permute.xlu1 %877  ;;  %15231 = vst [vmem:[#allocation21_spill] sm:$0xff] %v8380_v5  ;;  %v8409_v18 = vpop.permute.xlu0 %886  ;;  %v8424_v5 = vadd.f32 %v5897_v7, %v15244_v29 }
 0x117   : > { %15224 = vst [vmem:[#allocation26_spill] sm:$0xff] %v8353_v43  ;;  %2075 = vperm.xlu1 %7128, %v15225_v32   ;;  %7130 = vset.pattern.permute.xlu0 %v15042_v3  ;;  %v15226_v43 = vld [vmem:[#allocation20_spill] sm:$0xff]  ;;  %v15238_v3 = vld [vmem:[#allocation10_spill] sm:$0xff] }
 0x118   : > { %v8370_v1 = vadd.f32 %v5889_v47, %v15226_v43  ;;  %15229 = vst [vmem:[#allocation20_spill] sm:$0xff] %v8373_v17  ;;  %2364 = vperm.xlu0 %7130, %v7536_v2   ;;  %v5896_v47 = vsel %vm630_vm11, 1.0, %v15223_v30  ;;  %v15235_v43 = vld [vmem:[#allocation31_spill] sm:$0xff] }
 0x119   : > { %v8396_v2 = vadd.f32 %v5893_v57, %v15235_v43  ;;  %15237 = vst [vmem:[#allocation31_spill] sm:$0xff] %v8409_v18  ;;  %v15241_v43 = vld [vmem:[#allocation41_spill] sm:$0xff]  ;;  %v8421_v31 = vadd.f32 %v5896_v47, %v15242_v25  ;;  %v15250_v47 = vld [vmem:[#allocation42_spill] sm:$0xff] }
 0x11a   : > { %15227 = vst [vmem:[#allocation9_spill] sm:$0xff] %v8370_v1  ;;  %v8393_v16 = vpop.permute.xlu1 %883  ;;  %vm635_vm0 = vcmp.eq.s32.totalorder %v15241_v43, %v7672_v34  ;;  %vm636_vm1 = vcmp.eq.s32.totalorder %v15241_v43, %v7681_v37  ;;  %vm637_vm2 = vcmp.eq.s32.totalorder %v15241_v43, %v7684_v38  ;;  %vm638_vm3 = vcmp.eq.s32.totalorder %v15241_v43, %v7688_v39  ;;  %v15248_v18 = vld [vmem:[#allocation29_spill] sm:$0xff]  ;;  %v15252_v25 = vld [vmem:[#allocation30_spill] sm:$0xff] }
 0x11b   : > { %15234 = vst [vmem:[#allocation23_spill] sm:$0xff] %v8393_v16  ;;  %2081 = vperm.xlu1 %7128, %v15238_v3   ;;  %v15239_v16 = vld [vmem:[#allocation33_spill] sm:$0xff]  ;;  %15243 = vst [vmem:[#allocation10_spill] sm:$0xff] %v8421_v31  ;;  %v8435_v17 = vadd.f32 %v5899_v11, %v15248_v18  ;;  %vm639_vm4 = vcmp.eq.s32.totalorder %v15250_v47, %v7672_v34  ;;  %vm640_vm5 = vcmp.eq.s32.totalorder %v15250_v47, %v7681_v37  ;;  %v15262_v31 = vld [vmem:[#allocation44_spill] sm:$0xff] }
 0x11c   : > { %v8413_v57 = vadd.f32 %v5895_v20, %v15239_v16  ;;  %15245 = vst [vmem:[#allocation33_spill] sm:$0xff] %v8424_v5  ;;  %2373 = vperm.xlu0 %7130, %v15214_v9   ;;  %v15246_v20 = vld [vmem:[#allocation28_spill] sm:$0xff]  ;;  %v8444_v29 = vadd.f32 %v5900_v28, %v15252_v25  ;;  %v5901_v43 = vsel %vm635_vm0, 1.0, %v15223_v30  ;;  %v5902_v9 = vsel %vm636_vm1, 1.0, %v15223_v30  ;;  %v15261_v5 = vld [vmem:[#allocation43_spill] sm:$0xff] }
 0x11d   : > { %v8432_v16 = vadd.f32 %v5898_v40, %v15246_v20  ;;  %15249 = vst [vmem:[#allocation34_spill] sm:$0xff] %v8435_v17  ;;  %vm641_vm6 = vcmp.eq.s32.totalorder %v15250_v47, %v7684_v38  ;;  %v15254_v40 = vld [vmem:[#allocation11_spill] sm:$0xff]  ;;  %v5903_v11 = vsel %vm637_vm2, 1.0, %v15223_v30  ;;  %v5904_v18 = vsel %vm638_vm3, 1.0, %v15223_v30  ;;  %v15255_v20 = vld [vmem:[#allocation50_spill] sm:$0xff] }
 0x11e   : > { %15240 = vst [vmem:[#allocation32_spill] sm:$0xff] %v8413_v57  ;;  %v8441_v7 = vpop.permute.xlu1 %889  ;;  %15253 = vst [vmem:[#allocation28_spill] sm:$0xff] %v8444_v29  ;;  %vm642_vm7 = vcmp.eq.s32.totalorder %v15250_v47, %v7688_v39  ;;  %vm643_vm8 = vcmp.eq.s32.totalorder %v15255_v20, %v7672_v34  ;;  %v5905_v28 = vsel %vm639_vm4, 1.0, %v15223_v30  ;;  %v5906_v25 = vsel %vm640_vm5, 1.0, %v15223_v30  ;;  %v15259_v47 = vld [vmem:[#allocation40_spill] sm:$0xff] }
 0x11f   : > { %15247 = vst [vmem:[#allocation41_spill] sm:$0xff] %v8432_v16  ;;  %15251 = vst [vmem:[#allocation27_spill] sm:$0xff] %v8441_v7  ;;  %2087 = vperm.xlu1 %7128, %v15254_v40   ;;  %vm644_vm9 = vcmp.eq.s32.totalorder %v15255_v20, %v7681_v37  ;;  %vm645_vm10 = vcmp.eq.s32.totalorder %v15255_v20, %v7684_v38  ;;  %v8463_v40 = vpop.permute.xlu0 %1148  ;;  %v15257_v7 = vld [vmem:[#allocation39_spill] sm:$0xff]  ;;  %v8470_v17 = vadd.f32 %v5902_v9, %v15259_v47 }
 0x120   : > { %15256 = vst [vmem:[#allocation29_spill] sm:$0xff] %v8463_v40  ;;  %2379 = vperm.xlu0 %7130, %v15225_v32   ;;  %v8467_v29 = vadd.f32 %v5901_v43, %v15257_v7  ;;  %v5907_v16 = vsel %vm641_vm6, 1.0, %v15223_v30  ;;  %vm646_vm11 = vcmp.eq.s32.totalorder %v15255_v20, %v7688_v39  ;;  %v8476_v1 = vadd.f32 %v5903_v11, %v15261_v5  ;;  %v15263_v7 = vld [vmem:[#allocation12_spill] sm:$0xff]  ;;  %v15265_v9 = vld [vmem:[#allocation35_spill] sm:$0xff]  ;;  %v15269_v11 = vld [vmem:[#allocation37_spill] sm:$0xff] }
 0x121   : > { %15260 = vst [vmem:[#allocation30_spill] sm:$0xff] %v8470_v17  ;;  %v8479_v57 = vadd.f32 %v5904_v18, %v15262_v31  ;;  %v5908_v40 = vsel %vm642_vm7, 1.0, %v15223_v30  ;;  %v5909_v32 = vsel %vm643_vm8, 1.0, %v15223_v30  ;;  %v8487_v47 = vadd.f32 %v5905_v28, %v15265_v9  ;;  %v15267_v17 = vld [vmem:[#allocation36_spill] sm:$0xff]  ;;  %v15271_v28 = vld [vmem:[#allocation51_spill] sm:$0xff]  ;;  %v15274_v9 = vld [vmem:[#allocation49_spill] sm:$0xff] }
 0x122   : > { %15258 = vst [vmem:[#allocation42_spill] sm:$0xff] %v8467_v29  ;;  %v8490_v29 = vadd.f32 %v5906_v25, %v15267_v17  ;;  %v5910_v31 = vsel %vm644_vm9, 1.0, %v15223_v30  ;;  %v5911_v5 = vsel %vm645_vm10, 1.0, %v15223_v30  ;;  %v8501_v18 = vadd.f32 %v5907_v16, %v15269_v11  ;;  %v15272_v17 = vld [vmem:[#allocation38_spill] sm:$0xff]  ;;  %v15276_v16 = vld [vmem:[#allocation52_spill] sm:$0xff]  ;;  %v15278_v11 = vld [vmem:[#allocation53_spill] sm:$0xff] }
 0x123   : > { %2093 = vperm.xlu1 %7128, %v15263_v7   ;;  %v8484_v43 = vpop.permute.xlu1 %1151  ;;  %15266 = vst [vmem:[#allocation50_spill] sm:$0xff] %v8487_v47  ;;  %v5912_v7 = vsel %vm646_vm11, 1.0, %v15223_v30  ;;  %vm647_vm12 = vcmp.eq.s32.totalorder %v15271_v28, %v7672_v34  ;;  %vm648_vm13 = vcmp.eq.s32.totalorder %v15271_v28, %v7681_v37  ;;  %v8510_v25 = vadd.f32 %v5908_v40, %v15272_v17  ;;  %v15281_v40 = vld [vmem:[#allocation13_spill] sm:$0xff] }
 0x124   : > { %15264 = vst [vmem:[#allocation11_spill] sm:$0xff] %v8484_v43  ;;  %15268 = vst [vmem:[#allocation39_spill] sm:$0xff] %v8490_v29  ;;  %2385 = vperm.xlu0 %7130, %v15238_v3   ;;  %v8513_v43 = vadd.f32 %v5909_v32, %v15274_v9  ;;  %vm649_vm14 = vcmp.eq.s32.totalorder %v15271_v28, %v7684_v38  ;;  %vm650_vm15 = vcmp.eq.s32.totalorder %v15271_v28, %v7688_v39  ;;  %v8529_v3 = vpop.permute.xlu0 %1157  ;;  %v15283_v28 = vld [vmem:[#allocation54_spill] sm:$0xff] }
 0x125   : > { %15270 = vst [vmem:[#allocation40_spill] sm:$0xff] %v8501_v18  ;;  %15273 = vst [vmem:[#allocation43_spill] sm:$0xff] %v8510_v25  ;;  %v8520_v20 = vadd.f32 %v5910_v31, %v15276_v16  ;;  %v8523_v18 = vadd.f32 %v5911_v5, %v15278_v11  ;;  %vm891_vm0 = vcmp.eq.s32.totalorder %v8098_v4, %v7672_v34  ;;  %v5913_v31 = vsel %vm647_vm12, 1.0, %v15223_v30  ;;  %v7250_v11 = vld [vmem:[%s7530_s29 + $0x48] sm:$0xff] }
 0x126   : > { %15275 = vst [vmem:[#allocation44_spill] sm:$0xff] %v8513_v43  ;;  %vm892_vm1 = vcmp.eq.s32.totalorder %v8098_v4, %v7681_v37  ;;  %15280 = vst [vmem:[#allocation36_spill] sm:$0xff] %v8529_v3  ;;  %v8535_v17 = vadd.f32 %v5912_v7, %v15283_v28  ;;  %v5914_v5 = vsel %vm648_vm13, 1.0, %v15223_v30  ;;  %vm893_vm2 = vcmp.eq.s32.totalorder %v8098_v4, %v7684_v38  ;;  %v15285_v28 = vld [vmem:[#allocation45_spill] sm:$0xff]  ;;  %v15286_v3 = vld [vmem:[#allocation46_spill] sm:$0xff] }
 0x127   : > { %15277 = vst [vmem:[#allocation12_spill] sm:$0xff] %v8520_v20  ;;  %15279 = vst [vmem:[#allocation35_spill] sm:$0xff] %v8523_v18  ;;  %2099 = vperm.xlu1 %7128, %v15281_v40   ;;  %v8532_v32 = vpop.permute.xlu1 %1154  ;;  %v5915_v9 = vsel %vm649_vm14, 1.0, %v15223_v30  ;;  %v5916_v16 = vsel %vm650_vm15, 1.0, %v15223_v30  ;;  %vm894_vm3 = vcmp.eq.s32.totalorder %v8098_v4, %v7688_v39  ;;  %vm895_vm4 = vcmp.eq.s32.totalorder %v8100_v33, %v7672_v34  ;;  %v15289_v20 = vld [vmem:[#allocation48_spill] sm:$0xff] }
 0x128   : > { %15282 = vst [vmem:[#allocation37_spill] sm:$0xff] %v8532_v32  ;;  %15284 = vst [vmem:[#allocation51_spill] sm:$0xff] %v8535_v17  ;;  %2391 = vperm.xlu0 %7130, %v7250_v11   ;;  %v5917_v7 = vsel %vm891_vm0, 1.0, %v15223_v30  ;;  %v5918_v40 = vsel %vm892_vm1, 1.0, %v15223_v30  ;;  %vm896_vm5 = vcmp.eq.s32.totalorder %v8100_v33, %v7681_v37  ;;  %vm897_vm6 = vcmp.eq.s32.totalorder %v8100_v33, %v7684_v38  ;;  %v15287_v11 = vld [vmem:[#allocation14_spill] sm:$0xff]  ;;  %v15288_v17 = vld [vmem:[#allocation47_spill] sm:$0xff] }
 0x129   : > { %v8555_v32 = vadd.f32 %v5913_v31, %v15285_v28  ;;  %v8558_v25 = vadd.f32 %v5914_v5, %v15286_v3  ;;  %v5919_v29 = vsel %vm893_vm2, 1.0, %v15223_v30  ;;  %vm898_vm7 = vcmp.eq.s32.totalorder %v8100_v33, %v7688_v39 }
 0x12a   : > { %v8567_v18 = vadd.f32 %v5915_v9, %v15288_v17  ;;  %v8570_v43 = vadd.f32 %v5916_v16, %v15289_v20  ;;  %v5920_v3 = vsel %vm894_vm3, 1.0, %v15223_v30  ;;  %v5921_v31 = vsel %vm895_vm4, 1.0, %v15223_v30  ;;  %v8588_v9 = vpop.permute.xlu0 %1163  ;;  %v8591_v16 = vld [vmem:[%s7530_s29 + $0x58] sm:$0xff] }
 0x12b   : > { %2105 = vperm.xlu1 %7128, %v15287_v11   ;;  %v8564_v47 = vpop.permute.xlu1 %1160  ;;  %v8581_v5 = vadd.f32 %v5917_v7, %v8117_v36  ;;  %v8584_v28 = vadd.f32 %v5918_v40, %v8120_v42  ;;  %v5922_v17 = vsel %vm896_vm5, 1.0, %v15223_v30  ;;  %v5923_v20 = vsel %vm897_vm6, 1.0, %v15223_v30  ;;  %15290 = vst [vmem:[#allocation38_spill] sm:$0xff] %v8591_v16  ;;  %v15293_v7 = vld [vmem:[#allocation55_spill] sm:$0xff] }
 0x12c   : > { %2397 = vperm.xlu0 %7130, %v8591_v16   ;;  %v8595_v33 = vadd.f32 %v5919_v29, %v8126_v51  ;;  %v5924_v4 = vsel %vm898_vm7, 1.0, %v15223_v30  ;;  %vm899_vm8 = vcmp.eq.s32.totalorder %v8144_v6, %v7672_v34  ;;  %vm900_vm9 = vcmp.eq.s32.totalorder %v8144_v6, %v7681_v37 }
 0x12d   : > { %v8603_v42 = vadd.f32 %v5920_v3, %v8134_v48  ;;  %v8606_v36 = vadd.f32 %v5921_v31, %v8089_v15  ;;  %vm901_vm10 = vcmp.eq.s32.totalorder %v8144_v6, %v7684_v38  ;;  %vm902_vm11 = vcmp.eq.s32.totalorder %v8144_v6, %v7688_v39  ;;  %v8626_v15 = vld [vmem:[%s7530_s29 + $0x8] sm:$0xff] }
 0x12e   : > { %v15291_v51 = vmov 7   ;;  %v8616_v40 = vadd.f32 %v5922_v17, %v15293_v7  ;;  %v8619_v48 = vadd.f32 %v5923_v20, %v8103_v13  ;;  %vm907_vm12 = vcmp.eq.s32.totalorder %v8146_v52, %v7672_v34  ;;  %15294 = vst [vmem:[#allocation52_spill] sm:$0xff] %v8626_v15  ;;  %v7253_v13 = vld [vmem:[%s7530_s29 + $0x68] sm:$0xff] }
 0x12f   : > { %7131 = vset.pattern.permute.xlu1 %v15291_v51  ;;  %v8613_v29 = vpop.permute.xlu1 %1166  ;;  %vm908_vm13 = vcmp.eq.s32.totalorder %v8146_v52, %v7681_v37  ;;  %v8630_v11 = vadd.f32 %v5924_v4, %v8106_v58  ;;  %v5925_v3 = vsel %vm899_vm8, 1.0, %v15223_v30  ;;  %v5926_v31 = vsel %vm900_vm9, 1.0, %v15223_v30  ;;  %v8655_v51 = vpop.permute.xlu0 %1169 }
 0x130   : > { %15292 = vst [vmem:[#allocation49_spill] sm:$0xff] %v8613_v29  ;;  %2367 = vperm.xlu1 %7131, %v8626_v15   ;;  %vm909_vm14 = vcmp.eq.s32.totalorder %v8146_v52, %v7684_v38  ;;  %2403 = vperm.xlu0 %7130, %v7253_v13   ;;  %v5927_v17 = vsel %vm901_vm10, 1.0, %v15223_v30  ;;  %v5928_v58 = vsel %vm902_vm11, 1.0, %v15223_v30  ;;  %vm910_vm15 = vcmp.eq.s32.totalorder %v8146_v52, %v7688_v39  ;;  %v8669_v15 = vld [vmem:[%s7530_s29 + $0x10] sm:$0xff] }
 0x131   : > { %vm903_vm0 = vcmp.eq.s32.totalorder %v8179_v8, %v7672_v34  ;;  %v5933_v20 = vsel %vm907_vm12, 1.0, %v15223_v30  ;;  %v5934_v4 = vsel %vm908_vm13, 1.0, %v15223_v30  ;;  %vm904_vm1 = vcmp.eq.s32.totalorder %v8179_v8, %v7681_v37 }
 0x132   : > { %vm905_vm2 = vcmp.eq.s32.totalorder %v8179_v8, %v7684_v38  ;;  %v8660_v7 = vadd.f32 %v5925_v3, %v8137_v49  ;;  %v8663_v13 = vadd.f32 %v5926_v31, %v8149_v59  ;;  %v5935_v16 = vsel %vm909_vm14, 1.0, %v15223_v30  ;;  %v7255_v3 = vld [vmem:[%s7530_s29 + $0x78] sm:$0xff] }
 0x133   : > { %v8657_v6 = vpop.permute.xlu1 %1172  ;;  %vm906_vm3 = vcmp.eq.s32.totalorder %v8179_v8, %v7688_v39  ;;  %v8673_v29 = vadd.f32 %v5927_v17, %v8152_v53  ;;  %v5936_v49 = vsel %vm910_vm15, 1.0, %v15223_v30  ;;  %v5929_v59 = vsel %vm903_vm0, 1.0, %v15223_v30  ;;  %v7256_v8 = vld [vmem:[%s7530_s29 + $0x20] sm:$0xff] }
 0x134   : > { %15295 = vst [vmem:[#allocation53_spill] sm:$0xff] %v8657_v6  ;;  %2370 = vperm.xlu1 %7131, %v8669_v15   ;;  %v8676_v6 = vadd.f32 %v5928_v58, %v8159_v44  ;;  %2409 = vperm.xlu0 %7130, %v7255_v3   ;;  %v8688_v31 = vadd.f32 %v5933_v20, %v8202_v54  ;;  %v5930_v52 = vsel %vm904_vm1, 1.0, %v15223_v30  ;;  %v5931_v44 = vsel %vm905_vm2, 1.0, %v15223_v30  ;;  %v7257_v3 = vld [vmem:[%s7530_s29 + $0x30] sm:$0xff] }
 0x135   : > { %v8691_v53 = vadd.f32 %v5934_v4, %v8205_v55  ;;  %v8702_v17 = vadd.f32 %v5935_v16, %v8216_v60  ;;  %v5932_v58 = vsel %vm906_vm3, 1.0, %v15223_v30  ;;  %vm915_vm4 = vcmp.eq.s32.totalorder %v8181_v41, %v7672_v34 }
 0x136   : > { %vm916_vm5 = vcmp.eq.s32.totalorder %v8181_v41, %v7681_v37  ;;  %v8712_v55 = vadd.f32 %v5936_v49, %v8229_v23  ;;  %v8715_v20 = vadd.f32 %v5929_v59, %v8184_v22  ;;  %vm917_vm6 = vcmp.eq.s32.totalorder %v8181_v41, %v7684_v38  ;;  %v8732_v22 = vpop.permute.xlu0 %1175 }
 0x137   : > { %v8709_v54 = vpop.permute.xlu1 %1178  ;;  %vm918_vm7 = vcmp.eq.s32.totalorder %v8181_v41, %v7688_v39  ;;  %v8723_v60 = vadd.f32 %v5930_v52, %v8187_v50  ;;  %v8726_v16 = vadd.f32 %v5931_v44, %v8193_v26  ;;  %vm911_vm8 = vcmp.eq.s32.totalorder %v8224_v21, %v7672_v34 }
 0x138   : > { %15296 = vst [vmem:[#allocation13_spill] sm:$0xff] %v8709_v54  ;;  %2376 = vperm.xlu1 %7131, %v7256_v8   ;;  %vm912_vm9 = vcmp.eq.s32.totalorder %v8224_v21, %v7681_v37  ;;  %v8735_v23 = vadd.f32 %v5932_v58, %v8196_v62  ;;  %v5941_v41 = vsel %vm915_vm4, 1.0, %v15223_v30  ;;  %v5942_v50 = vsel %vm916_vm5, 1.0, %v15223_v30  ;;  %v15316_v54 = vld [vmem:[#allocation8_spill] sm:$0xff] }
 0x139   : > { %vm913_vm10 = vcmp.eq.s32.totalorder %v8224_v21, %v7684_v38  ;;  %v5943_v26 = vsel %vm917_vm6, 1.0, %v15223_v30  ;;  %v5944_v4 = vsel %vm918_vm7, 1.0, %v15223_v30  ;;  %vm914_vm11 = vcmp.eq.s32.totalorder %v8224_v21, %v7688_v39 }
 0x13a   : > { %vm923_vm12 = vcmp.eq.s32.totalorder %v8226_v35, %v7672_v34  ;;  %v5937_v62 = vsel %vm911_vm8, 1.0, %v15223_v30  ;;  %v5938_v49 = vsel %vm912_vm9, 1.0, %v15223_v30  ;;  %vm924_vm13 = vcmp.eq.s32.totalorder %v8226_v35, %v7681_v37 }
 0x13b   : > { %vm925_vm14 = vcmp.eq.s32.totalorder %v8226_v35, %v7684_v38  ;;  %v8753_v59 = vpop.permute.xlu1 %1184  ;;  %v8757_v52 = vadd.f32 %v5941_v41, %v8281_v61  ;;  %v8760_v21 = vadd.f32 %v5942_v50, %v8284_v63  ;;  %v5939_v44 = vsel %vm913_vm10, 1.0, %v15223_v30 }
 0x13c   : > { %15297 = vst [vmem:[#allocation54_spill] sm:$0xff] %v8753_v59  ;;  %2382 = vperm.xlu1 %7131, %v7257_v3   ;;  %vm926_vm15 = vcmp.eq.s32.totalorder %v8226_v35, %v7688_v39  ;;  %v8766_v58 = vadd.f32 %v5943_v26, %v8291_v56  ;;  %v8769_v8 = vadd.f32 %v5944_v4, %v8294_v10  ;;  %v5940_v3 = vsel %vm914_vm11, 1.0, %v15223_v30  ;;  %v8781_v59 = vpop.permute.xlu0 %1181  ;;  %v15305_v4 = vld [vmem:[#allocation18_spill] sm:$0xff] }
 0x13d   : > { %15298 = vst [vmem:[#allocation45_spill] sm:$0xff] %v8757_v52  ;;  %15299 = vst [vmem:[#allocation46_spill] sm:$0xff] %v8760_v21  ;;  %v5949_v61 = vsel %vm923_vm12, 1.0, %v15223_v30  ;;  %v8774_v41 = vadd.f32 %v5937_v62, %v8232_v24  ;;  %v8777_v63 = vadd.f32 %v5938_v49, %v8240_v45  ;;  %v5950_v50 = vsel %vm924_vm13, 1.0, %v15223_v30  ;;  %v8792_v24 = vld [vmem:[%s7530_s29 + $0x40] sm:$0xff] }
 0x13e   : > { %15300 = vst [vmem:[#allocation14_spill] sm:$0xff] %v8766_v58  ;;  %15301 = vst [vmem:[#allocation47_spill] sm:$0xff] %v8769_v8  ;;  %v5951_v35 = vsel %vm925_vm14, 1.0, %v15223_v30  ;;  %v8784_v56 = vadd.f32 %v5939_v44, %v8243_v46  ;;  %v5952_v10 = vsel %vm926_vm15, 1.0, %v15223_v30  ;;  %vm919_vm0 = vcmp.eq.s32.totalorder %v8269_v19, %v7672_v34  ;;  %v15307_v49 = vld [vmem:[#allocation56_spill] sm:$0xff] }
 0x13f   : > { %vm920_vm1 = vcmp.eq.s32.totalorder %v8269_v19, %v7681_v37  ;;  %15302 = vst [vmem:[#allocation48_spill] sm:$0xff] %v8792_v24  ;;  %v8796_v45 = vadd.f32 %v5940_v3, %v8251_v0  ;;  %v8799_v26 = vadd.f32 %v5949_v61, %v8327_v14  ;;  %vm921_vm2 = vcmp.eq.s32.totalorder %v8269_v19, %v7684_v38  ;;  %v8815_v0 = vpop.permute.xlu1 %1190  ;;  %v15309_v14 = vld [vmem:[#allocation25_spill] sm:$0xff]  ;;  %v15322_v58 = vld [vmem:[#allocation24_spill] sm:$0xff] }
 0x140   : > { %2388 = vperm.xlu1 %7131, %v8792_v24   ;;  %vm922_vm3 = vcmp.eq.s32.totalorder %v8269_v19, %v7688_v39  ;;  %v8806_v46 = vadd.f32 %v5950_v50, %v8335_v12  ;;  %v8809_v62 = vadd.f32 %v5951_v35, %v15305_v4  ;;  %vm931_vm4 = vcmp.eq.s32.totalorder %v15307_v49, %v7672_v34  ;;  %v15311_v50 = vld [vmem:[#allocation16_spill] sm:$0xff]  ;;  %v7259_v35 = vld [vmem:[%s7530_s29 + $0x50] sm:$0xff] }
 0x141   : > { %15303 = vst [vmem:[#allocation55_spill] sm:$0xff] %v8799_v26  ;;  %vm932_vm5 = vcmp.eq.s32.totalorder %v15307_v49, %v7681_v37  ;;  %15308 = vst [vmem:[#allocation56_spill] sm:$0xff] %v8815_v0  ;;  %v8818_v44 = vadd.f32 %v5952_v10, %v15309_v14  ;;  %v5945_v3 = vsel %vm919_vm0, 1.0, %v15223_v30  ;;  %v5946_v19 = vsel %vm920_vm1, 1.0, %v15223_v30  ;;  %v8837_v14 = vpop.permute.xlu0 %1187  ;;  %v15313_v0 = vld [vmem:[#allocation19_spill] sm:$0xff] }
 0x142   : > { %15304 = vst [vmem:[#allocation57_spill] sm:$0xff] %v8806_v46  ;;  %15306 = vst [vmem:[#allocation18_spill] sm:$0xff] %v8809_v62  ;;  %vm933_vm6 = vcmp.eq.s32.totalorder %v15307_v49, %v7684_v38  ;;  %v5947_v12 = vsel %vm921_vm2, 1.0, %v15223_v30  ;;  %v5948_v61 = vsel %vm922_vm3, 1.0, %v15223_v30  ;;  %vm934_vm7 = vcmp.eq.s32.totalorder %v15307_v49, %v7688_v39  ;;  %v15315_v46 = vld [vmem:[#allocation17_spill] sm:$0xff] }
 0x143   : > { %15310 = vst [vmem:[#allocation25_spill] sm:$0xff] %v8818_v44  ;;  %vm927_vm8 = vcmp.eq.s32.totalorder %v15311_v50, %v7672_v34  ;;  %v5957_v10 = vsel %vm931_vm4, 1.0, %v15223_v30  ;;  %v5958_v4 = vsel %vm932_vm5, 1.0, %v15223_v30  ;;  %vm928_vm9 = vcmp.eq.s32.totalorder %v15311_v50, %v7681_v37  ;;  %15312 = vst [vmem:[#allocation16_spill] sm:$0xff] %v8837_v14  ;;  %v15314_v44 = vld [vmem:[#allocation15_spill] sm:$0xff] }
 0x144   : > { %2394 = vperm.xlu1 %7131, %v7259_v35   ;;  %vm929_vm10 = vcmp.eq.s32.totalorder %v15311_v50, %v7684_v38  ;;  %v8840_v49 = vadd.f32 %v5945_v3, %v15313_v0  ;;  %v8843_v62 = vadd.f32 %v5946_v19, %v15314_v44  ;;  %v5959_v35 = vsel %vm933_vm6, 1.0, %v15223_v30 }
 0x145   : > { %vm930_vm11 = vcmp.eq.s32.totalorder %v15311_v50, %v7688_v39  ;;  %v8849_v26 = vadd.f32 %v5947_v12, %v15315_v46  ;;  %v8852_v24 = vadd.f32 %v5948_v61, %v15316_v54  ;;  %v5960_v8 = vsel %vm934_vm7, 1.0, %v15223_v30  ;;  %v8864_v50 = vpop.permute.xlu1 %1452  ;;  %v7260_v46 = vld [vmem:[%s7530_s29 + $0x60] sm:$0xff] }
 0x146   : > { %v5953_v14 = vsel %vm927_vm8, 1.0, %v15223_v30  ;;  %v8857_v0 = vadd.f32 %v5957_v10, %v8396_v2  ;;  %v8860_v44 = vadd.f32 %v5958_v4, %v8399_v27  ;;  %v5954_v3 = vsel %vm928_vm9, 1.0, %v15223_v30  ;;  %15319 = vst [vmem:[#allocation17_spill] sm:$0xff] %v8864_v50  ;;  %v15320_v54 = vld [vmem:[#allocation32_spill] sm:$0xff]  ;;  %v15323_v2 = vld [vmem:[#allocation10_spill] sm:$0xff]  ;;  %v15325_v10 = vld [vmem:[#allocation9_spill] sm:$0xff] }
 0x147   : > { %v5955_v19 = vsel %vm929_vm10, 1.0, %v15223_v30  ;;  %v8868_v12 = vadd.f32 %v5959_v35, %v15320_v54  ;;  %v5956_v61 = vsel %vm930_vm11, 1.0, %v15223_v30  ;;  %vm939_vm12 = vcmp.eq.s32.totalorder %v15322_v58, %v7672_v34  ;;  %v15326_v35 = vld [vmem:[#allocation20_spill] sm:$0xff]  ;;  %v15327_v54 = vld [vmem:[#allocation21_spill] sm:$0xff] }
 0x148   : > { %15317 = vst [vmem:[#allocation19_spill] sm:$0xff] %v8857_v0  ;;  %15318 = vst [vmem:[#allocation15_spill] sm:$0xff] %v8860_v44  ;;  %2400 = vperm.xlu1 %7131, %v7260_v46   ;;  %vm940_vm13 = vcmp.eq.s32.totalorder %v15322_v58, %v7681_v37  ;;  %v8876_v27 = vadd.f32 %v5960_v8, %v15323_v2  ;;  %v8879_v4 = vadd.f32 %v5953_v14, %v15325_v10  ;;  %v8895_v8 = vpop.permute.xlu0 %1193  ;;  %v15330_v14 = vld [vmem:[#allocation22_spill] sm:$0xff] }
 0x149   : > { %15321 = vst [vmem:[#allocation8_spill] sm:$0xff] %v8868_v12  ;;  %vm941_vm14 = vcmp.eq.s32.totalorder %v15322_v58, %v7684_v38  ;;  %vm942_vm15 = vcmp.eq.s32.totalorder %v15322_v58, %v7688_v39  ;;  %v8886_v46 = vadd.f32 %v5954_v3, %v15326_v35  ;;  %v8889_v50 = vadd.f32 %v5955_v19, %v15327_v54  ;;  %v15328_v12 = vld [vmem:[#allocation26_spill] sm:$0xff]  ;;  %v15332_v54 = vld [vmem:[#allocation31_spill] sm:$0xff] }
 0x14a   : > { %15324 = vst [vmem:[#allocation32_spill] sm:$0xff] %v8876_v27  ;;  %vm935_vm0 = vcmp.eq.s32.totalorder %v15328_v12, %v7672_v34  ;;  %vm936_vm1 = vcmp.eq.s32.totalorder %v15328_v12, %v7681_v37  ;;  %15329 = vst [vmem:[#allocation24_spill] sm:$0xff] %v8895_v8  ;;  %v8898_v2 = vadd.f32 %v5956_v61, %v15330_v14  ;;  %v5965_v10 = vsel %vm939_vm12, 1.0, %v15223_v30  ;;  %v7261_v3 = vld [vmem:[%s7530_s29 + $0x70] sm:$0xff] }
 0x14b   : > { %v5966_v58 = vsel %vm940_vm13, 1.0, %v15223_v30  ;;  %vm937_vm2 = vcmp.eq.s32.totalorder %v15328_v12, %v7684_v38  ;;  %v5967_v19 = vsel %vm941_vm14, 1.0, %v15223_v30  ;;  %v5968_v35 = vsel %vm942_vm15, 1.0, %v15223_v30  ;;  %v15334_v27 = vld [vmem:[#allocation42_spill] sm:$0xff] }
 0x14c   : > { %15331 = vst [vmem:[#allocation10_spill] sm:$0xff] %v8898_v2  ;;  %2406 = vperm.xlu1 %7131, %v7261_v3   ;;  %vm938_vm3 = vcmp.eq.s32.totalorder %v15328_v12, %v7688_v39  ;;  %vm947_vm4 = vcmp.eq.s32.totalorder %v15332_v54, %v7672_v34  ;;  %v5961_v61 = vsel %vm935_vm0, 1.0, %v15223_v30  ;;  %v5962_v14 = vsel %vm936_vm1, 1.0, %v15223_v30  ;;  %v8917_v3 = vpop.permute.xlu1 %1458  ;;  %v15336_v0 = vld [vmem:[#allocation30_spill] sm:$0xff] }
 0x14d   : > { %vm948_vm5 = vcmp.eq.s32.totalorder %v15332_v54, %v7681_v37  ;;  %vm949_vm6 = vcmp.eq.s32.totalorder %v15332_v54, %v7684_v38  ;;  %15333 = vst [vmem:[#allocation9_spill] sm:$0xff] %v8917_v3  ;;  %v8920_v44 = vadd.f32 %v5965_v10, %v15334_v27  ;;  %v8923_v12 = vadd.f32 %v5966_v58, %v15336_v0  ;;  %v15340_v27 = vld [vmem:[#allocation33_spill] sm:$0xff] }
 0x14e   : > { %v5963_v8 = vsel %vm937_vm2, 1.0, %v15223_v30  ;;  %vm950_vm7 = vcmp.eq.s32.totalorder %v15332_v54, %v7688_v39  ;;  %v8929_v21 = vadd.f32 %v5967_v19, %v8476_v1  ;;  %v8932_v52 = vadd.f32 %v5968_v35, %v8479_v57  ;;  %v15342_v0 = vld [vmem:[#allocation41_spill] sm:$0xff]  ;;  %v15345_v1 = vld [vmem:[#allocation34_spill] sm:$0xff]  ;;  %v15347_v35 = vld [vmem:[#allocation23_spill] sm:$0xff] }
 0x14f   : > { %15335 = vst [vmem:[#allocation20_spill] sm:$0xff] %v8920_v44  ;;  %15337 = vst [vmem:[#allocation21_spill] sm:$0xff] %v8923_v12  ;;  %v5964_v2 = vsel %vm938_vm3, 1.0, %v15223_v30  ;;  %v5973_v3 = vsel %vm947_vm4, 1.0, %v15223_v30  ;;  %v8937_v10 = vadd.f32 %v5961_v61, %v15340_v27  ;;  %v8940_v58 = vadd.f32 %v5962_v14, %v15342_v0  ;;  %v8944_v44 = vpop.permute.xlu0 %1455  ;;  %v15348_v61 = vld [vmem:[#allocation28_spill] sm:$0xff] }
 0x150   : > { %15338 = vst [vmem:[#allocation26_spill] sm:$0xff] %v8929_v21  ;;  %15339 = vst [vmem:[#allocation22_spill] sm:$0xff] %v8932_v52  ;;  %v5974_v12 = vsel %vm948_vm5, 1.0, %v15223_v30  ;;  %v5975_v54 = vsel %vm949_vm6, 1.0, %v15223_v30  ;;  %v8947_v19 = vadd.f32 %v5963_v8, %v15345_v1  ;;  %v5976_v57 = vsel %vm950_vm7, 1.0, %v15223_v30  ;;  %v15350_v27 = vld [vmem:[#allocation44_spill] sm:$0xff] }
 0x151   : > { %15341 = vst [vmem:[#allocation31_spill] sm:$0xff] %v8937_v10  ;;  %15343 = vst [vmem:[#allocation42_spill] sm:$0xff] %v8940_v58  ;;  %vm943_vm8 = vcmp.eq.s32.totalorder %v15347_v35, %v7672_v34  ;;  %vm944_vm9 = vcmp.eq.s32.totalorder %v15347_v35, %v7681_v37  ;;  %v8955_v14 = vadd.f32 %v5964_v2, %v15348_v61  ;;  %v15352_v8 = vld [vmem:[#allocation12_spill] sm:$0xff]  ;;  %v15354_v52 = vld [vmem:[#allocation35_spill] sm:$0xff]  ;;  %v8974_v2 = vpop.permute.xlu1 %1461 }
 0x152   : > { %15344 = vst [vmem:[#allocation30_spill] sm:$0xff] %v8944_v44  ;;  %15346 = vst [vmem:[#allocation33_spill] sm:$0xff] %v8947_v19  ;;  %v8958_v0 = vadd.f32 %v5973_v3, %v15350_v27  ;;  %vm945_vm10 = vcmp.eq.s32.totalorder %v15347_v35, %v7684_v38  ;;  %vm946_vm11 = vcmp.eq.s32.totalorder %v15347_v35, %v7688_v39  ;;  %v15356_v44 = vld [vmem:[#allocation29_spill] sm:$0xff]  ;;  %v15358_v3 = vld [vmem:[#allocation51_spill] sm:$0xff]  ;;  %v5969_v27 = vsel %vm943_vm8, 1.0, %v15223_v30 }
 0x153   : > { %15349 = vst [vmem:[#allocation41_spill] sm:$0xff] %v8955_v14  ;;  %v8965_v1 = vadd.f32 %v5974_v12, %v15352_v8  ;;  %v8968_v21 = vadd.f32 %v5975_v54, %v15354_v52  ;;  %vm1195_vm12 = vcmp.eq.s32.totalorder %v15356_v44, %v7672_v34  ;;  %vm1196_vm13 = vcmp.eq.s32.totalorder %v15356_v44, %v7681_v37  ;;  %v15360_v54 = vld [vmem:[#allocation27_spill] sm:$0xff] }
 0x154   : > { %15351 = vst [vmem:[#allocation34_spill] sm:$0xff] %v8958_v0  ;;  %15357 = vst [vmem:[#allocation44_spill] sm:$0xff] %v8974_v2  ;;  %v8977_v61 = vadd.f32 %v5976_v57, %v15358_v3  ;;  %v5970_v35 = vsel %vm944_vm9, 1.0, %v15223_v30  ;;  %vm1197_vm14 = vcmp.eq.s32.totalorder %v15356_v44, %v7684_v38  ;;  %v5971_v52 = vsel %vm945_vm10, 1.0, %v15223_v30  ;;  %v8995_v3 = vpop.permute.xlu0 %1464  ;;  %v15362_v2 = vld [vmem:[#allocation50_spill] sm:$0xff]  ;;  %v15364_v0 = vld [vmem:[#allocation40_spill] sm:$0xff] }
 0x155   : > { %15353 = vst [vmem:[#allocation23_spill] sm:$0xff] %v8965_v1  ;;  %15355 = vst [vmem:[#allocation28_spill] sm:$0xff] %v8968_v21  ;;  %v5972_v12 = vsel %vm946_vm11, 1.0, %v15223_v30  ;;  %vm1198_vm15 = vcmp.eq.s32.totalorder %v15356_v44, %v7688_v39  ;;  %vm951_vm0 = vcmp.eq.s32.totalorder %v15360_v54, %v7672_v34  ;;  %v5981_v57 = vsel %vm1195_vm12, 1.0, %v15223_v30  ;;  %v15363_v21 = vld [vmem:[#allocation39_spill] sm:$0xff] }
 0x156   : > { %15359 = vst [vmem:[#allocation12_spill] sm:$0xff] %v8977_v61  ;;  %v5982_v8 = vsel %vm1196_vm13, 1.0, %v15223_v30  ;;  %vm952_vm1 = vcmp.eq.s32.totalorder %v15360_v54, %v7681_v37  ;;  %vm953_vm2 = vcmp.eq.s32.totalorder %v15360_v54, %v7684_v38  ;;  %15361 = vst [vmem:[#allocation35_spill] sm:$0xff] %v8995_v3  ;;  %v8998_v61 = vadd.f32 %v5969_v27, %v15362_v2  ;;  %v15365_v19 = vld [vmem:[#allocation43_spill] sm:$0xff] }
 0x157   : > { %v9001_v44 = vadd.f32 %v5970_v35, %v15363_v21  ;;  %v5983_v1 = vsel %vm1197_vm14, 1.0, %v15223_v30  ;;  %vm954_vm3 = vcmp.eq.s32.totalorder %v15360_v54, %v7688_v39  ;;  %v9007_v14 = vadd.f32 %v5971_v52, %v15364_v0  ;;  %v9022_v54 = vpop.permute.xlu1 %1467  ;;  %v15367_v52 = vld [vmem:[#allocation36_spill] sm:$0xff] }
 0x158   : > { %v9010_v58 = vadd.f32 %v5972_v12, %v15365_v19  ;;  %v5984_v10 = vsel %vm1198_vm15, 1.0, %v15223_v30  ;;  %v5977_v3 = vsel %vm951_vm0, 1.0, %v15223_v30  ;;  %v9015_v2 = vadd.f32 %v5981_v57, %v8581_v5  ;;  %15366 = vst [vmem:[#allocation29_spill] sm:$0xff] %v9022_v54  ;;  %v15368_v12 = vld [vmem:[#allocation11_spill] sm:$0xff] }
 0x159   : > { %v9018_v21 = vadd.f32 %v5982_v8, %v8584_v28  ;;  %v5978_v27 = vsel %vm952_vm1, 1.0, %v15223_v30  ;;  %v5979_v35 = vsel %vm953_vm2, 1.0, %v15223_v30  ;;  %v9025_v0 = vadd.f32 %v5983_v1, %v8595_v33 }
 0x15a   : > { %v5980_v19 = vsel %vm954_vm3, 1.0, %v15223_v30  ;;  %vm1207_vm4 = vcmp.eq.s32.totalorder %v15367_v52, %v7672_v34  ;;  %vm1208_vm5 = vcmp.eq.s32.totalorder %v15367_v52, %v7681_v37  ;;  %v9033_v5 = vadd.f32 %v5984_v10, %v8603_v42 }
 0x15b   : > { %v9036_v28 = vadd.f32 %v5977_v3, %v8555_v32  ;;  %vm1209_vm6 = vcmp.eq.s32.totalorder %v15367_v52, %v7684_v38  ;;  %vm1210_vm7 = vcmp.eq.s32.totalorder %v15367_v52, %v7688_v39  ;;  %v9043_v33 = vadd.f32 %v5978_v27, %v8558_v25  ;;  %v9052_v32 = vpop.permute.xlu0 %1470  ;;  %v9073_v3 = vpop.permute.xlu1 %1473 }
 0x15c   : > { %v9046_v1 = vadd.f32 %v5979_v35, %v8567_v18  ;;  %vm1199_vm8 = vcmp.eq.s32.totalorder %v15368_v12, %v7672_v34  ;;  %vm1200_vm9 = vcmp.eq.s32.totalorder %v15368_v12, %v7681_v37  ;;  %v9055_v42 = vadd.f32 %v5980_v19, %v8570_v43  ;;  %15369 = vst [vmem:[#allocation51_spill] sm:$0xff] %v9073_v3 }
 0x15d   : > { %v5993_v10 = vsel %vm1207_vm4, 1.0, %v15223_v30  ;;  %v5994_v57 = vsel %vm1208_vm5, 1.0, %v15223_v30  ;;  %vm1201_vm10 = vcmp.eq.s32.totalorder %v15368_v12, %v7684_v38  ;;  %v5995_v18 = vsel %vm1209_vm6, 1.0, %v15223_v30 }
 0x15e   : > { %v5996_v25 = vsel %vm1210_vm7, 1.0, %v15223_v30  ;;  %vm1202_vm11 = vcmp.eq.s32.totalorder %v15368_v12, %v7688_v39  ;;  %vm1215_vm12 = vcmp.eq.s32.totalorder %v8588_v9, %v7672_v34  ;;  %v5985_v43 = vsel %vm1199_vm8, 1.0, %v15223_v30 }
 0x15f   : > { %v5986_v8 = vsel %vm1200_vm9, 1.0, %v15223_v30  ;;  %vm1216_vm13 = vcmp.eq.s32.totalorder %v8588_v9, %v7681_v37  ;;  %vm1217_vm14 = vcmp.eq.s32.totalorder %v8588_v9, %v7684_v38  ;;  %v9076_v27 = vadd.f32 %v5993_v10, %v8715_v20 }
 0x160   : > { %v9079_v35 = vadd.f32 %v5994_v57, %v8723_v60  ;;  %v5987_v19 = vsel %vm1201_vm10, 1.0, %v15223_v30  ;;  %vm1218_vm15 = vcmp.eq.s32.totalorder %v8588_v9, %v7688_v39  ;;  %v9085_v52 = vadd.f32 %v5995_v18, %v8726_v16  ;;  %v9100_v57 = vpop.permute.xlu0 %1476  ;;  %v15370_v18 = vld [vmem:[#allocation37_spill] sm:$0xff] }
 0x161   : > { %v9088_v12 = vadd.f32 %v5996_v25, %v8735_v23  ;;  %v5988_v54 = vsel %vm1202_vm11, 1.0, %v15223_v30  ;;  %v6001_v3 = vsel %vm1215_vm12, 1.0, %v15223_v30  ;;  %v9093_v20 = vadd.f32 %v5985_v43, %v8606_v36 }
 0x162   : > { %v9096_v60 = vadd.f32 %v5986_v8, %v8616_v40  ;;  %v6002_v10 = vsel %vm1216_vm13, 1.0, %v15223_v30  ;;  %v6003_v9 = vsel %vm1217_vm14, 1.0, %v15223_v30  ;;  %v9103_v16 = vadd.f32 %v5987_v19, %v8619_v48 }
 0x163   : > { %v6004_v23 = vsel %vm1218_vm15, 1.0, %v15223_v30  ;;  %vm1203_vm0 = vcmp.eq.s32.totalorder %v15370_v18, %v7672_v34  ;;  %vm1204_vm1 = vcmp.eq.s32.totalorder %v15370_v18, %v7681_v37  ;;  %v9111_v36 = vadd.f32 %v5988_v54, %v8630_v11  ;;  %v9130_v11 = vpop.permute.xlu1 %1479 }
 0x164   : > { %v9114_v40 = vadd.f32 %v6001_v3, %v8774_v41  ;;  %vm1205_vm2 = vcmp.eq.s32.totalorder %v15370_v18, %v7684_v38  ;;  %vm1206_vm3 = vcmp.eq.s32.totalorder %v15370_v18, %v7688_v39  ;;  %v9121_v48 = vadd.f32 %v6002_v10, %v8777_v63  ;;  %15374 = vst [vmem:[#allocation40_spill] sm:$0xff] %v9130_v11  ;;  %v9150_v19 = vpop.permute.xlu0 %1482 }
 0x165   : > { %v9124_v25 = vadd.f32 %v6003_v9, %v8784_v56  ;;  %vm1223_vm4 = vcmp.eq.s32.totalorder %v8655_v51, %v7672_v34  ;;  %vm1224_vm5 = vcmp.eq.s32.totalorder %v8655_v51, %v7681_v37  ;;  %v9133_v41 = vadd.f32 %v6004_v23, %v8796_v45  ;;  %v9161_v23 = vld [vmem:[%s7530_s29 + $0x18] sm:$0xff] }
 0x166   : > { %15371 = vst [vmem:[#allocation27_spill] sm:$0xff] %v9114_v40  ;;  %15372 = vst [vmem:[#allocation50_spill] sm:$0xff] %v9121_v48  ;;  %v5989_v54 = vsel %vm1203_vm0, 1.0, %v15223_v30  ;;  %v5990_v43 = vsel %vm1204_vm1, 1.0, %v15223_v30  ;;  %vm1225_vm6 = vcmp.eq.s32.totalorder %v8655_v51, %v7684_v38  ;;  %v5991_v63 = vsel %vm1205_vm2, 1.0, %v15223_v30  ;;  %v15433_v40 = vld [vmem:[#allocation26_spill] sm:$0xff] }
 0x167   : > { %15373 = vst [vmem:[#allocation39_spill] sm:$0xff] %v9124_v25  ;;  %15375 = vst [vmem:[#allocation43_spill] sm:$0xff] %v9133_v41  ;;  %v5992_v56 = vsel %vm1206_vm3, 1.0, %v15223_v30  ;;  %vm1226_vm7 = vcmp.eq.s32.totalorder %v8655_v51, %v7688_v39  ;;  %v6009_v8 = vsel %vm1223_vm4, 1.0, %v15223_v30  ;;  %v6010_v45 = vsel %vm1224_vm5, 1.0, %v15223_v30 }
 0x168   : > { %vm1211_vm8 = vcmp.eq.s32.totalorder %v8564_v47, %v7672_v34  ;;  %vm1212_vm9 = vcmp.eq.s32.totalorder %v8564_v47, %v7681_v37  ;;  %v15068_v3 = vmov 12   ;;  %v9153_v10 = vadd.f32 %v5989_v54, %v8660_v7 }
 0x169   : > { %7148 = vset.pattern.permute.xlu0 %v15068_v3  ;;  %v6011_v9 = vsel %vm1225_vm6, 1.0, %v15223_v30  ;;  %vm1213_vm10 = vcmp.eq.s32.totalorder %v8564_v47, %v7684_v38  ;;  %vm1214_vm11 = vcmp.eq.s32.totalorder %v8564_v47, %v7688_v39  ;;  %v9165_v18 = vadd.f32 %v5990_v43, %v8663_v13  ;;  %v9191_v13 = vpop.permute.xlu1 %1485 }
 0x16a   : > { %3893 = vperm.xlu0 %7148, %v9161_v23   ;;  %v9168_v3 = vadd.f32 %v5991_v63, %v8673_v29  ;;  %v9171_v7 = vadd.f32 %v5992_v56, %v8676_v6  ;;  %v6012_v54 = vsel %vm1226_vm7, 1.0, %v15223_v30  ;;  %v9178_v11 = vadd.f32 %v6009_v8, %v8840_v49  ;;  %15378 = vst [vmem:[#allocation37_spill] sm:$0xff] %v9191_v13  ;;  %v15381_v63 = vld [vmem:[#allocation49_spill] sm:$0xff]  ;;  %v9218_v8 = vpop.permute.xlu0 %1488  ;;  %v15396_v13 = vld [vmem:[#allocation42_spill] sm:$0xff] }
 0x16b   : > { %v9181_v41 = vadd.f32 %v6010_v45, %v8843_v62  ;;  %v5997_v29 = vsel %vm1211_vm8, 1.0, %v15223_v30  ;;  %v5998_v6 = vsel %vm1212_vm9, 1.0, %v15223_v30  ;;  %v9194_v51 = vadd.f32 %v6011_v9, %v8849_v26 }
 0x16c   : > { %15376 = vst [vmem:[#allocation36_spill] sm:$0xff] %v9178_v11  ;;  %v5999_v49 = vsel %vm1213_vm10, 1.0, %v15223_v30  ;;  %v6000_v62 = vsel %vm1214_vm11, 1.0, %v15223_v30  ;;  %vm1231_vm12 = vcmp.eq.s32.totalorder %v8732_v22, %v7672_v34  ;;  %vm1232_vm13 = vcmp.eq.s32.totalorder %v8732_v22, %v7681_v37 }
 0x16d   : > { %15377 = vst [vmem:[#allocation11_spill] sm:$0xff] %v9181_v41  ;;  %15379 = vst [vmem:[#allocation58_spill] sm:$0xff] %v9194_v51  ;;  %vm1233_vm14 = vcmp.eq.s32.totalorder %v8732_v22, %v7684_v38  ;;  %vm1234_vm15 = vcmp.eq.s32.totalorder %v8732_v22, %v7688_v39  ;;  %v9207_v47 = vadd.f32 %v6012_v54, %v8852_v24  ;;  %v15071_v56 = vmov 13   ;;  %v15401_v41 = vld [vmem:[#allocation33_spill] sm:$0xff] }
 0x16e   : > { %v9210_v26 = vadd.f32 %v5997_v29, %v8688_v31  ;;  %v9213_v43 = vadd.f32 %v5998_v6, %v8691_v53  ;;  %vm1219_vm0 = vcmp.eq.s32.totalorder %v15381_v63, %v7672_v34  ;;  %7149 = vset.pattern.permute.xlu0 %v15071_v56  ;;  %v9221_v45 = vadd.f32 %v5999_v49, %v8702_v17 }
 0x16f   : > { %15380 = vst [vmem:[#allocation59_spill] sm:$0xff] %v9207_v47  ;;  %v9224_v22 = vadd.f32 %v6000_v62, %v8712_v55  ;;  %v6017_v31 = vsel %vm1231_vm12, 1.0, %v15223_v30  ;;  %vm1220_vm1 = vcmp.eq.s32.totalorder %v15381_v63, %v7681_v37  ;;  %4194 = vperm.xlu0 %7149, %v8669_v15   ;;  %v6018_v53 = vsel %vm1232_vm13, 1.0, %v15223_v30  ;;  %v9242_v55 = vpop.permute.xlu1 %1491  ;;  %v15386_v62 = vld [vmem:[#allocation10_spill] sm:$0xff] }
 0x170   : > { %v6019_v24 = vsel %vm1233_vm14, 1.0, %v15223_v30  ;;  %v6020_v9 = vsel %vm1234_vm15, 1.0, %v15223_v30  ;;  %vm1221_vm2 = vcmp.eq.s32.totalorder %v15381_v63, %v7684_v38  ;;  %vm1222_vm3 = vcmp.eq.s32.totalorder %v15381_v63, %v7688_v39  ;;  %15382 = vst [vmem:[#allocation49_spill] sm:$0xff] %v9242_v55  ;;  %v15388_v55 = vld [vmem:[#allocation45_spill] sm:$0xff] }
 0x171   : > { %v6005_v17 = vsel %vm1219_vm0, 1.0, %v15223_v30  ;;  %vm1239_vm4 = vcmp.eq.s32.totalorder %v8781_v59, %v7672_v34  ;;  %vm1240_vm5 = vcmp.eq.s32.totalorder %v8781_v59, %v7681_v37  ;;  %v9245_v54 = vadd.f32 %v6017_v31, %v8879_v4  ;;  %v9263_v31 = vld [vmem:[%s7530_s29 + $0x28] sm:$0xff] }
 0x172   : > { %v6006_v29 = vsel %vm1220_vm1, 1.0, %v15223_v30  ;;  %vm1241_vm6 = vcmp.eq.s32.totalorder %v8781_v59, %v7684_v38  ;;  %vm1242_vm7 = vcmp.eq.s32.totalorder %v8781_v59, %v7688_v39  ;;  %v9253_v6 = vadd.f32 %v6018_v53, %v8886_v46  ;;  %v15390_v53 = vld [vmem:[#allocation46_spill] sm:$0xff] }
 0x173   : > { %15383 = vst [vmem:[#allocation60_spill] sm:$0xff] %v9245_v54  ;;  %v9256_v49 = vadd.f32 %v6019_v24, %v8889_v50  ;;  %v9259_v63 = vadd.f32 %v6020_v9, %v15386_v62  ;;  %v6007_v4 = vsel %vm1221_vm2, 1.0, %v15223_v30  ;;  %4203 = vperm.xlu0 %7149, %v9263_v31   ;;  %v6008_v56 = vsel %vm1222_vm3, 1.0, %v15223_v30  ;;  %v9272_v50 = vpop.permute.xlu0 %1494  ;;  %v9302_v51 = vpop.permute.xlu1 %1497 }
 0x174   : > { %15384 = vst [vmem:[#allocation61_spill] sm:$0xff] %v9253_v6  ;;  %v9268_v54 = vadd.f32 %v6005_v17, %v15388_v55  ;;  %v6025_v59 = vsel %vm1239_vm4, 1.0, %v15223_v30  ;;  %v6026_v46 = vsel %vm1240_vm5, 1.0, %v15223_v30  ;;  %15389 = vst [vmem:[#allocation45_spill] sm:$0xff] %v9272_v50  ;;  %v9275_v24 = vadd.f32 %v6006_v29, %v15390_v53  ;;  %v15393_v17 = vld [vmem:[#allocation47_spill] sm:$0xff] }
 0x175   : > { %15385 = vst [vmem:[#allocation62_spill] sm:$0xff] %v9256_v49  ;;  %15387 = vst [vmem:[#allocation10_spill] sm:$0xff] %v9259_v63  ;;  %v6027_v9 = vsel %vm1241_vm6, 1.0, %v15223_v30  ;;  %v6028_v62 = vsel %vm1242_vm7, 1.0, %v15223_v30  ;;  %v15391_v63 = vld [vmem:[#allocation53_spill] sm:$0xff]  ;;  %v15392_v49 = vld [vmem:[#allocation14_spill] sm:$0xff]  ;;  %v9291_v55 = vadd.f32 %v6008_v56, %v15393_v17  ;;  %v9297_v47 = vadd.f32 %v6026_v46, %v15396_v13 }
 0x176   : > { %vm1227_vm8 = vcmp.eq.s32.totalorder %v15391_v63, %v7672_v34  ;;  %v9282_v6 = vadd.f32 %v6007_v4, %v15392_v49  ;;  %vm1228_vm9 = vcmp.eq.s32.totalorder %v15391_v63, %v7681_v37  ;;  %vm1229_vm10 = vcmp.eq.s32.totalorder %v15391_v63, %v7684_v38  ;;  %v15394_v29 = vld [vmem:[#allocation31_spill] sm:$0xff]  ;;  %v15398_v49 = vld [vmem:[#allocation16_spill] sm:$0xff]  ;;  %15400 = vst [vmem:[#allocation14_spill] sm:$0xff] %v9302_v51 }
 0x177   : > { %vm1230_vm11 = vcmp.eq.s32.totalorder %v15391_v63, %v7688_v39  ;;  %v9294_v53 = vadd.f32 %v6025_v59, %v15394_v29  ;;  %15397 = vst [vmem:[#allocation53_spill] sm:$0xff] %v9297_v47  ;;  %vm1247_vm12 = vcmp.eq.s32.totalorder %v15398_v49, %v7672_v34  ;;  %v15399_v4 = vld [vmem:[#allocation48_spill] sm:$0xff]  ;;  %v9305_v11 = vadd.f32 %v6027_v9, %v15401_v41  ;;  %v15403_v63 = vld [vmem:[#allocation41_spill] sm:$0xff]  ;;  %v15407_v17 = vld [vmem:[#allocation55_spill] sm:$0xff]  ;;  %v9351_v48 = vpop.permute.xlu1 %1759 }
 0x178   : > { %4212 = vperm.xlu0 %7149, %v15399_v4   ;;  %v9308_v50 = vadd.f32 %v6028_v62, %v15403_v63  ;;  %v6013_v56 = vsel %vm1227_vm8, 1.0, %v15223_v30  ;;  %vm1248_vm13 = vcmp.eq.s32.totalorder %v15398_v49, %v7681_v37  ;;  %v6014_v13 = vsel %vm1228_vm9, 1.0, %v15223_v30  ;;  %v15405_v9 = vld [vmem:[#allocation13_spill] sm:$0xff]  ;;  %v9325_v62 = vpop.permute.xlu0 %1756  ;;  %15412 = vst [vmem:[#allocation48_spill] sm:$0xff] %v9351_v48  ;;  %v15420_v48 = vld [vmem:[#allocation8_spill] sm:$0xff] }
 0x179   : > { %15395 = vst [vmem:[#allocation46_spill] sm:$0xff] %v9294_v53  ;;  %15402 = vst [vmem:[#allocation47_spill] sm:$0xff] %v9305_v11  ;;  %v6015_v59 = vsel %vm1229_vm10, 1.0, %v15223_v30  ;;  %v6016_v46 = vsel %vm1230_vm11, 1.0, %v15223_v30  ;;  %vm1249_vm14 = vcmp.eq.s32.totalorder %v15398_v49, %v7684_v38  ;;  %vm1250_vm15 = vcmp.eq.s32.totalorder %v15398_v49, %v7688_v39  ;;  %v15408_v49 = vld [vmem:[#allocation57_spill] sm:$0xff] }
 0x17a   : > { %15404 = vst [vmem:[#allocation31_spill] sm:$0xff] %v9308_v50  ;;  %v6033_v41 = vsel %vm1247_vm12, 1.0, %v15223_v30  ;;  %vm1235_vm0 = vcmp.eq.s32.totalorder %v15405_v9, %v7672_v34  ;;  %vm1236_vm1 = vcmp.eq.s32.totalorder %v15405_v9, %v7681_v37  ;;  %15406 = vst [vmem:[#allocation42_spill] sm:$0xff] %v9325_v62  ;;  %v9328_v29 = vadd.f32 %v6013_v56, %v15407_v17  ;;  %v15409_v50 = vld [vmem:[#allocation18_spill] sm:$0xff]  ;;  %v15410_v47 = vld [vmem:[#allocation25_spill] sm:$0xff] }
 0x17b   : > { %v6034_v63 = vsel %vm1248_vm13, 1.0, %v15223_v30  ;;  %vm1237_vm2 = vcmp.eq.s32.totalorder %v15405_v9, %v7684_v38  ;;  %vm1238_vm3 = vcmp.eq.s32.totalorder %v15405_v9, %v7688_v39  ;;  %v9336_v51 = vadd.f32 %v6014_v13, %v15408_v49 }
 0x17c   : > { %v9339_v11 = vadd.f32 %v6015_v59, %v15409_v50  ;;  %v9342_v53 = vadd.f32 %v6016_v46, %v15410_v47  ;;  %v6035_v56 = vsel %vm1249_vm14, 1.0, %v15223_v30  ;;  %v6036_v17 = vsel %vm1250_vm15, 1.0, %v15223_v30  ;;  %v15414_v59 = vld [vmem:[#allocation24_spill] sm:$0xff]  ;;  %v15417_v46 = vld [vmem:[#allocation19_spill] sm:$0xff] }
 0x17d   : > { %v9347_v62 = vadd.f32 %v6033_v41, %v8998_v61  ;;  %v6021_v25 = vsel %vm1235_vm0, 1.0, %v15223_v30  ;;  %v6022_v9 = vsel %vm1236_vm1, 1.0, %v15223_v30  ;;  %v9354_v13 = vadd.f32 %v6034_v63, %v9001_v44  ;;  %v15418_v63 = vld [vmem:[#allocation15_spill] sm:$0xff] }
 0x17e   : > { %v6023_v50 = vsel %vm1237_vm2, 1.0, %v15223_v30  ;;  %v6024_v47 = vsel %vm1238_vm3, 1.0, %v15223_v30  ;;  %vm1255_vm4 = vcmp.eq.s32.totalorder %v15414_v59, %v7672_v34  ;;  %v9361_v61 = vadd.f32 %v6035_v56, %v9007_v14  ;;  %v9379_v56 = vpop.permute.xlu0 %1765 }
 0x17f   : > { %15411 = vst [vmem:[#allocation16_spill] sm:$0xff] %v9347_v62  ;;  %15413 = vst [vmem:[#allocation33_spill] sm:$0xff] %v9354_v13  ;;  %vm1256_vm5 = vcmp.eq.s32.totalorder %v15414_v59, %v7681_v37  ;;  %vm1257_vm6 = vcmp.eq.s32.totalorder %v15414_v59, %v7684_v38  ;;  %v9368_v44 = vadd.f32 %v6036_v17, %v9010_v58  ;;  %v15079_v14 = vmov 10   ;;  %v15421_v13 = vld [vmem:[#allocation32_spill] sm:$0xff]  ;;  %v15423_v17 = vld [vmem:[#allocation54_spill] sm:$0xff] }
 0x180   : > { %15415 = vst [vmem:[#allocation41_spill] sm:$0xff] %v9361_v61  ;;  %v9371_v41 = vadd.f32 %v6021_v25, %v15417_v46  ;;  %v9374_v49 = vadd.f32 %v6022_v9, %v15418_v63  ;;  %vm1258_vm7 = vcmp.eq.s32.totalorder %v15414_v59, %v7688_v39  ;;  %7176 = vset.pattern.permute.xlu0 %v15079_v14  ;;  %15419 = vst [vmem:[#allocation55_spill] sm:$0xff] %v9379_v56  ;;  %v9391_v9 = vld [vmem:[%s7530_s29] sm:$0xff]  ;;  %v15083_v56 = vmov 8  }
 0x181   : > { %15416 = vst [vmem:[#allocation13_spill] sm:$0xff] %v9368_v44  ;;  %v9382_v61 = vadd.f32 %v6023_v50, %v15420_v48  ;;  %v9385_v58 = vadd.f32 %v6024_v47, %v15421_v13  ;;  %v6041_v25 = vsel %vm1255_vm4, 1.0, %v15223_v30  ;;  %vm1243_vm8 = vcmp.eq.s32.totalorder %v15423_v17, %v7672_v34  ;;  %3276 = vperm.xlu0 %7176, %v9391_v9   ;;  %v15424_v13 = vld [vmem:[#allocation30_spill] sm:$0xff]  ;;  %v9407_v50 = vpop.permute.xlu1 %1762  ;;  %v15428_v62 = vld [vmem:[#allocation52_spill] sm:$0xff] }
 0x182   : > { %v6042_v59 = vsel %vm1256_vm5, 1.0, %v15223_v30  ;;  %v6043_v46 = vsel %vm1257_vm6, 1.0, %v15223_v30  ;;  %vm1244_vm9 = vcmp.eq.s32.totalorder %v15423_v17, %v7681_v37  ;;  %vm1245_vm10 = vcmp.eq.s32.totalorder %v15423_v17, %v7684_v38  ;;  %15425 = vst [vmem:[#allocation18_spill] sm:$0xff] %v9407_v50  ;;  %7132 = vset.pattern.permute.xlu1 %v15083_v56  ;;  %v15434_v56 = vld [vmem:[#allocation56_spill] sm:$0xff] }
 0x183   : > { %15422 = vst [vmem:[#allocation57_spill] sm:$0xff] %v9385_v58  ;;  %v6044_v48 = vsel %vm1258_vm7, 1.0, %v15223_v30  ;;  %vm1246_vm11 = vcmp.eq.s32.totalorder %v15423_v17, %v7688_v39  ;;  %vm1503_vm12 = vcmp.eq.s32.totalorder %v15424_v13, %v7672_v34  ;;  %vm1504_vm13 = vcmp.eq.s32.totalorder %v15424_v13, %v7681_v37  ;;  %2668 = vperm.xlu1 %7132, %v9391_v9  }
 0x184   : > { %v9410_v47 = vadd.f32 %v6041_v25, %v9036_v28  ;;  %v6029_v63 = vsel %vm1243_vm8, 1.0, %v15223_v30  ;;  %vm1505_vm14 = vcmp.eq.s32.totalorder %v15424_v13, %v7684_v38  ;;  %vm1506_vm15 = vcmp.eq.s32.totalorder %v15424_v13, %v7688_v39  ;;  %v15431_v13 = vld [vmem:[#allocation20_spill] sm:$0xff] }
 0x185   : > { %v9418_v17 = vadd.f32 %v6042_v59, %v9043_v33  ;;  %v6030_v14 = vsel %vm1244_vm9, 1.0, %v15223_v30  ;;  %v6031_v44 = vsel %vm1245_vm10, 1.0, %v15223_v30  ;;  %3279 = vperm.xlu0 %7176, %v15428_v62   ;;  %v9424_v28 = vadd.f32 %v6043_v46, %v9046_v1  ;;  %v9430_v33 = vpop.permute.xlu0 %1771  ;;  %v15432_v46 = vld [vmem:[#allocation21_spill] sm:$0xff] }
 0x186   : > { %15426 = vst [vmem:[#allocation25_spill] sm:$0xff] %v9410_v47  ;;  %v6032_v25 = vsel %vm1246_vm11, 1.0, %v15223_v30  ;;  %v6049_v50 = vsel %vm1503_vm12, 1.0, %v15223_v30  ;;  %v6050_v47 = vsel %vm1504_vm13, 1.0, %v15223_v30  ;;  %v9433_v59 = vadd.f32 %v6044_v48, %v9055_v42  ;;  %v15435_v42 = vld [vmem:[#allocation22_spill] sm:$0xff] }
 0x187   : > { %15427 = vst [vmem:[#allocation24_spill] sm:$0xff] %v9418_v17  ;;  %15429 = vst [vmem:[#allocation19_spill] sm:$0xff] %v9424_v28  ;;  %v9436_v17 = vadd.f32 %v6029_v63, %v15431_v13  ;;  %v6051_v1 = vsel %vm1505_vm14, 1.0, %v15223_v30  ;;  %v6052_v62 = vsel %vm1506_vm15, 1.0, %v15223_v30  ;;  %v9442_v28 = vadd.f32 %v6030_v14, %v15432_v46  ;;  %2674 = vperm.xlu1 %7132, %v8669_v15  }
 0x188   : > { %15430 = vst [vmem:[#allocation15_spill] sm:$0xff] %v9433_v59  ;;  %v9445_v58 = vadd.f32 %v6031_v44, %v15433_v40  ;;  %vm1251_vm0 = vcmp.eq.s32.totalorder %v15434_v56, %v7672_v34  ;;  %vm1252_vm1 = vcmp.eq.s32.totalorder %v15434_v56, %v7681_v37  ;;  %v9452_v48 = vadd.f32 %v6032_v25, %v15435_v42  ;;  %v9463_v40 = vpop.permute.xlu1 %1768 }
 0x189   : > { %v9455_v63 = vadd.f32 %v6049_v50, %v9093_v20  ;;  %v9458_v13 = vadd.f32 %v6050_v47, %v9096_v60  ;;  %vm1253_vm2 = vcmp.eq.s32.totalorder %v15434_v56, %v7684_v38  ;;  %3282 = vperm.xlu0 %7176, %v8669_v15   ;;  %15438 = vst [vmem:[#allocation54_spill] sm:$0xff] %v9463_v40  ;;  %v15441_v20 = vld [vmem:[#allocation35_spill] sm:$0xff]  ;;  %v6037_v60 = vsel %vm1251_vm0, 1.0, %v15223_v30  ;;  %v15443_v15 = vld [vmem:[#allocation34_spill] sm:$0xff]  ;;  %v15445_v40 = vld [vmem:[#allocation28_spill] sm:$0xff] }
 0x18a   : > { %v9466_v44 = vadd.f32 %v6051_v1, %v9103_v16  ;;  %v9469_v14 = vadd.f32 %v6052_v62, %v9111_v36  ;;  %vm1254_vm3 = vcmp.eq.s32.totalorder %v15434_v56, %v7688_v39  ;;  %vm1515_vm4 = vcmp.eq.s32.totalorder %v15441_v20, %v7672_v34  ;;  %v15442_v36 = vld [vmem:[#allocation17_spill] sm:$0xff]  ;;  %v9489_v56 = vpop.permute.xlu0 %1777  ;;  %v15444_v62 = vld [vmem:[#allocation23_spill] sm:$0xff] }
 0x18b   : > { %15436 = vst [vmem:[#allocation8_spill] sm:$0xff] %v9455_v63  ;;  %15437 = vst [vmem:[#allocation32_spill] sm:$0xff] %v9458_v13  ;;  %v6038_v50 = vsel %vm1252_vm1, 1.0, %v15223_v30  ;;  %vm1516_vm5 = vcmp.eq.s32.totalorder %v15441_v20, %v7681_v37  ;;  %vm1517_vm6 = vcmp.eq.s32.totalorder %v15441_v20, %v7684_v38  ;;  %v6039_v16 = vsel %vm1253_vm2, 1.0, %v15223_v30  ;;  %2677 = vperm.xlu1 %7132, %v9161_v23  }
 0x18c   : > { %15439 = vst [vmem:[#allocation30_spill] sm:$0xff] %v9466_v44  ;;  %15440 = vst [vmem:[#allocation52_spill] sm:$0xff] %v9469_v14  ;;  %vm1518_vm7 = vcmp.eq.s32.totalorder %v15441_v20, %v7688_v39  ;;  %vm1499_vm8 = vcmp.eq.s32.totalorder %v15442_v36, %v7672_v34  ;;  %vm1500_vm9 = vcmp.eq.s32.totalorder %v15442_v36, %v7681_v37  ;;  %v6040_v47 = vsel %vm1254_vm3, 1.0, %v15223_v30 }
 0x18d   : > { %v6061_v25 = vsel %vm1515_vm4, 1.0, %v15223_v30  ;;  %vm1501_vm10 = vcmp.eq.s32.totalorder %v15442_v36, %v7684_v38  ;;  %vm1502_vm11 = vcmp.eq.s32.totalorder %v15442_v36, %v7688_v39  ;;  %3291 = vperm.xlu0 %7176, %v9263_v31   ;;  %v9499_v1 = vadd.f32 %v6037_v60, %v15443_v15  ;;  %v9513_v60 = vpop.permute.xlu1 %1774  ;;  %v15446_v15 = vld [vmem:[#allocation12_spill] sm:$0xff] }
 0x18e   : > { %v9502_v46 = vadd.f32 %v6038_v50, %v15444_v62  ;;  %v6062_v42 = vsel %vm1516_vm5, 1.0, %v15223_v30  ;;  %v6063_v20 = vsel %vm1517_vm6, 1.0, %v15223_v30  ;;  %v9507_v14 = vadd.f32 %v6039_v16, %v15445_v40 }
 0x18f   : > { %v6064_v44 = vsel %vm1518_vm7, 1.0, %v15223_v30  ;;  %v6045_v13 = vsel %vm1499_vm8, 1.0, %v15223_v30  ;;  %v6046_v36 = vsel %vm1500_vm9, 1.0, %v15223_v30  ;;  %v9516_v50 = vadd.f32 %v6040_v47, %v15446_v15  ;;  %2683 = vperm.xlu1 %7132, %v9263_v31  }
 0x190   : > { %v9519_v62 = vadd.f32 %v6061_v25, %v9210_v26  ;;  %v6047_v63 = vsel %vm1501_vm10, 1.0, %v15223_v30  ;;  %v6048_v40 = vsel %vm1502_vm11, 1.0, %v15223_v30  ;;  %v9524_v16 = vadd.f32 %v6062_v42, %v9213_v43 }
 0x191   : > { %v9527_v59 = vadd.f32 %v6063_v20, %v9221_v45  ;;  %vm1523_vm12 = vcmp.eq.s32.totalorder %v9052_v32, %v7672_v34  ;;  %vm1524_vm13 = vcmp.eq.s32.totalorder %v9052_v32, %v7681_v37  ;;  %3300 = vperm.xlu0 %7176, %v15399_v4   ;;  %v9535_v26 = vadd.f32 %v6064_v44, %v9224_v22  ;;  %v9545_v45 = vpop.permute.xlu0 %1783 }
 0x192   : > { %v9538_v47 = vadd.f32 %v6045_v13, %v9015_v2  ;;  %v9541_v43 = vadd.f32 %v6046_v36, %v9018_v21  ;;  %vm1525_vm14 = vcmp.eq.s32.totalorder %v9052_v32, %v7684_v38  ;;  %v9548_v25 = vadd.f32 %v6047_v63, %v9025_v0  ;;  %v15447_v2 = vld [vmem:[#allocation9_spill] sm:$0xff]  ;;  %v9589_v36 = vld [vmem:[%s7530_s29 + $0x38] sm:$0xff] }
 0x193   : > { %v9551_v42 = vadd.f32 %v6048_v40, %v9033_v5  ;;  %vm1526_vm15 = vcmp.eq.s32.totalorder %v9052_v32, %v7688_v39  ;;  %vm1507_vm0 = vcmp.eq.s32.totalorder %v15447_v2, %v7672_v34  ;;  %v6069_v21 = vsel %vm1523_vm12, 1.0, %v15223_v30  ;;  %v15448_v5 = vld [vmem:[#allocation38_spill] sm:$0xff]  ;;  %v9572_v32 = vpop.permute.xlu1 %1780  ;;  %2689 = vperm.xlu1 %7132, %v9589_v36  }
 0x194   : > { %v6070_v22 = vsel %vm1524_vm13, 1.0, %v15223_v30  ;;  %vm1508_vm1 = vcmp.eq.s32.totalorder %v15447_v2, %v7681_v37  ;;  %vm1509_vm2 = vcmp.eq.s32.totalorder %v15447_v2, %v7684_v38  ;;  %v6071_v0 = vsel %vm1525_vm14, 1.0, %v15223_v30  ;;  %15449 = vst [vmem:[#allocation20_spill] sm:$0xff] %v9572_v32 }
 0x195   : > { %vm1510_vm3 = vcmp.eq.s32.totalorder %v15447_v2, %v7688_v39  ;;  %vm1531_vm4 = vcmp.eq.s32.totalorder %v9100_v57, %v7672_v34  ;;  %vm1532_vm5 = vcmp.eq.s32.totalorder %v9100_v57, %v7681_v37  ;;  %3309 = vperm.xlu0 %7176, %v15448_v5   ;;  %v6072_v31 = vsel %vm1526_vm15, 1.0, %v15223_v30 }
 0x196   : > { %v6053_v4 = vsel %vm1507_vm0, 1.0, %v15223_v30  ;;  %vm1533_vm6 = vcmp.eq.s32.totalorder %v9100_v57, %v7684_v38  ;;  %vm1534_vm7 = vcmp.eq.s32.totalorder %v9100_v57, %v7688_v39  ;;  %v9581_v63 = vadd.f32 %v6069_v21, %v9268_v54  ;;  %v9607_v21 = vpop.permute.xlu0 %1789  ;;  %v15452_v57 = vld [vmem:[#allocation44_spill] sm:$0xff] }
 0x197   : > { %v9584_v13 = vadd.f32 %v6070_v22, %v9275_v24  ;;  %v6054_v44 = vsel %vm1508_vm1, 1.0, %v15223_v30  ;;  %v6055_v20 = vsel %vm1509_vm2, 1.0, %v15223_v30  ;;  %v9593_v15 = vadd.f32 %v6071_v0, %v9282_v6 }
 0x198   : > { %v6056_v54 = vsel %vm1510_vm3, 1.0, %v15223_v30  ;;  %v6077_v24 = vsel %vm1531_vm4, 1.0, %v15223_v30  ;;  %v6078_v40 = vsel %vm1532_vm5, 1.0, %v15223_v30  ;;  %v9610_v6 = vadd.f32 %v6072_v31, %v9291_v55 }
 0x199   : > { %15450 = vst [vmem:[#allocation21_spill] sm:$0xff] %v9593_v15  ;;  %v9613_v22 = vadd.f32 %v6053_v4, %v9153_v10  ;;  %v6079_v2 = vsel %vm1533_vm6, 1.0, %v15223_v30  ;;  %v6080_v0 = vsel %vm1534_vm7, 1.0, %v15223_v30  ;;  %v9618_v5 = vadd.f32 %v6054_v44, %v9165_v18  ;;  %v9642_v18 = vpop.permute.xlu1 %1786  ;;  %v15499_v15 = vld [vmem:[#allocation55_spill] sm:$0xff] }
 0x19a   : > { %15451 = vst [vmem:[#allocation26_spill] sm:$0xff] %v9610_v6  ;;  %v9621_v32 = vadd.f32 %v6055_v20, %v9168_v3  ;;  %vm1511_vm8 = vcmp.eq.s32.totalorder %v15452_v57, %v7672_v34  ;;  %vm1512_vm9 = vcmp.eq.s32.totalorder %v15452_v57, %v7681_v37  ;;  %v9628_v55 = vadd.f32 %v6056_v54, %v9171_v7  ;;  %v9639_v3 = vld [vmem:[%s7530_s29 + $0x48] sm:$0xff]  ;;  %v9667_v44 = vpop.permute.xlu0 %1795 }
 0x19b   : > { %v9631_v10 = vadd.f32 %v6077_v24, %v9328_v29  ;;  %v9634_v31 = vadd.f32 %v6078_v40, %v9336_v51  ;;  %vm1513_vm10 = vcmp.eq.s32.totalorder %v15452_v57, %v7684_v38  ;;  %2695 = vperm.xlu1 %7132, %v9639_v3   ;;  %15455 = vst [vmem:[#allocation35_spill] sm:$0xff] %v9642_v18  ;;  %v6057_v51 = vsel %vm1511_vm8, 1.0, %v15223_v30  ;;  %v7267_v24 = vld [vmem:[%s7530_s29 + $0x58] sm:$0xff] }
 0x19c   : > { %v9645_v4 = vadd.f32 %v6079_v2, %v9339_v11  ;;  %v9648_v7 = vadd.f32 %v6080_v0, %v9342_v53  ;;  %vm1514_vm11 = vcmp.eq.s32.totalorder %v15452_v57, %v7688_v39  ;;  %vm1539_vm12 = vcmp.eq.s32.totalorder %v9150_v19, %v7672_v34  ;;  %v15458_v53 = vld [vmem:[#allocation29_spill] sm:$0xff] }
 0x19d   : > { %15453 = vst [vmem:[#allocation56_spill] sm:$0xff] %v9631_v10  ;;  %15454 = vst [vmem:[#allocation22_spill] sm:$0xff] %v9634_v31  ;;  %v6058_v29 = vsel %vm1512_vm9, 1.0, %v15223_v30  ;;  %vm1540_vm13 = vcmp.eq.s32.totalorder %v9150_v19, %v7681_v37  ;;  %vm1541_vm14 = vcmp.eq.s32.totalorder %v9150_v19, %v7684_v38  ;;  %v6059_v11 = vsel %vm1513_vm10, 1.0, %v15223_v30  ;;  %v15480_v31 = vld [vmem:[#allocation11_spill] sm:$0xff] }
 0x19e   : > { %15456 = vst [vmem:[#allocation17_spill] sm:$0xff] %v9645_v4  ;;  %15457 = vst [vmem:[#allocation34_spill] sm:$0xff] %v9648_v7  ;;  %vm1542_vm15 = vcmp.eq.s32.totalorder %v9150_v19, %v7688_v39  ;;  %vm1519_vm0 = vcmp.eq.s32.totalorder %v15458_v53, %v7672_v34  ;;  %vm1520_vm1 = vcmp.eq.s32.totalorder %v15458_v53, %v7681_v37  ;;  %v6060_v20 = vsel %vm1514_vm11, 1.0, %v15223_v30  ;;  %v9690_v7 = vpop.permute.xlu1 %1792 }
 0x19f   : > { %v6085_v54 = vsel %vm1539_vm12, 1.0, %v15223_v30  ;;  %vm1521_vm2 = vcmp.eq.s32.totalorder %v15458_v53, %v7684_v38  ;;  %vm1522_vm3 = vcmp.eq.s32.totalorder %v15458_v53, %v7688_v39  ;;  %2701 = vperm.xlu1 %7132, %v7267_v24   ;;  %v9677_v19 = vadd.f32 %v6057_v51, %v9076_v27  ;;  %15459 = vst [vmem:[#allocation23_spill] sm:$0xff] %v9690_v7 }
 0x1a0   : > { %v9680_v40 = vadd.f32 %v6058_v29, %v9079_v35  ;;  %v6086_v2 = vsel %vm1540_vm13, 1.0, %v15223_v30  ;;  %v6087_v0 = vsel %vm1541_vm14, 1.0, %v15223_v30  ;;  %v9685_v57 = vadd.f32 %v6059_v11, %v9085_v52 }
 0x1a1   : > { %v6088_v18 = vsel %vm1542_vm15, 1.0, %v15223_v30  ;;  %v6065_v53 = vsel %vm1519_vm0, 1.0, %v15223_v30  ;;  %v6066_v24 = vsel %vm1520_vm1, 1.0, %v15223_v30  ;;  %v9693_v27 = vadd.f32 %v6060_v20, %v9088_v12  ;;  %v9711_v12 = vld [vmem:[%s7530_s29 + $0x68] sm:$0xff] }
 0x1a2   : > { %v9696_v35 = vadd.f32 %v6085_v54, %v9371_v41  ;;  %v6067_v51 = vsel %vm1521_vm2, 1.0, %v15223_v30  ;;  %v6068_v29 = vsel %vm1522_vm3, 1.0, %v15223_v30  ;;  %v9701_v52 = vadd.f32 %v6086_v2, %v9374_v49  ;;  %15463 = vst [vmem:[#allocation38_spill] sm:$0xff] %v9711_v12  ;;  %v15464_v41 = vld [vmem:[#allocation57_spill] sm:$0xff]  ;;  %v15466_v54 = vld [vmem:[#allocation27_spill] sm:$0xff]  ;;  %v15467_v2 = vld [vmem:[#allocation50_spill] sm:$0xff] }
 0x1a3   : > { %v9704_v11 = vadd.f32 %v6087_v0, %v9382_v61  ;;  %vm1547_vm4 = vcmp.eq.s32.totalorder %v9218_v8, %v7672_v34  ;;  %vm1548_vm5 = vcmp.eq.s32.totalorder %v9218_v8, %v7681_v37  ;;  %2707 = vperm.xlu1 %7132, %v9711_v12   ;;  %v9715_v20 = vadd.f32 %v6088_v18, %v15464_v41  ;;  %v9723_v0 = vpop.permute.xlu0 %1801  ;;  %v15470_v41 = vld [vmem:[#allocation51_spill] sm:$0xff]  ;;  %v15481_v12 = vld [vmem:[#allocation40_spill] sm:$0xff] }
 0x1a4   : > { %15460 = vst [vmem:[#allocation28_spill] sm:$0xff] %v9696_v35  ;;  %15461 = vst [vmem:[#allocation12_spill] sm:$0xff] %v9701_v52  ;;  %v9718_v49 = vadd.f32 %v6065_v53, %v15466_v54  ;;  %v9721_v61 = vadd.f32 %v6066_v24, %v15467_v2  ;;  %v15469_v35 = vld [vmem:[#allocation43_spill] sm:$0xff]  ;;  %vm1549_vm6 = vcmp.eq.s32.totalorder %v9218_v8, %v7684_v38  ;;  %v15088_v18 = vmov 9  }
 0x1a5   : > { %15462 = vst [vmem:[#allocation9_spill] sm:$0xff] %v9704_v11  ;;  %15465 = vst [vmem:[#allocation44_spill] sm:$0xff] %v9715_v20  ;;  %v15468_v11 = vld [vmem:[#allocation39_spill] sm:$0xff]  ;;  %v9729_v7 = vadd.f32 %v6068_v29, %v15469_v35  ;;  %vm1550_vm7 = vcmp.eq.s32.totalorder %v9218_v8, %v7688_v39  ;;  %7183 = vset.pattern.permute.xlu0 %v15088_v18  ;;  %v6093_v53 = vsel %vm1547_vm4, 1.0, %v15223_v30  ;;  %v6094_v24 = vsel %vm1548_vm5, 1.0, %v15223_v30  ;;  %v9743_v35 = vld [vmem:[%s7530_s29 + $0x10] sm:$0xff]  ;;  %v9755_v29 = vpop.permute.xlu1 %1798 }
 0x1a6   : > { %v9726_v52 = vadd.f32 %v6067_v51, %v15468_v11  ;;  %vm1527_vm8 = vcmp.eq.s32.totalorder %v15470_v41, %v7672_v34  ;;  %vm1528_vm9 = vcmp.eq.s32.totalorder %v15470_v41, %v7681_v37  ;;  %15471 = vst [vmem:[#allocation29_spill] sm:$0xff] %v9743_v35  ;;  %2978 = vperm.xlu0 %7183, %v9743_v35   ;;  %v15472_v51 = vld [vmem:[#allocation45_spill] sm:$0xff]  ;;  %15473 = vst [vmem:[#allocation57_spill] sm:$0xff] %v9755_v29  ;;  %v15479_v20 = vld [vmem:[#allocation36_spill] sm:$0xff] }
 0x1a7   : > { %vm1529_vm10 = vcmp.eq.s32.totalorder %v15470_v41, %v7684_v38  ;;  %vm1530_vm11 = vcmp.eq.s32.totalorder %v15470_v41, %v7688_v39  ;;  %vm1555_vm12 = vcmp.eq.s32.totalorder %v15472_v51, %v7672_v34  ;;  %vm1556_vm13 = vcmp.eq.s32.totalorder %v15472_v51, %v7681_v37  ;;  %7133 = vset.pattern.permute.xlu1 %v15088_v18 }
 0x1a8   : > { %v6095_v11 = vsel %vm1549_vm6, 1.0, %v15223_v30  ;;  %v6096_v54 = vsel %vm1550_vm7, 1.0, %v15223_v30  ;;  %vm1557_vm14 = vcmp.eq.s32.totalorder %v15472_v51, %v7684_v38  ;;  %vm1558_vm15 = vcmp.eq.s32.totalorder %v15472_v51, %v7688_v39  ;;  %2972 = vperm.xlu1 %7133, %v9391_v9  }
 0x1a9   : > { %v9771_v2 = vadd.f32 %v6093_v53, %v9436_v17  ;;  %v9774_v18 = vadd.f32 %v6094_v24, %v9442_v28  ;;  %v6073_v8 = vsel %vm1527_vm8, 1.0, %v15223_v30  ;;  %v6074_v35 = vsel %vm1528_vm9, 1.0, %v15223_v30  ;;  %v9789_v53 = vpop.permute.xlu0 %2063 }
 0x1aa   : > { %v6075_v51 = vsel %vm1529_vm10, 1.0, %v15223_v30  ;;  %v6076_v29 = vsel %vm1530_vm11, 1.0, %v15223_v30  ;;  %v6101_v17 = vsel %vm1555_vm12, 1.0, %v15223_v30  ;;  %v6102_v28 = vsel %vm1556_vm13, 1.0, %v15223_v30  ;;  %2981 = vperm.xlu0 %7183, %v9161_v23   ;;  %15476 = vst [vmem:[#allocation39_spill] sm:$0xff] %v9789_v53 }
 0x1ab   : > { %15474 = vst [vmem:[#allocation27_spill] sm:$0xff] %v9771_v2  ;;  %15475 = vst [vmem:[#allocation50_spill] sm:$0xff] %v9774_v18  ;;  %v9792_v24 = vadd.f32 %v6095_v11, %v9445_v58  ;;  %v9795_v18 = vadd.f32 %v6096_v54, %v9452_v48  ;;  %v6103_v41 = vsel %vm1557_vm14, 1.0, %v15223_v30  ;;  %v6104_v2 = vsel %vm1558_vm15, 1.0, %v15223_v30  ;;  %v9810_v58 = vld [vmem:[%s7530_s29 + $0x8] sm:$0xff]  ;;  %v15482_v48 = vld [vmem:[#allocation58_spill] sm:$0xff] }
 0x1ac   : > { %v9800_v4 = vadd.f32 %v6073_v8, %v15479_v20  ;;  %v9803_v10 = vadd.f32 %v6074_v35, %v15480_v31  ;;  %vm1535_vm0 = vcmp.eq.s32.totalorder %v15481_v12, %v7672_v34  ;;  %vm1536_vm1 = vcmp.eq.s32.totalorder %v15481_v12, %v7681_v37  ;;  %2975 = vperm.xlu1 %7133, %v9810_v58   ;;  %v15483_v54 = vld [vmem:[#allocation59_spill] sm:$0xff]  ;;  %v9825_v35 = vpop.permute.xlu1 %2060 }
 0x1ad   : > { %15477 = vst [vmem:[#allocation43_spill] sm:$0xff] %v9792_v24  ;;  %15478 = vst [vmem:[#allocation51_spill] sm:$0xff] %v9795_v18  ;;  %v9814_v11 = vadd.f32 %v6075_v51, %v15482_v48  ;;  %v9817_v18 = vadd.f32 %v6076_v29, %v15483_v54  ;;  %v9820_v20 = vadd.f32 %v6101_v17, %v9499_v1  ;;  %v9838_v29 = vld [vmem:[%s7530_s29 + $0x30] sm:$0xff]  ;;  %v6081_v1 = vsel %vm1535_vm0, 1.0, %v15223_v30  ;;  %v15492_v17 = vld [vmem:[#allocation60_spill] sm:$0xff] }
 0x1ae   : > { %v9823_v31 = vadd.f32 %v6102_v28, %v9502_v46  ;;  %15486 = vst [vmem:[#allocation11_spill] sm:$0xff] %v9825_v35  ;;  %v9828_v8 = vadd.f32 %v6103_v41, %v9507_v14  ;;  %v9831_v24 = vadd.f32 %v6104_v2, %v9516_v50  ;;  %vm1537_vm2 = vcmp.eq.s32.totalorder %v15481_v12, %v7684_v38  ;;  %v15489_v14 = vld [vmem:[#allocation42_spill] sm:$0xff]  ;;  %v15490_v50 = vld [vmem:[#allocation37_spill] sm:$0xff] }
 0x1af   : > { %15484 = vst [vmem:[#allocation45_spill] sm:$0xff] %v9820_v20  ;;  %vm1538_vm3 = vcmp.eq.s32.totalorder %v15481_v12, %v7688_v39  ;;  %2990 = vperm.xlu0 %7183, %v9838_v29   ;;  %v6082_v46 = vsel %vm1536_vm1, 1.0, %v15223_v30  ;;  %vm1803_vm4 = vcmp.eq.s32.totalorder %v15489_v14, %v7672_v34  ;;  %vm1804_vm5 = vcmp.eq.s32.totalorder %v15489_v14, %v7681_v37  ;;  %v9855_v12 = vpop.permute.xlu0 %2072  ;;  %v15493_v41 = vld [vmem:[#allocation61_spill] sm:$0xff] }
 0x1b0   : > { %15485 = vst [vmem:[#allocation36_spill] sm:$0xff] %v9823_v31  ;;  %15487 = vst [vmem:[#allocation40_spill] sm:$0xff] %v9828_v8  ;;  %vm1805_vm6 = vcmp.eq.s32.totalorder %v15489_v14, %v7684_v38  ;;  %vm1806_vm7 = vcmp.eq.s32.totalorder %v15489_v14, %v7688_v39  ;;  %vm1543_vm8 = vcmp.eq.s32.totalorder %v15490_v50, %v7672_v34  ;;  %v6083_v2 = vsel %vm1537_vm2, 1.0, %v15223_v30 }
 0x1b1   : > { %15488 = vst [vmem:[#allocation58_spill] sm:$0xff] %v9831_v24  ;;  %vm1544_vm9 = vcmp.eq.s32.totalorder %v15490_v50, %v7681_v37  ;;  %15491 = vst [vmem:[#allocation59_spill] sm:$0xff] %v9855_v12  ;;  %v6084_v51 = vsel %vm1538_vm3, 1.0, %v15223_v30  ;;  %vm1545_vm10 = vcmp.eq.s32.totalorder %v15490_v50, %v7684_v38  ;;  %vm1546_vm11 = vcmp.eq.s32.totalorder %v15490_v50, %v7688_v39 }
 0x1b2   : > { %v9864_v28 = vadd.f32 %v6081_v1, %v15492_v17  ;;  %v9867_v48 = vadd.f32 %v6082_v46, %v15493_v41  ;;  %v6109_v54 = vsel %vm1803_vm4, 1.0, %v15223_v30  ;;  %v6110_v14 = vsel %vm1804_vm5, 1.0, %v15223_v30  ;;  %v9876_v1 = vpop.permute.xlu1 %2066  ;;  %v15495_v17 = vld [vmem:[#allocation62_spill] sm:$0xff] }
 0x1b3   : > { %2999 = vperm.xlu0 %7183, %v9639_v3   ;;  %v6111_v35 = vsel %vm1805_vm6, 1.0, %v15223_v30  ;;  %v6112_v24 = vsel %vm1806_vm7, 1.0, %v15223_v30  ;;  %v6089_v8 = vsel %vm1543_vm8, 1.0, %v15223_v30  ;;  %v6090_v50 = vsel %vm1544_vm9, 1.0, %v15223_v30  ;;  %15494 = vst [vmem:[#allocation42_spill] sm:$0xff] %v9876_v1  ;;  %v15496_v41 = vld [vmem:[#allocation10_spill] sm:$0xff] }
 0x1b4   : > { %v9879_v46 = vadd.f32 %v6083_v2, %v15495_v17  ;;  %v9882_v31 = vadd.f32 %v6084_v51, %v15496_v41  ;;  %v6091_v20 = vsel %vm1545_vm10, 1.0, %v15223_v30  ;;  %v6092_v12 = vsel %vm1546_vm11, 1.0, %v15223_v30  ;;  %v15502_v17 = vld [vmem:[#allocation46_spill] sm:$0xff] }
 0x1b5   : > { %v9887_v53 = vadd.f32 %v6109_v54, %v9538_v47  ;;  %v9890_v6 = vadd.f32 %v6110_v14, %v9541_v43  ;;  %vm1815_vm12 = vcmp.eq.s32.totalorder %v15499_v15, %v7672_v34  ;;  %vm1816_vm13 = vcmp.eq.s32.totalorder %v15499_v15, %v7681_v37  ;;  %v15503_v47 = vld [vmem:[#allocation53_spill] sm:$0xff]  ;;  %v9909_v43 = vld [vmem:[%s7530_s29 + $0x60] sm:$0xff]  ;;  %v9912_v14 = vpop.permute.xlu0 %2078  ;;  %v15515_v1 = vld [vmem:[#allocation14_spill] sm:$0xff] }
 0x1b6   : > { %v9897_v2 = vadd.f32 %v6111_v35, %v9548_v25  ;;  %v9900_v51 = vadd.f32 %v6112_v24, %v9551_v42  ;;  %v9903_v41 = vadd.f32 %v6089_v8, %v15502_v17  ;;  %v9906_v54 = vadd.f32 %v6090_v50, %v15503_v47  ;;  %15504 = vst [vmem:[#allocation10_spill] sm:$0xff] %v9909_v43  ;;  %v15506_v25 = vld [vmem:[#allocation31_spill] sm:$0xff]  ;;  %v15507_v8 = vld [vmem:[#allocation49_spill] sm:$0xff] }
 0x1b7   : > { %15497 = vst [vmem:[#allocation37_spill] sm:$0xff] %v9887_v53  ;;  %15498 = vst [vmem:[#allocation60_spill] sm:$0xff] %v9890_v6  ;;  %3008 = vperm.xlu0 %7183, %v9909_v43   ;;  %v15505_v6 = vld [vmem:[#allocation47_spill] sm:$0xff]  ;;  %v9918_v35 = vadd.f32 %v6092_v12, %v15506_v25  ;;  %vm1817_vm14 = vcmp.eq.s32.totalorder %v15499_v15, %v7684_v38  ;;  %vm1818_vm15 = vcmp.eq.s32.totalorder %v15499_v15, %v7688_v39  ;;  %v9938_v15 = vpop.permute.xlu1 %2069 }
 0x1b8   : > { %15500 = vst [vmem:[#allocation61_spill] sm:$0xff] %v9897_v2  ;;  %15501 = vst [vmem:[#allocation62_spill] sm:$0xff] %v9900_v51  ;;  %v9915_v53 = vadd.f32 %v6091_v20, %v15505_v6  ;;  %v6121_v42 = vsel %vm1815_vm12, 1.0, %v15223_v30  ;;  %v6122_v24 = vsel %vm1816_vm13, 1.0, %v15223_v30  ;;  %vm1551_vm0 = vcmp.eq.s32.totalorder %v15507_v8, %v7672_v34 }
 0x1b9   : > { %vm1552_vm1 = vcmp.eq.s32.totalorder %v15507_v8, %v7681_v37  ;;  %vm1553_vm2 = vcmp.eq.s32.totalorder %v15507_v8, %v7684_v38  ;;  %vm1554_vm3 = vcmp.eq.s32.totalorder %v15507_v8, %v7688_v39  ;;  %vm1823_vm4 = vcmp.eq.s32.totalorder %v9430_v33, %v7672_v34  ;;  %15508 = vst [vmem:[#allocation55_spill] sm:$0xff] %v9938_v15  ;;  %v9958_v51 = vpop.permute.xlu0 %2084 }
 0x1ba   : > { %vm1824_vm5 = vcmp.eq.s32.totalorder %v9430_v33, %v7681_v37  ;;  %v6123_v6 = vsel %vm1817_vm14, 1.0, %v15223_v30  ;;  %v6124_v20 = vsel %vm1818_vm15, 1.0, %v15223_v30  ;;  %vm1825_vm6 = vcmp.eq.s32.totalorder %v9430_v33, %v7684_v38 }
 0x1bb   : > { %vm1826_vm7 = vcmp.eq.s32.totalorder %v9430_v33, %v7688_v39  ;;  %v9947_v12 = vadd.f32 %v6121_v42, %v9677_v19  ;;  %v9950_v50 = vadd.f32 %v6122_v24, %v9680_v40  ;;  %v6097_v17 = vsel %vm1551_vm0, 1.0, %v15223_v30  ;;  %v15513_v24 = vld [vmem:[#allocation16_spill] sm:$0xff] }
 0x1bc   : > { %v6098_v47 = vsel %vm1552_vm1, 1.0, %v15223_v30  ;;  %v6099_v25 = vsel %vm1553_vm2, 1.0, %v15223_v30  ;;  %v6100_v8 = vsel %vm1554_vm3, 1.0, %v15223_v30  ;;  %v6129_v15 = vsel %vm1823_vm4, 1.0, %v15223_v30 }
 0x1bd   : > { %15509 = vst [vmem:[#allocation46_spill] sm:$0xff] %v9947_v12  ;;  %15510 = vst [vmem:[#allocation53_spill] sm:$0xff] %v9950_v50  ;;  %v6130_v43 = vsel %vm1824_vm5, 1.0, %v15223_v30  ;;  %v9961_v33 = vadd.f32 %v6123_v6, %v9685_v57  ;;  %v9964_v19 = vadd.f32 %v6124_v20, %v9693_v27  ;;  %v6131_v40 = vsel %vm1825_vm6, 1.0, %v15223_v30  ;;  %v15514_v12 = vld [vmem:[#allocation33_spill] sm:$0xff] }
 0x1be   : > { %v6132_v42 = vsel %vm1826_vm7, 1.0, %v15223_v30  ;;  %v9969_v50 = vadd.f32 %v6097_v17, %v15513_v24  ;;  %v9972_v2 = vadd.f32 %v6098_v47, %v15514_v12  ;;  %vm1559_vm8 = vcmp.eq.s32.totalorder %v15515_v1, %v7672_v34  ;;  %v15516_v57 = vld [vmem:[#allocation41_spill] sm:$0xff]  ;;  %v9990_v12 = vpop.permute.xlu1 %2075 }
 0x1bf   : > { %15511 = vst [vmem:[#allocation47_spill] sm:$0xff] %v9961_v33  ;;  %15512 = vst [vmem:[#allocation31_spill] sm:$0xff] %v9964_v19  ;;  %vm1560_vm9 = vcmp.eq.s32.totalorder %v15515_v1, %v7681_v37  ;;  %v9979_v6 = vadd.f32 %v6099_v25, %v15516_v57  ;;  %v15517_v27 = vld [vmem:[#allocation13_spill] sm:$0xff]  ;;  %v9985_v19 = vadd.f32 %v6129_v15, %v9718_v49  ;;  %v6105_v49 = vsel %vm1559_vm8, 1.0, %v15223_v30 }
 0x1c0   : > { %v9982_v20 = vadd.f32 %v6100_v8, %v15517_v27  ;;  %v9988_v17 = vadd.f32 %v6130_v43, %v9721_v61  ;;  %15520 = vst [vmem:[#allocation33_spill] sm:$0xff] %v9990_v12  ;;  %v9993_v47 = vadd.f32 %v6131_v40, %v9726_v52  ;;  %v9996_v24 = vadd.f32 %v6132_v42, %v9729_v7  ;;  %v15523_v7 = vld [vmem:[#allocation48_spill] sm:$0xff]  ;;  %v10014_v52 = vpop.permute.xlu0 %2090  ;;  %v15525_v25 = vld [vmem:[#allocation25_spill] sm:$0xff]  ;;  %v15529_v12 = vld [vmem:[#allocation15_spill] sm:$0xff] }
 0x1c1   : > { %15518 = vst [vmem:[#allocation49_spill] sm:$0xff] %v9985_v19  ;;  %vm1561_vm10 = vcmp.eq.s32.totalorder %v15515_v1, %v7684_v38  ;;  %vm1562_vm11 = vcmp.eq.s32.totalorder %v15515_v1, %v7688_v39  ;;  %v6106_v15 = vsel %vm1560_vm9, 1.0, %v15223_v30  ;;  %vm1831_vm12 = vcmp.eq.s32.totalorder %v9489_v56, %v7672_v34  ;;  %15524 = vst [vmem:[#allocation13_spill] sm:$0xff] %v10014_v52 }
 0x1c2   : > { %15519 = vst [vmem:[#allocation16_spill] sm:$0xff] %v9988_v17  ;;  %15521 = vst [vmem:[#allocation14_spill] sm:$0xff] %v9993_v47  ;;  %vm1832_vm13 = vcmp.eq.s32.totalorder %v9489_v56, %v7681_v37  ;;  %vm1833_vm14 = vcmp.eq.s32.totalorder %v9489_v56, %v7684_v38  ;;  %vm1834_vm15 = vcmp.eq.s32.totalorder %v9489_v56, %v7688_v39  ;;  %v6107_v61 = vsel %vm1561_vm10, 1.0, %v15223_v30 }
 0x1c3   : > { %15522 = vst [vmem:[#allocation41_spill] sm:$0xff] %v9996_v24  ;;  %vm1807_vm0 = vcmp.eq.s32.totalorder %v15523_v7, %v7672_v34  ;;  %v6108_v1 = vsel %vm1562_vm11, 1.0, %v15223_v30  ;;  %vm1808_vm1 = vcmp.eq.s32.totalorder %v15523_v7, %v7681_v37  ;;  %vm1809_vm2 = vcmp.eq.s32.totalorder %v15523_v7, %v7684_v38  ;;  %v10034_v24 = vpop.permute.xlu1 %2081 }
 0x1c4   : > { %v15100_v43 = vmov 15   ;;  %v10024_v56 = vadd.f32 %v6105_v49, %v15525_v25  ;;  %v6137_v8 = vsel %vm1831_vm12, 1.0, %v15223_v30  ;;  %v6138_v40 = vsel %vm1832_vm13, 1.0, %v15223_v30  ;;  %15526 = vst [vmem:[#allocation48_spill] sm:$0xff] %v10034_v24  ;;  %v15528_v25 = vld [vmem:[#allocation19_spill] sm:$0xff] }
 0x1c5   : > { %7186 = vset.pattern.permute.xlu0 %v15100_v43  ;;  %vm1810_vm3 = vcmp.eq.s32.totalorder %v15523_v7, %v7688_v39  ;;  %v6139_v42 = vsel %vm1833_vm14, 1.0, %v15223_v30  ;;  %v6140_v57 = vsel %vm1834_vm15, 1.0, %v15223_v30  ;;  %v6113_v27 = vsel %vm1807_vm0, 1.0, %v15223_v30  ;;  %v15527_v43 = vld [vmem:[#allocation24_spill] sm:$0xff] }
 0x1c6   : > { %4796 = vperm.xlu0 %7186, %v9391_v9   ;;  %v10037_v49 = vadd.f32 %v6106_v15, %v15527_v43  ;;  %v10040_v47 = vadd.f32 %v6107_v61, %v15528_v25  ;;  %v6114_v17 = vsel %vm1808_vm1, 1.0, %v15223_v30  ;;  %v6115_v7 = vsel %vm1809_vm2, 1.0, %v15223_v30  ;;  %v15533_v25 = vld [vmem:[#allocation8_spill] sm:$0xff] }
 0x1c7   : > { %v15105_v19 = vmov 11   ;;  %v10046_v33 = vadd.f32 %v6108_v1, %v15529_v12  ;;  %v10049_v52 = vadd.f32 %v6137_v8, %v9800_v4  ;;  %v10052_v24 = vadd.f32 %v6138_v40, %v9803_v10  ;;  %v10068_v10 = vpop.permute.xlu0 %2096  ;;  %v15534_v4 = vld [vmem:[#allocation32_spill] sm:$0xff]  ;;  %v15535_v1 = vld [vmem:[#allocation30_spill] sm:$0xff] }
 0x1c8   : > { %7134 = vset.pattern.permute.xlu1 %v15105_v19  ;;  %v6116_v15 = vsel %vm1810_vm3, 1.0, %v15223_v30  ;;  %v10057_v61 = vadd.f32 %v6139_v42, %v9814_v11  ;;  %v10060_v43 = vadd.f32 %v6140_v57, %v9817_v18  ;;  %v10063_v19 = vadd.f32 %v6113_v27, %v15533_v25  ;;  %v15536_v18 = vld [vmem:[#allocation52_spill] sm:$0xff] }
 0x1c9   : > { %15530 = vst [vmem:[#allocation25_spill] sm:$0xff] %v10052_v24  ;;  %3580 = vperm.xlu1 %7134, %v9391_v9   ;;  %vm1839_vm4 = vcmp.eq.s32.totalorder %v9545_v45, %v7672_v34  ;;  %v10071_v12 = vadd.f32 %v6114_v17, %v15534_v4  ;;  %v10074_v8 = vadd.f32 %v6115_v7, %v15535_v1  ;;  %v15538_v40 = vmov 12  }
 0x1ca   : > { %15531 = vst [vmem:[#allocation24_spill] sm:$0xff] %v10057_v61  ;;  %15532 = vst [vmem:[#allocation19_spill] sm:$0xff] %v10060_v43  ;;  %4805 = vperm.xlu0 %7186, %v9161_v23   ;;  %vm1840_vm5 = vcmp.eq.s32.totalorder %v9545_v45, %v7681_v37  ;;  %vm1841_vm6 = vcmp.eq.s32.totalorder %v9545_v45, %v7684_v38  ;;  %v10081_v11 = vadd.f32 %v6116_v15, %v15536_v18  ;;  %v15537_v23 = vld [vmem:[#allocation18_spill] sm:$0xff] }
 0x1cb   : > { %vm1842_vm7 = vcmp.eq.s32.totalorder %v9545_v45, %v7688_v39  ;;  %vm1811_vm8 = vcmp.eq.s32.totalorder %v15537_v23, %v7672_v34  ;;  %vm1812_vm9 = vcmp.eq.s32.totalorder %v15537_v23, %v7681_v37  ;;  %v6145_v17 = vsel %vm1839_vm4, 1.0, %v15223_v30  ;;  %v10097_v45 = vpop.permute.xlu1 %2087 }
 0x1cc   : > { %vm1813_vm10 = vcmp.eq.s32.totalorder %v15537_v23, %v7684_v38  ;;  %vm1814_vm11 = vcmp.eq.s32.totalorder %v15537_v23, %v7688_v39  ;;  %vm1847_vm12 = vcmp.eq.s32.totalorder %v9607_v21, %v7672_v34  ;;  %15539 = vst [vmem:[#allocation15_spill] sm:$0xff] %v10097_v45  ;;  %v6146_v42 = vsel %vm1840_vm5, 1.0, %v15223_v30  ;;  %v10127_v45 = vpop.permute.xlu0 %2102 }
 0x1cd   : > { %7135 = vset.pattern.permute.xlu1 %v15538_v40  ;;  %v6147_v57 = vsel %vm1841_vm6, 1.0, %v15223_v30  ;;  %vm1848_vm13 = vcmp.eq.s32.totalorder %v9607_v21, %v7681_v37  ;;  %vm1849_vm14 = vcmp.eq.s32.totalorder %v9607_v21, %v7684_v38  ;;  %v6148_v27 = vsel %vm1842_vm7, 1.0, %v15223_v30 }
 0x1ce   : > { %3884 = vperm.xlu1 %7135, %v9391_v9   ;;  %4814 = vperm.xlu0 %7186, %v9838_v29   ;;  %v6117_v7 = vsel %vm1811_vm8, 1.0, %v15223_v30  ;;  %v6118_v15 = vsel %vm1812_vm9, 1.0, %v15223_v30  ;;  %vm1850_vm15 = vcmp.eq.s32.totalorder %v9607_v21, %v7688_v39  ;;  %v10113_v25 = vadd.f32 %v6145_v17, %v9864_v28 }
 0x1cf   : > { %v6119_v4 = vsel %vm1813_vm10, 1.0, %v15223_v30  ;;  %v6120_v1 = vsel %vm1814_vm11, 1.0, %v15223_v30  ;;  %v6153_v18 = vsel %vm1847_vm12, 1.0, %v15223_v30  ;;  %v10130_v28 = vadd.f32 %v6146_v42, %v9867_v48 }
 0x1d0   : > { %15540 = vst [vmem:[#allocation8_spill] sm:$0xff] %v10113_v25  ;;  %v10133_v17 = vadd.f32 %v6147_v57, %v9879_v46  ;;  %v6154_v25 = vsel %vm1848_vm13, 1.0, %v15223_v30  ;;  %v6155_v43 = vsel %vm1849_vm14, 1.0, %v15223_v30  ;;  %v10138_v23 = vadd.f32 %v6148_v27, %v9882_v31 }
 0x1d1   : > { %v10141_v61 = vadd.f32 %v6117_v7, %v9613_v22  ;;  %v10144_v21 = vadd.f32 %v6118_v15, %v9618_v5  ;;  %v6156_v24 = vsel %vm1850_vm15, 1.0, %v15223_v30  ;;  %v15541_v48 = vmov 11   ;;  %v15542_v22 = vld [vmem:[#allocation54_spill] sm:$0xff]  ;;  %v10161_v5 = vpop.permute.xlu1 %2093 }
 0x1d2   : > { %7136 = vset.pattern.permute.xlu1 %v15541_v48  ;;  %4823 = vperm.xlu0 %7186, %v9639_v3   ;;  %v10150_v46 = vadd.f32 %v6119_v4, %v9621_v32  ;;  %v10153_v42 = vadd.f32 %v6120_v1, %v9628_v55  ;;  %v10156_v31 = vadd.f32 %v6153_v18, %v9903_v41 }
 0x1d3   : > { %vm1819_vm0 = vcmp.eq.s32.totalorder %v15542_v22, %v7672_v34  ;;  %3583 = vperm.xlu1 %7136, %v9810_v58   ;;  %v10164_v57 = vadd.f32 %v6154_v25, %v9906_v54  ;;  %v10167_v3 = vadd.f32 %v6155_v43, %v9915_v53  ;;  %vm1820_vm1 = vcmp.eq.s32.totalorder %v15542_v22, %v7681_v37  ;;  %v10190_v53 = vpop.permute.xlu0 %2364 }
 0x1d4   : > { %vm1821_vm2 = vcmp.eq.s32.totalorder %v15542_v22, %v7684_v38  ;;  %v10174_v32 = vadd.f32 %v6156_v24, %v9918_v35  ;;  %vm1822_vm3 = vcmp.eq.s32.totalorder %v15542_v22, %v7688_v39  ;;  %vm1855_vm4 = vcmp.eq.s32.totalorder %v9667_v44, %v7672_v34  ;;  %v10200_v24 = vld [vmem:[%s7530_s29 + $0x20] sm:$0xff] }
 0x1d5   : > { %15543 = vst [vmem:[#allocation32_spill] sm:$0xff] %v10167_v3  ;;  %vm1856_vm5 = vcmp.eq.s32.totalorder %v9667_v44, %v7681_v37  ;;  %v6125_v55 = vsel %vm1819_vm0, 1.0, %v15223_v30  ;;  %vm1857_vm6 = vcmp.eq.s32.totalorder %v9667_v44, %v7684_v38  ;;  %vm1858_vm7 = vcmp.eq.s32.totalorder %v9667_v44, %v7688_v39  ;;  %v10233_v18 = vpop.permute.xlu1 %2099 }
 0x1d6   : > { %15544 = vst [vmem:[#allocation30_spill] sm:$0xff] %v10174_v32  ;;  %vm1827_vm8 = vcmp.eq.s32.totalorder %v9513_v60, %v7672_v34  ;;  %7189 = vset.pattern.permute.xlu0 %v15541_v48  ;;  %v6126_v41 = vsel %vm1820_vm1, 1.0, %v15223_v30  ;;  %v6127_v54 = vsel %vm1821_vm2, 1.0, %v15223_v30  ;;  %vm1828_vm9 = vcmp.eq.s32.totalorder %v9513_v60, %v7681_v37 }
 0x1d7   : > { %vm1829_vm10 = vcmp.eq.s32.totalorder %v9513_v60, %v7684_v38  ;;  %v15545_v35 = vmov 13   ;;  %3592 = vperm.xlu0 %7189, %v10200_v24   ;;  %v6128_v43 = vsel %vm1822_vm3, 1.0, %v15223_v30  ;;  %v6161_v27 = vsel %vm1855_vm4, 1.0, %v15223_v30 }
 0x1d8   : > { %7137 = vset.pattern.permute.xlu1 %v15545_v35  ;;  %v6162_v7 = vsel %vm1856_vm5, 1.0, %v15223_v30  ;;  %vm1830_vm11 = vcmp.eq.s32.totalorder %v9513_v60, %v7688_v39  ;;  %v10219_v15 = vadd.f32 %v6125_v55, %v9519_v62  ;;  %v6163_v25 = vsel %vm1857_vm6, 1.0, %v15223_v30 }
 0x1d9   : > { %4188 = vperm.xlu1 %7137, %v9391_v9   ;;  %v6164_v4 = vsel %vm1858_vm7, 1.0, %v15223_v30  ;;  %v6133_v1 = vsel %vm1827_vm8, 1.0, %v15223_v30  ;;  %v10236_v9 = vadd.f32 %v6126_v41, %v9524_v16  ;;  %v10239_v62 = vadd.f32 %v6127_v54, %v9527_v59 }
 0x1da   : > { %v6134_v22 = vsel %vm1828_vm9, 1.0, %v15223_v30  ;;  %v6135_v44 = vsel %vm1829_vm10, 1.0, %v15223_v30  ;;  %v10250_v55 = vadd.f32 %v6128_v43, %v9535_v26  ;;  %v10253_v32 = vadd.f32 %v6161_v27, %v9969_v50  ;;  %v10272_v26 = vpop.permute.xlu0 %2373  ;;  %v15553_v43 = vld [vmem:[#allocation39_spill] sm:$0xff]  ;;  %v10302_v27 = vld [vmem:[%s7530_s29 + $0x50] sm:$0xff] }
 0x1db   : > { %v10256_v16 = vadd.f32 %v6162_v7, %v9972_v2  ;;  %v6136_v59 = vsel %vm1830_vm11, 1.0, %v15223_v30  ;;  %3601 = vperm.xlu0 %7189, %v9589_v36   ;;  %v10261_v41 = vadd.f32 %v6163_v25, %v9979_v6  ;;  %v10264_v54 = vadd.f32 %v6164_v4, %v9982_v20  ;;  %v15550_v36 = vld [vmem:[#allocation21_spill] sm:$0xff] }
 0x1dc   : > { %15546 = vst [vmem:[#allocation52_spill] sm:$0xff] %v10253_v32  ;;  %v10267_v60 = vadd.f32 %v6133_v1, %v9581_v63  ;;  %vm1863_vm12 = vcmp.eq.s32.totalorder %v9723_v0, %v7672_v34  ;;  %v10275_v2 = vadd.f32 %v6134_v22, %v9584_v13  ;;  %v10278_v50 = vadd.f32 %v6135_v44, %v15550_v36  ;;  %v15551_v63 = vld [vmem:[#allocation26_spill] sm:$0xff]  ;;  %v15552_v13 = vld [vmem:[#allocation20_spill] sm:$0xff] }
 0x1dd   : > { %15547 = vst [vmem:[#allocation18_spill] sm:$0xff] %v10256_v16  ;;  %15548 = vst [vmem:[#allocation54_spill] sm:$0xff] %v10261_v41  ;;  %7138 = vset.pattern.permute.xlu1 %v15538_v40  ;;  %vm1864_vm13 = vcmp.eq.s32.totalorder %v9723_v0, %v7681_v37  ;;  %vm1865_vm14 = vcmp.eq.s32.totalorder %v9723_v0, %v7684_v38  ;;  %v10286_v6 = vadd.f32 %v6136_v59, %v15551_v63  ;;  %v15561_v32 = vld [vmem:[#allocation22_spill] sm:$0xff] }
 0x1de   : > { %15549 = vst [vmem:[#allocation63_spill] sm:$0xff] %v10264_v54  ;;  %3887 = vperm.xlu1 %7138, %v9810_v58   ;;  %vm1866_vm15 = vcmp.eq.s32.totalorder %v9723_v0, %v7688_v39  ;;  %vm1835_vm0 = vcmp.eq.s32.totalorder %v15552_v13, %v7672_v34  ;;  %vm1836_vm1 = vcmp.eq.s32.totalorder %v15552_v13, %v7681_v37  ;;  %v6169_v20 = vsel %vm1863_vm12, 1.0, %v15223_v30  ;;  %v10305_v0 = vpop.permute.xlu1 %2105 }
 0x1df   : > { %vm1837_vm2 = vcmp.eq.s32.totalorder %v15552_v13, %v7684_v38  ;;  %vm1838_vm3 = vcmp.eq.s32.totalorder %v15552_v13, %v7688_v39  ;;  %vm2111_vm4 = vcmp.eq.s32.totalorder %v15553_v43, %v7672_v34  ;;  %3610 = vperm.xlu0 %7189, %v10302_v27   ;;  %15554 = vst [vmem:[#allocation21_spill] sm:$0xff] %v10305_v0  ;;  %v6170_v7 = vsel %vm1864_vm13, 1.0, %v15223_v30  ;;  %v10324_v13 = vpop.permute.xlu0 %2379 }
 0x1e0   : > { %v6171_v25 = vsel %vm1865_vm14, 1.0, %v15223_v30  ;;  %vm2112_vm5 = vcmp.eq.s32.totalorder %v15553_v43, %v7681_v37  ;;  %vm2113_vm6 = vcmp.eq.s32.totalorder %v15553_v43, %v7684_v38  ;;  %v6172_v4 = vsel %vm1866_vm15, 1.0, %v15223_v30 }
 0x1e1   : > { %v6141_v1 = vsel %vm1835_vm0, 1.0, %v15223_v30  ;;  %v6142_v22 = vsel %vm1836_vm1, 1.0, %v15223_v30  ;;  %vm2114_vm7 = vcmp.eq.s32.totalorder %v15553_v43, %v7688_v39  ;;  %v10319_v44 = vadd.f32 %v6169_v20, %v10024_v56  ;;  %v15558_v56 = vld [vmem:[#allocation38_spill] sm:$0xff] }
 0x1e2   : > { %v6143_v59 = vsel %vm1837_vm2, 1.0, %v15223_v30  ;;  %v6144_v36 = vsel %vm1838_vm3, 1.0, %v15223_v30  ;;  %v6177_v63 = vsel %vm2111_vm4, 1.0, %v15223_v30  ;;  %v10327_v0 = vadd.f32 %v6170_v7, %v10037_v49  ;;  %v15562_v7 = vld [vmem:[#allocation17_spill] sm:$0xff] }
 0x1e3   : > { %15555 = vst [vmem:[#allocation26_spill] sm:$0xff] %v10319_v44  ;;  %v10330_v54 = vadd.f32 %v6171_v25, %v10040_v47  ;;  %v6178_v41 = vsel %vm2112_vm5, 1.0, %v15223_v30  ;;  %v6179_v43 = vsel %vm2113_vm6, 1.0, %v15223_v30  ;;  %3619 = vperm.xlu0 %7189, %v15558_v56   ;;  %v10336_v20 = vadd.f32 %v6172_v4, %v10046_v33  ;;  %v15560_v44 = vld [vmem:[#allocation56_spill] sm:$0xff]  ;;  %v15563_v25 = vld [vmem:[#allocation34_spill] sm:$0xff]  ;;  %v15565_v33 = vld [vmem:[#allocation35_spill] sm:$0xff]  ;;  %v10356_v4 = vpop.permute.xlu1 %2367 }
 0x1e4   : > { %15556 = vst [vmem:[#allocation20_spill] sm:$0xff] %v10327_v0  ;;  %v10339_v16 = vadd.f32 %v6141_v1, %v15560_v44  ;;  %v10342_v3 = vadd.f32 %v6142_v22, %v15561_v32  ;;  %v6180_v49 = vsel %vm2114_vm7, 1.0, %v15223_v30  ;;  %v10346_v47 = vadd.f32 %v6143_v59, %v15562_v7  ;;  %15566 = vst [vmem:[#allocation22_spill] sm:$0xff] %v10356_v4  ;;  %v15570_v22 = vld [vmem:[#allocation59_spill] sm:$0xff]  ;;  %v15573_v56 = vld [vmem:[#allocation28_spill] sm:$0xff] }
 0x1e5   : > { %15557 = vst [vmem:[#allocation39_spill] sm:$0xff] %v10330_v54  ;;  %15559 = vst [vmem:[#allocation38_spill] sm:$0xff] %v10336_v20  ;;  %v10349_v54 = vadd.f32 %v6144_v36, %v15563_v25  ;;  %v10352_v0 = vadd.f32 %v6177_v63, %v10063_v19  ;;  %vm1843_vm8 = vcmp.eq.s32.totalorder %v15565_v33, %v7672_v34 }
 0x1e6   : > { %v10359_v1 = vadd.f32 %v6178_v41, %v10071_v12  ;;  %v10362_v32 = vadd.f32 %v6179_v43, %v10074_v8  ;;  %vm1844_vm9 = vcmp.eq.s32.totalorder %v15565_v33, %v7681_v37  ;;  %vm1845_vm10 = vcmp.eq.s32.totalorder %v15565_v33, %v7684_v38  ;;  %v10386_v41 = vpop.permute.xlu0 %2385 }
 0x1e7   : > { %15564 = vst [vmem:[#allocation56_spill] sm:$0xff] %v10352_v0  ;;  %v10369_v19 = vadd.f32 %v6180_v49, %v10081_v11  ;;  %vm1846_vm11 = vcmp.eq.s32.totalorder %v15565_v33, %v7688_v39  ;;  %vm2123_vm12 = vcmp.eq.s32.totalorder %v15570_v22, %v7672_v34  ;;  %vm2124_vm13 = vcmp.eq.s32.totalorder %v15570_v22, %v7681_v37  ;;  %v15572_v11 = vld [vmem:[#allocation23_spill] sm:$0xff] }
 0x1e8   : > { %15567 = vst [vmem:[#allocation17_spill] sm:$0xff] %v10359_v1  ;;  %15568 = vst [vmem:[#allocation34_spill] sm:$0xff] %v10362_v32  ;;  %v15571_v12 = vmov 8   ;;  %v6149_v8 = vsel %vm1843_vm8, 1.0, %v15223_v30  ;;  %vm2125_vm14 = vcmp.eq.s32.totalorder %v15570_v22, %v7684_v38  ;;  %vm2126_vm15 = vcmp.eq.s32.totalorder %v15570_v22, %v7688_v39  ;;  %v10405_v22 = vpop.permute.xlu1 %2370  ;;  %v15576_v32 = vld [vmem:[#allocation9_spill] sm:$0xff] }
 0x1e9   : > { %15569 = vst [vmem:[#allocation35_spill] sm:$0xff] %v10369_v19  ;;  %7198 = vset.pattern.permute.xlu0 %v15571_v12  ;;  %vm1851_vm0 = vcmp.eq.s32.totalorder %v15572_v11, %v7672_v34  ;;  %v6150_v44 = vsel %vm1844_vm9, 1.0, %v15223_v30  ;;  %v6151_v59 = vsel %vm1845_vm10, 1.0, %v15223_v30  ;;  %vm1852_vm1 = vcmp.eq.s32.totalorder %v15572_v11, %v7681_v37  ;;  %15574 = vst [vmem:[#allocation59_spill] sm:$0xff] %v10405_v22  ;;  %v15575_v12 = vld [vmem:[#allocation12_spill] sm:$0xff] }
 0x1ea   : > { %2671 = vperm.xlu0 %7198, %v9810_v58   ;;  %vm1853_vm2 = vcmp.eq.s32.totalorder %v15572_v11, %v7684_v38  ;;  %v6152_v36 = vsel %vm1846_vm11, 1.0, %v15223_v30  ;;  %v6189_v63 = vsel %vm2123_vm12, 1.0, %v15223_v30  ;;  %v6190_v43 = vsel %vm2124_vm13, 1.0, %v15223_v30 }
 0x1eb   : > { %vm1854_vm3 = vcmp.eq.s32.totalorder %v15572_v11, %v7688_v39  ;;  %v10400_v49 = vadd.f32 %v6149_v8, %v15573_v56  ;;  %v6191_v7 = vsel %vm2125_vm14, 1.0, %v15223_v30  ;;  %v6192_v25 = vsel %vm2126_vm15, 1.0, %v15223_v30  ;;  %v15577_v8 = vld [vmem:[#allocation44_spill] sm:$0xff] }
 0x1ec   : > { %v6157_v33 = vsel %vm1851_vm0, 1.0, %v15223_v30  ;;  %v10408_v19 = vadd.f32 %v6150_v44, %v15575_v12  ;;  %v10411_v1 = vadd.f32 %v6151_v59, %v15576_v32  ;;  %v6158_v0 = vsel %vm1852_vm1, 1.0, %v15223_v30  ;;  %v15582_v12 = vld [vmem:[#allocation27_spill] sm:$0xff] }
 0x1ed   : > { %v6159_v11 = vsel %vm1853_vm2, 1.0, %v15223_v30  ;;  %v10417_v56 = vadd.f32 %v6152_v36, %v15577_v8  ;;  %v10420_v4 = vadd.f32 %v6189_v63, %v10219_v15  ;;  %v10423_v22 = vadd.f32 %v6190_v43, %v10236_v9  ;;  %v10435_v36 = vpop.permute.xlu0 %2391  ;;  %v15583_v8 = vld [vmem:[#allocation50_spill] sm:$0xff]  ;;  %v15584_v63 = vld [vmem:[#allocation43_spill] sm:$0xff]  ;;  %v15586_v43 = vld [vmem:[#allocation57_spill] sm:$0xff] }
 0x1ee   : > { %2680 = vperm.xlu0 %7198, %v10200_v24   ;;  %v6160_v44 = vsel %vm1854_vm3, 1.0, %v15223_v30  ;;  %v10427_v32 = vadd.f32 %v6191_v7, %v10239_v62  ;;  %v10430_v59 = vadd.f32 %v6192_v25, %v10250_v55  ;;  %v10433_v20 = vadd.f32 %v6157_v33, %v15582_v12  ;;  %v15585_v62 = vld [vmem:[#allocation51_spill] sm:$0xff]  ;;  %v10465_v7 = vpop.permute.xlu1 %2376 }
 0x1ef   : > { %15578 = vst [vmem:[#allocation23_spill] sm:$0xff] %v10420_v4  ;;  %15579 = vst [vmem:[#allocation28_spill] sm:$0xff] %v10423_v22  ;;  %v10438_v15 = vadd.f32 %v6158_v0, %v15583_v8  ;;  %v10441_v4 = vadd.f32 %v6159_v11, %v15584_v63  ;;  %vm2131_vm4 = vcmp.eq.s32.totalorder %v9912_v14, %v7672_v34  ;;  %v15111_v9 = vmov 14   ;;  %v7275_v0 = vld [vmem:[%s7530_s29] sm:$0xff] }
 0x1f0   : > { %15580 = vst [vmem:[#allocation12_spill] sm:$0xff] %v10427_v32  ;;  %15581 = vst [vmem:[#allocation9_spill] sm:$0xff] %v10430_v59  ;;  %vm2132_vm5 = vcmp.eq.s32.totalorder %v9912_v14, %v7681_v37  ;;  %7139 = vset.pattern.permute.xlu1 %v15111_v9  ;;  %v10449_v55 = vadd.f32 %v6160_v44, %v15585_v62  ;;  %vm2133_vm6 = vcmp.eq.s32.totalorder %v9912_v14, %v7684_v38  ;;  %v15591_v9 = vld [vmem:[#allocation29_spill] sm:$0xff] }
 0x1f1   : > { %vm2134_vm7 = vcmp.eq.s32.totalorder %v9912_v14, %v7688_v39  ;;  %4492 = vperm.xlu1 %7139, %v7275_v0   ;;  %vm1859_vm8 = vcmp.eq.s32.totalorder %v15586_v43, %v7672_v34  ;;  %vm1860_vm9 = vcmp.eq.s32.totalorder %v15586_v43, %v7681_v37  ;;  %vm1861_vm10 = vcmp.eq.s32.totalorder %v15586_v43, %v7684_v38  ;;  %v10484_v63 = vpop.permute.xlu0 %2397 }
 0x1f2   : > { %2686 = vperm.xlu0 %7198, %v9838_v29   ;;  %vm1862_vm11 = vcmp.eq.s32.totalorder %v15586_v43, %v7688_v39  ;;  %15587 = vst [vmem:[#allocation44_spill] sm:$0xff] %v10465_v7  ;;  %v6197_v14 = vsel %vm2131_vm4, 1.0, %v15223_v30  ;;  %v6198_v25 = vsel %vm2132_vm5, 1.0, %v15223_v30  ;;  %vm2139_vm12 = vcmp.eq.s32.totalorder %v9958_v51, %v7672_v34  ;;  %15588 = vst [vmem:[#allocation27_spill] sm:$0xff] %v10484_v63  ;;  %v15596_v7 = vld [vmem:[#allocation40_spill] sm:$0xff] }
 0x1f3   : > { %vm2140_vm13 = vcmp.eq.s32.totalorder %v9958_v51, %v7681_v37  ;;  %v6199_v29 = vsel %vm2133_vm6, 1.0, %v15223_v30  ;;  %v6200_v33 = vsel %vm2134_vm7, 1.0, %v15223_v30  ;;  %vm2141_vm14 = vcmp.eq.s32.totalorder %v9958_v51, %v7684_v38 }
 0x1f4   : > { %vm2142_vm15 = vcmp.eq.s32.totalorder %v9958_v51, %v7688_v39  ;;  %v6165_v11 = vsel %vm1859_vm8, 1.0, %v15223_v30  ;;  %v6166_v44 = vsel %vm1860_vm9, 1.0, %v15223_v30  ;;  %v6167_v12 = vsel %vm1861_vm10, 1.0, %v15223_v30 }
 0x1f5   : > { %v6168_v8 = vsel %vm1862_vm11, 1.0, %v15223_v30  ;;  %7140 = vset.pattern.permute.xlu1 %v15541_v48  ;;  %v10487_v62 = vadd.f32 %v6197_v14, %v10267_v60  ;;  %v10490_v0 = vadd.f32 %v6198_v25, %v10275_v2  ;;  %v6205_v51 = vsel %vm2139_vm12, 1.0, %v15223_v30  ;;  %v7276_v14 = vld [vmem:[%s7530_s29 + $0x40] sm:$0xff]  ;;  %v15594_v2 = vld [vmem:[#allocation45_spill] sm:$0xff] }
 0x1f6   : > { %v6206_v43 = vsel %vm2140_vm13, 1.0, %v15223_v30  ;;  %3586 = vperm.xlu1 %7140, %v15591_v9   ;;  %v10496_v59 = vadd.f32 %v6199_v29, %v10278_v50  ;;  %v10499_v32 = vadd.f32 %v6200_v33, %v10286_v6  ;;  %v6207_v22 = vsel %vm2141_vm14, 1.0, %v15223_v30  ;;  %2692 = vperm.xlu0 %7198, %v7276_v14   ;;  %v15597_v50 = vld [vmem:[#allocation58_spill] sm:$0xff]  ;;  %v10516_v6 = vpop.permute.xlu1 %2382 }
 0x1f7   : > { %15589 = vst [vmem:[#allocation50_spill] sm:$0xff] %v10487_v62  ;;  %15590 = vst [vmem:[#allocation43_spill] sm:$0xff] %v10490_v0  ;;  %v6208_v60 = vsel %vm2142_vm15, 1.0, %v15223_v30  ;;  %v10505_v25 = vadd.f32 %v6165_v11, %v15594_v2  ;;  %v15595_v0 = vld [vmem:[#allocation36_spill] sm:$0xff]  ;;  %v10511_v63 = vadd.f32 %v6167_v12, %v15596_v7  ;;  %v10514_v29 = vadd.f32 %v6168_v8, %v15597_v50  ;;  %v15601_v11 = vld [vmem:[#allocation11_spill] sm:$0xff] }
 0x1f8   : > { %15592 = vst [vmem:[#allocation51_spill] sm:$0xff] %v10496_v59  ;;  %15593 = vst [vmem:[#allocation57_spill] sm:$0xff] %v10499_v32  ;;  %v10508_v62 = vadd.f32 %v6166_v44, %v15595_v0  ;;  %v10519_v33 = vadd.f32 %v6205_v51, %v10339_v16  ;;  %v10522_v32 = vadd.f32 %v6206_v43, %v10342_v3  ;;  %v15604_v3 = vld [vmem:[#allocation13_spill] sm:$0xff]  ;;  %v10548_v16 = vpop.permute.xlu0 %2403  ;;  %v15612_v59 = vld [vmem:[#allocation62_spill] sm:$0xff] }
 0x1f9   : > { %15598 = vst [vmem:[#allocation29_spill] sm:$0xff] %v10516_v6  ;;  %vm2107_vm0 = vcmp.eq.s32.totalorder %v15601_v11, %v7672_v34  ;;  %vm2108_vm1 = vcmp.eq.s32.totalorder %v15601_v11, %v7681_v37  ;;  %v10529_v7 = vadd.f32 %v6207_v22, %v10346_v47  ;;  %v10532_v44 = vadd.f32 %v6208_v60, %v10349_v54  ;;  %v15606_v22 = vld [vmem:[#allocation42_spill] sm:$0xff]  ;;  %v15608_v2 = vld [vmem:[#allocation37_spill] sm:$0xff] }
 0x1fa   : > { %15599 = vst [vmem:[#allocation45_spill] sm:$0xff] %v10519_v33  ;;  %15600 = vst [vmem:[#allocation36_spill] sm:$0xff] %v10522_v32  ;;  %vm2109_vm2 = vcmp.eq.s32.totalorder %v15601_v11, %v7684_v38  ;;  %vm2110_vm3 = vcmp.eq.s32.totalorder %v15601_v11, %v7688_v39  ;;  %7141 = vset.pattern.permute.xlu1 %v15545_v35  ;;  %vm2147_vm4 = vcmp.eq.s32.totalorder %v15604_v3, %v7672_v34  ;;  %v10567_v14 = vpop.permute.xlu1 %2388  ;;  %v15609_v11 = vld [vmem:[#allocation60_spill] sm:$0xff]  ;;  %v15611_v32 = vld [vmem:[#allocation61_spill] sm:$0xff] }
 0x1fb   : > { %15602 = vst [vmem:[#allocation40_spill] sm:$0xff] %v10529_v7  ;;  %15603 = vst [vmem:[#allocation58_spill] sm:$0xff] %v10532_v44  ;;  %vm2148_vm5 = vcmp.eq.s32.totalorder %v15604_v3, %v7681_v37  ;;  %vm2149_vm6 = vcmp.eq.s32.totalorder %v15604_v3, %v7684_v38  ;;  %vm2150_vm7 = vcmp.eq.s32.totalorder %v15604_v3, %v7688_v39  ;;  %4191 = vperm.xlu1 %7141, %v9810_v58   ;;  %v15610_v7 = vmov 10  }
 0x1fc   : > { %15605 = vst [vmem:[#allocation11_spill] sm:$0xff] %v10548_v16  ;;  %v6173_v54 = vsel %vm2107_vm0, 1.0, %v15223_v30  ;;  %v6174_v47 = vsel %vm2108_vm1, 1.0, %v15223_v30  ;;  %vm2115_vm8 = vcmp.eq.s32.totalorder %v15606_v22, %v7672_v34  ;;  %vm2116_vm9 = vcmp.eq.s32.totalorder %v15606_v22, %v7681_v37  ;;  %2698 = vperm.xlu0 %7198, %v10302_v27   ;;  %15607 = vst [vmem:[#allocation13_spill] sm:$0xff] %v10567_v14 }
 0x1fd   : > { %v6175_v12 = vsel %vm2109_vm2, 1.0, %v15223_v30  ;;  %v6176_v8 = vsel %vm2110_vm3, 1.0, %v15223_v30  ;;  %vm2117_vm10 = vcmp.eq.s32.totalorder %v15606_v22, %v7684_v38  ;;  %vm2118_vm11 = vcmp.eq.s32.totalorder %v15606_v22, %v7688_v39 }
 0x1fe   : > { %v6213_v0 = vsel %vm2147_vm4, 1.0, %v15223_v30  ;;  %v6214_v51 = vsel %vm2148_vm5, 1.0, %v15223_v30  ;;  %v6215_v43 = vsel %vm2149_vm6, 1.0, %v15223_v30  ;;  %v6216_v60 = vsel %vm2150_vm7, 1.0, %v15223_v30 }
 0x1ff   : > { %v10570_v50 = vadd.f32 %v6173_v54, %v15608_v2  ;;  %v10573_v3 = vadd.f32 %v6174_v47, %v15609_v11  ;;  %v6181_v44 = vsel %vm2115_vm8, 1.0, %v15223_v30  ;;  %v6182_v22 = vsel %vm2116_vm9, 1.0, %v15223_v30  ;;  %7142 = vset.pattern.permute.xlu1 %v15610_v7  ;;  %v10587_v2 = vld [vmem:[%s7530_s29 + $0x18] sm:$0xff]  ;;  %v15613_v47 = vld [vmem:[#allocation10_spill] sm:$0xff] }
 0x200   : > { %v10579_v33 = vadd.f32 %v6175_v12, %v15611_v32  ;;  %v10582_v6 = vadd.f32 %v6176_v8, %v15612_v59  ;;  %v6183_v14 = vsel %vm2117_vm10, 1.0, %v15223_v30  ;;  %v6184_v54 = vsel %vm2118_vm11, 1.0, %v15223_v30  ;;  %3285 = vperm.xlu1 %7142, %v10587_v2   ;;  %2704 = vperm.xlu0 %7198, %v15613_v47   ;;  %v10603_v12 = vpop.permute.xlu0 %2409 }
 0x201   : > { %v10592_v11 = vadd.f32 %v6213_v0, %v10400_v49  ;;  %v10595_v16 = vadd.f32 %v6214_v51, %v10408_v19  ;;  %v10598_v32 = vadd.f32 %v6215_v43, %v10411_v1  ;;  %v10601_v59 = vadd.f32 %v6216_v60, %v10417_v56 }
 0x202   : > { %v10606_v8 = vadd.f32 %v6181_v44, %v10141_v61  ;;  %v10609_v35 = vadd.f32 %v6182_v22, %v10144_v21  ;;  %vm2155_vm12 = vcmp.eq.s32.totalorder %v10068_v10, %v7672_v34  ;;  %vm2156_vm13 = vcmp.eq.s32.totalorder %v10068_v10, %v7681_v37  ;;  %v15618_v61 = vld [vmem:[#allocation55_spill] sm:$0xff]  ;;  %v10634_v21 = vpop.permute.xlu1 %2394  ;;  %v10652_v44 = vld [vmem:[%s7530_s29 + $0x70] sm:$0xff] }
 0x203   : > { %15614 = vst [vmem:[#allocation42_spill] sm:$0xff] %v10592_v11  ;;  %15615 = vst [vmem:[#allocation37_spill] sm:$0xff] %v10595_v16  ;;  %v10616_v1 = vadd.f32 %v6183_v14, %v10150_v46  ;;  %v10619_v19 = vadd.f32 %v6184_v54, %v10153_v42  ;;  %vm2157_vm14 = vcmp.eq.s32.totalorder %v10068_v10, %v7684_v38  ;;  %v6221_v46 = vsel %vm2155_vm12, 1.0, %v15223_v30  ;;  %v15641_v11 = vld [vmem:[#allocation41_spill] sm:$0xff] }
 0x204   : > { %15616 = vst [vmem:[#allocation60_spill] sm:$0xff] %v10598_v32  ;;  %15617 = vst [vmem:[#allocation61_spill] sm:$0xff] %v10601_v59  ;;  %vm2158_vm15 = vcmp.eq.s32.totalorder %v10068_v10, %v7688_v39  ;;  %vm2119_vm0 = vcmp.eq.s32.totalorder %v15618_v61, %v7672_v34  ;;  %vm2120_vm1 = vcmp.eq.s32.totalorder %v15618_v61, %v7681_v37  ;;  %7143 = vset.pattern.permute.xlu1 %v15538_v40  ;;  %v10643_v42 = vpop.permute.xlu0 %3893 }
 0x205   : > { %vm2121_vm2 = vcmp.eq.s32.totalorder %v15618_v61, %v7684_v38  ;;  %vm2122_vm3 = vcmp.eq.s32.totalorder %v15618_v61, %v7688_v39  ;;  %v6222_v10 = vsel %vm2156_vm13, 1.0, %v15223_v30  ;;  %vm2163_vm4 = vcmp.eq.s32.totalorder %v10127_v45, %v7672_v34  ;;  %3890 = vperm.xlu1 %7143, %v15591_v9   ;;  %2710 = vperm.xlu0 %7198, %v10652_v44  }
 0x206   : > { %vm2164_vm5 = vcmp.eq.s32.totalorder %v10127_v45, %v7681_v37  ;;  %v6223_v49 = vsel %vm2157_vm14, 1.0, %v15223_v30  ;;  %v6224_v56 = vsel %vm2158_vm15, 1.0, %v15223_v30  ;;  %vm2165_vm6 = vcmp.eq.s32.totalorder %v10127_v45, %v7684_v38 }
 0x207   : > { %vm2166_vm7 = vcmp.eq.s32.totalorder %v10127_v45, %v7688_v39  ;;  %v6185_v9 = vsel %vm2119_vm0, 1.0, %v15223_v30  ;;  %v6186_v0 = vsel %vm2120_vm1, 1.0, %v15223_v30  ;;  %v6187_v51 = vsel %vm2121_vm2, 1.0, %v15223_v30  ;;  %v15626_v45 = vld [vmem:[#allocation47_spill] sm:$0xff] }
 0x208   : > { %v6188_v43 = vsel %vm2122_vm3, 1.0, %v15223_v30  ;;  %v10672_v60 = vadd.f32 %v6221_v46, %v10433_v20  ;;  %v10675_v14 = vadd.f32 %v6222_v10, %v10438_v15  ;;  %v6229_v22 = vsel %vm2163_vm4, 1.0, %v15223_v30  ;;  %v15624_v10 = vld [vmem:[#allocation46_spill] sm:$0xff] }
 0x209   : > { %v6230_v54 = vsel %vm2164_vm5, 1.0, %v15223_v30  ;;  %v10686_v47 = vadd.f32 %v6223_v49, %v10441_v4  ;;  %v10689_v20 = vadd.f32 %v6224_v56, %v10449_v55  ;;  %v6231_v15 = vsel %vm2165_vm6, 1.0, %v15223_v30  ;;  %v15627_v4 = vld [vmem:[#allocation31_spill] sm:$0xff]  ;;  %v10707_v55 = vpop.permute.xlu1 %2400 }
 0x20a   : > { %15619 = vst [vmem:[#allocation62_spill] sm:$0xff] %v10672_v60  ;;  %15620 = vst [vmem:[#allocation10_spill] sm:$0xff] %v10675_v14  ;;  %v6232_v61 = vsel %vm2166_vm7, 1.0, %v15223_v30  ;;  %v15623_v46 = vmov 9   ;;  %v10695_v14 = vadd.f32 %v6185_v9, %v15624_v10  ;;  %v15625_v60 = vld [vmem:[#allocation53_spill] sm:$0xff]  ;;  %v10701_v32 = vadd.f32 %v6187_v51, %v15626_v45  ;;  %v10723_v51 = vpop.permute.xlu0 %4194 }
 0x20b   : > { %15621 = vst [vmem:[#allocation55_spill] sm:$0xff] %v10686_v47  ;;  %15622 = vst [vmem:[#allocation64_spill] sm:$0xff] %v10689_v20  ;;  %7144 = vset.pattern.permute.xlu1 %v15623_v46  ;;  %v10698_v59 = vadd.f32 %v6186_v0, %v15625_v60  ;;  %v10704_v49 = vadd.f32 %v6188_v43, %v15627_v4  ;;  %v10710_v56 = vadd.f32 %v6229_v22, %v10505_v25  ;;  %v15630_v9 = vld [vmem:[#allocation33_spill] sm:$0xff]  ;;  %v10720_v0 = vld [vmem:[%s7530_s29 + $0x78] sm:$0xff] }
 0x20c   : > { %2984 = vperm.xlu1 %7144, %v10200_v24   ;;  %v10713_v20 = vadd.f32 %v6230_v54, %v10508_v62  ;;  %vm2127_vm8 = vcmp.eq.s32.totalorder %v15630_v9, %v7672_v34  ;;  %vm2128_vm9 = vcmp.eq.s32.totalorder %v15630_v9, %v7681_v37  ;;  %15631 = vst [vmem:[#allocation47_spill] sm:$0xff] %v10720_v0  ;;  %15632 = vst [vmem:[#allocation31_spill] sm:$0xff] %v10723_v51  ;;  %v15637_v4 = vld [vmem:[#allocation49_spill] sm:$0xff]  ;;  %v15640_v51 = vld [vmem:[#allocation14_spill] sm:$0xff] }
 0x20d   : > { %15628 = vst [vmem:[#allocation46_spill] sm:$0xff] %v10710_v56  ;;  %2713 = vperm.xlu0 %7198, %v10720_v0   ;;  %v10726_v43 = vadd.f32 %v6231_v15, %v10511_v63  ;;  %v10729_v25 = vadd.f32 %v6232_v61, %v10514_v29  ;;  %vm2129_vm10 = vcmp.eq.s32.totalorder %v15630_v9, %v7684_v38  ;;  %v6193_v63 = vsel %vm2127_vm8, 1.0, %v15223_v30  ;;  %v15635_v29 = vld [vmem:[#allocation48_spill] sm:$0xff]  ;;  %v10763_v45 = vpop.permute.xlu1 %2406 }
 0x20e   : > { %15629 = vst [vmem:[#allocation53_spill] sm:$0xff] %v10713_v20  ;;  %vm2130_vm11 = vcmp.eq.s32.totalorder %v15630_v9, %v7688_v39  ;;  %vm2411_vm12 = vcmp.eq.s32.totalorder %v10190_v53, %v7672_v34  ;;  %vm2412_vm13 = vcmp.eq.s32.totalorder %v10190_v53, %v7681_v37  ;;  %vm2413_vm14 = vcmp.eq.s32.totalorder %v10190_v53, %v7684_v38  ;;  %v10775_v47 = vpop.permute.xlu0 %4203 }
 0x20f   : > { %15633 = vst [vmem:[#allocation33_spill] sm:$0xff] %v10726_v43  ;;  %15634 = vst [vmem:[#allocation65_spill] sm:$0xff] %v10729_v25  ;;  %vm2414_vm15 = vcmp.eq.s32.totalorder %v10190_v53, %v7688_v39  ;;  %v6194_v62 = vsel %vm2128_vm9, 1.0, %v15223_v30  ;;  %vm2135_vm0 = vcmp.eq.s32.totalorder %v15635_v29, %v7672_v34  ;;  %vm2136_vm1 = vcmp.eq.s32.totalorder %v15635_v29, %v7681_v37  ;;  %v15638_v25 = vld [vmem:[#allocation16_spill] sm:$0xff] }
 0x210   : > { %7145 = vset.pattern.permute.xlu1 %v15541_v48  ;;  %v6195_v60 = vsel %vm2129_vm10, 1.0, %v15223_v30  ;;  %v6196_v22 = vsel %vm2130_vm11, 1.0, %v15223_v30  ;;  %vm2137_vm2 = vcmp.eq.s32.totalorder %v15635_v29, %v7684_v38  ;;  %vm2138_vm3 = vcmp.eq.s32.totalorder %v15635_v29, %v7688_v39  ;;  %15639 = vst [vmem:[#allocation48_spill] sm:$0xff] %v10775_v47  ;;  %v15645_v47 = vld [vmem:[#allocation25_spill] sm:$0xff] }
 0x211   : > { %3589 = vperm.xlu1 %7145, %v10587_v2   ;;  %v15636_v53 = vmov 14   ;;  %v6237_v54 = vsel %vm2411_vm12, 1.0, %v15223_v30  ;;  %v6238_v15 = vsel %vm2412_vm13, 1.0, %v15223_v30  ;;  %v6239_v61 = vsel %vm2413_vm14, 1.0, %v15223_v30 }
 0x212   : > { %7201 = vset.pattern.permute.xlu0 %v15636_v53  ;;  %v6240_v10 = vsel %vm2414_vm15, 1.0, %v15223_v30  ;;  %v2319_v9 = vadd.f32 %v6193_v63, %v15637_v4  ;;  %v2320_v43 = vadd.f32 %v6194_v62, %v15638_v25  ;;  %v6201_v20 = vsel %vm2135_vm0, 1.0, %v15223_v30 }
 0x213   : > { %4495 = vperm.xlu0 %7201, %v9810_v58   ;;  %v6202_v56 = vsel %vm2136_vm1, 1.0, %v15223_v30  ;;  %v2321_v16 = vadd.f32 %v6195_v60, %v15640_v51  ;;  %v2322_v0 = vadd.f32 %v6196_v22, %v15641_v11  ;;  %v6203_v25 = vsel %vm2137_vm2, 1.0, %v15223_v30 }
 0x214   : > { %v6204_v63 = vsel %vm2138_vm3, 1.0, %v15223_v30  ;;  %v10788_v62 = vadd.f32 %v6237_v54, %v10570_v50  ;;  %v10791_v4 = vadd.f32 %v6238_v15, %v10573_v3  ;;  %v10794_v51 = vadd.f32 %v6239_v61, %v10579_v33  ;;  %v15646_v33 = vld [vmem:[#allocation24_spill] sm:$0xff] }
 0x215   : > { %v10797_v11 = vadd.f32 %v6240_v10, %v10582_v6  ;;  %v15644_v60 = vmov 15   ;;  %v10801_v22 = vadd.f32 %v6201_v20, %v10049_v52  ;;  %v10804_v29 = vadd.f32 %v6202_v56, %v15645_v47  ;;  %v15647_v6 = vld [vmem:[#allocation19_spill] sm:$0xff]  ;;  %v10838_v20 = vpop.permute.xlu0 %4212 }
 0x216   : > { %15642 = vst [vmem:[#allocation49_spill] sm:$0xff] %v10794_v51  ;;  %7146 = vset.pattern.permute.xlu1 %v15644_v60  ;;  %vm2423_vm4 = vcmp.eq.s32.totalorder %v10272_v26, %v7672_v34  ;;  %vm2424_vm5 = vcmp.eq.s32.totalorder %v10272_v26, %v7681_v37  ;;  %v10812_v50 = vadd.f32 %v6203_v25, %v15646_v33  ;;  %v15648_v52 = vld [vmem:[#allocation15_spill] sm:$0xff]  ;;  %15649 = vst [vmem:[#allocation14_spill] sm:$0xff] %v10838_v20 }
 0x217   : > { %15643 = vst [vmem:[#allocation16_spill] sm:$0xff] %v10797_v11  ;;  %4799 = vperm.xlu1 %7146, %v9810_v58   ;;  %v10815_v3 = vadd.f32 %v6204_v63, %v15647_v6  ;;  %vm2425_vm6 = vcmp.eq.s32.totalorder %v10272_v26, %v7684_v38  ;;  %vm2426_vm7 = vcmp.eq.s32.totalorder %v10272_v26, %v7688_v39  ;;  %v10830_v58 = vpop.permute.xlu1 %2668  ;;  %v6249_v47 = vsel %vm2423_vm4, 1.0, %v15223_v30  ;;  %v10861_v20 = vld [vmem:[%s7530_s29 + $0x38] sm:$0xff] }
 0x218   : > { %4504 = vperm.xlu0 %7201, %v10200_v24   ;;  %vm2143_vm8 = vcmp.eq.s32.totalorder %v15648_v52, %v7672_v34  ;;  %vm2144_vm9 = vcmp.eq.s32.totalorder %v15648_v52, %v7681_v37  ;;  %vm2145_vm10 = vcmp.eq.s32.totalorder %v15648_v52, %v7684_v38  ;;  %vm2146_vm11 = vcmp.eq.s32.totalorder %v15648_v52, %v7688_v39 }
 0x219   : > { %v6250_v26 = vsel %vm2424_vm5, 1.0, %v15223_v30  ;;  %vm2431_vm12 = vcmp.eq.s32.totalorder %v10324_v13, %v7672_v34  ;;  %vm2432_vm13 = vcmp.eq.s32.totalorder %v10324_v13, %v7681_v37  ;;  %v6251_v56 = vsel %vm2425_vm6, 1.0, %v15223_v30 }
 0x21a   : > { %v6252_v54 = vsel %vm2426_vm7, 1.0, %v15223_v30  ;;  %vm2433_vm14 = vcmp.eq.s32.totalorder %v10324_v13, %v7684_v38  ;;  %vm2434_vm15 = vcmp.eq.s32.totalorder %v10324_v13, %v7688_v39  ;;  %v6209_v15 = vsel %vm2143_vm8, 1.0, %v15223_v30  ;;  %v10912_v13 = vld [vmem:[%s7530_s29 + $0x10] sm:$0xff] }
 0x21b   : > { %7147 = vset.pattern.permute.xlu1 %v15610_v7  ;;  %v6210_v61 = vsel %vm2144_vm9, 1.0, %v15223_v30  ;;  %v6211_v10 = vsel %vm2145_vm10, 1.0, %v15223_v30  ;;  %v6212_v25 = vsel %vm2146_vm11, 1.0, %v15223_v30  ;;  %v10853_v63 = vadd.f32 %v6249_v47, %v10695_v14  ;;  %v15654_v47 = vld [vmem:[#allocation8_spill] sm:$0xff] }
 0x21c   : > { %3288 = vperm.xlu1 %7147, %v10200_v24   ;;  %v10856_v33 = vadd.f32 %v6250_v26, %v10698_v59  ;;  %v6257_v6 = vsel %vm2431_vm12, 1.0, %v15223_v30  ;;  %v6258_v52 = vsel %vm2432_vm13, 1.0, %v15223_v30  ;;  %4513 = vperm.xlu0 %7201, %v10861_v20   ;;  %v10865_v11 = vadd.f32 %v6251_v56, %v10701_v32 }
 0x21d   : > { %15650 = vst [vmem:[#allocation41_spill] sm:$0xff] %v10853_v63  ;;  %v10868_v51 = vadd.f32 %v6252_v54, %v10704_v49  ;;  %v6259_v59 = vsel %vm2433_vm14, 1.0, %v15223_v30  ;;  %v6260_v14 = vsel %vm2434_vm15, 1.0, %v15223_v30  ;;  %v10879_v26 = vadd.f32 %v6209_v15, %v15654_v47  ;;  %v10890_v54 = vpop.permute.xlu1 %2674  ;;  %v10958_v47 = vld [vmem:[%s7530_s29 + $0x60] sm:$0xff] }
 0x21e   : > { %15651 = vst [vmem:[#allocation25_spill] sm:$0xff] %v10856_v33  ;;  %15652 = vst [vmem:[#allocation24_spill] sm:$0xff] %v10865_v11  ;;  %v10882_v32 = vadd.f32 %v6210_v61, %v10130_v28  ;;  %v10885_v49 = vadd.f32 %v6211_v10, %v10133_v17  ;;  %v10888_v56 = vadd.f32 %v6212_v25, %v10138_v23  ;;  %v10901_v28 = vpop.permute.xlu0 %3276  ;;  %v15666_v33 = vld [vmem:[#allocation18_spill] sm:$0xff] }
 0x21f   : > { %15653 = vst [vmem:[#allocation19_spill] sm:$0xff] %v10868_v51  ;;  %v10892_v51 = vadd.f32 %v6257_v6, %v2319_v9  ;;  %v10894_v11 = vadd.f32 %v6258_v52, %v2320_v43  ;;  %vm2151_vm0 = vcmp.eq.s32.totalorder %v10161_v5, %v7672_v34  ;;  %vm2152_vm1 = vcmp.eq.s32.totalorder %v10161_v5, %v7681_v37 }
 0x220   : > { %7150 = vset.pattern.permute.xlu1 %v15636_v53  ;;  %v10903_v17 = vadd.f32 %v6259_v59, %v2321_v16  ;;  %v10905_v23 = vadd.f32 %v6260_v14, %v2322_v0  ;;  %vm2153_vm2 = vcmp.eq.s32.totalorder %v10161_v5, %v7684_v38  ;;  %vm2154_vm3 = vcmp.eq.s32.totalorder %v10161_v5, %v7688_v39  ;;  %v10952_v59 = vld [vmem:[%s7530_s29 + $0x28] sm:$0xff] }
 0x221   : > { %15655 = vst [vmem:[#allocation15_spill] sm:$0xff] %v10892_v51  ;;  %15656 = vst [vmem:[#allocation8_spill] sm:$0xff] %v10894_v11  ;;  %4498 = vperm.xlu1 %7150, %v10912_v13   ;;  %vm2439_vm4 = vcmp.eq.s32.totalorder %v10386_v41, %v7672_v34  ;;  %vm2440_vm5 = vcmp.eq.s32.totalorder %v10386_v41, %v7681_v37  ;;  %vm2441_vm6 = vcmp.eq.s32.totalorder %v10386_v41, %v7684_v38  ;;  %v10941_v61 = vpop.permute.xlu1 %2677 }
 0x222   : > { %15657 = vst [vmem:[#allocation66_spill] sm:$0xff] %v10903_v17  ;;  %15658 = vst [vmem:[#allocation67_spill] sm:$0xff] %v10905_v23  ;;  %vm2442_vm7 = vcmp.eq.s32.totalorder %v10386_v41, %v7688_v39  ;;  %4522 = vperm.xlu0 %7201, %v10302_v27   ;;  %v6217_v5 = vsel %vm2151_vm0, 1.0, %v15223_v30  ;;  %v6218_v16 = vsel %vm2152_vm1, 1.0, %v15223_v30  ;;  %vm2159_vm8 = vcmp.eq.s32.totalorder %v10233_v18, %v7672_v34  ;;  %v10955_v14 = vpop.permute.xlu0 %3279  ;;  %v15659_v23 = vld [vmem:[#allocation32_spill] sm:$0xff] }
 0x223   : > { %vm2160_vm9 = vcmp.eq.s32.totalorder %v10233_v18, %v7681_v37  ;;  %v6219_v0 = vsel %vm2153_vm2, 1.0, %v15223_v30  ;;  %v6220_v43 = vsel %vm2154_vm3, 1.0, %v15223_v30  ;;  %vm2161_vm10 = vcmp.eq.s32.totalorder %v10233_v18, %v7684_v38 }
 0x224   : > { %vm2162_vm11 = vcmp.eq.s32.totalorder %v10233_v18, %v7688_v39  ;;  %v6265_v27 = vsel %vm2439_vm4, 1.0, %v15223_v30  ;;  %v6266_v41 = vsel %vm2440_vm5, 1.0, %v15223_v30  ;;  %v6267_v9 = vsel %vm2441_vm6, 1.0, %v15223_v30  ;;  %v15667_v18 = vld [vmem:[#allocation54_spill] sm:$0xff] }
 0x225   : > { %v6268_v15 = vsel %vm2442_vm7, 1.0, %v15223_v30  ;;  %7151 = vset.pattern.permute.xlu1 %v15623_v46  ;;  %v10944_v10 = vadd.f32 %v6217_v5, %v10156_v31  ;;  %v10947_v25 = vadd.f32 %v6218_v16, %v10164_v57  ;;  %v6225_v6 = vsel %vm2159_vm8, 1.0, %v15223_v30  ;;  %v15660_v5 = vld [vmem:[#allocation30_spill] sm:$0xff] }
 0x226   : > { %v6226_v52 = vsel %vm2160_vm9, 1.0, %v15223_v30  ;;  %2987 = vperm.xlu1 %7151, %v10952_v59   ;;  %4528 = vperm.xlu0 %7201, %v10958_v47   ;;  %v2345_v31 = vadd.f32 %v6219_v0, %v15659_v23  ;;  %v10963_v17 = vadd.f32 %v6220_v43, %v15660_v5  ;;  %v6227_v57 = vsel %vm2161_vm10, 1.0, %v15223_v30  ;;  %v15665_v43 = vld [vmem:[#allocation52_spill] sm:$0xff] }
 0x227   : > { %v6228_v16 = vsel %vm2162_vm11, 1.0, %v15223_v30  ;;  %v10974_v11 = vadd.f32 %v6265_v27, %v10801_v22  ;;  %v10977_v51 = vadd.f32 %v6266_v41, %v10804_v29  ;;  %v10980_v23 = vadd.f32 %v6267_v9, %v10812_v50  ;;  %v15668_v29 = vld [vmem:[#allocation63_spill] sm:$0xff]  ;;  %v11013_v27 = vpop.permute.xlu1 %2683 }
 0x228   : > { %v10983_v0 = vadd.f32 %v6268_v15, %v10815_v3  ;;  %v10986_v5 = vadd.f32 %v6225_v6, %v15665_v43  ;;  %v10989_v63 = vadd.f32 %v6226_v52, %v15666_v33  ;;  %vm2447_vm12 = vcmp.eq.s32.totalorder %v10435_v36, %v7672_v34  ;;  %v15670_v33 = vld [vmem:[#allocation21_spill] sm:$0xff]  ;;  %15671 = vst [vmem:[#allocation52_spill] sm:$0xff] %v11013_v27  ;;  %v15672_v15 = vld [vmem:[#allocation27_spill] sm:$0xff]  ;;  %v11022_v6 = vpop.permute.xlu0 %3282  ;;  %v11025_v52 = vld [vmem:[%s7530_s29 + $0x30] sm:$0xff] }
 0x229   : > { %15661 = vst [vmem:[#allocation32_spill] sm:$0xff] %v10974_v11  ;;  %15662 = vst [vmem:[#allocation30_spill] sm:$0xff] %v10977_v51  ;;  %vm2448_vm13 = vcmp.eq.s32.totalorder %v10435_v36, %v7681_v37  ;;  %v10996_v22 = vadd.f32 %v6227_v57, %v15667_v18  ;;  %v10999_v50 = vadd.f32 %v6228_v16, %v15668_v29  ;;  %v15669_v3 = vmov 13  }
 0x22a   : > { %15663 = vst [vmem:[#allocation68_spill] sm:$0xff] %v10980_v23  ;;  %15664 = vst [vmem:[#allocation69_spill] sm:$0xff] %v10983_v0  ;;  %vm2449_vm14 = vcmp.eq.s32.totalorder %v10435_v36, %v7684_v38  ;;  %vm2450_vm15 = vcmp.eq.s32.totalorder %v10435_v36, %v7688_v39  ;;  %7152 = vset.pattern.permute.xlu1 %v15669_v3  ;;  %vm2167_vm0 = vcmp.eq.s32.totalorder %v15670_v33, %v7672_v34 }
 0x22b   : > { %vm2168_vm1 = vcmp.eq.s32.totalorder %v15670_v33, %v7681_v37  ;;  %vm2169_vm2 = vcmp.eq.s32.totalorder %v15670_v33, %v7684_v38  ;;  %4197 = vperm.xlu1 %7152, %v10587_v2   ;;  %7204 = vset.pattern.permute.xlu0 %v15538_v40  ;;  %v6273_v41 = vsel %vm2447_vm12, 1.0, %v15223_v30  ;;  %v6274_v9 = vsel %vm2448_vm13, 1.0, %v15223_v30 }
 0x22c   : > { %vm2170_vm3 = vcmp.eq.s32.totalorder %v15670_v33, %v7688_v39  ;;  %vm2455_vm4 = vcmp.eq.s32.totalorder %v15672_v15, %v7672_v34  ;;  %3902 = vperm.xlu0 %7204, %v11025_v52   ;;  %v6275_v57 = vsel %vm2449_vm14, 1.0, %v15223_v30  ;;  %v6276_v16 = vsel %vm2450_vm15, 1.0, %v15223_v30 }
 0x22d   : > { %vm2456_vm5 = vcmp.eq.s32.totalorder %v15672_v15, %v7681_v37  ;;  %vm2457_vm6 = vcmp.eq.s32.totalorder %v15672_v15, %v7684_v38  ;;  %v6233_v43 = vsel %vm2167_vm0, 1.0, %v15223_v30  ;;  %v6234_v18 = vsel %vm2168_vm1, 1.0, %v15223_v30 }
 0x22e   : > { %v6235_v36 = vsel %vm2169_vm2, 1.0, %v15223_v30  ;;  %vm2458_vm7 = vcmp.eq.s32.totalorder %v15672_v15, %v7688_v39  ;;  %v11055_v29 = vadd.f32 %v6273_v41, %v10879_v26  ;;  %v11058_v0 = vadd.f32 %v6274_v9, %v10882_v32  ;;  %v15676_v32 = vld [vmem:[#allocation26_spill] sm:$0xff]  ;;  %v15678_v9 = vld [vmem:[#allocation20_spill] sm:$0xff] }
 0x22f   : > { %v6236_v23 = vsel %vm2170_vm3, 1.0, %v15223_v30  ;;  %v6281_v51 = vsel %vm2455_vm4, 1.0, %v15223_v30  ;;  %7153 = vset.pattern.permute.xlu1 %v15644_v60  ;;  %v11064_v11 = vadd.f32 %v6275_v57, %v10885_v49  ;;  %v11067_v33 = vadd.f32 %v6276_v16, %v10888_v56  ;;  %v11082_v57 = vpop.permute.xlu1 %2689  ;;  %v7285_v56 = vld [vmem:[%s7530_s29 + $0x48] sm:$0xff]  ;;  %v15682_v16 = vld [vmem:[#allocation38_spill] sm:$0xff] }
 0x230   : > { %15673 = vst [vmem:[#allocation18_spill] sm:$0xff] %v11055_v29  ;;  %15674 = vst [vmem:[#allocation54_spill] sm:$0xff] %v11058_v0  ;;  %v6282_v15 = vsel %vm2456_vm5, 1.0, %v15223_v30  ;;  %v6283_v26 = vsel %vm2457_vm6, 1.0, %v15223_v30  ;;  %4802 = vperm.xlu1 %7153, %v10912_v13   ;;  %v11073_v41 = vadd.f32 %v6233_v43, %v15676_v32  ;;  %v11076_v0 = vadd.f32 %v6234_v18, %v15678_v9  ;;  %v15680_v29 = vld [vmem:[#allocation39_spill] sm:$0xff]  ;;  %v11095_v18 = vpop.permute.xlu0 %3291 }
 0x231   : > { %15675 = vst [vmem:[#allocation63_spill] sm:$0xff] %v11067_v33  ;;  %v11079_v27 = vadd.f32 %v6235_v36, %v15680_v29  ;;  %v6284_v49 = vsel %vm2458_vm7, 1.0, %v15223_v30  ;;  %3911 = vperm.xlu0 %7204, %v7285_v56   ;;  %v11086_v33 = vadd.f32 %v6236_v23, %v15682_v16  ;;  %v11089_v13 = vadd.f32 %v6281_v51, %v10944_v10  ;;  %v15685_v43 = vld [vmem:[#allocation11_spill] sm:$0xff]  ;;  %v15689_v10 = vld [vmem:[#allocation22_spill] sm:$0xff] }
 0x232   : > { %15677 = vst [vmem:[#allocation21_spill] sm:$0xff] %v11073_v41  ;;  %15679 = vst [vmem:[#allocation27_spill] sm:$0xff] %v11076_v0  ;;  %vm2463_vm8 = vcmp.eq.s32.totalorder %v15685_v43, %v7672_v34  ;;  %vm2464_vm9 = vcmp.eq.s32.totalorder %v15685_v43, %v7681_v37  ;;  %v11098_v36 = vadd.f32 %v6282_v15, %v10947_v25 }
 0x233   : > { %15681 = vst [vmem:[#allocation26_spill] sm:$0xff] %v11079_v27  ;;  %15683 = vst [vmem:[#allocation20_spill] sm:$0xff] %v11086_v33  ;;  %v11100_v29 = vadd.f32 %v6283_v26, %v2345_v31  ;;  %vm2465_vm10 = vcmp.eq.s32.totalorder %v15685_v43, %v7684_v38  ;;  %vm2466_vm11 = vcmp.eq.s32.totalorder %v15685_v43, %v7688_v39  ;;  %v6289_v25 = vsel %vm2463_vm8, 1.0, %v15223_v30  ;;  %v11289_v27 = vld [vmem:[%s7530_s29 + $0x20] sm:$0xff] }
 0x234   : > { %15684 = vst [vmem:[#allocation39_spill] sm:$0xff] %v11089_v13  ;;  %15686 = vst [vmem:[#allocation38_spill] sm:$0xff] %v11098_v36  ;;  %v11107_v51 = vadd.f32 %v6284_v49, %v10963_v17  ;;  %vm2415_vm12 = vcmp.eq.s32.totalorder %v15689_v10, %v7672_v34  ;;  %vm2416_vm13 = vcmp.eq.s32.totalorder %v15689_v10, %v7681_v37  ;;  %7154 = vset.pattern.permute.xlu1 %v15538_v40  ;;  %v15690_v17 = vld [vmem:[#allocation59_spill] sm:$0xff]  ;;  %v11153_v43 = vpop.permute.xlu0 %3300 }
 0x235   : > { %15687 = vst [vmem:[#allocation11_spill] sm:$0xff] %v11100_v29  ;;  %vm2417_vm14 = vcmp.eq.s32.totalorder %v15689_v10, %v7684_v38  ;;  %vm2418_vm15 = vcmp.eq.s32.totalorder %v15689_v10, %v7688_v39  ;;  %v6290_v31 = vsel %vm2464_vm9, 1.0, %v15223_v30  ;;  %vm2419_vm0 = vcmp.eq.s32.totalorder %v15690_v17, %v7672_v34  ;;  %3896 = vperm.xlu1 %7154, %v10200_v24  }
 0x236   : > { %15688 = vst [vmem:[#allocation70_spill] sm:$0xff] %v11107_v51  ;;  %3920 = vperm.xlu0 %7204, %v10958_v47   ;;  %v6291_v23 = vsel %vm2465_vm10, 1.0, %v15223_v30  ;;  %v6292_v15 = vsel %vm2466_vm11, 1.0, %v15223_v30  ;;  %vm2420_vm1 = vcmp.eq.s32.totalorder %v15690_v17, %v7681_v37  ;;  %vm2421_vm2 = vcmp.eq.s32.totalorder %v15690_v17, %v7684_v38  ;;  %v11141_v47 = vpop.permute.xlu1 %2695 }
 0x237   : > { %v11131_v26 = vsel %vm2415_vm12, 1.0, %v15223_v30  ;;  %v11134_v32 = vsel %vm2416_vm13, 1.0, %v15223_v30  ;;  %v11137_v24 = vsel %vm2417_vm14, 1.0, %v15223_v30  ;;  %vm2422_vm3 = vcmp.eq.s32.totalorder %v15690_v17, %v7688_v39 }
 0x238   : > { %15691 = vst [vmem:[#allocation22_spill] sm:$0xff] %v11131_v26  ;;  %15692 = vst [vmem:[#allocation59_spill] sm:$0xff] %v11134_v32  ;;  %v11144_v9 = vsel %vm2418_vm15, 1.0, %v15223_v30  ;;  %v11147_v49 = vadd.f32 %v6289_v25, %v10986_v5  ;;  %v11150_v56 = vadd.f32 %v6290_v31, %v10989_v63  ;;  %v6245_v16 = vsel %vm2419_vm0, 1.0, %v15223_v30  ;;  %v15706_v31 = vld [vmem:[#allocation29_spill] sm:$0xff]  ;;  %v5131_v26 = vld [vmem:[#allocation2 + $0x100] sm:$0xff] }
 0x239   : > { %15693 = vst [vmem:[#allocation71_spill] sm:$0xff] %v11137_v24  ;;  %15694 = vst [vmem:[#allocation72_spill] sm:$0xff] %v11144_v9  ;;  %v11156_v10 = vadd.f32 %v6291_v23, %v10996_v22  ;;  %v11159_v17 = vadd.f32 %v6292_v15, %v10999_v50  ;;  %v6246_v51 = vsel %vm2420_vm1, 1.0, %v15223_v30  ;;  %v6247_v29 = vsel %vm2421_vm2, 1.0, %v15223_v30  ;;  %7155 = vset.pattern.permute.xlu1 %v15636_v53  ;;  %v15699_v22 = vld [vmem:[#allocation44_spill] sm:$0xff]  ;;  %v11218_v23 = vpop.permute.xlu0 %3309  ;;  %v5100_v32 = vld [vmem:[#allocation2 + $0x8] sm:$0xff] }
 0x23a   : > { %15695 = vst [vmem:[#allocation73_spill] sm:$0xff] %v11147_v49  ;;  %15696 = vst [vmem:[#allocation74_spill] sm:$0xff] %v11150_v56  ;;  %v6248_v5 = vsel %vm2422_vm3, 1.0, %v15223_v30  ;;  %vm2471_vm4 = vcmp.eq.s32.totalorder %v10603_v12, %v7672_v34  ;;  %vm2472_vm5 = vcmp.eq.s32.totalorder %v10603_v12, %v7681_v37  ;;  %vm2473_vm6 = vcmp.eq.s32.totalorder %v10603_v12, %v7684_v38  ;;  %v15773_v9 = vld [vmem:[#allocation32_spill] sm:$0xff] }
 0x23b   : > { %15697 = vst [vmem:[#allocation75_spill] sm:$0xff] %v11156_v10  ;;  %15698 = vst [vmem:[#allocation76_spill] sm:$0xff] %v11159_v17  ;;  %4501 = vperm.xlu1 %7155, %v10587_v2   ;;  %3926 = vperm.xlu0 %7204, %v10652_v44   ;;  %v11174_v63 = vadd.f32 %v6245_v16, %v10606_v8  ;;  %vm2474_vm7 = vcmp.eq.s32.totalorder %v10603_v12, %v7688_v39  ;;  %v11196_v12 = vsel %vm2471_vm4, 1.0, %v15223_v30  ;;  %v15710_v17 = vld [vmem:[#allocation13_spill] sm:$0xff] }
 0x23c   : > { %vm2427_vm8 = vcmp.eq.s32.totalorder %v15699_v22, %v7672_v34  ;;  %vm2428_vm9 = vcmp.eq.s32.totalorder %v15699_v22, %v7681_v37  ;;  %v11183_v50 = vadd.f32 %v6246_v51, %v10609_v35  ;;  %v11186_v25 = vadd.f32 %v6247_v29, %v10616_v1  ;;  %15700 = vst [vmem:[#allocation44_spill] sm:$0xff] %v11196_v12  ;;  %v11204_v1 = vpop.permute.xlu1 %2701 }
 0x23d   : > { %vm2429_vm10 = vcmp.eq.s32.totalorder %v15699_v22, %v7684_v38  ;;  %vm2430_vm11 = vcmp.eq.s32.totalorder %v15699_v22, %v7688_v39  ;;  %v11193_v2 = vadd.f32 %v6248_v5, %v10619_v19  ;;  %v11199_v8 = vsel %vm2472_vm5, 1.0, %v15223_v30  ;;  %v7286_v5 = vld [vmem:[%s7530_s29 + $0x58] sm:$0xff] }
 0x23e   : > { %15701 = vst [vmem:[#allocation77_spill] sm:$0xff] %v11199_v8  ;;  %v11202_v35 = vsel %vm2473_vm6, 1.0, %v15223_v30  ;;  %v11207_v29 = vsel %vm2474_vm7, 1.0, %v15223_v30  ;;  %v11210_v51 = vsel %vm2427_vm8, 1.0, %v15223_v30  ;;  %v11213_v19 = vsel %vm2428_vm9, 1.0, %v15223_v30  ;;  %v7288_v8 = vld [vmem:[%s7530_s29 + $0x68] sm:$0xff] }
 0x23f   : > { %15702 = vst [vmem:[#allocation78_spill] sm:$0xff] %v11202_v35  ;;  %15703 = vst [vmem:[#allocation79_spill] sm:$0xff] %v11207_v29  ;;  %vm2435_vm12 = vcmp.eq.s32.totalorder %v15706_v31, %v7672_v34  ;;  %7156 = vset.pattern.permute.xlu1 %v15541_v48  ;;  %v11221_v15 = vsel %vm2429_vm10, 1.0, %v15223_v30  ;;  %v11224_v16 = vsel %vm2430_vm11, 1.0, %v15223_v30  ;;  %vm2436_vm13 = vcmp.eq.s32.totalorder %v15706_v31, %v7681_v37  ;;  %v11286_v35 = vpop.permute.xlu0 %2978 }
 0x240   : > { %15704 = vst [vmem:[#allocation80_spill] sm:$0xff] %v11210_v51  ;;  %15705 = vst [vmem:[#allocation81_spill] sm:$0xff] %v11213_v19  ;;  %vm2437_vm14 = vcmp.eq.s32.totalorder %v15706_v31, %v7684_v38  ;;  %3595 = vperm.xlu1 %7156, %v10952_v59   ;;  %7209 = vset.pattern.permute.xlu0 %v15669_v3  ;;  %vm2438_vm15 = vcmp.eq.s32.totalorder %v15706_v31, %v7688_v39  ;;  %v11242_v22 = vsel %vm2435_vm12, 1.0, %v15223_v30  ;;  %v11273_v36 = vpop.permute.xlu1 %2707 }
 0x241   : > { %15707 = vst [vmem:[#allocation29_spill] sm:$0xff] %v11221_v15  ;;  %15708 = vst [vmem:[#allocation82_spill] sm:$0xff] %v11224_v16  ;;  %vm3943_vm0 = vcmp.eq.s32.totalorder %v10643_v42, %v7672_v34  ;;  %vm3944_vm1 = vcmp.eq.s32.totalorder %v10643_v42, %v7681_v37  ;;  %vm3945_vm2 = vcmp.eq.s32.totalorder %v10643_v42, %v7684_v38  ;;  %4221 = vperm.xlu0 %7209, %v7286_v5   ;;  %v15743_v16 = vld [vmem:[#allocation16_spill] sm:$0xff] }
 0x242   : > { %15709 = vst [vmem:[#allocation83_spill] sm:$0xff] %v11242_v22  ;;  %vm3946_vm3 = vcmp.eq.s32.totalorder %v10643_v42, %v7688_v39  ;;  %vm2443_vm4 = vcmp.eq.s32.totalorder %v15710_v17, %v7672_v34  ;;  %vm2444_vm5 = vcmp.eq.s32.totalorder %v15710_v17, %v7681_v37  ;;  %v11251_v31 = vsel %vm2436_vm13, 1.0, %v15223_v30  ;;  %v15742_v22 = vld [vmem:[#allocation47_spill] sm:$0xff] }
 0x243   : > { %15711 = vst [vmem:[#allocation13_spill] sm:$0xff] %v11251_v31  ;;  %v11254_v56 = vsel %vm2437_vm14, 1.0, %v15223_v30  ;;  %vm2445_vm6 = vcmp.eq.s32.totalorder %v15710_v17, %v7684_v38  ;;  %vm2446_vm7 = vcmp.eq.s32.totalorder %v15710_v17, %v7688_v39  ;;  %v11261_v42 = vsel %vm2438_vm15, 1.0, %v15223_v30 }
 0x244   : > { %15712 = vst [vmem:[#allocation84_spill] sm:$0xff] %v11254_v56  ;;  %15713 = vst [vmem:[#allocation85_spill] sm:$0xff] %v11261_v42  ;;  %v11264_v5 = vsel %vm3943_vm0, 1.0, %v15223_v30  ;;  %v11267_v10 = vsel %vm3944_vm1, 1.0, %v15223_v30  ;;  %v11270_v49 = vsel %vm3945_vm2, 1.0, %v15223_v30  ;;  %7157 = vset.pattern.permute.xlu1 %v15669_v3  ;;  %v11276_v13 = vsel %vm3946_vm3, 1.0, %v15223_v30 }
 0x245   : > { %15714 = vst [vmem:[#allocation86_spill] sm:$0xff] %v11264_v5  ;;  %15715 = vst [vmem:[#allocation87_spill] sm:$0xff] %v11267_v10  ;;  %v11279_v29 = vsel %vm2443_vm4, 1.0, %v15223_v30  ;;  %v11282_v33 = vsel %vm2444_vm5, 1.0, %v15223_v30  ;;  %vm2451_vm8 = vcmp.eq.s32.totalorder %v10634_v21, %v7672_v34  ;;  %4200 = vperm.xlu1 %7157, %v11289_v27   ;;  %4227 = vperm.xlu0 %7209, %v7288_v8   ;;  %v11297_v0 = vsel %vm2445_vm6, 1.0, %v15223_v30  ;;  %v15741_v42 = vld [vmem:[#allocation49_spill] sm:$0xff] }
 0x246   : > { %15716 = vst [vmem:[#allocation88_spill] sm:$0xff] %v11270_v49  ;;  %15717 = vst [vmem:[#allocation89_spill] sm:$0xff] %v11276_v13  ;;  %v11303_v12 = vsel %vm2446_vm7, 1.0, %v15223_v30  ;;  %vm2452_vm9 = vcmp.eq.s32.totalorder %v10634_v21, %v7681_v37  ;;  %vm2453_vm10 = vcmp.eq.s32.totalorder %v10634_v21, %v7684_v38  ;;  %vm2454_vm11 = vcmp.eq.s32.totalorder %v10634_v21, %v7688_v39  ;;  %v11350_v13 = vpop.permute.xlu1 %2972 }
 0x247   : > { %15718 = vst [vmem:[#allocation90_spill] sm:$0xff] %v11279_v29  ;;  %15719 = vst [vmem:[#allocation91_spill] sm:$0xff] %v11282_v33  ;;  %vm2459_vm12 = vcmp.eq.s32.totalorder %v10707_v55, %v7672_v34  ;;  %vm2460_vm13 = vcmp.eq.s32.totalorder %v10707_v55, %v7681_v37  ;;  %vm2461_vm14 = vcmp.eq.s32.totalorder %v10707_v55, %v7684_v38  ;;  %v11318_v17 = vsel %vm2451_vm8, 1.0, %v15223_v30 }
 0x248   : > { %15720 = vst [vmem:[#allocation92_spill] sm:$0xff] %v11297_v0  ;;  %15721 = vst [vmem:[#allocation93_spill] sm:$0xff] %v11303_v12  ;;  %vm2462_vm15 = vcmp.eq.s32.totalorder %v10707_v55, %v7688_v39  ;;  %vm2467_vm0 = vcmp.eq.s32.totalorder %v10763_v45, %v7672_v34  ;;  %vm2468_vm1 = vcmp.eq.s32.totalorder %v10763_v45, %v7681_v37  ;;  %v11327_v21 = vsel %vm2452_vm9, 1.0, %v15223_v30 }
 0x249   : > { %15722 = vst [vmem:[#allocation94_spill] sm:$0xff] %v11318_v17  ;;  %15723 = vst [vmem:[#allocation95_spill] sm:$0xff] %v11327_v21  ;;  %v11330_v8 = vsel %vm2453_vm10, 1.0, %v15223_v30  ;;  %vm2469_vm2 = vcmp.eq.s32.totalorder %v10763_v45, %v7684_v38  ;;  %vm2470_vm3 = vcmp.eq.s32.totalorder %v10763_v45, %v7688_v39  ;;  %7158 = vset.pattern.permute.xlu1 %v15610_v7  ;;  %v11338_v55 = vsel %vm2454_vm11, 1.0, %v15223_v30 }
 0x24a   : > { %15724 = vst [vmem:[#allocation96_spill] sm:$0xff] %v11330_v8  ;;  %15725 = vst [vmem:[#allocation97_spill] sm:$0xff] %v11338_v55  ;;  %v11341_v41 = vsel %vm2459_vm12, 1.0, %v15223_v30  ;;  %v11344_v49 = vsel %vm2460_vm13, 1.0, %v15223_v30  ;;  %v11347_v5 = vsel %vm2461_vm14, 1.0, %v15223_v30  ;;  %3294 = vperm.xlu1 %7158, %v11025_v52   ;;  %4230 = vperm.xlu0 %7209, %v10652_v44   ;;  %v11354_v45 = vsel %vm2462_vm15, 1.0, %v15223_v30 }
 0x24b   : > { %15726 = vst [vmem:[#allocation98_spill] sm:$0xff] %v11341_v41  ;;  %15727 = vst [vmem:[#allocation99_spill] sm:$0xff] %v11344_v49  ;;  %v11357_v10 = vsel %vm2467_vm0, 1.0, %v15223_v30  ;;  %v11360_v41 = vsel %vm2468_vm1, 1.0, %v15223_v30  ;;  %vm3323_vm4 = vcmp.eq.s32.totalorder %v10901_v28, %v7672_v34  ;;  %v11364_v49 = vpop.permute.xlu0 %2981  ;;  %v11370_v55 = vsel %vm2470_vm3, 1.0, %v15223_v30 }
 0x24c   : > { %15728 = vst [vmem:[#allocation100_spill] sm:$0xff] %v11347_v5  ;;  %15729 = vst [vmem:[#allocation101_spill] sm:$0xff] %v11354_v45  ;;  %v11367_v5 = vsel %vm2469_vm2, 1.0, %v15223_v30  ;;  %vm3324_vm5 = vcmp.eq.s32.totalorder %v10901_v28, %v7681_v37  ;;  %vm3325_vm6 = vcmp.eq.s32.totalorder %v10901_v28, %v7684_v38  ;;  %vm3326_vm7 = vcmp.eq.s32.totalorder %v10901_v28, %v7688_v39 }
 0x24d   : > { %15730 = vst [vmem:[#allocation102_spill] sm:$0xff] %v11357_v10  ;;  %15731 = vst [vmem:[#allocation103_spill] sm:$0xff] %v11360_v41  ;;  %vm3327_vm8 = vcmp.eq.s32.totalorder %v10955_v14, %v7672_v34  ;;  %vm3328_vm9 = vcmp.eq.s32.totalorder %v10955_v14, %v7681_v37  ;;  %vm3329_vm10 = vcmp.eq.s32.totalorder %v10955_v14, %v7684_v38  ;;  %v11395_v28 = vsel %vm3324_vm5, 1.0, %v15223_v30 }
 0x24e   : > { %15732 = vst [vmem:[#allocation104_spill] sm:$0xff] %v11367_v5  ;;  %15733 = vst [vmem:[#allocation105_spill] sm:$0xff] %v11370_v55  ;;  %v11385_v55 = vsel %vm3323_vm4, 1.0, %v15223_v30  ;;  %vm2715_vm11 = vcmp.eq.s32.totalorder %v10830_v58, %v7672_v34  ;;  %vm2716_vm12 = vcmp.eq.s32.totalorder %v10830_v58, %v7681_v37  ;;  %vm2717_vm13 = vcmp.eq.s32.totalorder %v10830_v58, %v7684_v38 }
 0x24f   : > { %15734 = vst [vmem:[#allocation106_spill] sm:$0xff] %v11385_v55  ;;  %7159 = vset.pattern.permute.xlu1 %v15538_v40  ;;  %v11398_v5 = vsel %vm3325_vm6, 1.0, %v15223_v30  ;;  %vm3330_vm14 = vcmp.eq.s32.totalorder %v10955_v14, %v7688_v39  ;;  %vm2718_vm15 = vcmp.eq.s32.totalorder %v10830_v58, %v7688_v39  ;;  %7214 = vset.pattern.permute.xlu0 %v15636_v53  ;;  %v11407_v41 = vsel %vm3326_vm7, 1.0, %v15223_v30  ;;  %v11418_v14 = vpop.permute.xlu1 %2975  ;;  %v11435_v0 = vpop.permute.xlu0 %2990 }
 0x250   : > { %15735 = vst [vmem:[#allocation107_spill] sm:$0xff] %v11398_v5  ;;  %3899 = vperm.xlu1 %7159, %v10952_v59   ;;  %15736 = vst [vmem:[#allocation108_spill] sm:$0xff] %v11407_v41  ;;  %v11410_v10 = vsel %vm3327_vm8, 1.0, %v15223_v30  ;;  %v11413_v45 = vsel %vm3328_vm9, 1.0, %v15223_v30  ;;  %v11416_v8 = vsel %vm3329_vm10, 1.0, %v15223_v30  ;;  %4534 = vperm.xlu0 %7214, %v10652_v44   ;;  %v6301_v21 = vsel %vm2715_vm11, 1.0, %v15223_v30 }
 0x251   : > { %15737 = vst [vmem:[#allocation109_spill] sm:$0xff] %v11410_v10  ;;  %15738 = vst [vmem:[#allocation110_spill] sm:$0xff] %v11413_v45  ;;  %v6302_v17 = vsel %vm2716_vm12, 1.0, %v15223_v30  ;;  %v6303_v12 = vsel %vm2717_vm13, 1.0, %v15223_v30  ;;  %vm2723_vm0 = vcmp.eq.s32.totalorder %v10890_v54, %v7672_v34  ;;  %v11438_v44 = vsel %vm3330_vm14, 1.0, %v15223_v30  ;;  %v15776_v5 = vld [vmem:[#allocation30_spill] sm:$0xff] }
 0x252   : > { %15739 = vst [vmem:[#allocation111_spill] sm:$0xff] %v11416_v8  ;;  %15740 = vst [vmem:[#allocation112_spill] sm:$0xff] %v11438_v44  ;;  %v6304_v33 = vsel %vm2718_vm15, 1.0, %v15223_v30  ;;  %vm2724_vm1 = vcmp.eq.s32.totalorder %v10890_v54, %v7681_v37  ;;  %vm2725_vm2 = vcmp.eq.s32.totalorder %v10890_v54, %v7684_v38  ;;  %vm3331_vm3 = vcmp.eq.s32.totalorder %v11022_v6, %v7672_v34  ;;  %v15754_v8 = vld [vmem:[#allocation25_spill] sm:$0xff] }
 0x253   : > { %vm3332_vm4 = vcmp.eq.s32.totalorder %v11022_v6, %v7681_v37  ;;  %vm3333_vm5 = vcmp.eq.s32.totalorder %v11022_v6, %v7684_v38  ;;  %vm2726_vm6 = vcmp.eq.s32.totalorder %v10890_v54, %v7688_v39  ;;  %v11455_v58 = vadd.f32 %v6301_v21, %v10788_v62 }
 0x254   : > { %7160 = vset.pattern.permute.xlu1 %v15623_v46  ;;  %v11458_v29 = vadd.f32 %v6302_v17, %v10791_v4  ;;  %v11461_v56 = vadd.f32 %v6303_v12, %v15741_v42  ;;  %v6309_v31 = vsel %vm2723_vm0, 1.0, %v15223_v30  ;;  %4537 = vperm.xlu0 %7214, %v15742_v22   ;;  %v11467_v15 = vadd.f32 %v6304_v33, %v15743_v16  ;;  %v11483_v33 = vpop.permute.xlu1 %3580  ;;  %v11494_v17 = vpop.permute.xlu0 %2999 }
 0x255   : > { %2993 = vperm.xlu1 %7160, %v10861_v20   ;;  %vm3334_vm7 = vcmp.eq.s32.totalorder %v11022_v6, %v7688_v39  ;;  %v6310_v62 = vsel %vm2724_vm1, 1.0, %v15223_v30  ;;  %v6311_v4 = vsel %vm2725_vm2, 1.0, %v15223_v30  ;;  %v11474_v54 = vsel %vm3331_vm3, 1.0, %v15223_v30 }
 0x256   : > { %15744 = vst [vmem:[#allocation49_spill] sm:$0xff] %v11474_v54  ;;  %v11477_v12 = vsel %vm3332_vm4, 1.0, %v15223_v30  ;;  %v11480_v42 = vsel %vm3333_vm5, 1.0, %v15223_v30  ;;  %v6312_v22 = vsel %vm2726_vm6, 1.0, %v15223_v30  ;;  %v11486_v16 = vadd.f32 %v6309_v31, %v11174_v63 }
 0x257   : > { %15745 = vst [vmem:[#allocation47_spill] sm:$0xff] %v11477_v12  ;;  %15746 = vst [vmem:[#allocation16_spill] sm:$0xff] %v11480_v42  ;;  %vm3343_vm8 = vcmp.eq.s32.totalorder %v11095_v18, %v7672_v34  ;;  %vm3344_vm9 = vcmp.eq.s32.totalorder %v11095_v18, %v7681_v37  ;;  %vm3345_vm10 = vcmp.eq.s32.totalorder %v11095_v18, %v7684_v38  ;;  %v11511_v63 = vsel %vm3334_vm7, 1.0, %v15223_v30 }
 0x258   : > { %v11497_v21 = vadd.f32 %v6310_v62, %v11183_v50  ;;  %v11500_v19 = vadd.f32 %v6311_v4, %v11186_v25  ;;  %vm3346_vm11 = vcmp.eq.s32.totalorder %v11095_v18, %v7688_v39  ;;  %vm2727_vm12 = vcmp.eq.s32.totalorder %v10941_v61, %v7672_v34  ;;  %15747 = vst [vmem:[#allocation113_spill] sm:$0xff] %v11511_v63  ;;  %v15752_v62 = vld [vmem:[#allocation52_spill] sm:$0xff]  ;;  %v11550_v4 = vpop.permute.xlu0 %3008  ;;  %v15756_v63 = vld [vmem:[#allocation19_spill] sm:$0xff] }
 0x259   : > { %7161 = vset.pattern.permute.xlu1 %v15541_v48  ;;  %vm2728_vm13 = vcmp.eq.s32.totalorder %v10941_v61, %v7681_v37  ;;  %vm2729_vm14 = vcmp.eq.s32.totalorder %v10941_v61, %v7684_v38  ;;  %vm2730_vm15 = vcmp.eq.s32.totalorder %v10941_v61, %v7688_v39  ;;  %7217 = vset.pattern.permute.xlu0 %v15644_v60  ;;  %v11528_v6 = vsel %vm3343_vm8, 1.0, %v15223_v30 }
 0x25a   : > { %3598 = vperm.xlu1 %7161, %v11025_v52   ;;  %v11522_v50 = vadd.f32 %v6312_v22, %v11193_v2  ;;  %15748 = vst [vmem:[#allocation114_spill] sm:$0xff] %v11528_v6  ;;  %v11534_v25 = vsel %vm3344_vm9, 1.0, %v15223_v30  ;;  %v11540_v61 = vsel %vm3345_vm10, 1.0, %v15223_v30  ;;  %v11543_v2 = vsel %vm3346_vm11, 1.0, %v15223_v30 }
 0x25b   : > { %15749 = vst [vmem:[#allocation115_spill] sm:$0xff] %v11534_v25  ;;  %15750 = vst [vmem:[#allocation116_spill] sm:$0xff] %v11540_v61  ;;  %v6313_v31 = vsel %vm2727_vm12, 1.0, %v15223_v30  ;;  %vm2735_vm0 = vcmp.eq.s32.totalorder %v15752_v62, %v7672_v34  ;;  %vm2736_vm1 = vcmp.eq.s32.totalorder %v15752_v62, %v7681_v37  ;;  %v6314_v22 = vsel %vm2728_vm13, 1.0, %v15223_v30  ;;  %v15753_v61 = vld [vmem:[#allocation41_spill] sm:$0xff] }
 0x25c   : > { %15751 = vst [vmem:[#allocation117_spill] sm:$0xff] %v11543_v2  ;;  %v6315_v25 = vsel %vm2729_vm14, 1.0, %v15223_v30  ;;  %v6316_v18 = vsel %vm2730_vm15, 1.0, %v15223_v30  ;;  %vm3355_vm2 = vcmp.eq.s32.totalorder %v11153_v43, %v7672_v34  ;;  %v11557_v2 = vpop.permute.xlu1 %3884  ;;  %vm3356_vm3 = vcmp.eq.s32.totalorder %v11153_v43, %v7681_v37 }
 0x25d   : > { %vm3357_vm4 = vcmp.eq.s32.totalorder %v11153_v43, %v7684_v38  ;;  %vm3358_vm5 = vcmp.eq.s32.totalorder %v11153_v43, %v7688_v39  ;;  %vm2737_vm6 = vcmp.eq.s32.totalorder %v15752_v62, %v7684_v38  ;;  %v11569_v6 = vadd.f32 %v6313_v31, %v15753_v61  ;;  %v15755_v43 = vld [vmem:[#allocation24_spill] sm:$0xff] }
 0x25e   : > { %7162 = vset.pattern.permute.xlu1 %v15644_v60  ;;  %vm2738_vm7 = vcmp.eq.s32.totalorder %v15752_v62, %v7688_v39  ;;  %v6321_v51 = vsel %vm2735_vm0, 1.0, %v15223_v30  ;;  %v6322_v44 = vsel %vm2736_vm1, 1.0, %v15223_v30  ;;  %v11577_v45 = vadd.f32 %v6314_v22, %v15754_v8  ;;  %v15761_v22 = vld [vmem:[#allocation15_spill] sm:$0xff] }
 0x25f   : > { %4808 = vperm.xlu1 %7162, %v11289_v27   ;;  %v11580_v10 = vadd.f32 %v6315_v25, %v15755_v43  ;;  %v11583_v42 = vadd.f32 %v6316_v18, %v15756_v63  ;;  %v11586_v61 = vsel %vm3355_vm2, 1.0, %v15223_v30  ;;  %v11589_v31 = vsel %vm3356_vm3, 1.0, %v15223_v30  ;;  %v15763_v63 = vld [vmem:[#allocation8_spill] sm:$0xff] }
 0x260   : > { %15757 = vst [vmem:[#allocation52_spill] sm:$0xff] %v11586_v61  ;;  %15758 = vst [vmem:[#allocation41_spill] sm:$0xff] %v11589_v31  ;;  %v11592_v62 = vsel %vm3357_vm4, 1.0, %v15223_v30  ;;  %v11595_v27 = vsel %vm3358_vm5, 1.0, %v15223_v30  ;;  %v6323_v8 = vsel %vm2737_vm6, 1.0, %v15223_v30  ;;  %v6324_v25 = vsel %vm2738_vm7, 1.0, %v15223_v30  ;;  %v11607_v31 = vpop.permute.xlu0 %4796 }
 0x261   : > { %15759 = vst [vmem:[#allocation25_spill] sm:$0xff] %v11592_v62  ;;  %15760 = vst [vmem:[#allocation24_spill] sm:$0xff] %v11595_v27  ;;  %v11600_v43 = vadd.f32 %v6321_v51, %v15761_v22  ;;  %v11603_v18 = vadd.f32 %v6322_v44, %v15763_v63  ;;  %vm2743_vm8 = vcmp.eq.s32.totalorder %v11082_v57, %v7672_v34  ;;  %v11618_v51 = vpop.permute.xlu1 %3583  ;;  %v15767_v44 = vld [vmem:[#allocation66_spill] sm:$0xff]  ;;  %v15769_v63 = vld [vmem:[#allocation67_spill] sm:$0xff] }
 0x262   : > { %15765 = vst [vmem:[#allocation8_spill] sm:$0xff] %v11607_v31  ;;  %vm2744_vm9 = vcmp.eq.s32.totalorder %v11082_v57, %v7681_v37  ;;  %vm2745_vm10 = vcmp.eq.s32.totalorder %v11082_v57, %v7684_v38  ;;  %vm2746_vm11 = vcmp.eq.s32.totalorder %v11082_v57, %v7688_v39  ;;  %vm3027_vm12 = vcmp.eq.s32.totalorder %v11286_v35, %v7672_v34  ;;  %v5116_v62 = vld [vmem:[#allocation2 + $0x88] sm:$0xff] }
 0x263   : > { %15762 = vst [vmem:[#allocation19_spill] sm:$0xff] %v11600_v43  ;;  %15764 = vst [vmem:[#allocation15_spill] sm:$0xff] %v11603_v18  ;;  %7163 = vset.pattern.permute.xlu1 %v15610_v7  ;;  %v11621_v22 = vadd.f32 %v6323_v8, %v15767_v44  ;;  %vm3028_vm13 = vcmp.eq.s32.totalorder %v11286_v35, %v7681_v37  ;;  %vm3029_vm14 = vcmp.eq.s32.totalorder %v11286_v35, %v7684_v38  ;;  %v5148_v18 = vld [vmem:[#allocation2 + $0x188] sm:$0xff]  ;;  %v5099_v43 = vld [vmem:[#allocation2] sm:$0xff] }
 0x264   : > { %15766 = vst [vmem:[#allocation118_spill] sm:$0xff] %v11618_v51  ;;  %vm3030_vm15 = vcmp.eq.s32.totalorder %v11286_v35, %v7688_v39  ;;  %3297 = vperm.xlu1 %7163, %v10861_v20   ;;  %v11631_v27 = vadd.f32 %v6324_v25, %v15769_v63  ;;  %vm3367_vm0 = vcmp.eq.s32.totalorder %v11218_v23, %v7672_v34  ;;  %v6329_v8 = vsel %vm2743_vm8, 1.0, %v15223_v30  ;;  %v5115_v63 = vld [vmem:[#allocation2 + $0x80] sm:$0xff]  ;;  %v5132_v7 = vld [vmem:[#allocation2 + $0x108] sm:$0xff]  ;;  %v11667_v51 = vpop.permute.xlu0 %4805 }
 0x265   : > { %15768 = vst [vmem:[#allocation66_spill] sm:$0xff] %v11621_v22  ;;  %vm3368_vm1 = vcmp.eq.s32.totalorder %v11218_v23, %v7681_v37  ;;  %v6330_v44 = vsel %vm2744_vm9, 1.0, %v15223_v30  ;;  %v6331_v35 = vsel %vm2745_vm10, 1.0, %v15223_v30  ;;  %v6332_v20 = vsel %vm2746_vm11, 1.0, %v15223_v30  ;;  %v5147_v22 = vld [vmem:[#allocation2 + $0x180] sm:$0xff]  ;;  %15775 = vst [vmem:[#allocation121_spill] sm:$0xff] %v11667_v51 }
 0x266   : > { %15770 = vst [vmem:[#allocation67_spill] sm:$0xff] %v11631_v27  ;;  %v6373_v25 = vsel %vm3027_vm12, 1.0, %v15223_v30  ;;  %vm3369_vm2 = vcmp.eq.s32.totalorder %v11218_v23, %v7684_v38  ;;  %v6374_v61 = vsel %vm3028_vm13, 1.0, %v15223_v30  ;;  %v6375_v27 = vsel %vm3029_vm14, 1.0, %v15223_v30  ;;  %v15780_v31 = vld [vmem:[#allocation69_spill] sm:$0xff] }
 0x267   : > { %v6376_v57 = vsel %vm3030_vm15, 1.0, %v15223_v30  ;;  %vm3370_vm3 = vcmp.eq.s32.totalorder %v11218_v23, %v7688_v39  ;;  %v11656_v12 = vsel %vm3367_vm0, 1.0, %v15223_v30  ;;  %v11662_v54 = vsel %vm3368_vm1, 1.0, %v15223_v30 }
 0x268   : > { %15771 = vst [vmem:[#allocation119_spill] sm:$0xff] %v11656_v12  ;;  %15772 = vst [vmem:[#allocation120_spill] sm:$0xff] %v11662_v54  ;;  %v11665_v24 = vadd.f32 %v6329_v8, %v15773_v9  ;;  %7164 = vset.pattern.permute.xlu1 %v15636_v53  ;;  %v11671_v55 = vadd.f32 %v6330_v44, %v15776_v5  ;;  %v15778_v12 = vld [vmem:[#allocation68_spill] sm:$0xff]  ;;  %v11677_v41 = vadd.f32 %v6332_v20, %v15780_v31  ;;  %v5117_v9 = vld [vmem:[#allocation2 + $0x90] sm:$0xff] }
 0x269   : > { %v11674_v48 = vadd.f32 %v6331_v35, %v15778_v12  ;;  %v11680_v54 = vadd.f32 %v6373_v25, %v11486_v16  ;;  %v5118_v8 = vld [vmem:[#allocation2 + $0x98] sm:$0xff]  ;;  %4507 = vperm.xlu1 %7164, %v10952_v59   ;;  %v11686_v51 = vadd.f32 %v6374_v61, %v11497_v21  ;;  %v11689_v5 = vadd.f32 %v6375_v27, %v11500_v19  ;;  %v5149_v44 = vld [vmem:[#allocation2 + $0x190] sm:$0xff]  ;;  %v5119_v19 = vld [vmem:[#allocation2 + $0xa0] sm:$0xff] }
 0x26a   : > { %15774 = vst [vmem:[#allocation32_spill] sm:$0xff] %v11665_v24  ;;  %15777 = vst [vmem:[#allocation30_spill] sm:$0xff] %v11671_v55  ;;  %v11683_v24 = vpop.permute.xlu1 %4188  ;;  %v11692_v12 = vadd.f32 %v6376_v57, %v11522_v50  ;;  %v6981_v31 = vpack.c.bf16 %v5116_v62, %v5115_v63  ;;  %v5150_v35 = vld [vmem:[#allocation2 + $0x198] sm:$0xff]  ;;  %v5101_v16 = vld [vmem:[#allocation2 + $0x10] sm:$0xff]  ;;  %vm2751_vm4 = vcmp.eq.s32.totalorder %v11141_v47, %v7672_v34  ;;  %v11716_v27 = vsel %vm3370_vm3, 1.0, %v15223_v30 }
 0x26b   : > { %15779 = vst [vmem:[#allocation68_spill] sm:$0xff] %v11674_v48  ;;  %15781 = vst [vmem:[#allocation69_spill] sm:$0xff] %v11677_v41  ;;  %v7013_v20 = vpack.c.bf16 %v5148_v18, %v5147_v22  ;;  %v6983_v25 = vpack.c.bf16 %v5100_v32, %v5099_v43  ;;  %v7015_v41 = vpack.c.bf16 %v5132_v7, %v5131_v26  ;;  %v5102_v48 = vld [vmem:[#allocation2 + $0x18] sm:$0xff]  ;;  %v5133_v55 = vld [vmem:[#allocation2 + $0x110] sm:$0xff]  ;;  %v11708_v7 = vsel %vm3369_vm2, 1.0, %v15223_v30  ;;  %v11720_v22 = vpop.permute.xlu0 %4814 }
 0x26c   : > { %v5134_v21 = vld [vmem:[#allocation2 + $0x118] sm:$0xff]  ;;  %vm2752_vm5 = vcmp.eq.s32.totalorder %v11141_v47, %v7681_v37  ;;  %vm3031_vm6 = vcmp.eq.s32.totalorder %v11364_v49, %v7672_v34  ;;  %vm3032_vm7 = vcmp.eq.s32.totalorder %v11364_v49, %v7681_v37  ;;  %vm3033_vm8 = vcmp.eq.s32.totalorder %v11364_v49, %v7684_v38  ;;  %6982 = vmatprep.subr.bf16.mxu0 %v6981_v31  ;;  %v5120_v50 = vld [vmem:[#allocation2 + $0xa8] sm:$0xff]  ;;  %v5151_v61 = vld [vmem:[#allocation2 + $0x1a0] sm:$0xff] }
 0x26d   : > { %15782 = vst [vmem:[#allocation122_spill] sm:$0xff] %v11708_v7  ;;  %vm3034_vm9 = vcmp.eq.s32.totalorder %v11364_v49, %v7688_v39  ;;  %7014 = vmatprep.subr.bf16.mxu1 %v7013_v20  ;;  %6984 = vmatpush3.bf16.msra.mxu0 %v6983_v25  ;;  %v6985_v26 = vpack.c.bf16 %v5118_v8, %v5117_v9  ;;  %v5152_v62 = vld [vmem:[#allocation2 + $0x1a8] sm:$0xff]  ;;  %15783 = vst [vmem:[#allocation123_spill] sm:$0xff] %v11716_v27  ;;  %v5103_v63 = vld [vmem:[#allocation2 + $0x20] sm:$0xff]  ;;  %v11729_v23 = vsel %vm2751_vm4, 1.0, %v15223_v30 }
 0x26e   : > { %v7017_v32 = vpack.c.bf16 %v5150_v35, %v5149_v44  ;;  %vm2753_vm10 = vcmp.eq.s32.totalorder %v11141_v47, %v7684_v38  ;;  %7016 = vmatpush3.bf16.msra.mxu1 %v7015_v41  ;;  %v6987_v43 = vpack.c.bf16 %v5102_v48, %v5101_v16  ;;  %v7019_v18 = vpack.c.bf16 %v5134_v21, %v5133_v55  ;;  %v5104_v57 = vld [vmem:[#allocation2 + $0x28] sm:$0xff]  ;;  %v5135_v55 = vld [vmem:[#allocation2 + $0x120] sm:$0xff]  ;;  %v11739_v8 = vpop.permute.xlu1 %3887  ;;  %v5121_v20 = vld [vmem:[#allocation2 + $0xb0] sm:$0xff] }
 0x26f   : > { %15784 = vst [vmem:[#allocation124_spill] sm:$0xff] %v11720_v22  ;;  %7165 = vset.pattern.permute.xlu1 %v15623_v46  ;;  %vm2754_vm11 = vcmp.eq.s32.totalorder %v11141_v47, %v7688_v39  ;;  %v6377_v48 = vsel %vm3031_vm6, 1.0, %v15223_v30  ;;  %v6378_v41 = vsel %vm3032_vm7, 1.0, %v15223_v30  ;;  %6986 = vmatprep.subr.bf16.mxu0 %v6985_v26  ;;  %v5136_v9 = vld [vmem:[#allocation2 + $0x128] sm:$0xff]  ;;  %v6379_v31 = vsel %vm3033_vm8, 1.0, %v15223_v30  ;;  %v11750_v25 = vld [vmem:[%s7530_s29 + $0x40] sm:$0xff] }
 0x270   : > { %7018 = vmatprep.subr.bf16.mxu1 %v7017_v32  ;;  %v6380_v44 = vsel %vm3034_vm9, 1.0, %v15223_v30  ;;  %v6989_v35 = vpack.c.bf16 %v5120_v50, %v5119_v19  ;;  %v7021_v16 = vpack.c.bf16 %v5152_v62, %v5151_v61  ;;  %2996 = vperm.xlu1 %7165, %v11750_v25   ;;  %v11757_v21 = vsel %vm2752_vm5, 1.0, %v15223_v30  ;;  %v5122_v19 = vld [vmem:[#allocation2 + $0xb8] sm:$0xff]  ;;  %v5153_v32 = vld [vmem:[#allocation2 + $0x1b0] sm:$0xff] }
 0x271   : > { %v11763_v26 = vsel %vm2753_vm10, 1.0, %v15223_v30  ;;  %vm2759_vm12 = vcmp.eq.s32.totalorder %v11204_v1, %v7672_v34  ;;  %6988 = vmatpush3.bf16.msra.mxu0 %v6987_v43  ;;  %v6991_v49 = vpack.c.bf16 %v5104_v57, %v5103_v63  ;;  %v5154_v50 = vld [vmem:[#allocation2 + $0x1b8] sm:$0xff]  ;;  %v11771_v61 = vsel %vm2754_vm11, 1.0, %v15223_v30  ;;  %v5105_v43 = vld [vmem:[#allocation2 + $0x30] sm:$0xff] }
 0x272   : > { %v11774_v62 = vadd.f32 %v6377_v48, %v11569_v6  ;;  %v11777_v27 = vadd.f32 %v6378_v41, %v11577_v45  ;;  %7020 = vmatpush3.bf16.msra.mxu1 %v7019_v18  ;;  %6990 = vmatprep.subr.bf16.mxu0 %v6989_v35  ;;  %v7023_v7 = vpack.c.bf16 %v5136_v9, %v5135_v55  ;;  %v5106_v63 = vld [vmem:[#allocation2 + $0x38] sm:$0xff]  ;;  %v5137_v47 = vld [vmem:[#allocation2 + $0x130] sm:$0xff]  ;;  %v5123_v48 = vld [vmem:[#allocation2 + $0xc0] sm:$0xff] }
 0x273   : > { %v11780_v57 = vadd.f32 %v6379_v31, %v11580_v10  ;;  %v11783_v22 = vadd.f32 %v6380_v44, %v11583_v42  ;;  %vm2760_vm13 = vcmp.eq.s32.totalorder %v11204_v1, %v7681_v37  ;;  %vm2761_vm14 = vcmp.eq.s32.totalorder %v11204_v1, %v7684_v38  ;;  %7022 = vmatprep.subr.bf16.mxu1 %v7021_v16  ;;  %v5138_v45 = vld [vmem:[#allocation2 + $0x138] sm:$0xff]  ;;  %v11797_v42 = vpop.permute.xlu0 %4823  ;;  %v5124_v41 = vld [vmem:[#allocation2 + $0xc8] sm:$0xff]  ;;  %v5155_v9 = vld [vmem:[#allocation2 + $0x1c0] sm:$0xff]  ;;  %v11806_v44 = vpop.permute.xlu1 %4492 }
 0x274   : > { %vm2762_vm15 = vcmp.eq.s32.totalorder %v11204_v1, %v7688_v39  ;;  %v11795_v10 = vsel %vm2759_vm12, 1.0, %v15223_v30  ;;  %15786 = vst [vmem:[#allocation126_spill] sm:$0xff] %v11797_v42  ;;  %v6993_v6 = vpack.c.bf16 %v5122_v19, %v5121_v20  ;;  %v7025_v18 = vpack.c.bf16 %v5154_v50, %v5153_v32  ;;  %7166 = vset.pattern.permute.xlu1 %v15669_v3  ;;  %v5156_v31 = vld [vmem:[#allocation2 + $0x1c8] sm:$0xff]  ;;  %v5107_v20 = vld [vmem:[#allocation2 + $0x40] sm:$0xff] }
 0x275   : > { %15785 = vst [vmem:[#allocation125_spill] sm:$0xff] %v11795_v10  ;;  %vm3043_vm0 = vcmp.eq.s32.totalorder %v11435_v0, %v7672_v34  ;;  %vm3044_vm1 = vcmp.eq.s32.totalorder %v11435_v0, %v7681_v37  ;;  %vm3045_vm2 = vcmp.eq.s32.totalorder %v11435_v0, %v7684_v38  ;;  %6992 = vmatpush3.bf16.msra.mxu0 %v6991_v49  ;;  %v11812_v35 = vsel %vm2760_vm13, 1.0, %v15223_v30  ;;  %v5108_v49 = vld [vmem:[#allocation2 + $0x48] sm:$0xff]  ;;  %v5139_v50 = vld [vmem:[#allocation2 + $0x140] sm:$0xff]  ;;  %v15798_v10 = vld [vmem:[#allocation54_spill] sm:$0xff] }
 0x276   : > { %v6995_v55 = vpack.c.bf16 %v5106_v63, %v5105_v43  ;;  %15787 = vst [vmem:[#allocation127_spill] sm:$0xff] %v11812_v35  ;;  %vm3046_vm3 = vcmp.eq.s32.totalorder %v11435_v0, %v7688_v39  ;;  %vm2767_vm4 = vcmp.eq.s32.totalorder %v11273_v36, %v7672_v34  ;;  %7024 = vmatpush3.bf16.msra.mxu1 %v7023_v7  ;;  %v11822_v19 = vsel %vm2761_vm14, 1.0, %v15223_v30  ;;  %v5140_v43 = vld [vmem:[#allocation2 + $0x148] sm:$0xff] }
 0x277   : > { %6994 = vmatprep.subr.bf16.mxu0 %v6993_v6  ;;  %v7027_v16 = vpack.c.bf16 %v5138_v45, %v5137_v47  ;;  %15788 = vst [vmem:[#allocation128_spill] sm:$0xff] %v11822_v19  ;;  %v11828_v32 = vsel %vm2762_vm15, 1.0, %v15223_v30  ;;  %vm2768_vm5 = vcmp.eq.s32.totalorder %v11273_v36, %v7681_v37  ;;  %7026 = vmatprep.subr.bf16.mxu1 %v7025_v18  ;;  %v11837_v63 = vsel %vm3043_vm0, 1.0, %v15223_v30  ;;  %v15797_v19 = vld [vmem:[#allocation18_spill] sm:$0xff]  ;;  %v5160_v42 = vld [vmem:[#allocation2 + $0x1e8] sm:$0xff] }
 0x278   : > { %15789 = vst [vmem:[#allocation129_spill] sm:$0xff] %v11828_v32  ;;  %v6997_v7 = vpack.c.bf16 %v5124_v41, %v5123_v48  ;;  %4206 = vperm.xlu1 %7166, %v11025_v52   ;;  %15790 = vst [vmem:[#allocation130_spill] sm:$0xff] %v11837_v63  ;;  %v11843_v1 = vsel %vm3044_vm1, 1.0, %v15223_v30  ;;  %vm2769_vm6 = vcmp.eq.s32.totalorder %v11273_v36, %v7684_v38  ;;  %v11851_v52 = vsel %vm3045_vm2, 1.0, %v15223_v30  ;;  %v5125_v48 = vld [vmem:[#allocation2 + $0xd0] sm:$0xff]  ;;  %v5126_v41 = vld [vmem:[#allocation2 + $0xd8] sm:$0xff]  ;;  %v11879_v32 = vpop.permute.xlu1 %3586 }
 0x279   : > { %15791 = vst [vmem:[#allocation131_spill] sm:$0xff] %v11843_v1  ;;  %v7029_v47 = vpack.c.bf16 %v5156_v31, %v5155_v9  ;;  %15792 = vst [vmem:[#allocation132_spill] sm:$0xff] %v11851_v52  ;;  %v11857_v45 = vsel %vm3046_vm3, 1.0, %v15223_v30  ;;  %v11863_v6 = vsel %vm2767_vm4, 1.0, %v15223_v30  ;;  %6996 = vmatpush3.bf16.msra.mxu0 %v6995_v55  ;;  %v6999_v18 = vpack.c.bf16 %v5108_v49, %v5107_v20  ;;  %v5157_v9 = vld [vmem:[#allocation2 + $0x1d0] sm:$0xff]  ;;  %v11877_v55 = vpop.permute.xlu0 %3592  ;;  %v5158_v20 = vld [vmem:[#allocation2 + $0x1d8] sm:$0xff] }
 0x27a   : > { %15793 = vst [vmem:[#allocation133_spill] sm:$0xff] %v11857_v45  ;;  %15794 = vst [vmem:[#allocation134_spill] sm:$0xff] %v11863_v6  ;;  %vm2770_vm7 = vcmp.eq.s32.totalorder %v11273_v36, %v7688_v39  ;;  %v11871_v0 = vsel %vm2768_vm5, 1.0, %v15223_v30  ;;  %vm3055_vm8 = vcmp.eq.s32.totalorder %v11494_v17, %v7672_v34  ;;  %vm3056_vm9 = vcmp.eq.s32.totalorder %v11494_v17, %v7681_v37  ;;  %v5109_v49 = vld [vmem:[#allocation2 + $0x50] sm:$0xff]  ;;  %v5110_v6 = vld [vmem:[#allocation2 + $0x58] sm:$0xff] }
 0x27b   : > { %15795 = vst [vmem:[#allocation135_spill] sm:$0xff] %v11871_v0  ;;  %7028 = vmatpush3.bf16.msra.mxu1 %v7027_v16  ;;  %6998 = vmatprep.subr.bf16.mxu0 %v6997_v7  ;;  %v7031_v31 = vpack.c.bf16 %v5140_v43, %v5139_v50  ;;  %v11885_v0 = vsel %vm2769_vm6, 1.0, %v15223_v30  ;;  %v2943_v35 = vadd.f32 %v11729_v23, %v15797_v19  ;;  %v5141_v7 = vld [vmem:[#allocation2 + $0x150] sm:$0xff]  ;;  %v5142_v50 = vld [vmem:[#allocation2 + $0x158] sm:$0xff]  ;;  %v5127_v19 = vld [vmem:[#allocation2 + $0xe0] sm:$0xff] }
 0x27c   : > { %15796 = vst [vmem:[#allocation136_spill] sm:$0xff] %v11885_v0  ;;  %v2944_v16 = vadd.f32 %v11757_v21, %v15798_v10  ;;  %vm3057_vm10 = vcmp.eq.s32.totalorder %v11494_v17, %v7684_v38  ;;  %7030 = vmatprep.subr.bf16.mxu1 %v7029_v47  ;;  %7167 = vset.pattern.permute.xlu1 %v15644_v60  ;;  %v5128_v21 = vld [vmem:[#allocation2 + $0xe8] sm:$0xff]  ;;  %v6401_v10 = vsel %vm3055_vm8, 1.0, %v15223_v30  ;;  %v5159_v0 = vld [vmem:[#allocation2 + $0x1e0] sm:$0xff] }
 0x27d   : > { %v2945_v43 = vadd.f32 %v11763_v26, %v11064_v11  ;;  %vm3058_vm11 = vcmp.eq.s32.totalorder %v11494_v17, %v7688_v39  ;;  %vm3020_vm12 = vcmp.eq.s32.totalorder %v11350_v13, %v7681_v37  ;;  %v7001_v23 = vpack.c.bf16 %v5126_v41, %v5125_v48  ;;  %4811 = vperm.xlu1 %7167, %v10952_v59   ;;  %v5111_v41 = vld [vmem:[#allocation2 + $0x60] sm:$0xff]  ;;  %v5144_v52 = vld [vmem:[#allocation2 + $0x168] sm:$0xff]  ;;  %v11935_v1 = vpop.permute.xlu0 %3601 }
 0x27e   : > { %v6402_v11 = vsel %vm3056_vm9, 1.0, %v15223_v30  ;;  %7000 = vmatpush3.bf16.msra.mxu0 %v6999_v18  ;;  %v7033_v26 = vpack.c.bf16 %v5158_v20, %v5157_v9  ;;  %v7003_v47 = vpack.c.bf16 %v5110_v6, %v5109_v49  ;;  %v6403_v59 = vsel %vm3057_vm10, 1.0, %v15223_v30  ;;  %v5112_v18 = vld [vmem:[#allocation2 + $0x68] sm:$0xff]  ;;  %v5143_v9 = vld [vmem:[#allocation2 + $0x160] sm:$0xff]  ;;  %v15799_v6 = vld [vmem:[#allocation63_spill] sm:$0xff] }
 0x27f   : > { %vm3019_vm13 = vcmp.eq.s32.totalorder %v11350_v13, %v7672_v34  ;;  %vm3021_vm14 = vcmp.eq.s32.totalorder %v11350_v13, %v7684_v38  ;;  %7032 = vmatpush3.bf16.msra.mxu1 %v7031_v31  ;;  %7002 = vmatprep.subr.bf16.mxu0 %v7001_v23  ;;  %v7035_v48 = vpack.c.bf16 %v5142_v50, %v5141_v7  ;;  %v6366_v49 = vsel %vm3020_vm12, 1.0, %v15223_v30  ;;  %v5129_v31 = vld [vmem:[#allocation2 + $0xf0] sm:$0xff]  ;;  %v5130_v7 = vld [vmem:[#allocation2 + $0xf8] sm:$0xff]  ;;  %v11925_v50 = vpop.permute.xlu1 %4191 }
 0x280   : > { %v2946_v20 = vadd.f32 %v11771_v61, %v15799_v6  ;;  %vm3022_vm15 = vcmp.eq.s32.totalorder %v11350_v13, %v7688_v39  ;;  %7034 = vmatprep.subr.bf16.mxu1 %v7033_v26  ;;  %v7005_v45 = vpack.c.bf16 %v5128_v21, %v5127_v19  ;;  %15800 = vst [vmem:[#allocation18_spill] sm:$0xff] %v11925_v50  ;;  %v6404_v61 = vsel %vm3058_vm11, 1.0, %v15223_v30  ;;  %v5161_v26 = vld [vmem:[#allocation2 + $0x1f0] sm:$0xff]  ;;  %v5162_v19 = vld [vmem:[#allocation2 + $0x1f8] sm:$0xff] }
 0x281   : > { %v11931_v23 = vadd.f32 %v6401_v10, %v2943_v35  ;;  %v11933_v6 = vadd.f32 %v6402_v11, %v2944_v16  ;;  %v7037_v63 = vpack.c.bf16 %v5160_v42, %v5159_v0  ;;  %7168 = vset.pattern.permute.xlu1 %v15538_v40  ;;  %v11938_v21 = vadd.f32 %v6403_v59, %v2945_v43  ;;  %v11949_v16 = vld [vmem:[%s7530_s29 + $0x38] sm:$0xff]  ;;  %v5113_v11 = vld [vmem:[#allocation2 + $0x70] sm:$0xff] }
 0x282   : > { %v6365_v50 = vsel %vm3019_vm13, 1.0, %v15223_v30  ;;  %v6367_v17 = vsel %vm3021_vm14, 1.0, %v15223_v30  ;;  %7004 = vmatpush3.bf16.msra.mxu0 %v7003_v47  ;;  %v7007_v35 = vpack.c.bf16 %v5112_v18, %v5111_v41  ;;  %3905 = vperm.xlu1 %7168, %v11949_v16   ;;  %v6368_v42 = vsel %vm3022_vm15, 1.0, %v15223_v30  ;;  %v5114_v59 = vld [vmem:[#allocation2 + $0x78] sm:$0xff]  ;;  %v5145_v47 = vld [vmem:[#allocation2 + $0x170] sm:$0xff] }
 0x283   : > { %15801 = vst [vmem:[#allocation54_spill] sm:$0xff] %v11931_v23  ;;  %15802 = vst [vmem:[#allocation63_spill] sm:$0xff] %v11933_v6  ;;  %v3212_v0 = vadd.f32 %v6366_v49, %v11458_v29  ;;  %7036 = vmatpush3.bf16.msra.mxu1 %v7035_v48  ;;  %7006 = vmatprep.subr.bf16.mxu0 %v7005_v45  ;;  %v7039_v43 = vpack.c.bf16 %v5144_v52, %v5143_v9  ;;  %v5146_v41 = vld [vmem:[#allocation2 + $0x178] sm:$0xff]  ;;  %v11970_v45 = vpop.permute.xlu1 %3285  ;;  %v15831_v23 = vld [vmem:[#allocation34_spill] sm:$0xff] }
 0x284   : > { %15803 = vst [vmem:[#allocation137_spill] sm:$0xff] %v11938_v21  ;;  %v7009_v10 = vpack.c.bf16 %v5130_v7, %v5129_v31  ;;  %vm3023_vm0 = vcmp.eq.s32.totalorder %v11418_v14, %v7672_v34  ;;  %vm3024_vm1 = vcmp.eq.s32.totalorder %v11418_v14, %v7681_v37  ;;  %vm3628_vm2 = vcmp.eq.s32.totalorder %v11483_v33, %v7681_v37  ;;  %v15830_v21 = vld [vmem:[#allocation59_spill] sm:$0xff] }
 0x285   : > { %7038 = vmatprep.subr.bf16.mxu1 %v7037_v63  ;;  %v7041_v13 = vpack.c.bf16 %v5162_v19, %v5161_v26  ;;  %v11963_v29 = vadd.f32 %v6404_v61, %v2946_v20  ;;  %v3211_v52 = vadd.f32 %v6365_v50, %v11455_v58  ;;  %vm3025_vm3 = vcmp.eq.s32.totalorder %v11418_v14, %v7684_v38  ;;  %v15806_v19 = vld [vmem:[#allocation108_spill] sm:$0xff] }
 0x286   : > { %vm3026_vm4 = vcmp.eq.s32.totalorder %v11418_v14, %v7688_v39  ;;  %v11976_v63 = vsel %vm2770_vm7, 1.0, %v15223_v30  ;;  %v11979_v48 = vadd.f32 %v6367_v17, %v11461_v56  ;;  %v3214_v18 = vadd.f32 %v6368_v42, %v11467_v15  ;;  %7008 = vmatpush3.bf16.msra.mxu0 %v7007_v35  ;;  %7169 = vset.pattern.permute.xlu1 %v15636_v53  ;;  %v11995_v56 = vpop.permute.xlu0 %3610  ;;  %v7291_v14 = vld [vmem:[%s7530_s29 + $0x30] sm:$0xff] }
 0x287   : > { %15804 = vst [vmem:[#allocation138_spill] sm:$0xff] %v11963_v29  ;;  %15805 = vst [vmem:[#allocation139_spill] sm:$0xff] %v11976_v63  ;;  %v7011_v58 = vpack.c.bf16 %v5114_v59, %v5113_v11  ;;  %v11987_v9 = vsel %vm3023_vm0, 1.0, %v15223_v30  ;;  %v11993_v36 = vsel %vm3024_vm1, 1.0, %v15223_v30  ;;  %7040 = vmatpush3.bf16.msra.mxu1 %v7039_v43  ;;  %7010 = vmatprep.subr.bf16.mxu0 %v7009_v10  ;;  %v6494_v20 = vsel %vm3628_vm2, 1.0, %v15223_v30  ;;  %v12030_v61 = vpop.permute.xlu1 %3890  ;;  %v15827_v29 = vld [vmem:[#allocation56_spill] sm:$0xff] }
 0x288   : > { %v7043_v15 = vpack.c.bf16 %v5146_v41, %v5145_v47  ;;  %v12005_v49 = vsel %vm3025_vm3, 1.0, %v15223_v30  ;;  %v12011_v31 = vsel %vm3026_vm4, 1.0, %v15223_v30  ;;  %vm3630_vm5 = vcmp.eq.s32.totalorder %v11483_v33, %v7688_v39  ;;  %7042 = vmatprep.subr.bf16.mxu1 %v7041_v13  ;;  %4510 = vperm.xlu1 %7169, %v7291_v14   ;;  %v15810_v47 = vld [vmem:[#allocation106_spill] sm:$0xff] }
 0x289   : > { %v3516_v7 = vadd.f32 %v11395_v28, %v3212_v0  ;;  %vm3067_vm6 = vcmp.eq.s32.totalorder %v11550_v4, %v7672_v34  ;;  %vm3068_vm7 = vcmp.eq.s32.totalorder %v11550_v4, %v7681_v37  ;;  %vm3932_vm8 = vcmp.eq.s32.totalorder %v11557_v2, %v7681_v37  ;;  %v15807_v0 = vld [vmem:[#allocation8_spill] sm:$0xff] }
 0x28a   : > { %vm4236_vm9 = vcmp.eq.s32.totalorder %v11683_v24, %v7681_v37  ;;  %vm3627_vm10 = vcmp.eq.s32.totalorder %v11483_v33, %v7672_v34  ;;  %7012 = vmatpush3.bf16.msra.mxu0 %v7011_v58  ;;  %v6558_v28 = vsel %vm3932_vm8, 1.0, %v15223_v30  ;;  %vm4540_vm11 = vcmp.eq.s32.totalorder %v11806_v44, %v7681_v37  ;;  %v12049_v10 = vpop.permute.xlu0 %3619 }
 0x28b   : > { %v3820_v50 = vadd.f32 %v6494_v20, %v3516_v7  ;;  %vm3069_vm12 = vcmp.eq.s32.totalorder %v11550_v4, %v7684_v38  ;;  %7044 = vmatpush3.bf16.msra.mxu1 %v7043_v15  ;;  %v6622_v26 = vsel %vm4236_vm9, 1.0, %v15223_v30  ;;  %v3518_v17 = vadd.f32 %v15806_v19, %v3214_v18  ;;  %15808 = vst [vmem:[#allocation108_spill] sm:$0xff] %v12049_v10 }
 0x28c   : > { %v6496_v35 = vsel %vm3630_vm5, 1.0, %v15223_v30  ;;  %vm3934_vm13 = vcmp.eq.s32.totalorder %v11557_v2, %v7688_v39  ;;  %vm4844_vm14 = vcmp.eq.s32.totalorder %v15807_v0, %v7681_v37  ;;  %vm4238_vm15 = vcmp.eq.s32.totalorder %v11683_v24, %v7688_v39 }
 0x28d   : > { %v4124_v42 = vadd.f32 %v6558_v28, %v3820_v50  ;;  %v6560_v43 = vsel %vm3934_vm13, 1.0, %v15223_v30  ;;  %vm3931_vm0 = vcmp.eq.s32.totalorder %v11557_v2, %v7672_v34  ;;  %v6686_v11 = vsel %vm4540_vm11, 1.0, %v15223_v30 }
 0x28e   : > { %v3822_v59 = vadd.f32 %v6496_v35, %v3518_v17  ;;  %vm4542_vm1 = vcmp.eq.s32.totalorder %v11806_v44, %v7688_v39  ;;  %v15809_v13 = vmov 11   ;;  %v3515_v41 = vadd.f32 %v15810_v47, %v3211_v52  ;;  %v12067_v52 = vpop.permute.xlu1 %2984 }
 0x28f   : > { %7170 = vset.pattern.permute.xlu1 %v15809_v13  ;;  %v6493_v18 = vsel %vm3627_vm10, 1.0, %v15223_v30  ;;  %v4428_v58 = vadd.f32 %v6622_v26, %v4124_v42  ;;  %v6624_v15 = vsel %vm4238_vm15, 1.0, %v15223_v30  ;;  %vm3629_vm2 = vcmp.eq.s32.totalorder %v11483_v33, %v7684_v38 }
 0x290   : > { %3604 = vperm.xlu1 %7170, %v11750_v25   ;;  %v6750_v20 = vsel %vm4844_vm14, 1.0, %v15223_v30  ;;  %v4126_v7 = vadd.f32 %v6560_v43, %v3822_v59  ;;  %vm4846_vm3 = vcmp.eq.s32.totalorder %v15807_v0, %v7688_v39  ;;  %vm3070_vm4 = vcmp.eq.s32.totalorder %v11550_v4, %v7688_v39  ;;  %v15812_v43 = vld [vmem:[#allocation107_spill] sm:$0xff]  ;;  %v12093_v59 = vpop.permute.xlu0 %2671 }
 0x291   : > { %v6557_v14 = vsel %vm3931_vm0, 1.0, %v15223_v30  ;;  %v4732_v50 = vadd.f32 %v6686_v11, %v4428_v58  ;;  %v6688_v28 = vsel %vm4542_vm1, 1.0, %v15223_v30  ;;  %v3819_v33 = vadd.f32 %v6493_v18, %v3515_v41 }
 0x292   : > { %vm3933_vm5 = vcmp.eq.s32.totalorder %v11557_v2, %v7684_v38  ;;  %vm4235_vm8 = vcmp.eq.s32.totalorder %v11683_v24, %v7672_v34  ;;  %v4430_v26 = vadd.f32 %v6624_v15, %v4126_v7  ;;  %v12084_v19 = vsel %vm3067_vm6, 1.0, %v15223_v30  ;;  %v12109_v58 = vpop.permute.xlu1 %3589 }
 0x293   : > { %15811 = vst [vmem:[#allocation8_spill] sm:$0xff] %v12084_v19  ;;  %v6495_v17 = vsel %vm3629_vm2, 1.0, %v15223_v30  ;;  %v5036_v35 = vadd.f32 %v6750_v20, %v4732_v50  ;;  %v6752_v42 = vsel %vm4846_vm3, 1.0, %v15223_v30  ;;  %v3517_v2 = vadd.f32 %v15812_v43, %v11979_v48 }
 0x294   : > { %7171 = vset.pattern.permute.xlu1 %v15669_v3  ;;  %vm4843_vm9 = vcmp.eq.s32.totalorder %v15807_v0, %v7672_v34  ;;  %v4734_v11 = vadd.f32 %v6688_v28, %v4430_v26  ;;  %v4123_v47 = vadd.f32 %v6557_v14, %v3819_v33  ;;  %v12100_v41 = vsel %vm3068_vm7, 1.0, %v15223_v30  ;;  %v15816_v33 = vld [vmem:[#allocation118_spill] sm:$0xff] }
 0x295   : > { %4209 = vperm.xlu1 %7171, %v11949_v16   ;;  %15813 = vst [vmem:[#allocation106_spill] sm:$0xff] %v12100_v41  ;;  %v6559_v18 = vsel %vm3933_vm5, 1.0, %v15223_v30  ;;  %5227 = vmatprep.mubr.f32.mxu0 %v5036_v35  ;;  %v6621_v48 = vsel %vm4235_vm8, 1.0, %v15223_v30  ;;  %vm4539_vm6 = vcmp.eq.s32.totalorder %v11806_v44, %v7672_v34  ;;  %v3821_v15 = vadd.f32 %v6495_v17, %v3517_v2  ;;  %v12263_v41 = vld [vmem:[%s7530_s29 + $0x50] sm:$0xff] }
 0x296   : > { %vm4237_vm10 = vcmp.eq.s32.totalorder %v11683_v24, %v7684_v38  ;;  %v5038_v20 = vadd.f32 %v6752_v42, %v4734_v11  ;;  %v4427_v7 = vadd.f32 %v6621_v48, %v4123_v47  ;;  %v12117_v14 = vsel %vm3069_vm12, 1.0, %v15223_v30  ;;  %v12145_v11 = vpop.permute.xlu0 %2680  ;;  %v12148_v47 = vld [vmem:[%s7530_s29 + $0x48] sm:$0xff] }
 0x297   : > { %15814 = vst [vmem:[#allocation107_spill] sm:$0xff] %v12117_v14  ;;  %v12123_v50 = vsel %vm3070_vm4, 1.0, %v15223_v30  ;;  %v6685_v28 = vsel %vm4539_vm6, 1.0, %v15223_v30  ;;  %v6749_v24 = vsel %vm4843_vm9, 1.0, %v15223_v30  ;;  %vm4845_vm7 = vcmp.eq.s32.totalorder %v15807_v0, %v7684_v38 }
 0x298   : > { %15815 = vst [vmem:[#allocation140_spill] sm:$0xff] %v12123_v50  ;;  %vm3631_vm11 = vcmp.eq.s32.totalorder %v15816_v33, %v7672_v34  ;;  %5372 = vmatprep.mubr.f32.mxu1 %v5038_v20  ;;  %v4731_v26 = vadd.f32 %v6685_v28, %v4427_v7  ;;  %v4125_v17 = vadd.f32 %v6559_v18, %v3821_v15  ;;  %v6623_v4 = vsel %vm4237_vm10, 1.0, %v15223_v30  ;;  %v12151_v18 = vpop.permute.xlu1 %4799 }
 0x299   : > { %vm3632_vm12 = vcmp.eq.s32.totalorder %v15816_v33, %v7681_v37  ;;  %vm3633_vm13 = vcmp.eq.s32.totalorder %v15816_v33, %v7684_v38  ;;  %vm4541_vm14 = vcmp.eq.s32.totalorder %v11806_v44, %v7684_v38  ;;  %v15817_v35 = vmov 10  }
 0x29a   : > { %7172 = vset.pattern.permute.xlu1 %v15817_v35  ;;  %vm3634_vm15 = vcmp.eq.s32.totalorder %v15816_v33, %v7688_v39  ;;  %v5035_v42 = vadd.f32 %v6749_v24, %v4731_v26  ;;  %v4429_v43 = vadd.f32 %v6623_v4, %v4125_v17  ;;  %v6687_v2 = vsel %vm4541_vm14, 1.0, %v15223_v30 }
 0x29b   : > { %3303 = vperm.xlu1 %7172, %v12148_v47   ;;  %v12157_v44 = vsel %vm3631_vm11, 1.0, %v15223_v30  ;;  %vm3643_vm0 = vcmp.eq.s32.totalorder %v11877_v55, %v7672_v34  ;;  %vm3644_vm1 = vcmp.eq.s32.totalorder %v11877_v55, %v7681_v37  ;;  %v6751_v48 = vsel %vm4845_vm7, 1.0, %v15223_v30 }
 0x29c   : > { %v12171_v15 = vsel %vm3632_vm12, 1.0, %v15223_v30  ;;  %vm3645_vm2 = vcmp.eq.s32.totalorder %v11877_v55, %v7684_v38  ;;  %vm3646_vm3 = vcmp.eq.s32.totalorder %v11877_v55, %v7688_v39  ;;  %5228 = vmatmul.mubr.f32.vlgmr.msra.gmra.mrb[0].mxu0 %v5035_v42  ;;  %v4733_v20 = vadd.f32 %v6687_v2, %v4429_v43  ;;  %v12213_v17 = vpop.permute.xlu1 %3288 }
 0x29d   : > { %v12181_v0 = vsel %vm3633_vm13, 1.0, %v15223_v30  ;;  %v12187_v7 = vsel %vm3634_vm15, 1.0, %v15223_v30  ;;  %vm3935_vm4 = vcmp.eq.s32.totalorder %v11739_v8, %v7672_v34  ;;  %vm3936_vm5 = vcmp.eq.s32.totalorder %v11739_v8, %v7681_v37  ;;  %15822 = vst [vmem:[#allocation144_spill] sm:$0xff] %v12213_v17 }
 0x29e   : > { %v12194_v55 = vsel %vm3643_vm0, 1.0, %v15223_v30  ;;  %v12197_v28 = vsel %vm3644_vm1, 1.0, %v15223_v30  ;;  %vm3937_vm8 = vcmp.eq.s32.totalorder %v11739_v8, %v7684_v38  ;;  %v5037_v24 = vadd.f32 %v6751_v48, %v4733_v20 }
 0x29f   : > { %15818 = vst [vmem:[#allocation118_spill] sm:$0xff] %v12194_v55  ;;  %15819 = vst [vmem:[#allocation141_spill] sm:$0xff] %v12197_v28  ;;  %7173 = vset.pattern.permute.xlu1 %v15538_v40  ;;  %v12203_v33 = vsel %vm3645_vm2, 1.0, %v15223_v30  ;;  %v12206_v26 = vsel %vm3646_vm3, 1.0, %v15223_v30  ;;  %vm3938_vm9 = vcmp.eq.s32.totalorder %v11739_v8, %v7688_v39  ;;  %vm3655_vm6 = vcmp.eq.s32.totalorder %v11935_v1, %v7672_v34  ;;  %v12225_v8 = vpop.permute.xlu0 %2686 }
 0x2a0   : > { %15820 = vst [vmem:[#allocation142_spill] sm:$0xff] %v12203_v33  ;;  %15821 = vst [vmem:[#allocation143_spill] sm:$0xff] %v12206_v26  ;;  %3908 = vperm.xlu1 %7173, %v11750_v25   ;;  %v12216_v4 = vsel %vm3935_vm4, 1.0, %v15223_v30  ;;  %v12219_v42 = vsel %vm3936_vm5, 1.0, %v15223_v30  ;;  %vm3656_vm10 = vcmp.eq.s32.totalorder %v11935_v1, %v7681_v37  ;;  %vm3657_vm7 = vcmp.eq.s32.totalorder %v11935_v1, %v7684_v38  ;;  %v12266_v19 = vpop.permute.xlu1 %4498  ;;  %v15832_v33 = vld [vmem:[#allocation71_spill] sm:$0xff] }
 0x2a1   : > { %5373 = vmatmul.mubr.f32.vlgmr.msra.gmra.mrb[0].mxu1 %v5037_v24  ;;  %v12228_v43 = vsel %vm3937_vm8, 1.0, %v15223_v30  ;;  %vm2719_vm11 = vcmp.eq.s32.totalorder %v12093_v59, %v7672_v34  ;;  %vm2720_vm12 = vcmp.eq.s32.totalorder %v12093_v59, %v7681_v37  ;;  %vm2721_vm13 = vcmp.eq.s32.totalorder %v12093_v59, %v7684_v38  ;;  %15826 = vst [vmem:[#allocation148_spill] sm:$0xff] %v12266_v19 }
 0x2a2   : > { %v12237_v2 = vsel %vm3938_vm9, 1.0, %v15223_v30  ;;  %vm3658_vm14 = vcmp.eq.s32.totalorder %v11935_v1, %v7688_v39  ;;  %v12242_v48 = vsel %vm3655_vm6, 1.0, %v15223_v30  ;;  %vm2722_vm15 = vcmp.eq.s32.totalorder %v12093_v59, %v7688_v39 }
 0x2a3   : > { %15823 = vst [vmem:[#allocation145_spill] sm:$0xff] %v12242_v48  ;;  %v12247_v20 = vsel %vm3656_vm10, 1.0, %v15223_v30  ;;  %v12250_v24 = vsel %vm3657_vm7, 1.0, %v15223_v30  ;;  %vm3667_vm0 = vcmp.eq.s32.totalorder %v11995_v56, %v7672_v34  ;;  %vm3668_vm1 = vcmp.eq.s32.totalorder %v11995_v56, %v7681_v37 }
 0x2a4   : > { %15824 = vst [vmem:[#allocation146_spill] sm:$0xff] %v12247_v20  ;;  %15825 = vst [vmem:[#allocation147_spill] sm:$0xff] %v12250_v24  ;;  %7174 = vset.pattern.permute.xlu1 %v15623_v46  ;;  %vm3669_vm2 = vcmp.eq.s32.totalorder %v11995_v56, %v7684_v38  ;;  %v6305_v63 = vsel %vm2719_vm11, 1.0, %v15223_v30  ;;  %v6306_v50 = vsel %vm2720_vm12, 1.0, %v15223_v30  ;;  %v6307_v14 = vsel %vm2721_vm13, 1.0, %v15223_v30  ;;  %v15828_v24 = vld [vmem:[#allocation22_spill] sm:$0xff] }
 0x2a5   : > { %3002 = vperm.xlu1 %7174, %v12263_v41   ;;  %v2607_v48 = vadd.f32 %v15828_v24, %v15827_v29  ;;  %v15829_v20 = vld [vmem:[#allocation17_spill] sm:$0xff]  ;;  %v2609_v55 = vadd.f32 %v15832_v33, %v15831_v23  ;;  %v6308_v26 = vsel %vm2722_vm15, 1.0, %v15223_v30  ;;  %vm3670_vm3 = vcmp.eq.s32.totalorder %v11995_v56, %v7688_v39  ;;  %v15833_v29 = vld [vmem:[#allocation35_spill] sm:$0xff]  ;;  %v15834_v24 = vld [vmem:[#allocation72_spill] sm:$0xff] }
 0x2a6   : > { %v2608_v6 = vadd.f32 %v15830_v21, %v15829_v20  ;;  %vm3635_vm4 = vcmp.eq.s32.totalorder %v11879_v32, %v7672_v34  ;;  %vm3636_vm5 = vcmp.eq.s32.totalorder %v11879_v32, %v7681_v37  ;;  %v2610_v21 = vadd.f32 %v15834_v24, %v15833_v29  ;;  %v12286_v20 = vpop.permute.xlu0 %2692 }
 0x2a7   : > { %vm3637_vm8 = vcmp.eq.s32.totalorder %v11879_v32, %v7684_v38  ;;  %v2911_v23 = vadd.f32 %v6305_v63, %v2607_v48  ;;  %v2913_v33 = vadd.f32 %v6307_v14, %v2609_v55  ;;  %v12294_v28 = vsel %vm3658_vm14, 1.0, %v15223_v30  ;;  %v12326_v14 = vpop.permute.xlu1 %2987 }
 0x2a8   : > { %v2912_v59 = vadd.f32 %v6306_v50, %v2608_v6  ;;  %15835 = vst [vmem:[#allocation56_spill] sm:$0xff] %v12294_v28  ;;  %v12300_v17 = vsel %vm3667_vm0, 1.0, %v15223_v30  ;;  %vm3638_vm9 = vcmp.eq.s32.totalorder %v11879_v32, %v7688_v39  ;;  %v2914_v29 = vadd.f32 %v6308_v26, %v2610_v21  ;;  %15840 = vst [vmem:[#allocation71_spill] sm:$0xff] %v12326_v14  ;;  %v15841_v50 = vld [vmem:[#allocation49_spill] sm:$0xff] }
 0x2a9   : > { %15836 = vst [vmem:[#allocation22_spill] sm:$0xff] %v12300_v17  ;;  %7175 = vset.pattern.permute.xlu1 %v15809_v13  ;;  %v12309_v6 = vsel %vm3668_vm1, 1.0, %v15223_v30  ;;  %v12315_v1 = vsel %vm3669_vm2, 1.0, %v15223_v30  ;;  %v12321_v63 = vsel %vm3670_vm3, 1.0, %v15223_v30  ;;  %vm3679_vm6 = vcmp.eq.s32.totalorder %v12049_v10, %v7672_v34  ;;  %v15844_v28 = vld [vmem:[#allocation113_spill] sm:$0xff] }
 0x2aa   : > { %15837 = vst [vmem:[#allocation17_spill] sm:$0xff] %v12309_v6  ;;  %15838 = vst [vmem:[#allocation59_spill] sm:$0xff] %v12315_v1  ;;  %3607 = vperm.xlu1 %7175, %v12148_v47   ;;  %v3523_v55 = vadd.f32 %v15841_v50, %v11680_v54  ;;  %v6501_v26 = vsel %vm3635_vm4, 1.0, %v15223_v30  ;;  %v6502_v56 = vsel %vm3636_vm5, 1.0, %v15223_v30  ;;  %v6503_v48 = vsel %vm3637_vm8, 1.0, %v15223_v30  ;;  %v15843_v6 = vld [vmem:[#allocation16_spill] sm:$0xff]  ;;  %v12353_v19 = vpop.permute.xlu0 %2698 }
 0x2ab   : > { %15839 = vst [vmem:[#allocation34_spill] sm:$0xff] %v12321_v63  ;;  %v6504_v24 = vsel %vm3638_vm9, 1.0, %v15223_v30  ;;  %v3215_v21 = vadd.f32 %v11987_v9, %v2911_v23  ;;  %v3216_v54 = vadd.f32 %v11993_v36, %v2912_v59  ;;  %v3217_v50 = vadd.f32 %v12005_v49, %v2913_v33  ;;  %v15842_v63 = vld [vmem:[#allocation47_spill] sm:$0xff]  ;;  %v12377_v49 = vpop.permute.xlu1 %4197  ;;  %v15851_v23 = vld [vmem:[#allocation110_spill] sm:$0xff] }
 0x2ac   : > { %v3524_v1 = vadd.f32 %v15842_v63, %v11686_v51  ;;  %v3525_v17 = vadd.f32 %v15843_v6, %v11689_v5  ;;  %v3526_v14 = vadd.f32 %v15844_v28, %v11692_v12  ;;  %v3218_v32 = vadd.f32 %v12011_v31, %v2914_v29  ;;  %15849 = vst [vmem:[#allocation16_spill] sm:$0xff] %v12377_v49  ;;  %v15850_v31 = vld [vmem:[#allocation109_spill] sm:$0xff]  ;;  %v15852_v33 = vld [vmem:[#allocation111_spill] sm:$0xff]  ;;  %v15855_v63 = vld [vmem:[#allocation80_spill] sm:$0xff] }
 0x2ad   : > { %v12359_v9 = vsel %vm3679_vm6, 1.0, %v15223_v30  ;;  %v12361_v36 = vadd.f32 %v6501_v26, %v3523_v55  ;;  %vm2731_vm10 = vcmp.eq.s32.totalorder %v12145_v11, %v7672_v34  ;;  %vm2732_vm7 = vcmp.eq.s32.totalorder %v12145_v11, %v7681_v37  ;;  %v15856_v26 = vld [vmem:[#allocation28_spill] sm:$0xff] }
 0x2ae   : > { %15845 = vst [vmem:[#allocation35_spill] sm:$0xff] %v12359_v9  ;;  %7177 = vset.pattern.permute.xlu1 %v15644_v60  ;;  %v12368_v51 = vadd.f32 %v6502_v56, %v3524_v1  ;;  %v12370_v5 = vadd.f32 %v6503_v48, %v3525_v17  ;;  %v12372_v12 = vadd.f32 %v6504_v24, %v3526_v14  ;;  %v15853_v17 = vld [vmem:[#allocation112_spill] sm:$0xff]  ;;  %v15854_v1 = vld [vmem:[#allocation23_spill] sm:$0xff]  ;;  %v6317_v14 = vsel %vm2731_vm10, 1.0, %v15223_v30  ;;  %v15857_v56 = vld [vmem:[#allocation81_spill] sm:$0xff] }
 0x2af   : > { %15846 = vst [vmem:[#allocation72_spill] sm:$0xff] %v12361_v36  ;;  %vm2733_vm11 = vcmp.eq.s32.totalorder %v12145_v11, %v7684_v38  ;;  %4817 = vperm.xlu1 %7177, %v11949_v16   ;;  %v12380_v28 = vadd.f32 %v15850_v31, %v3215_v21  ;;  %v12383_v59 = vadd.f32 %v15851_v23, %v3216_v54  ;;  %v6318_v55 = vsel %vm2732_vm7, 1.0, %v15223_v30  ;;  %v15858_v24 = vld [vmem:[#allocation12_spill] sm:$0xff]  ;;  %v15859_v21 = vld [vmem:[#allocation29_spill] sm:$0xff]  ;;  %v15861_v31 = vld [vmem:[#allocation82_spill] sm:$0xff] }
 0x2b0   : > { %15847 = vst [vmem:[#allocation49_spill] sm:$0xff] %v12370_v5  ;;  %15848 = vst [vmem:[#allocation47_spill] sm:$0xff] %v12372_v12  ;;  %v12386_v29 = vadd.f32 %v15852_v33, %v3217_v50  ;;  %vm2734_vm12 = vcmp.eq.s32.totalorder %v12145_v11, %v7688_v39  ;;  %v12391_v6 = vadd.f32 %v15853_v17, %v3218_v32  ;;  %v15860_v50 = vld [vmem:[#allocation9_spill] sm:$0xff]  ;;  %v6319_v11 = vsel %vm2733_vm11, 1.0, %v15223_v30  ;;  %v12411_v33 = vpop.permute.xlu0 %2704  ;;  %v15867_v9 = vld [vmem:[#allocation51_spill] sm:$0xff] }
 0x2b1   : > { %v2619_v16 = vadd.f32 %v15855_v63, %v15854_v1  ;;  %v2620_v48 = vadd.f32 %v15857_v56, %v15856_v26  ;;  %v2621_v54 = vadd.f32 %v15859_v21, %v15858_v24  ;;  %v2622_v23 = vadd.f32 %v15861_v31, %v15860_v50  ;;  %v12423_v63 = vpop.permute.xlu1 %4802  ;;  %v15863_v24 = vld [vmem:[#allocation50_spill] sm:$0xff]  ;;  %v15864_v21 = vld [vmem:[#allocation83_spill] sm:$0xff]  ;;  %v15866_v31 = vld [vmem:[#allocation13_spill] sm:$0xff] }
 0x2b2   : > { %v6320_v32 = vsel %vm2734_vm12, 1.0, %v15223_v30  ;;  %vm3335_vm13 = vcmp.eq.s32.totalorder %v11970_v45, %v7672_v34  ;;  %vm2739_vm14 = vcmp.eq.s32.totalorder %v12225_v8, %v7672_v34  ;;  %vm2740_vm15 = vcmp.eq.s32.totalorder %v12225_v8, %v7681_v37  ;;  %15862 = vst [vmem:[#allocation113_spill] sm:$0xff] %v12423_v63  ;;  %v15865_v50 = vld [vmem:[#allocation43_spill] sm:$0xff]  ;;  %v15868_v49 = vld [vmem:[#allocation84_spill] sm:$0xff]  ;;  %v15869_v5 = vld [vmem:[#allocation57_spill] sm:$0xff] }
 0x2b3   : > { %7178 = vset.pattern.permute.xlu1 %v15817_v35  ;;  %v12414_v17 = vadd.f32 %v6317_v14, %v2619_v16  ;;  %v12416_v1 = vadd.f32 %v6318_v55, %v2620_v48  ;;  %vm3336_vm0 = vcmp.eq.s32.totalorder %v11970_v45, %v7681_v37  ;;  %vm2741_vm1 = vcmp.eq.s32.totalorder %v12225_v8, %v7684_v38  ;;  %v15870_v36 = vld [vmem:[#allocation85_spill] sm:$0xff] }
 0x2b4   : > { %3306 = vperm.xlu1 %7178, %v12263_v41   ;;  %v12425_v26 = vadd.f32 %v6319_v11, %v2621_v54  ;;  %vm3337_vm2 = vcmp.eq.s32.totalorder %v11970_v45, %v7684_v38  ;;  %vm3338_vm3 = vcmp.eq.s32.totalorder %v11970_v45, %v7688_v39  ;;  %vm2742_vm4 = vcmp.eq.s32.totalorder %v12225_v8, %v7688_v39 }
 0x2b5   : > { %v12433_v16 = vadd.f32 %v6320_v32, %v2622_v23  ;;  %v6441_v14 = vsel %vm3335_vm13, 1.0, %v15223_v30  ;;  %v6325_v55 = vsel %vm2739_vm14, 1.0, %v15223_v30  ;;  %v6326_v56 = vsel %vm2740_vm15, 1.0, %v15223_v30 }
 0x2b6   : > { %v6442_v48 = vsel %vm3336_vm0, 1.0, %v15223_v30  ;;  %v2627_v54 = vadd.f32 %v15864_v21, %v15863_v24  ;;  %v2628_v23 = vadd.f32 %v15866_v31, %v15865_v50  ;;  %v6327_v45 = vsel %vm2741_vm1, 1.0, %v15223_v30  ;;  %v12463_v50 = vpop.permute.xlu0 %2710  ;;  %v12466_v31 = vpop.permute.xlu1 %3896 }
 0x2b7   : > { %v6443_v11 = vsel %vm3337_vm2, 1.0, %v15223_v30  ;;  %v6444_v32 = vsel %vm3338_vm3, 1.0, %v15223_v30  ;;  %v2629_v35 = vadd.f32 %v15868_v49, %v15867_v9  ;;  %v6328_v8 = vsel %vm2742_vm4, 1.0, %v15223_v30  ;;  %15871 = vst [vmem:[#allocation109_spill] sm:$0xff] %v12463_v50  ;;  %15872 = vst [vmem:[#allocation110_spill] sm:$0xff] %v12466_v31  ;;  %v15879_v31 = vld [vmem:[#allocation92_spill] sm:$0xff] }
 0x2b8   : > { %7179 = vset.pattern.permute.xlu1 %v15636_v53  ;;  %v2630_v12 = vadd.f32 %v15870_v36, %v15869_v5  ;;  %v2931_v24 = vadd.f32 %v6325_v55, %v2627_v54  ;;  %v2932_v21 = vadd.f32 %v6326_v56, %v2628_v23  ;;  %vm2747_vm5 = vcmp.eq.s32.totalorder %v12286_v20, %v7672_v34  ;;  %v15874_v55 = vld [vmem:[#allocation45_spill] sm:$0xff]  ;;  %v15875_v56 = vld [vmem:[#allocation90_spill] sm:$0xff]  ;;  %v15876_v23 = vld [vmem:[#allocation36_spill] sm:$0xff] }
 0x2b9   : > { %4516 = vperm.xlu1 %7179, %v11750_v25   ;;  %v2933_v63 = vadd.f32 %v6327_v45, %v2629_v35  ;;  %vm2748_vm8 = vcmp.eq.s32.totalorder %v12286_v20, %v7681_v37  ;;  %vm2749_vm9 = vcmp.eq.s32.totalorder %v12286_v20, %v7684_v38  ;;  %vm2750_vm6 = vcmp.eq.s32.totalorder %v12286_v20, %v7688_v39  ;;  %v15877_v45 = vld [vmem:[#allocation91_spill] sm:$0xff] }
 0x2ba   : > { %v12475_v9 = vadd.f32 %v6441_v14, %v11774_v62  ;;  %v12478_v36 = vadd.f32 %v6442_v48, %v11777_v27  ;;  %v12481_v5 = vadd.f32 %v6443_v11, %v11780_v57  ;;  %v2934_v35 = vadd.f32 %v6328_v8, %v2630_v12  ;;  %v15878_v14 = vld [vmem:[#allocation40_spill] sm:$0xff]  ;;  %v12512_v50 = vpop.permute.xlu1 %4501 }
 0x2bb   : > { %v12484_v49 = vadd.f32 %v6444_v32, %v11783_v22  ;;  %v2635_v54 = vadd.f32 %v15875_v56, %v15874_v55  ;;  %v2636_v20 = vadd.f32 %v15877_v45, %v15876_v23  ;;  %v6333_v62 = vsel %vm2747_vm5, 1.0, %v15223_v30  ;;  %v15880_v22 = vld [vmem:[#allocation130_spill] sm:$0xff]  ;;  %v15882_v32 = vld [vmem:[#allocation131_spill] sm:$0xff]  ;;  %v15884_v55 = vld [vmem:[#allocation132_spill] sm:$0xff] }
 0x2bc   : > { %15873 = vst [vmem:[#allocation111_spill] sm:$0xff] %v12481_v5  ;;  %v2637_v27 = vadd.f32 %v15879_v31, %v15878_v14  ;;  %v6334_v48 = vsel %vm2748_vm8, 1.0, %v15223_v30  ;;  %v6335_v57 = vsel %vm2749_vm9, 1.0, %v15223_v30  ;;  %v6336_v12 = vsel %vm2750_vm6, 1.0, %v15223_v30  ;;  %v15886_v23 = vld [vmem:[#allocation58_spill] sm:$0xff]  ;;  %v15887_v45 = vld [vmem:[#allocation93_spill] sm:$0xff] }
 0x2bd   : > { %7180 = vset.pattern.permute.xlu1 %v15623_v46  ;;  %v12498_v11 = vadd.f32 %v15880_v22, %v2931_v24  ;;  %v12501_v8 = vadd.f32 %v15882_v32, %v2932_v21  ;;  %v12504_v56 = vadd.f32 %v15884_v55, %v2933_v63  ;;  %v2638_v31 = vadd.f32 %v15887_v45, %v15886_v23  ;;  %v12509_v14 = vld [vmem:[%s7530_s29 + $0x58] sm:$0xff]  ;;  %v15888_v5 = vld [vmem:[#allocation133_spill] sm:$0xff]  ;;  %v12523_v63 = vpop.permute.xlu0 %2713 }
 0x2be   : > { %3005 = vperm.xlu1 %7180, %v12509_v14   ;;  %v12515_v46 = vadd.f32 %v15888_v5, %v2934_v35  ;;  %v12517_v24 = vadd.f32 %v6333_v62, %v2635_v54  ;;  %vm3939_vm10 = vcmp.eq.s32.totalorder %v12030_v61, %v7672_v34  ;;  %vm3940_vm7 = vcmp.eq.s32.totalorder %v12030_v61, %v7681_v37  ;;  %v15895_v5 = vld [vmem:[#allocation18_spill] sm:$0xff]  ;;  %v15899_v45 = vld [vmem:[#allocation37_spill] sm:$0xff] }
 0x2bf   : > { %15881 = vst [vmem:[#allocation112_spill] sm:$0xff] %v12498_v11  ;;  %15883 = vst [vmem:[#allocation23_spill] sm:$0xff] %v12501_v8  ;;  %v12525_v21 = vadd.f32 %v6334_v48, %v2636_v20  ;;  %v12527_v22 = vadd.f32 %v6335_v57, %v2637_v27  ;;  %v12529_v32 = vadd.f32 %v6336_v12, %v2638_v31  ;;  %v12546_v35 = vsel %vm3939_vm10, 1.0, %v15223_v30  ;;  %v12568_v62 = vpop.permute.xlu1 %3595  ;;  %v15897_v27 = vld [vmem:[#allocation42_spill] sm:$0xff]  ;;  %v15900_v31 = vld [vmem:[#allocation95_spill] sm:$0xff] }
 0x2c0   : > { %15885 = vst [vmem:[#allocation80_spill] sm:$0xff] %v12504_v56  ;;  %15889 = vst [vmem:[#allocation28_spill] sm:$0xff] %v12515_v46  ;;  %vm3941_vm11 = vcmp.eq.s32.totalorder %v12030_v61, %v7684_v38  ;;  %vm4240_vm12 = vcmp.eq.s32.totalorder %v15895_v5, %v7681_v37  ;;  %vm3942_vm13 = vcmp.eq.s32.totalorder %v12030_v61, %v7688_v39  ;;  %v12549_v54 = vsel %vm3940_vm7, 1.0, %v15223_v30  ;;  %v15898_v48 = vld [vmem:[#allocation94_spill] sm:$0xff]  ;;  %v15903_v46 = vld [vmem:[#allocation61_spill] sm:$0xff] }
 0x2c1   : > { %15890 = vst [vmem:[#allocation81_spill] sm:$0xff] %v12517_v24  ;;  %15891 = vst [vmem:[#allocation12_spill] sm:$0xff] %v12523_v63  ;;  %vm2755_vm14 = vcmp.eq.s32.totalorder %v12353_v19, %v7672_v34  ;;  %vm2756_vm15 = vcmp.eq.s32.totalorder %v12353_v19, %v7681_v37  ;;  %vm2757_vm0 = vcmp.eq.s32.totalorder %v12353_v19, %v7684_v38  ;;  %v12559_v20 = vsel %vm3941_vm11, 1.0, %v15223_v30  ;;  %v15902_v63 = vld [vmem:[#allocation96_spill] sm:$0xff]  ;;  %v4496_v24 = vpop.permute.xlu0 %4495  ;;  %v15904_v56 = vld [vmem:[#allocation97_spill] sm:$0xff] }
 0x2c2   : > { %15892 = vst [vmem:[#allocation29_spill] sm:$0xff] %v12525_v21  ;;  %15893 = vst [vmem:[#allocation9_spill] sm:$0xff] %v12527_v22  ;;  %vm4242_vm1 = vcmp.eq.s32.totalorder %v15895_v5, %v7688_v39  ;;  %vm2758_vm2 = vcmp.eq.s32.totalorder %v12353_v19, %v7688_v39  ;;  %vm3035_vm3 = vcmp.eq.s32.totalorder %v12067_v52, %v7672_v34  ;;  %7181 = vset.pattern.permute.xlu1 %v15669_v3 }
 0x2c3   : > { %15894 = vst [vmem:[#allocation82_spill] sm:$0xff] %v12529_v32  ;;  %vm4239_vm4 = vcmp.eq.s32.totalorder %v15895_v5, %v7672_v34  ;;  %vm3036_vm5 = vcmp.eq.s32.totalorder %v12067_v52, %v7681_v37  ;;  %vm3037_vm8 = vcmp.eq.s32.totalorder %v12067_v52, %v7684_v38  ;;  %vm3038_vm9 = vcmp.eq.s32.totalorder %v12067_v52, %v7688_v39 }
 0x2c4   : > { %4215 = vperm.xlu1 %7181, %v12148_v47   ;;  %15896 = vst [vmem:[#allocation50_spill] sm:$0xff] %v12568_v62  ;;  %v2643_v57 = vadd.f32 %v15898_v48, %v15897_v27  ;;  %v6341_v12 = vsel %vm2755_vm14, 1.0, %v15223_v30  ;;  %v6342_v55 = vsel %vm2756_vm15, 1.0, %v15223_v30  ;;  %v6343_v23 = vsel %vm2757_vm0, 1.0, %v15223_v30  ;;  %v15901_v48 = vld [vmem:[#allocation60_spill] sm:$0xff]  ;;  %v12633_v61 = vpop.permute.xlu1 %4200 }
 0x2c5   : > { %vm4241_vm6 = vcmp.eq.s32.totalorder %v15895_v5, %v7684_v38  ;;  %v2644_v27 = vadd.f32 %v15900_v31, %v15899_v45  ;;  %v2645_v32 = vadd.f32 %v15902_v63, %v15901_v48  ;;  %v6344_v22 = vsel %vm2758_vm2, 1.0, %v15223_v30 }
 0x2c6   : > { %v6381_v21 = vsel %vm3035_vm3, 1.0, %v15223_v30  ;;  %v2646_v8 = vadd.f32 %v15904_v56, %v15903_v46  ;;  %v6382_v45 = vsel %vm3036_vm5, 1.0, %v15223_v30  ;;  %v6383_v19 = vsel %vm3037_vm8, 1.0, %v15223_v30 }
 0x2c7   : > { %v6384_v63 = vsel %vm3038_vm9, 1.0, %v15223_v30  ;;  %v12616_v46 = vsel %vm3942_vm13, 1.0, %v15223_v30  ;;  %v12618_v56 = vadd.f32 %v6341_v12, %v2643_v57  ;;  %v12620_v31 = vadd.f32 %v6342_v55, %v2644_v27  ;;  %v15910_v12 = vld [vmem:[#allocation31_spill] sm:$0xff] }
 0x2c8   : > { %v12622_v48 = vadd.f32 %v6343_v23, %v2645_v32  ;;  %7182 = vset.pattern.permute.xlu1 %v15644_v60  ;;  %v12625_v11 = vadd.f32 %v6344_v22, %v2646_v8  ;;  %v12628_v62 = vadd.f32 %v6381_v21, %v12414_v17  ;;  %vm4543_vm10 = vcmp.eq.s32.totalorder %v4496_v24, %v7672_v34  ;;  %v15908_v17 = vld [vmem:[#allocation62_spill] sm:$0xff] }
 0x2c9   : > { %15905 = vst [vmem:[#allocation83_spill] sm:$0xff] %v12620_v31  ;;  %vm4544_vm7 = vcmp.eq.s32.totalorder %v4496_v24, %v7681_v37  ;;  %4820 = vperm.xlu1 %7182, %v11750_v25   ;;  %v12636_v52 = vadd.f32 %v6382_v45, %v12416_v1  ;;  %v12639_v32 = vadd.f32 %v6383_v19, %v12425_v26  ;;  %v15909_v21 = vld [vmem:[#allocation98_spill] sm:$0xff]  ;;  %v6689_v26 = vsel %vm4543_vm10, 1.0, %v15223_v30  ;;  %v12682_v55 = vpop.permute.xlu1 %3294 }
 0x2ca   : > { %15906 = vst [vmem:[#allocation43_spill] sm:$0xff] %v12622_v48  ;;  %15907 = vst [vmem:[#allocation13_spill] sm:$0xff] %v12625_v11  ;;  %v12642_v8 = vadd.f32 %v6384_v63, %v12433_v16  ;;  %vm4546_vm11 = vcmp.eq.s32.totalorder %v4496_v24, %v7688_v39  ;;  %v12647_v22 = vadd.f32 %v15909_v21, %v15908_v17  ;;  %v6690_v16 = vsel %vm4544_vm7, 1.0, %v15223_v30 }
 0x2cb   : > { %vm2763_vm13 = vcmp.eq.s32.totalorder %v12411_v33, %v7672_v34  ;;  %v3824_v25 = vadd.f32 %v12171_v15, %v12383_v59  ;;  %v3826_v1 = vadd.f32 %v12187_v7, %v12391_v6  ;;  %vm2764_vm14 = vcmp.eq.s32.totalorder %v12411_v33, %v7681_v37 }
 0x2cc   : > { %vm4545_vm15 = vcmp.eq.s32.totalorder %v4496_v24, %v7684_v38  ;;  %v3823_v57 = vadd.f32 %v12157_v44, %v12380_v28  ;;  %vm4244_vm0 = vcmp.eq.s32.totalorder %v15910_v12, %v7681_v37  ;;  %v6692_v15 = vsel %vm4546_vm11, 1.0, %v15223_v30 }
 0x2cd   : > { %v4128_v59 = vadd.f32 %v12219_v42, %v3824_v25  ;;  %v6626_v7 = vsel %vm4240_vm12, 1.0, %v15223_v30  ;;  %v4130_v6 = vadd.f32 %v12237_v2, %v3826_v1  ;;  %7184 = vset.pattern.permute.xlu1 %v15538_v40  ;;  %vm4848_vm2 = vcmp.eq.s32.totalorder %v12151_v18, %v7681_v37 }
 0x2ce   : > { %v6628_v44 = vsel %vm4242_vm1, 1.0, %v15223_v30  ;;  %v4127_v28 = vadd.f32 %v12216_v4, %v3823_v57  ;;  %v3825_v42 = vadd.f32 %v12181_v0, %v12386_v29  ;;  %3914 = vperm.xlu1 %7184, %v12263_v41   ;;  %vm4246_vm12 = vcmp.eq.s32.totalorder %v15910_v12, %v7688_v39 }
 0x2cf   : > { %v4432_v2 = vadd.f32 %v6626_v7, %v4128_v59  ;;  %v4434_v23 = vadd.f32 %v6628_v44, %v4130_v6  ;;  %vm4850_vm3 = vcmp.eq.s32.totalorder %v12151_v18, %v7688_v39  ;;  %v6625_v4 = vsel %vm4239_vm4, 1.0, %v15223_v30  ;;  %v12716_v5 = vpop.permute.xlu1 %3899  ;;  %v15911_v59 = vld [vmem:[#allocation10_spill] sm:$0xff]  ;;  %v15912_v7 = vld [vmem:[#allocation99_spill] sm:$0xff] }
 0x2d0   : > { %v6691_v0 = vsel %vm4545_vm15, 1.0, %v15223_v30  ;;  %v4431_v29 = vadd.f32 %v6625_v4, %v4127_v28  ;;  %vm4847_vm1 = vcmp.eq.s32.totalorder %v12151_v18, %v7672_v34  ;;  %v4129_v27 = vadd.f32 %v12228_v43, %v3825_v42  ;;  %v15913_v44 = vld [vmem:[#allocation55_spill] sm:$0xff]  ;;  %v15914_v28 = vld [vmem:[#allocation100_spill] sm:$0xff] }
 0x2d1   : > { %vm4243_vm5 = vcmp.eq.s32.totalorder %v15910_v12, %v7672_v34  ;;  %v4736_v45 = vadd.f32 %v6690_v16, %v4432_v2  ;;  %v6754_v19 = vsel %vm4848_vm2, 1.0, %v15223_v30  ;;  %v4738_v63 = vadd.f32 %v6692_v15, %v4434_v23  ;;  %v15915_v2 = vld [vmem:[#allocation64_spill] sm:$0xff]  ;;  %v15916_v23 = vld [vmem:[#allocation101_spill] sm:$0xff] }
 0x2d2   : > { %v6627_v24 = vsel %vm4241_vm6, 1.0, %v15223_v30  ;;  %v6756_v17 = vsel %vm4850_vm3, 1.0, %v15223_v30  ;;  %v4735_v21 = vadd.f32 %v6689_v26, %v4431_v29  ;;  %vm4849_vm4 = vcmp.eq.s32.totalorder %v12151_v18, %v7684_v38  ;;  %7185 = vset.pattern.permute.xlu1 %v15636_v53 }
 0x2d3   : > { %v4433_v25 = vadd.f32 %v6627_v24, %v4129_v27  ;;  %vm2765_vm8 = vcmp.eq.s32.totalorder %v12411_v33, %v7684_v38  ;;  %v5040_v43 = vadd.f32 %v6754_v19, %v4736_v45  ;;  %v5042_v1 = vadd.f32 %v6756_v17, %v4738_v63  ;;  %4519 = vperm.xlu1 %7185, %v12148_v47  }
 0x2d4   : > { %v6753_v16 = vsel %vm4847_vm1, 1.0, %v15223_v30  ;;  %vm4245_vm9 = vcmp.eq.s32.totalorder %v15910_v12, %v7684_v38  ;;  %vm2766_vm6 = vcmp.eq.s32.totalorder %v12411_v33, %v7688_v39  ;;  %v6349_v26 = vsel %vm2763_vm13, 1.0, %v15223_v30  ;;  %v12779_v63 = vpop.permute.xlu1 %2993 }
 0x2d5   : > { %v5039_v57 = vadd.f32 %v6753_v16, %v4735_v21  ;;  %v4737_v15 = vadd.f32 %v6691_v0, %v4433_v25  ;;  %v2652_v6 = vadd.f32 %v15912_v7, %v15911_v59  ;;  %vm3639_vm10 = vcmp.eq.s32.totalorder %v12109_v58, %v7672_v34  ;;  %5232 = vmatprep.mubr.f32.mxu0 %v5040_v43  ;;  %v15918_v21 = vld [vmem:[#allocation148_spill] sm:$0xff]  ;;  %v15919_v25 = vld [vmem:[#allocation113_spill] sm:$0xff]  ;;  %v15920_v16 = vld [vmem:[#allocation47_spill] sm:$0xff] }
 0x2d6   : > { %vm3640_vm7 = vcmp.eq.s32.totalorder %v12109_v58, %v7681_v37  ;;  %5377 = vmatprep.mubr.f32.mxu1 %v5042_v1  ;;  %v6755_v47 = vsel %vm4849_vm4, 1.0, %v15223_v30  ;;  %v12738_v42 = vadd.f32 %v15914_v28, %v15913_v44  ;;  %v12742_v4 = vadd.f32 %v15916_v23, %v15915_v2  ;;  %v15922_v44 = vld [vmem:[#allocation121_spill] sm:$0xff] }
 0x2d7   : > { %vm3642_vm11 = vcmp.eq.s32.totalorder %v12109_v58, %v7688_v39  ;;  %5233 = vmatmul.mubr.f32.gmra.mrb[2].mxu0 %v5039_v57  ;;  %v5041_v0 = vadd.f32 %v6755_v47, %v4737_v15  ;;  %v6350_v29 = vsel %vm2764_vm14, 1.0, %v15223_v30  ;;  %v6351_v18 = vsel %vm2765_vm8, 1.0, %v15223_v30  ;;  %7187 = vset.pattern.permute.xlu1 %v15809_v13 }
 0x2d8   : > { %v6352_v27 = vsel %vm2766_vm6, 1.0, %v15223_v30  ;;  %v12759_v45 = vadd.f32 %v6349_v26, %v12647_v22  ;;  %vm3680_vm13 = vcmp.eq.s32.totalorder %v12049_v10, %v7681_v37  ;;  %vm3641_vm14 = vcmp.eq.s32.totalorder %v12109_v58, %v7684_v38  ;;  %3613 = vperm.xlu1 %7187, %v12509_v14  }
 0x2d9   : > { %v6505_v19 = vsel %vm3639_vm10, 1.0, %v15223_v30  ;;  %v6506_v33 = vsel %vm3640_vm7, 1.0, %v15223_v30  ;;  %5378 = vmatmul.mubr.f32.gmra.mrb[2].mxu1 %v5041_v0  ;;  %v6630_v22 = vsel %vm4244_vm0, 1.0, %v15223_v30  ;;  %v6508_v24 = vsel %vm3642_vm11, 1.0, %v15223_v30 }
 0x2da   : > { %15917 = vst [vmem:[#allocation51_spill] sm:$0xff] %v12759_v45  ;;  %v4132_v17 = vadd.f32 %v12549_v54, %v12368_v51  ;;  %vm4548_vm15 = vcmp.eq.s32.totalorder %v15918_v21, %v7681_v37  ;;  %vm4852_vm2 = vcmp.eq.s32.totalorder %v15919_v25, %v7681_v37  ;;  %v4134_v26 = vadd.f32 %v12616_v46, %v15920_v16  ;;  %v15921_v51 = vld [vmem:[#allocation72_spill] sm:$0xff] }
 0x2db   : > { %v6694_v43 = vsel %vm4548_vm15, 1.0, %v15223_v30  ;;  %v6758_v1 = vsel %vm4852_vm2, 1.0, %v15223_v30  ;;  %v6632_v57 = vsel %vm4246_vm12, 1.0, %v15223_v30  ;;  %vm4550_vm0 = vcmp.eq.s32.totalorder %v15918_v21, %v7688_v39  ;;  %v15976_v45 = vld [vmem:[#allocation80_spill] sm:$0xff] }
 0x2dc   : > { %v4436_v15 = vadd.f32 %v6630_v22, %v4132_v17  ;;  %vm4854_vm3 = vcmp.eq.s32.totalorder %v15919_v25, %v7688_v39  ;;  %v4131_v54 = vadd.f32 %v12546_v35, %v15921_v51  ;;  %v4438_v59 = vadd.f32 %v6632_v57, %v4134_v26  ;;  %7188 = vset.pattern.permute.xlu1 %v15669_v3  ;;  %v12819_v35 = vpop.permute.xlu1 %3598  ;;  %v15923_v17 = vld [vmem:[#allocation49_spill] sm:$0xff] }
 0x2dd   : > { %v6696_v7 = vsel %vm4550_vm0, 1.0, %v15223_v30  ;;  %v6760_v46 = vsel %vm4854_vm3, 1.0, %v15223_v30  ;;  %v6629_v47 = vsel %vm4243_vm5, 1.0, %v15223_v30  ;;  %vm4856_vm12 = vcmp.eq.s32.totalorder %v15922_v44, %v7681_v37  ;;  %4218 = vperm.xlu1 %7188, %v12263_v41  }
 0x2de   : > { %v4740_v28 = vadd.f32 %v6694_v43, %v4436_v15  ;;  %v4435_v2 = vadd.f32 %v6629_v47, %v4131_v54  ;;  %vm4547_vm1 = vcmp.eq.s32.totalorder %v15918_v21, %v7672_v34  ;;  %vm4851_vm4 = vcmp.eq.s32.totalorder %v15919_v25, %v7672_v34 }
 0x2df   : > { %vm4858_vm5 = vcmp.eq.s32.totalorder %v15922_v44, %v7688_v39  ;;  %v4742_v23 = vadd.f32 %v6696_v7, %v4438_v59  ;;  %v6693_v0 = vsel %vm4547_vm1, 1.0, %v15223_v30  ;;  %v6757_v22 = vsel %vm4851_vm4, 1.0, %v15223_v30 }
 0x2e0   : > { %v4133_v43 = vadd.f32 %v12559_v20, %v15923_v17  ;;  %v5044_v16 = vadd.f32 %v6758_v1, %v4740_v28  ;;  %v4739_v26 = vadd.f32 %v6693_v0, %v4435_v2  ;;  %v6631_v57 = vsel %vm4245_vm9, 1.0, %v15223_v30  ;;  %v15932_v28 = vld [vmem:[#allocation102_spill] sm:$0xff]  ;;  %v15937_v0 = vld [vmem:[#allocation104_spill] sm:$0xff]  ;;  %v15939_v17 = vld [vmem:[#allocation109_spill] sm:$0xff] }
 0x2e1   : > { %vm4549_vm8 = vcmp.eq.s32.totalorder %v15918_v21, %v7684_v38  ;;  %vm4855_vm6 = vcmp.eq.s32.totalorder %v15922_v44, %v7672_v34  ;;  %v5046_v15 = vadd.f32 %v6760_v46, %v4742_v23  ;;  %vm4853_vm10 = vcmp.eq.s32.totalorder %v15919_v25, %v7684_v38  ;;  %v12855_v25 = vpop.permute.xlu1 %4808  ;;  %v15936_v23 = vld [vmem:[#allocation33_spill] sm:$0xff] }
 0x2e2   : > { %v4437_v51 = vadd.f32 %v6631_v57, %v4133_v43  ;;  %v6695_v54 = vsel %vm4549_vm8, 1.0, %v15223_v30  ;;  %v12838_v20 = vadd.f32 %v6350_v29, %v2652_v6  ;;  %v6507_v12 = vsel %vm3641_vm14, 1.0, %v15223_v30  ;;  %5237 = vmatprep.mubr.f32.mxu0 %v5044_v16  ;;  %v15940_v43 = vld [vmem:[#allocation87_spill] sm:$0xff] }
 0x2e3   : > { %v5043_v21 = vadd.f32 %v6757_v22, %v4739_v26  ;;  %v6759_v1 = vsel %vm4853_vm10, 1.0, %v15223_v30  ;;  %v15925_v59 = vmov 10   ;;  %vm4857_vm9 = vcmp.eq.s32.totalorder %v15922_v44, %v7684_v38  ;;  %5382 = vmatprep.mubr.f32.mxu1 %v5046_v15  ;;  %v15941_v15 = vld [vmem:[#allocation89_spill] sm:$0xff] }
 0x2e4   : > { %15924 = vst [vmem:[#allocation84_spill] sm:$0xff] %v12838_v20  ;;  %7190 = vset.pattern.permute.xlu1 %v15925_v59  ;;  %v12849_v7 = vadd.f32 %v6351_v18, %v12738_v42  ;;  %v12852_v6 = vadd.f32 %v6352_v27, %v12742_v4  ;;  %v3832_v29 = vadd.f32 %v6506_v33, %v12478_v36  ;;  %v12861_v46 = vsel %vm3680_vm13, 1.0, %v15223_v30  ;;  %v15929_v18 = vld [vmem:[#allocation16_spill] sm:$0xff]  ;;  %v15930_v36 = vld [vmem:[#allocation111_spill] sm:$0xff]  ;;  %v15931_v33 = vld [vmem:[#allocation46_spill] sm:$0xff] }
 0x2e5   : > { %v4741_v58 = vadd.f32 %v6695_v54, %v4437_v51  ;;  %15928 = vst [vmem:[#allocation45_spill] sm:$0xff] %v12861_v46  ;;  %v3831_v47 = vadd.f32 %v6505_v19, %v12475_v9  ;;  %v3834_v42 = vadd.f32 %v6508_v24, %v12484_v49  ;;  %vm4248_vm7 = vcmp.eq.s32.totalorder %v15929_v18, %v7681_v37  ;;  %v12868_v4 = vld [vmem:[%s7530_s29 + $0x60] sm:$0xff]  ;;  %v15933_v19 = vld [vmem:[#allocation53_spill] sm:$0xff]  ;;  %v15934_v49 = vld [vmem:[#allocation103_spill] sm:$0xff] }
 0x2e6   : > { %15926 = vst [vmem:[#allocation57_spill] sm:$0xff] %v12849_v7  ;;  %15927 = vst [vmem:[#allocation85_spill] sm:$0xff] %v12852_v6  ;;  %5238 = vmatmul.mubr.f32.gmra.mrb[4].mxu0 %v5043_v21  ;;  %3312 = vperm.xlu1 %7190, %v12868_v4   ;;  %v3833_v27 = vadd.f32 %v6507_v12, %v15930_v36  ;;  %v12874_v2 = vadd.f32 %v15932_v28, %v15931_v33  ;;  %v6634_v26 = vsel %vm4248_vm7, 1.0, %v15223_v30  ;;  %v15966_v46 = vld [vmem:[#allocation50_spill] sm:$0xff]  ;;  %v15972_v7 = vld [vmem:[#allocation117_spill] sm:$0xff] }
 0x2e7   : > { %vm4250_vm11 = vcmp.eq.s32.totalorder %v15929_v18, %v7688_v39  ;;  %v5045_v9 = vadd.f32 %v6759_v1, %v4741_v58  ;;  %v12880_v24 = vadd.f32 %v15934_v49, %v15933_v19  ;;  %v12884_v22 = vadd.f32 %v15937_v0, %v15936_v23  ;;  %v15943_v49 = vld [vmem:[#allocation88_spill] sm:$0xff] }
 0x2e8   : > { %vm2771_vm13 = vcmp.eq.s32.totalorder %v15939_v17, %v7672_v34  ;;  %vm4247_vm14 = vcmp.eq.s32.totalorder %v15929_v18, %v7672_v34  ;;  %vm4249_vm15 = vcmp.eq.s32.totalorder %v15929_v18, %v7684_v38  ;;  %v4136_v16 = vadd.f32 %v15940_v43, %v3832_v29  ;;  %v15942_v29 = vld [vmem:[#allocation86_spill] sm:$0xff] }
 0x2e9   : > { %15935 = vst [vmem:[#allocation90_spill] sm:$0xff] %v12880_v24  ;;  %15938 = vst [vmem:[#allocation36_spill] sm:$0xff] %v12884_v22  ;;  %5383 = vmatmul.mubr.f32.gmra.mrb[4].mxu1 %v5045_v9  ;;  %vm4552_vm2 = vcmp.eq.s32.totalorder %v12512_v50, %v7681_v37  ;;  %v4138_v51 = vadd.f32 %v15941_v15, %v3834_v42  ;;  %v6636_v54 = vsel %vm4250_vm11, 1.0, %v15223_v30  ;;  %v6762_v21 = vsel %vm4856_vm12, 1.0, %v15223_v30  ;;  %v12909_v42 = vpop.permute.xlu1 %3297  ;;  %v15978_v22 = vld [vmem:[#allocation141_spill] sm:$0xff]  ;;  %v15979_v24 = vld [vmem:[#allocation143_spill] sm:$0xff] }
 0x2ea   : > { %v6698_v57 = vsel %vm4552_vm2, 1.0, %v15223_v30  ;;  %vm4554_vm0 = vcmp.eq.s32.totalorder %v12512_v50, %v7688_v39  ;;  %7191 = vset.pattern.permute.xlu1 %v15538_v40  ;;  %v4440_v12 = vadd.f32 %v6634_v26, %v4136_v16  ;;  %v4135_v58 = vadd.f32 %v15942_v29, %v3831_v47 }
 0x2eb   : > { %v6700_v1 = vsel %vm4554_vm0, 1.0, %v15223_v30  ;;  %3917 = vperm.xlu1 %7191, %v12509_v14   ;;  %v4442_v36 = vadd.f32 %v6636_v54, %v4138_v51  ;;  %v6764_v33 = vsel %vm4858_vm5, 1.0, %v15223_v30  ;;  %v6633_v28 = vsel %vm4247_vm14, 1.0, %v15223_v30 }
 0x2ec   : > { %vm4551_vm3 = vcmp.eq.s32.totalorder %v12512_v50, %v7672_v34  ;;  %v4744_v9 = vadd.f32 %v6698_v57, %v4440_v12  ;;  %v4439_v47 = vadd.f32 %v6633_v28, %v4135_v58  ;;  %v4137_v23 = vadd.f32 %v15943_v49, %v3833_v27  ;;  %v15945_v12 = vld [vmem:[#allocation65_spill] sm:$0xff]  ;;  %v15949_v28 = vld [vmem:[#allocation71_spill] sm:$0xff] }
 0x2ed   : > { %v6697_v19 = vsel %vm4551_vm3, 1.0, %v15223_v30  ;;  %v4746_v0 = vadd.f32 %v6700_v1, %v4442_v36  ;;  %v6761_v43 = vsel %vm4855_vm6, 1.0, %v15223_v30  ;;  %v6635_v16 = vsel %vm4249_vm15, 1.0, %v15223_v30  ;;  %v12953_v36 = vpop.permute.xlu1 %4507 }
 0x2ee   : > { %vm4553_vm12 = vcmp.eq.s32.totalorder %v12512_v50, %v7684_v38  ;;  %v5048_v26 = vadd.f32 %v6762_v21, %v4744_v9  ;;  %v4743_v57 = vadd.f32 %v6697_v19, %v4439_v47  ;;  %v4441_v15 = vadd.f32 %v6635_v16, %v4137_v23  ;;  %v12944_v50 = vld [vmem:[%s7530_s29 + $0x68] sm:$0xff] }
 0x2ef   : > { %v6699_v51 = vsel %vm4553_vm12, 1.0, %v15223_v30  ;;  %v15944_v27 = vmov 9   ;;  %vm2772_vm1 = vcmp.eq.s32.totalorder %v15939_v17, %v7681_v37  ;;  %vm2773_vm4 = vcmp.eq.s32.totalorder %v15939_v17, %v7684_v38  ;;  %v15946_v21 = vld [vmem:[#allocation105_spill] sm:$0xff] }
 0x2f0   : > { %7192 = vset.pattern.permute.xlu1 %v15944_v27  ;;  %v5050_v54 = vadd.f32 %v6764_v33, %v4746_v0  ;;  %v6763_v18 = vsel %vm4857_vm9, 1.0, %v15223_v30  ;;  %v12949_v1 = vadd.f32 %v15946_v21, %v15945_v12  ;;  %vm2774_vm5 = vcmp.eq.s32.totalorder %v15939_v17, %v7688_v39  ;;  %5242 = vmatprep.mubr.f32.mxu0 %v5048_v26  ;;  %v15948_v33 = vld [vmem:[#allocation144_spill] sm:$0xff]  ;;  %v15954_v16 = vld [vmem:[#allocation21_spill] sm:$0xff]  ;;  %v15960_v12 = vld [vmem:[#allocation26_spill] sm:$0xff] }
 0x2f1   : > { %3011 = vperm.xlu1 %7192, %v12944_v50   ;;  %v5047_v29 = vadd.f32 %v6761_v43, %v4743_v57  ;;  %v4745_v58 = vadd.f32 %v6699_v51, %v4441_v15  ;;  %v6357_v44 = vsel %vm2771_vm13, 1.0, %v15223_v30  ;;  %vm3339_vm8 = vcmp.eq.s32.totalorder %v15948_v33, %v7672_v34  ;;  %v15955_v26 = vld [vmem:[#allocation44_spill] sm:$0xff]  ;;  %v15957_v15 = vld [vmem:[#allocation27_spill] sm:$0xff]  ;;  %v15958_v51 = vld [vmem:[#allocation77_spill] sm:$0xff] }
 0x2f2   : > { %15947 = vst [vmem:[#allocation91_spill] sm:$0xff] %v12949_v1  ;;  %vm3340_vm6 = vcmp.eq.s32.totalorder %v15948_v33, %v7681_v37  ;;  %vm3039_vm10 = vcmp.eq.s32.totalorder %v15949_v28, %v7672_v34  ;;  %5387 = vmatprep.mubr.f32.mxu1 %v5050_v54  ;;  %v12969_v9 = vsel %vm2772_vm1, 1.0, %v15223_v30  ;;  %v12975_v47 = vsel %vm2773_vm4, 1.0, %v15223_v30  ;;  %v15961_v21 = vld [vmem:[#allocation78_spill] sm:$0xff] }
 0x2f3   : > { %15950 = vst [vmem:[#allocation40_spill] sm:$0xff] %v12969_v9  ;;  %15951 = vst [vmem:[#allocation92_spill] sm:$0xff] %v12975_v47  ;;  %vm3040_vm9 = vcmp.eq.s32.totalorder %v15949_v28, %v7681_v37  ;;  %5243 = vmatmul.mubr.f32.gmra.mrb[6].mxu0 %v5047_v29  ;;  %v5049_v19 = vadd.f32 %v6763_v18, %v4745_v58  ;;  %v12980_v49 = vsel %vm2774_vm5, 1.0, %v15223_v30  ;;  %v6445_v17 = vsel %vm3339_vm8, 1.0, %v15223_v30 }
 0x2f4   : > { %15952 = vst [vmem:[#allocation130_spill] sm:$0xff] %v12980_v49  ;;  %vm3341_vm7 = vcmp.eq.s32.totalorder %v15948_v33, %v7684_v38  ;;  %vm3041_vm11 = vcmp.eq.s32.totalorder %v15949_v28, %v7684_v38  ;;  %vm3042_vm13 = vcmp.eq.s32.totalorder %v15949_v28, %v7688_v39  ;;  %vm3342_vm14 = vcmp.eq.s32.totalorder %v15948_v33, %v7688_v39  ;;  %v13017_v33 = vpop.permute.xlu1 %2996 }
 0x2f5   : > { %7193 = vset.pattern.permute.xlu1 %v15809_v13  ;;  %v6446_v23 = vsel %vm3340_vm6, 1.0, %v15223_v30  ;;  %v6385_v0 = vsel %vm3039_vm10, 1.0, %v15223_v30  ;;  %5388 = vmatmul.mubr.f32.gmra.mrb[6].mxu1 %v5049_v19  ;;  %v12996_v43 = vadd.f32 %v6357_v44, %v12874_v2  ;;  %v13000_v57 = vadd.f32 %v15955_v26, %v15954_v16  ;;  %v15963_v26 = vld [vmem:[#allocation19_spill] sm:$0xff] }
 0x2f6   : > { %3616 = vperm.xlu1 %7193, %v12868_v4   ;;  %v13004_v54 = vadd.f32 %v15958_v51, %v15957_v15  ;;  %v6386_v18 = vsel %vm3040_vm9, 1.0, %v15223_v30  ;;  %v13012_v29 = vadd.f32 %v15961_v21, %v15960_v12  ;;  %v6447_v2 = vsel %vm3341_vm7, 1.0, %v15223_v30  ;;  %v15964_v51 = vld [vmem:[#allocation15_spill] sm:$0xff]  ;;  %v15965_v21 = vld [vmem:[#allocation110_spill] sm:$0xff] }
 0x2f7   : > { %15953 = vst [vmem:[#allocation131_spill] sm:$0xff] %v12996_v43  ;;  %15956 = vst [vmem:[#allocation132_spill] sm:$0xff] %v13000_v57  ;;  %v6387_v58 = vsel %vm3041_vm11, 1.0, %v15223_v30  ;;  %v6388_v44 = vsel %vm3042_vm13, 1.0, %v15223_v30  ;;  %v6448_v19 = vsel %vm3342_vm14, 1.0, %v15223_v30  ;;  %v13021_v16 = vadd.f32 %v6445_v17, %v12628_v62  ;;  %v15967_v62 = vld [vmem:[#allocation66_spill] sm:$0xff] }
 0x2f8   : > { %15959 = vst [vmem:[#allocation58_spill] sm:$0xff] %v13004_v54  ;;  %15962 = vst [vmem:[#allocation93_spill] sm:$0xff] %v13012_v29  ;;  %v13024_v28 = vadd.f32 %v6446_v23, %v12636_v52  ;;  %v3231_v15 = vadd.f32 %v6385_v0, %v15963_v26  ;;  %v3232_v12 = vadd.f32 %v6386_v18, %v15964_v51  ;;  %v15968_v43 = vld [vmem:[#allocation67_spill] sm:$0xff]  ;;  %v4505_v18 = vpop.permute.xlu0 %4504  ;;  %v13065_v51 = vpop.permute.xlu1 %4206 }
 0x2f9   : > { %vm3947_vm15 = vcmp.eq.s32.totalorder %v15965_v21, %v7672_v34  ;;  %vm3647_vm2 = vcmp.eq.s32.totalorder %v15966_v46, %v7672_v34  ;;  %vm3648_vm0 = vcmp.eq.s32.totalorder %v15966_v46, %v7681_v37  ;;  %v3233_v17 = vadd.f32 %v6387_v58, %v15967_v62  ;;  %v15971_v62 = vld [vmem:[#allocation116_spill] sm:$0xff] }
 0x2fa   : > { %7194 = vset.pattern.permute.xlu1 %v15644_v60  ;;  %v3234_v52 = vadd.f32 %v6388_v44, %v15968_v43  ;;  %vm3948_vm3 = vcmp.eq.s32.totalorder %v15965_v21, %v7681_v37  ;;  %vm3649_vm12 = vcmp.eq.s32.totalorder %v15966_v46, %v7684_v38  ;;  %v13043_v23 = vadd.f32 %v6447_v2, %v12639_v32  ;;  %v15969_v2 = vld [vmem:[#allocation114_spill] sm:$0xff]  ;;  %v15970_v44 = vld [vmem:[#allocation115_spill] sm:$0xff] }
 0x2fb   : > { %4826 = vperm.xlu1 %7194, %v12263_v41   ;;  %v13046_v0 = vadd.f32 %v6448_v19, %v12642_v8  ;;  %vm3949_vm1 = vcmp.eq.s32.totalorder %v15965_v21, %v7684_v38  ;;  %vm3950_vm4 = vcmp.eq.s32.totalorder %v15965_v21, %v7688_v39  ;;  %v13053_v43 = vsel %vm3947_vm15, 1.0, %v15223_v30 }
 0x2fc   : > { %vm3650_vm5 = vcmp.eq.s32.totalorder %v15966_v46, %v7688_v39  ;;  %v6513_v41 = vsel %vm3647_vm2, 1.0, %v15223_v30  ;;  %v6514_v32 = vsel %vm3648_vm0, 1.0, %v15223_v30  ;;  %v13060_v8 = vsel %vm3948_vm3, 1.0, %v15223_v30 }
 0x2fd   : > { %v3535_v58 = vadd.f32 %v15969_v2, %v3231_v15  ;;  %v3536_v19 = vadd.f32 %v15970_v44, %v3232_v12  ;;  %v6515_v26 = vsel %vm3649_vm12, 1.0, %v15223_v30  ;;  %v13068_v21 = vsel %vm3949_vm1, 1.0, %v15223_v30 }
 0x2fe   : > { %v13071_v46 = vsel %vm3950_vm4, 1.0, %v15223_v30  ;;  %v3537_v6 = vadd.f32 %v15971_v62, %v3233_v17  ;;  %v3538_v20 = vadd.f32 %v15972_v7, %v3234_v52  ;;  %v6516_v15 = vsel %vm3650_vm5, 1.0, %v15223_v30  ;;  %v4514_v7 = vpop.permute.xlu0 %4513  ;;  %v13103_v52 = vpop.permute.xlu1 %4811 }
 0x2ff   : > { %7195 = vset.pattern.permute.xlu1 %v15925_v59  ;;  %v13077_v2 = vadd.f32 %v6513_v41, %v3535_v58  ;;  %v13079_v12 = vadd.f32 %v6514_v32, %v3536_v19  ;;  %vm3347_vm8 = vcmp.eq.s32.totalorder %v12682_v55, %v7672_v34  ;;  %vm4555_vm6 = vcmp.eq.s32.totalorder %v4505_v18, %v7672_v34 }
 0x300   : > { %3315 = vperm.xlu1 %7195, %v12944_v50   ;;  %v13084_v44 = vadd.f32 %v6515_v26, %v3537_v6  ;;  %vm4556_vm10 = vcmp.eq.s32.totalorder %v4505_v18, %v7681_v37  ;;  %vm4557_vm9 = vcmp.eq.s32.totalorder %v4505_v18, %v7684_v38  ;;  %vm4558_vm7 = vcmp.eq.s32.totalorder %v4505_v18, %v7688_v39  ;;  %v15973_v26 = vld [vmem:[#allocation112_spill] sm:$0xff] }
 0x301   : > { %vm3348_vm11 = vcmp.eq.s32.totalorder %v12682_v55, %v7681_v37  ;;  %vm3349_vm13 = vcmp.eq.s32.totalorder %v12682_v55, %v7684_v38  ;;  %vm3350_vm14 = vcmp.eq.s32.totalorder %v12682_v55, %v7688_v39  ;;  %v13096_v6 = vadd.f32 %v6516_v15, %v3538_v20 }
 0x302   : > { %vm4251_vm15 = vcmp.eq.s32.totalorder %v12633_v61, %v7672_v34  ;;  %vm4252_vm2 = vcmp.eq.s32.totalorder %v12633_v61, %v7681_v37  ;;  %v6453_v17 = vsel %vm3347_vm8, 1.0, %v15223_v30  ;;  %vm4254_vm0 = vcmp.eq.s32.totalorder %v12633_v61, %v7688_v39  ;;  %v13140_v15 = vpop.permute.xlu0 %4522 }
 0x303   : > { %v13108_v41 = vsel %vm4555_vm6, 1.0, %v15223_v30  ;;  %v13111_v55 = vsel %vm4556_vm10, 1.0, %v15223_v30  ;;  %v13114_v20 = vsel %vm4557_vm9, 1.0, %v15223_v30  ;;  %vm4253_vm3 = vcmp.eq.s32.totalorder %v12633_v61, %v7684_v38  ;;  %15974 = vst [vmem:[#allocation133_spill] sm:$0xff] %v13140_v15 }
 0x304   : > { %7196 = vset.pattern.permute.xlu1 %v15636_v53  ;;  %v13120_v32 = vsel %vm4558_vm7, 1.0, %v15223_v30  ;;  %v6454_v18 = vsel %vm3348_vm11, 1.0, %v15223_v30  ;;  %v6455_v58 = vsel %vm3349_vm13, 1.0, %v15223_v30  ;;  %v6456_v19 = vsel %vm3350_vm14, 1.0, %v15223_v30 }
 0x305   : > { %4525 = vperm.xlu1 %7196, %v12509_v14   ;;  %v13127_v62 = vadd.f32 %v6453_v17, %v15973_v26  ;;  %vm3951_vm12 = vcmp.eq.s32.totalorder %v12716_v5, %v7672_v34  ;;  %vm3952_vm1 = vcmp.eq.s32.totalorder %v12716_v5, %v7681_v37  ;;  %vm3953_vm4 = vcmp.eq.s32.totalorder %v12716_v5, %v7684_v38  ;;  %v15975_v17 = vld [vmem:[#allocation23_spill] sm:$0xff] }
 0x306   : > { %vm3954_vm5 = vcmp.eq.s32.totalorder %v12716_v5, %v7688_v39  ;;  %vm4567_vm8 = vcmp.eq.s32.totalorder %v4514_v7, %v7672_v34  ;;  %vm4568_vm6 = vcmp.eq.s32.totalorder %v4514_v7, %v7681_v37  ;;  %vm4569_vm10 = vcmp.eq.s32.totalorder %v4514_v7, %v7684_v38  ;;  %v15977_v5 = vld [vmem:[#allocation28_spill] sm:$0xff]  ;;  %v13201_v10 = vpop.permute.xlu0 %4528 }
 0x307   : > { %v13143_v26 = vadd.f32 %v6454_v18, %v15975_v17  ;;  %v13146_v29 = vadd.f32 %v6455_v58, %v15976_v45  ;;  %vm4570_vm9 = vcmp.eq.s32.totalorder %v4514_v7, %v7688_v39  ;;  %vm3047_vm7 = vcmp.eq.s32.totalorder %v12779_v63, %v7672_v34  ;;  %v13164_v45 = vpop.permute.xlu1 %3905  ;;  %15980 = vst [vmem:[#allocation18_spill] sm:$0xff] %v13201_v10 }
 0x308   : > { %v13152_v54 = vadd.f32 %v6456_v19, %v15977_v5  ;;  %v13155_v57 = vsel %vm3951_vm12, 1.0, %v15223_v30  ;;  %v13158_v49 = vsel %vm3952_vm1, 1.0, %v15223_v30  ;;  %v13161_v18 = vsel %vm3953_vm4, 1.0, %v15223_v30  ;;  %v13179_v5 = vld [vmem:[%s7530_s29 + $0x70] sm:$0xff] }
 0x309   : > { %7197 = vset.pattern.permute.xlu1 %v15944_v27  ;;  %v13167_v7 = vsel %vm3954_vm5, 1.0, %v15223_v30  ;;  %v13170_v58 = vsel %vm4567_vm8, 1.0, %v15223_v30  ;;  %v13173_v19 = vsel %vm4568_vm6, 1.0, %v15223_v30  ;;  %v13176_v17 = vsel %vm4569_vm10, 1.0, %v15223_v30 }
 0x30a   : > { %3014 = vperm.xlu1 %7197, %v13179_v5   ;;  %v13183_v1 = vsel %vm4570_vm9, 1.0, %v15223_v30  ;;  %vm3048_vm11 = vcmp.eq.s32.totalorder %v12779_v63, %v7681_v37  ;;  %vm3049_vm13 = vcmp.eq.s32.totalorder %v12779_v63, %v7684_v38  ;;  %v6393_v47 = vsel %vm3047_vm7, 1.0, %v15223_v30 }
 0x30b   : > { %vm3651_vm14 = vcmp.eq.s32.totalorder %v12819_v35, %v7672_v34  ;;  %vm3652_vm12 = vcmp.eq.s32.totalorder %v12819_v35, %v7681_v37  ;;  %v3836_v9 = vadd.f32 %v15978_v22, %v13024_v28  ;;  %v3838_v15 = vadd.f32 %v15979_v24, %v13046_v0  ;;  %v15981_v22 = vld [vmem:[#allocation118_spill] sm:$0xff]  ;;  %v15982_v24 = vld [vmem:[#allocation48_spill] sm:$0xff] }
 0x30c   : > { %v6638_v11 = vsel %vm4252_vm2, 1.0, %v15223_v30  ;;  %vm4860_vm1 = vcmp.eq.s32.totalorder %v12855_v25, %v7681_v37  ;;  %v6640_v48 = vsel %vm4254_vm0, 1.0, %v15223_v30  ;;  %v3835_v28 = vadd.f32 %v15981_v22, %v13021_v16 }
 0x30d   : > { %vm4256_vm4 = vcmp.eq.s32.totalorder %v15982_v24, %v7681_v37  ;;  %v4140_v0 = vadd.f32 %v13060_v8, %v3836_v9  ;;  %v4142_v10 = vadd.f32 %v13071_v46, %v3838_v15  ;;  %vm4862_vm2 = vcmp.eq.s32.totalorder %v12855_v25, %v7688_v39  ;;  %v15983_v9 = vld [vmem:[#allocation142_spill] sm:$0xff]  ;;  %v13234_v46 = vpop.permute.xlu1 %4510 }
 0x30e   : > { %v6637_v31 = vsel %vm4251_vm15, 1.0, %v15223_v30  ;;  %7199 = vset.pattern.permute.xlu1 %v15669_v3  ;;  %vm3653_vm0 = vcmp.eq.s32.totalorder %v12819_v35, %v7684_v38  ;;  %v4139_v16 = vadd.f32 %v13053_v43, %v3835_v28  ;;  %vm4859_vm5 = vcmp.eq.s32.totalorder %v12855_v25, %v7672_v34 }
 0x30f   : > { %v3837_v8 = vadd.f32 %v15983_v9, %v13043_v23  ;;  %4224 = vperm.xlu1 %7199, %v12868_v4   ;;  %vm4258_vm15 = vcmp.eq.s32.totalorder %v15982_v24, %v7688_v39  ;;  %v4444_v15 = vadd.f32 %v6638_v11, %v4140_v0  ;;  %v6766_v22 = vsel %vm4860_vm1, 1.0, %v15223_v30 }
 0x310   : > { %v4446_v43 = vadd.f32 %v6640_v48, %v4142_v10  ;;  %v6639_v28 = vsel %vm4253_vm3, 1.0, %v15223_v30  ;;  %v6768_v23 = vsel %vm4862_vm2, 1.0, %v15223_v30  ;;  %v4443_v9 = vadd.f32 %v6637_v31, %v4139_v16 }
 0x311   : > { %v4141_v3 = vadd.f32 %v13068_v21, %v3837_v8  ;;  %vm4861_vm8 = vcmp.eq.s32.totalorder %v12855_v25, %v7684_v38  ;;  %vm4255_vm6 = vcmp.eq.s32.totalorder %v15982_v24, %v7672_v34  ;;  %vm3654_vm10 = vcmp.eq.s32.totalorder %v12819_v35, %v7688_v39  ;;  %v3903_v21 = vpop.permute.xlu0 %3902 }
 0x312   : > { %v4748_v10 = vadd.f32 %v13111_v55, %v4444_v15  ;;  %v4750_v11 = vadd.f32 %v13120_v32, %v4446_v43  ;;  %v6765_v31 = vsel %vm4859_vm5, 1.0, %v15223_v30  ;;  %v6394_v48 = vsel %vm3048_vm11, 1.0, %v15223_v30  ;;  %v13276_v15 = vpop.permute.xlu1 %3604 }
 0x313   : > { %v6517_v61 = vsel %vm3651_vm14, 1.0, %v15223_v30  ;;  %v4747_v55 = vadd.f32 %v13108_v41, %v4443_v9  ;;  %v4445_v0 = vadd.f32 %v6639_v28, %v4141_v3  ;;  %7200 = vset.pattern.permute.xlu1 %v15644_v60  ;;  %v6518_v25 = vsel %vm3652_vm12, 1.0, %v15223_v30  ;;  %v15984_v28 = vld [vmem:[#allocation32_spill] sm:$0xff] }
 0x314   : > { %v5052_v32 = vadd.f32 %v6766_v22, %v4748_v10  ;;  %v5054_v16 = vadd.f32 %v6768_v23, %v4750_v11  ;;  %v6767_v8 = vsel %vm4861_vm8, 1.0, %v15223_v30  ;;  %4829 = vperm.xlu1 %7200, %v12509_v14   ;;  %vm4257_vm3 = vcmp.eq.s32.totalorder %v15982_v24, %v7684_v38  ;;  %v15985_v23 = vld [vmem:[#allocation30_spill] sm:$0xff] }
 0x315   : > { %v6519_v3 = vsel %vm3653_vm0, 1.0, %v15223_v30  ;;  %v6520_v41 = vsel %vm3654_vm10, 1.0, %v15223_v30  ;;  %v5051_v22 = vadd.f32 %v6765_v31, %v4747_v55  ;;  %v4749_v43 = vadd.f32 %v13114_v20, %v4445_v0 }
 0x316   : > { %v13293_v14 = vsel %vm3049_vm13, 1.0, %v15223_v30  ;;  %vm3955_vm9 = vcmp.eq.s32.totalorder %v3903_v21, %v7672_v34  ;;  %vm3956_vm7 = vcmp.eq.s32.totalorder %v3903_v21, %v7681_v37  ;;  %vm3957_vm11 = vcmp.eq.s32.totalorder %v3903_v21, %v7684_v38  ;;  %5247 = vmatprep.mubr.f32.mxu0 %v5052_v32  ;;  %5392 = vmatprep.mubr.f32.mxu1 %v5054_v16 }
 0x317   : > { %v13299_v35 = vadd.f32 %v6393_v47, %v15984_v28  ;;  %v13302_v9 = vadd.f32 %v6394_v48, %v15985_v23  ;;  %vm3958_vm14 = vcmp.eq.s32.totalorder %v3903_v21, %v7688_v39  ;;  %5248 = vmatmul.mubr.f32.gmra.mrb[8].mxu0 %v5051_v22  ;;  %v5053_v20 = vadd.f32 %v6767_v8, %v4749_v43 }
 0x318   : > { %v3843_v10 = vadd.f32 %v6517_v61, %v13127_v62  ;;  %v3844_v11 = vadd.f32 %v6518_v25, %v13143_v26  ;;  %v3845_v31 = vadd.f32 %v6519_v3, %v13146_v29  ;;  %v3846_v55 = vadd.f32 %v6520_v41, %v13152_v54  ;;  %7202 = vset.pattern.permute.xlu1 %v15925_v59  ;;  %v13326_v29 = vpop.permute.xlu1 %4209 }
 0x319   : > { %vm3050_vm13 = vcmp.eq.s32.totalorder %v12779_v63, %v7688_v39  ;;  %v6581_v47 = vsel %vm3955_vm9, 1.0, %v15223_v30  ;;  %v6582_v48 = vsel %vm3956_vm7, 1.0, %v15223_v30  ;;  %v6583_v62 = vsel %vm3957_vm11, 1.0, %v15223_v30  ;;  %5393 = vmatmul.mubr.f32.gmra.mrb[8].mxu1 %v5053_v20  ;;  %3318 = vperm.xlu1 %7202, %v13179_v5  }
 0x31a   : > { %v6642_v54 = vsel %vm4256_vm4, 1.0, %v15223_v30  ;;  %v6584_v26 = vsel %vm3958_vm14, 1.0, %v15223_v30  ;;  %v4144_v61 = vadd.f32 %v13158_v49, %v13079_v12  ;;  %vm4560_vm12 = vcmp.eq.s32.totalorder %v12953_v36, %v7681_v37  ;;  %v15986_v49 = vld [vmem:[#allocation124_spill] sm:$0xff] }
 0x31b   : > { %vm4864_vm1 = vcmp.eq.s32.totalorder %v13103_v52, %v7681_v37  ;;  %v6706_v0 = vsel %vm4560_vm12, 1.0, %v15223_v30  ;;  %v4146_v32 = vadd.f32 %v13167_v7, %v13096_v6  ;;  %v6644_v21 = vsel %vm4258_vm15, 1.0, %v15223_v30 }
 0x31c   : > { %v6770_v25 = vsel %vm4864_vm1, 1.0, %v15223_v30  ;;  %vm4868_vm4 = vcmp.eq.s32.totalorder %v15986_v49, %v7681_v37  ;;  %v4448_v12 = vadd.f32 %v6642_v54, %v4144_v61  ;;  %vm4562_vm2 = vcmp.eq.s32.totalorder %v12953_v36, %v7688_v39  ;;  %v13371_v23 = vpop.permute.xlu1 %3303 }
 0x31d   : > { %vm4866_vm0 = vcmp.eq.s32.totalorder %v13103_v52, %v7688_v39  ;;  %v4143_v16 = vadd.f32 %v13155_v57, %v13077_v2  ;;  %v4450_v8 = vadd.f32 %v6644_v21, %v4146_v32  ;;  %v6708_v6 = vsel %vm4562_vm2, 1.0, %v15223_v30  ;;  %7203 = vset.pattern.permute.xlu1 %v15538_v40 }
 0x31e   : > { %v6772_v7 = vsel %vm4866_vm0, 1.0, %v15223_v30  ;;  %v6641_v3 = vsel %vm4255_vm6, 1.0, %v15223_v30  ;;  %vm4870_vm5 = vcmp.eq.s32.totalorder %v15986_v49, %v7688_v39  ;;  %v4752_v41 = vadd.f32 %v6706_v0, %v4448_v12  ;;  %3923 = vperm.xlu1 %7203, %v12944_v50  }
 0x31f   : > { %v4447_v22 = vadd.f32 %v6641_v3, %v4143_v16  ;;  %vm4559_vm15 = vcmp.eq.s32.totalorder %v12953_v36, %v7672_v34  ;;  %vm4863_vm8 = vcmp.eq.s32.totalorder %v13103_v52, %v7672_v34  ;;  %v4754_v57 = vadd.f32 %v6708_v6, %v4450_v8 }
 0x320   : > { %v6705_v2 = vsel %vm4559_vm15, 1.0, %v15223_v30  ;;  %v6769_v43 = vsel %vm4863_vm8, 1.0, %v15223_v30  ;;  %v4145_v28 = vadd.f32 %v13161_v18, %v13084_v44  ;;  %vm4867_vm6 = vcmp.eq.s32.totalorder %v15986_v49, %v7672_v34 }
 0x321   : > { %v5056_v20 = vadd.f32 %v6770_v25, %v4752_v41  ;;  %v4751_v54 = vadd.f32 %v6705_v2, %v4447_v22  ;;  %v6643_v61 = vsel %vm4257_vm3, 1.0, %v15223_v30  ;;  %vm4561_vm10 = vcmp.eq.s32.totalorder %v12953_v36, %v7684_v38 }
 0x322   : > { %v5058_v0 = vadd.f32 %v6772_v7, %v4754_v57  ;;  %v4449_v32 = vadd.f32 %v6643_v61, %v4145_v28  ;;  %v6707_v21 = vsel %vm4561_vm10, 1.0, %v15223_v30  ;;  %vm4865_vm9 = vcmp.eq.s32.totalorder %v13103_v52, %v7684_v38  ;;  %7205 = vset.pattern.permute.xlu1 %v15944_v27  ;;  %v13401_v27 = vld [vmem:[%s7530_s29 + $0x78] sm:$0xff] }
 0x323   : > { %vm4869_vm7 = vcmp.eq.s32.totalorder %v15986_v49, %v7684_v38  ;;  %v4147_v44 = vadd.f32 %v6581_v47, %v3843_v10  ;;  %v4148_v18 = vadd.f32 %v6582_v48, %v3844_v11  ;;  %5252 = vmatprep.mubr.f32.mxu0 %v5056_v20  ;;  %v5055_v25 = vadd.f32 %v6769_v43, %v4751_v54  ;;  %v13404_v10 = vpop.permute.xlu1 %3908  ;;  %v15987_v49 = vld [vmem:[#allocation68_spill] sm:$0xff] }
 0x324   : > { %v6771_v24 = vsel %vm4865_vm9, 1.0, %v15223_v30  ;;  %v4149_v36 = vadd.f32 %v6583_v62, %v3845_v31  ;;  %v4150_v12 = vadd.f32 %v6584_v26, %v3846_v55  ;;  %vm3351_vm3 = vcmp.eq.s32.totalorder %v12909_v42, %v7672_v34  ;;  %5397 = vmatprep.mubr.f32.mxu1 %v5058_v0  ;;  %3017 = vperm.xlu1 %7205, %v13401_v27  }
 0x325   : > { %v4753_v16 = vadd.f32 %v6707_v21, %v4449_v32  ;;  %v6396_v52 = vsel %vm3050_vm13, 1.0, %v15223_v30  ;;  %vm3352_vm11 = vcmp.eq.s32.totalorder %v12909_v42, %v7681_v37  ;;  %vm4260_vm14 = vcmp.eq.s32.totalorder %v13065_v51, %v7681_v37  ;;  %5253 = vmatmul.mubr.f32.gmra.mrb[10].mxu0 %v5055_v25 }
 0x326   : > { %vm4262_vm12 = vcmp.eq.s32.totalorder %v13065_v51, %v7688_v39  ;;  %vm3353_vm1 = vcmp.eq.s32.totalorder %v12909_v42, %v7684_v38  ;;  %vm3354_vm13 = vcmp.eq.s32.totalorder %v12909_v42, %v7688_v39  ;;  %vm3051_vm2 = vcmp.eq.s32.totalorder %v13017_v33, %v7672_v34 }
 0x327   : > { %v5057_v63 = vadd.f32 %v6771_v24, %v4753_v16  ;;  %vm3052_vm0 = vcmp.eq.s32.totalorder %v13017_v33, %v7681_v37  ;;  %vm3053_vm15 = vcmp.eq.s32.totalorder %v13017_v33, %v7684_v38  ;;  %vm4259_vm8 = vcmp.eq.s32.totalorder %v13065_v51, %v7672_v34  ;;  %v13444_v7 = vpop.permute.xlu1 %3002 }
 0x328   : > { %vm4261_vm10 = vcmp.eq.s32.totalorder %v13065_v51, %v7684_v38  ;;  %v6646_v11 = vsel %vm4260_vm14, 1.0, %v15223_v30  ;;  %vm4564_vm9 = vcmp.eq.s32.totalorder %v13234_v46, %v7681_v37  ;;  %v6774_v31 = vsel %vm4868_vm4, 1.0, %v15223_v30  ;;  %7206 = vset.pattern.permute.xlu1 %v15809_v13 }
 0x329   : > { %5398 = vmatmul.mubr.f32.gmra.mrb[10].mxu1 %v5057_v63  ;;  %v6648_v55 = vsel %vm4262_vm12, 1.0, %v15223_v30  ;;  %v4452_v47 = vadd.f32 %v6646_v11, %v4148_v18  ;;  %v6710_v48 = vsel %vm4564_vm9, 1.0, %v15223_v30  ;;  %vm4566_vm14 = vcmp.eq.s32.totalorder %v13234_v46, %v7688_v39  ;;  %3622 = vperm.xlu1 %7206, %v13179_v5  }
 0x32a   : > { %v4454_v62 = vadd.f32 %v6648_v55, %v4150_v12  ;;  %v6712_v26 = vsel %vm4566_vm14, 1.0, %v15223_v30  ;;  %v6776_v8 = vsel %vm4870_vm5, 1.0, %v15223_v30  ;;  %v6645_v6 = vsel %vm4259_vm8, 1.0, %v15223_v30  ;;  %v15988_v12 = vld [vmem:[#allocation69_spill] sm:$0xff] }
 0x32b   : > { %vm4563_vm4 = vcmp.eq.s32.totalorder %v13234_v46, %v7672_v34  ;;  %v4756_v3 = vadd.f32 %v6710_v48, %v4452_v47  ;;  %v4451_v22 = vadd.f32 %v6645_v6, %v4147_v44  ;;  %vm3054_vm12 = vcmp.eq.s32.totalorder %v13017_v33, %v7688_v39  ;;  %v13481_v24 = vpop.permute.xlu1 %3607  ;;  %v15989_v47 = vld [vmem:[#allocation81_spill] sm:$0xff] }
 0x32c   : > { %v4758_v41 = vadd.f32 %v6712_v26, %v4454_v62  ;;  %v6709_v57 = vsel %vm4563_vm4, 1.0, %v15223_v30  ;;  %v6773_v2 = vsel %vm4867_vm6, 1.0, %v15223_v30  ;;  %v6647_v43 = vsel %vm4261_vm10, 1.0, %v15223_v30  ;;  %v15990_v48 = vld [vmem:[#allocation29_spill] sm:$0xff] }
 0x32d   : > { %vm4565_vm5 = vcmp.eq.s32.totalorder %v13234_v46, %v7684_v38  ;;  %v5060_v28 = vadd.f32 %v6774_v31, %v4756_v3  ;;  %v4755_v54 = vadd.f32 %v6709_v57, %v4451_v22  ;;  %v4453_v61 = vadd.f32 %v6647_v43, %v4149_v36  ;;  %7207 = vset.pattern.permute.xlu1 %v15644_v60  ;;  %v15993_v22 = vld [vmem:[#allocation52_spill] sm:$0xff] }
 0x32e   : > { %v5062_v20 = vadd.f32 %v6776_v8, %v4758_v41  ;;  %v6457_v0 = vsel %vm3351_vm3, 1.0, %v15223_v30  ;;  %v6397_v32 = vsel %vm3051_vm2, 1.0, %v15223_v30  ;;  %v6711_v51 = vsel %vm4565_vm5, 1.0, %v15223_v30  ;;  %4832 = vperm.xlu1 %7207, %v12868_v4   ;;  %v15991_v4 = vld [vmem:[#allocation9_spill] sm:$0xff]  ;;  %v15992_v8 = vld [vmem:[#allocation82_spill] sm:$0xff] }
 0x32f   : > { %v6775_v46 = vsel %vm4869_vm7, 1.0, %v15223_v30  ;;  %v6398_v21 = vsel %vm3052_vm0, 1.0, %v15223_v30  ;;  %v6399_v44 = vsel %vm3053_vm15, 1.0, %v15223_v30  ;;  %5257 = vmatprep.mubr.f32.mxu0 %v5060_v28  ;;  %v5059_v18 = vadd.f32 %v6773_v2, %v4755_v54  ;;  %v13528_v41 = vpop.permute.xlu1 %4817  ;;  %v15994_v28 = vld [vmem:[#allocation41_spill] sm:$0xff] }
 0x330   : > { %5402 = vmatprep.mubr.f32.mxu1 %v5062_v20  ;;  %v4757_v25 = vadd.f32 %v6711_v51, %v4453_v61  ;;  %v3241_v36 = vadd.f32 %v13293_v14, %v15987_v49  ;;  %v3242_v16 = vadd.f32 %v6396_v52, %v15988_v12  ;;  %v6458_v63 = vsel %vm3352_vm11, 1.0, %v15223_v30  ;;  %v15995_v54 = vld [vmem:[#allocation25_spill] sm:$0xff] }
 0x331   : > { %v6400_v11 = vsel %vm3054_vm12, 1.0, %v15223_v30  ;;  %v6459_v31 = vsel %vm3353_vm1, 1.0, %v15223_v30  ;;  %v6460_v14 = vsel %vm3354_vm13, 1.0, %v15223_v30  ;;  %v13504_v52 = vadd.f32 %v6457_v0, %v13299_v35  ;;  %5258 = vmatmul.mubr.f32.gmra.mrb[12].mxu0 %v5059_v18  ;;  %v15996_v0 = vld [vmem:[#allocation24_spill] sm:$0xff] }
 0x332   : > { %v5061_v55 = vadd.f32 %v6775_v46, %v4757_v25  ;;  %v3243_v33 = vadd.f32 %v6397_v32, %v15989_v47  ;;  %v3244_v62 = vadd.f32 %v6398_v21, %v15990_v48  ;;  %v3245_v26 = vadd.f32 %v6399_v44, %v15991_v4  ;;  %7208 = vset.pattern.permute.xlu1 %v15925_v59 }
 0x333   : > { %vm3659_vm6 = vcmp.eq.s32.totalorder %v13276_v15, %v7672_v34  ;;  %v3246_v6 = vadd.f32 %v6400_v11, %v15992_v8  ;;  %vm3660_vm7 = vcmp.eq.s32.totalorder %v13276_v15, %v7681_v37  ;;  %vm3661_vm3 = vcmp.eq.s32.totalorder %v13276_v15, %v7684_v38  ;;  %3321 = vperm.xlu1 %7208, %v13401_v27   ;;  %v13573_v49 = vpop.permute.xlu1 %3306 }
 0x334   : > { %vm3662_vm11 = vcmp.eq.s32.totalorder %v13276_v15, %v7688_v39  ;;  %5403 = vmatmul.mubr.f32.gmra.mrb[12].mxu1 %v5061_v55  ;;  %v13519_v42 = vadd.f32 %v6458_v63, %v13302_v9  ;;  %v13521_v35 = vadd.f32 %v6459_v31, %v3241_v36  ;;  %v13523_v3 = vadd.f32 %v6460_v14, %v3242_v16 }
 0x335   : > { %vm3959_vm1 = vcmp.eq.s32.totalorder %v13164_v45, %v7672_v34  ;;  %vm3960_vm13 = vcmp.eq.s32.totalorder %v13164_v45, %v7681_v37  ;;  %vm3961_vm2 = vcmp.eq.s32.totalorder %v13164_v45, %v7684_v38  ;;  %vm3962_vm0 = vcmp.eq.s32.totalorder %v13164_v45, %v7688_v39 }
 0x336   : > { %v6525_v9 = vsel %vm3659_vm6, 1.0, %v15223_v30  ;;  %v3547_v57 = vadd.f32 %v15993_v22, %v3243_v33  ;;  %v6526_v59 = vsel %vm3660_vm7, 1.0, %v15223_v30  ;;  %v6527_v2 = vsel %vm3661_vm3, 1.0, %v15223_v30  ;;  %v15997_v33 = vld [vmem:[#allocation54_spill] sm:$0xff] }
 0x337   : > { %v6528_v45 = vsel %vm3662_vm11, 1.0, %v15223_v30  ;;  %v13552_v43 = vsel %vm3959_vm1, 1.0, %v15223_v30  ;;  %v3548_v20 = vadd.f32 %v15994_v28, %v3244_v62  ;;  %v3549_v61 = vadd.f32 %v15995_v54, %v3245_v26  ;;  %7210 = vset.pattern.permute.xlu1 %v15636_v53  ;;  %v15998_v62 = vld [vmem:[#allocation63_spill] sm:$0xff]  ;;  %v15999_v26 = vld [vmem:[#allocation137_spill] sm:$0xff] }
 0x338   : > { %v3550_v32 = vadd.f32 %v15996_v0, %v3246_v6  ;;  %v6586_v51 = vsel %vm3960_vm13, 1.0, %v15223_v30  ;;  %v13559_v46 = vsel %vm3961_vm2, 1.0, %v15223_v30  ;;  %v6588_v21 = vsel %vm3962_vm0, 1.0, %v15223_v30  ;;  %4531 = vperm.xlu1 %7210, %v12944_v50   ;;  %v13615_v11 = vpop.permute.xlu1 %4516 }
 0x339   : > { %v13562_v44 = vadd.f32 %v6525_v9, %v3547_v57  ;;  %v13564_v15 = vadd.f32 %v6526_v59, %v3548_v20  ;;  %v13566_v18 = vadd.f32 %v6527_v2, %v3549_v61  ;;  %vm4264_vm15 = vcmp.eq.s32.totalorder %v13326_v29, %v7681_v37  ;;  %v16000_v9 = vld [vmem:[#allocation146_spill] sm:$0xff]  ;;  %v16001_v57 = vld [vmem:[#allocation56_spill] sm:$0xff]  ;;  %v16003_v61 = vld [vmem:[#allocation147_spill] sm:$0xff] }
 0x33a   : > { %v13568_v25 = vadd.f32 %v6528_v45, %v3550_v32  ;;  %vm4263_vm8 = vcmp.eq.s32.totalorder %v13326_v29, %v7672_v34  ;;  %vm4265_vm10 = vcmp.eq.s32.totalorder %v13326_v29, %v7684_v38  ;;  %vm4266_vm9 = vcmp.eq.s32.totalorder %v13326_v29, %v7688_v39  ;;  %v16002_v45 = vld [vmem:[#allocation145_spill] sm:$0xff] }
 0x33b   : > { %vm3359_vm14 = vcmp.eq.s32.totalorder %v13371_v23, %v7672_v34  ;;  %vm3360_vm4 = vcmp.eq.s32.totalorder %v13371_v23, %v7681_v37  ;;  %vm3361_vm12 = vcmp.eq.s32.totalorder %v13371_v23, %v7684_v38  ;;  %vm3362_vm5 = vcmp.eq.s32.totalorder %v13371_v23, %v7688_v39 }
 0x33c   : > { %vm3963_vm6 = vcmp.eq.s32.totalorder %v13404_v10, %v7672_v34  ;;  %vm3964_vm7 = vcmp.eq.s32.totalorder %v13404_v10, %v7681_v37  ;;  %vm3965_vm3 = vcmp.eq.s32.totalorder %v13404_v10, %v7684_v38  ;;  %vm3059_vm11 = vcmp.eq.s32.totalorder %v13444_v7, %v7672_v34  ;;  %7211 = vset.pattern.permute.xlu1 %v15809_v13 }
 0x33d   : > { %v6650_v53 = vsel %vm4264_vm15, 1.0, %v15223_v30  ;;  %v6465_v36 = vsel %vm3359_vm14, 1.0, %v15223_v30  ;;  %vm3060_vm1 = vcmp.eq.s32.totalorder %v13444_v7, %v7681_v37  ;;  %vm3061_vm13 = vcmp.eq.s32.totalorder %v13444_v7, %v7684_v38  ;;  %3625 = vperm.xlu1 %7211, %v13401_v27  }
 0x33e   : > { %vm3062_vm2 = vcmp.eq.s32.totalorder %v13444_v7, %v7688_v39  ;;  %v6466_v23 = vsel %vm3360_vm4, 1.0, %v15223_v30  ;;  %v6467_v12 = vsel %vm3361_vm12, 1.0, %v15223_v30  ;;  %v13609_v16 = vsel %vm3362_vm5, 1.0, %v15223_v30 }
 0x33f   : > { %v13612_v63 = vsel %vm3963_vm6, 1.0, %v15223_v30  ;;  %v13618_v31 = vsel %vm3964_vm7, 1.0, %v15223_v30  ;;  %v13621_v14 = vsel %vm3965_vm3, 1.0, %v15223_v30  ;;  %v6405_v7 = vsel %vm3059_vm11, 1.0, %v15223_v30 }
 0x340   : > { %vm3663_vm0 = vcmp.eq.s32.totalorder %v13481_v24, %v7672_v34  ;;  %v13628_v55 = vsel %vm3060_vm1, 1.0, %v15223_v30  ;;  %v13631_v13 = vsel %vm3061_vm13, 1.0, %v15223_v30  ;;  %v13634_v47 = vsel %vm3062_vm2, 1.0, %v15223_v30 }
 0x341   : > { %v13637_v48 = vadd.f32 %v6465_v36, %v15997_v33  ;;  %v13640_v4 = vadd.f32 %v6466_v23, %v15998_v62  ;;  %v13643_v8 = vadd.f32 %v6467_v12, %v15999_v26  ;;  %vm3664_vm15 = vcmp.eq.s32.totalorder %v13481_v24, %v7681_v37  ;;  %7212 = vset.pattern.permute.xlu1 %v15644_v60 }
 0x342   : > { %vm3665_vm14 = vcmp.eq.s32.totalorder %v13481_v24, %v7684_v38  ;;  %vm3666_vm4 = vcmp.eq.s32.totalorder %v13481_v24, %v7688_v39  ;;  %v13652_v6 = vsel %vm3663_vm0, 1.0, %v15223_v30  ;;  %v3848_v22 = vadd.f32 %v16000_v9, %v13519_v42  ;;  %4835 = vperm.xlu1 %7212, %v12944_v50   ;;  %v3912_v9 = vpop.permute.xlu0 %3911 }
 0x343   : > { %v3850_v59 = vadd.f32 %v16001_v57, %v13523_v3  ;;  %vm3966_vm12 = vcmp.eq.s32.totalorder %v13404_v10, %v7688_v39  ;;  %vm4872_vm5 = vcmp.eq.s32.totalorder %v13528_v41, %v7681_v37  ;;  %vm4874_vm6 = vcmp.eq.s32.totalorder %v13528_v41, %v7688_v39  ;;  %v13671_v3 = vpop.permute.xlu1 %3005 }
 0x344   : > { %v6652_v2 = vsel %vm4266_vm9, 1.0, %v15223_v30  ;;  %v3847_v42 = vadd.f32 %v16002_v45, %v13504_v52  ;;  %v4152_v28 = vadd.f32 %v6586_v51, %v3848_v22  ;;  %v6649_v54 = vsel %vm4263_vm8, 1.0, %v15223_v30 }
 0x345   : > { %v4154_v20 = vadd.f32 %v6588_v21, %v3850_v59  ;;  %v3849_v0 = vadd.f32 %v16003_v61, %v13521_v35  ;;  %vm4871_vm9 = vcmp.eq.s32.totalorder %v13528_v41, %v7672_v34  ;;  %vm4873_vm7 = vcmp.eq.s32.totalorder %v13528_v41, %v7684_v38 }
 0x346   : > { %v4151_v52 = vadd.f32 %v13552_v43, %v3847_v42  ;;  %v6651_v32 = vsel %vm4265_vm10, 1.0, %v15223_v30  ;;  %vm3363_vm8 = vcmp.eq.s32.totalorder %v13573_v49, %v7672_v34  ;;  %v4456_v51 = vadd.f32 %v6650_v53, %v4152_v28  ;;  %7213 = vset.pattern.permute.xlu1 %v15538_v40  ;;  %v16006_v28 = vld [vmem:[#allocation43_spill] sm:$0xff] }
 0x347   : > { %v4458_v35 = vadd.f32 %v6652_v2, %v4154_v20  ;;  %v4153_v50 = vadd.f32 %v13559_v46, %v3849_v0  ;;  %vm3364_vm3 = vcmp.eq.s32.totalorder %v13573_v49, %v7681_v37  ;;  %v6778_v43 = vsel %vm4872_vm5, 1.0, %v15223_v30  ;;  %v13706_v12 = vpop.permute.xlu1 %4215  ;;  %3929 = vperm.xlu1 %7213, %v13401_v27  }
 0x348   : > { %v6780_v29 = vsel %vm4874_vm6, 1.0, %v15223_v30  ;;  %v4455_v21 = vadd.f32 %v6649_v54, %v4151_v52  ;;  %v4760_v36 = vadd.f32 %v13173_v19, %v4456_v51  ;;  %v6777_v46 = vsel %vm4871_vm9, 1.0, %v15223_v30  ;;  %v16007_v54 = vld [vmem:[#allocation13_spill] sm:$0xff] }
 0x349   : > { %v4762_v53 = vadd.f32 %v13183_v1, %v4458_v35  ;;  %v4457_v23 = vadd.f32 %v6651_v32, %v4153_v50  ;;  %vm3365_vm10 = vcmp.eq.s32.totalorder %v13573_v49, %v7684_v38  ;;  %vm3366_vm11 = vcmp.eq.s32.totalorder %v13573_v49, %v7688_v39  ;;  %v16005_v49 = vld [vmem:[#allocation83_spill] sm:$0xff] }
 0x34a   : > { %v4759_v33 = vadd.f32 %v13170_v58, %v4455_v21  ;;  %v6779_v1 = vsel %vm4873_vm7, 1.0, %v15223_v30  ;;  %v6530_v40 = vsel %vm3664_vm15, 1.0, %v15223_v30  ;;  %v5064_v19 = vadd.f32 %v6778_v43, %v4760_v36  ;;  %v16011_v21 = vld [vmem:[#allocation17_spill] sm:$0xff] }
 0x34b   : > { %v5066_v62 = vadd.f32 %v6780_v29, %v4762_v53  ;;  %v4761_v26 = vadd.f32 %v13176_v17, %v4457_v23  ;;  %v6531_v58 = vsel %vm3665_vm14, 1.0, %v15223_v30  ;;  %v3251_v41 = vadd.f32 %v6405_v7, %v12618_v56  ;;  %v16004_v56 = vld [vmem:[#allocation14_spill] sm:$0xff]  ;;  %v13753_v52 = vpop.permute.xlu1 %4820  ;;  %v16012_v53 = vld [vmem:[#allocation59_spill] sm:$0xff] }
 0x34c   : > { %v6469_v22 = vsel %vm3363_vm8, 1.0, %v15223_v30  ;;  %v5063_v57 = vadd.f32 %v6777_v46, %v4759_v33  ;;  %v6470_v59 = vsel %vm3364_vm3, 1.0, %v15223_v30  ;;  %v6471_v17 = vsel %vm3365_vm10, 1.0, %v15223_v30  ;;  %5262 = vmatprep.mubr.f32.mxu0 %v5064_v19  ;;  %v16013_v23 = vld [vmem:[#allocation34_spill] sm:$0xff] }
 0x34d   : > { %v6472_v2 = vsel %vm3366_vm11, 1.0, %v15223_v30  ;;  %5407 = vmatprep.mubr.f32.mxu1 %v5066_v62  ;;  %v5065_v45 = vadd.f32 %v6779_v1, %v4761_v26  ;;  %vm4268_vm1 = vcmp.eq.s32.totalorder %v16004_v56, %v7681_v37  ;;  %vm4270_vm13 = vcmp.eq.s32.totalorder %v16004_v56, %v7688_v39 }
 0x34e   : > { %v6532_v7 = vsel %vm3666_vm4, 1.0, %v15223_v30  ;;  %v3252_v42 = vadd.f32 %v13628_v55, %v16005_v49  ;;  %v3253_v20 = vadd.f32 %v13631_v13, %v16006_v28  ;;  %v3254_v61 = vadd.f32 %v13634_v47, %v16007_v54  ;;  %5263 = vmatmul.mubr.f32.gmra.mrb[14].mxu0 %v5063_v57  ;;  %v16009_v55 = vld [vmem:[#allocation138_spill] sm:$0xff] }
 0x34f   : > { %v16008_v0 = vmov 13   ;;  %vm4267_vm2 = vcmp.eq.s32.totalorder %v16004_v56, %v7672_v34  ;;  %v6592_v24 = vsel %vm3966_vm12, 1.0, %v15223_v30  ;;  %v3554_v32 = vadd.f32 %v13609_v16, %v16009_v55  ;;  %5408 = vmatmul.mubr.f32.gmra.mrb[14].mxu1 %v5065_v45 }
 0x350   : > { %7215 = vset.pattern.permute.xlu1 %v16008_v0  ;;  %vm3967_vm0 = vcmp.eq.s32.totalorder %v3912_v9, %v7672_v34  ;;  %vm3968_vm15 = vcmp.eq.s32.totalorder %v3912_v9, %v7681_v37  ;;  %vm4269_vm14 = vcmp.eq.s32.totalorder %v16004_v56, %v7684_v38  ;;  %v3555_v13 = vadd.f32 %v6469_v22, %v3251_v41  ;;  %v16014_v41 = vld [vmem:[#allocation12_spill] sm:$0xff] }
 0x351   : > { %4233 = vperm.xlu1 %7215, %v13401_v27   ;;  %v3556_v47 = vadd.f32 %v6470_v59, %v3252_v42  ;;  %v3557_v51 = vadd.f32 %v6471_v17, %v3253_v20  ;;  %v3558_v35 = vadd.f32 %v6472_v2, %v3254_v61  ;;  %v13770_v10 = vadd.f32 %v13652_v6, %v13637_v48  ;;  %v16016_v42 = vld [vmem:[#allocation108_spill] sm:$0xff] }
 0x352   : > { %v3856_v16 = vadd.f32 %v6530_v40, %v13640_v4  ;;  %v13774_v50 = vadd.f32 %v6531_v58, %v13643_v8  ;;  %v13776_v43 = vadd.f32 %v6532_v7, %v3554_v32  ;;  %vm3969_vm4 = vcmp.eq.s32.totalorder %v3912_v9, %v7684_v38  ;;  %v13795_v4 = vpop.permute.xlu1 %3914  ;;  %v16010_v8 = vld [vmem:[#allocation22_spill] sm:$0xff] }
 0x353   : > { %vm3970_vm12 = vcmp.eq.s32.totalorder %v3912_v9, %v7688_v39  ;;  %v6594_v29 = vsel %vm3968_vm15, 1.0, %v15223_v30  ;;  %vm4571_vm5 = vcmp.eq.s32.totalorder %v13615_v11, %v7672_v34  ;;  %v13786_v48 = vsel %vm3967_vm0, 1.0, %v15223_v30 }
 0x354   : > { %vm4572_vm6 = vcmp.eq.s32.totalorder %v13615_v11, %v7681_v37  ;;  %vm4573_vm9 = vcmp.eq.s32.totalorder %v13615_v11, %v7684_v38  ;;  %vm4574_vm7 = vcmp.eq.s32.totalorder %v13615_v11, %v7688_v39  ;;  %v13799_v6 = vadd.f32 %v16010_v8, %v3555_v13 }
 0x355   : > { %7216 = vset.pattern.permute.xlu1 %v15644_v60  ;;  %v13802_v36 = vadd.f32 %v16011_v21, %v3556_v47  ;;  %v13805_v46 = vadd.f32 %v16012_v53, %v3557_v51  ;;  %v13808_v33 = vadd.f32 %v16013_v23, %v3558_v35  ;;  %v6595_v11 = vsel %vm3969_vm4, 1.0, %v15223_v30 }
 0x356   : > { %4838 = vperm.xlu1 %7216, %v13179_v5   ;;  %v6596_v60 = vsel %vm3970_vm12, 1.0, %v15223_v30  ;;  %v13812_v1 = vadd.f32 %v6594_v29, %v3856_v16  ;;  %v6717_v5 = vsel %vm4571_vm5, 1.0, %v15223_v30  ;;  %v6718_v40 = vsel %vm4572_vm6, 1.0, %v15223_v30  ;;  %v4520_v9 = vpop.permute.xlu1 %4519 }
 0x357   : > { %v6719_v19 = vsel %vm4573_vm9, 1.0, %v15223_v30  ;;  %v6720_v62 = vsel %vm4574_vm7, 1.0, %v15223_v30  ;;  %vm4271_vm8 = vcmp.eq.s32.totalorder %v13706_v12, %v7672_v34  ;;  %vm4272_vm3 = vcmp.eq.s32.totalorder %v13706_v12, %v7681_v37 }
 0x358   : > { %vm4273_vm10 = vcmp.eq.s32.totalorder %v13706_v12, %v7684_v38  ;;  %vm4274_vm11 = vcmp.eq.s32.totalorder %v13706_v12, %v7688_v39  ;;  %vm4875_vm0 = vcmp.eq.s32.totalorder %v13753_v52, %v7672_v34  ;;  %vm4876_vm15 = vcmp.eq.s32.totalorder %v13753_v52, %v7681_v37 }
 0x359   : > { %vm4878_vm4 = vcmp.eq.s32.totalorder %v13753_v52, %v7688_v39  ;;  %v4156_v26 = vadd.f32 %v13618_v31, %v13564_v15  ;;  %v4158_v58 = vadd.f32 %v6592_v24, %v13568_v25  ;;  %vm2775_vm12 = vcmp.eq.s32.totalorder %v16014_v41, %v7672_v34  ;;  %v16015_v25 = vld [vmem:[#allocation126_spill] sm:$0xff] }
 0x35a   : > { %4841 = vperm.xlu1 %7216, %v13401_v27   ;;  %vm2776_vm5 = vcmp.eq.s32.totalorder %v16014_v41, %v7681_v37  ;;  %vm4877_vm6 = vcmp.eq.s32.totalorder %v13753_v52, %v7684_v38  ;;  %v6654_v22 = vsel %vm4268_vm1, 1.0, %v15223_v30  ;;  %v6656_v27 = vsel %vm4270_vm13, 1.0, %v15223_v30  ;;  %v13893_v54 = vpop.permute.xlu1 %3613 }
 0x35b   : > { %v4155_v15 = vadd.f32 %v13612_v63, %v13562_v44  ;;  %vm4880_vm9 = vcmp.eq.s32.totalorder %v16015_v25, %v7681_v37  ;;  %vm4882_vm7 = vcmp.eq.s32.totalorder %v16015_v25, %v7688_v39  ;;  %v4460_v31 = vadd.f32 %v6654_v22, %v4156_v26 }
 0x35c   : > { %v4462_v57 = vadd.f32 %v6656_v27, %v4158_v58  ;;  %v6653_v59 = vsel %vm4267_vm2, 1.0, %v15223_v30  ;;  %v4157_v17 = vadd.f32 %v13621_v14, %v13566_v18  ;;  %vm4879_vm1 = vcmp.eq.s32.totalorder %v16015_v25, %v7672_v34 }
 0x35d   : > { %vm4881_vm13 = vcmp.eq.s32.totalorder %v16015_v25, %v7684_v38  ;;  %v6782_v44 = vsel %vm4876_vm15, 1.0, %v15223_v30  ;;  %v6784_v63 = vsel %vm4878_vm4, 1.0, %v15223_v30  ;;  %v4459_v2 = vadd.f32 %v6653_v59, %v4155_v15  ;;  %v16017_v25 = vld [vmem:[#allocation20_spill] sm:$0xff] }
 0x35e   : > { %v6655_v18 = vsel %vm4269_vm14, 1.0, %v15223_v30  ;;  %v4764_v14 = vadd.f32 %v6718_v40, %v4460_v31  ;;  %v4766_v45 = vadd.f32 %v6720_v62, %v4462_v57  ;;  %v6781_v7 = vsel %vm4875_vm0, 1.0, %v15223_v30 }
 0x35f   : > { %v4461_v49 = vadd.f32 %v6655_v18, %v4157_v17  ;;  %vm3681_vm2 = vcmp.eq.s32.totalorder %v16016_v42, %v7684_v38  ;;  %v6658_v28 = vsel %vm4272_vm3, 1.0, %v15223_v30  ;;  %v4763_v20 = vadd.f32 %v6717_v5, %v4459_v2  ;;  %v16018_v17 = vld [vmem:[#allocation79_spill] sm:$0xff]  ;;  %v16020_v18 = vld [vmem:[#allocation90_spill] sm:$0xff] }
 0x360   : > { %v6783_v56 = vsel %vm4877_vm6, 1.0, %v15223_v30  ;;  %vm4576_vm14 = vcmp.eq.s32.totalorder %v4520_v9, %v7681_v37  ;;  %vm3682_vm0 = vcmp.eq.s32.totalorder %v16016_v42, %v7688_v39  ;;  %v5068_v61 = vadd.f32 %v6782_v44, %v4764_v14  ;;  %v16021_v14 = vld [vmem:[#allocation40_spill] sm:$0xff]  ;;  %v16027_v42 = vld [vmem:[#allocation58_spill] sm:$0xff] }
 0x361   : > { %v5070_v0 = vadd.f32 %v6784_v63, %v4766_v45  ;;  %v4765_v24 = vadd.f32 %v6719_v19, %v4461_v49  ;;  %vm4578_vm15 = vcmp.eq.s32.totalorder %v4520_v9, %v7688_v39  ;;  %v6660_v55 = vsel %vm4274_vm11, 1.0, %v15223_v30  ;;  %v16019_v63 = vld [vmem:[#allocation133_spill] sm:$0xff]  ;;  %v16023_v49 = vld [vmem:[#allocation92_spill] sm:$0xff] }
 0x362   : > { %v5067_v32 = vadd.f32 %v6781_v7, %v4763_v20  ;;  %vm4575_vm3 = vcmp.eq.s32.totalorder %v4520_v9, %v7672_v34  ;;  %vm4577_vm4 = vcmp.eq.s32.totalorder %v4520_v9, %v7684_v38  ;;  %v4162_v52 = vadd.f32 %v6596_v60, %v13776_v43  ;;  %5267 = vmatprep.mubr.f32.mxu0 %v5068_v61  ;;  %v16022_v7 = vld [vmem:[#allocation36_spill] sm:$0xff]  ;;  %v16024_v20 = vld [vmem:[#allocation91_spill] sm:$0xff] }
 0x363   : > { %v6657_v13 = vsel %vm4271_vm8, 1.0, %v15223_v30  ;;  %v6659_v47 = vsel %vm4273_vm10, 1.0, %v15223_v30  ;;  %5412 = vmatprep.mubr.f32.mxu1 %v5070_v0  ;;  %v5069_v51 = vadd.f32 %v6783_v56, %v4765_v24  ;;  %v4159_v35 = vadd.f32 %v13786_v48, %v13770_v10  ;;  %v16025_v56 = vld [vmem:[#allocation130_spill] sm:$0xff]  ;;  %v16026_v0 = vld [vmem:[#allocation132_spill] sm:$0xff] }
 0x364   : > { %v4161_v16 = vadd.f32 %v6595_v11, %v13774_v50  ;;  %5268 = vmatmul.mubr.f32.gmra.mrb[16].mxu0 %v5067_v32  ;;  %v6722_v43 = vsel %vm4576_vm14, 1.0, %v15223_v30  ;;  %v6724_v29 = vsel %vm4578_vm15, 1.0, %v15223_v30  ;;  %v4464_v8 = vadd.f32 %v6658_v28, %v13812_v1  ;;  %v13927_v50 = vpop.permute.xlu1 %4218  ;;  %v16028_v32 = vld [vmem:[#allocation93_spill] sm:$0xff] }
 0x365   : > { %v4466_v21 = vadd.f32 %v6660_v55, %v4162_v52  ;;  %5413 = vmatmul.mubr.f32.gmra.mrb[16].mxu1 %v5069_v51  ;;  %v6721_v12 = vsel %vm4575_vm3, 1.0, %v15223_v30  ;;  %v6723_v10 = vsel %vm4577_vm4, 1.0, %v15223_v30  ;;  %vm2777_vm8 = vcmp.eq.s32.totalorder %v16014_v41, %v7684_v38 }
 0x366   : > { %vm2778_vm10 = vcmp.eq.s32.totalorder %v16014_v41, %v7688_v39  ;;  %v4463_v48 = vadd.f32 %v6657_v13, %v4159_v35  ;;  %v4465_v53 = vadd.f32 %v6659_v47, %v4161_v16  ;;  %v6361_v23 = vsel %vm2775_vm12, 1.0, %v15223_v30  ;;  %v16029_v35 = vld [vmem:[#allocation51_spill] sm:$0xff]  ;;  %v16030_v16 = vld [vmem:[#allocation8_spill] sm:$0xff] }
 0x367   : > { %v6362_v11 = vsel %vm2776_vm5, 1.0, %v15223_v30  ;;  %v4768_v60 = vadd.f32 %v6722_v43, %v4464_v8  ;;  %v4770_v1 = vadd.f32 %v6724_v29, %v4466_v21  ;;  %v6786_v5 = vsel %vm4880_vm9, 1.0, %v15223_v30  ;;  %v16031_v29 = vld [vmem:[#allocation84_spill] sm:$0xff]  ;;  %v16032_v8 = vld [vmem:[#allocation106_spill] sm:$0xff] }
 0x368   : > { %v6788_v40 = vsel %vm4882_vm7, 1.0, %v15223_v30  ;;  %v4767_v19 = vadd.f32 %v6721_v12, %v4463_v48  ;;  %v4769_v62 = vadd.f32 %v6723_v10, %v4465_v53  ;;  %v6785_v9 = vsel %vm4879_vm1, 1.0, %v15223_v30  ;;  %v13977_v41 = vpop.permute.xlu1 %3312  ;;  %v16033_v12 = vld [vmem:[#allocation57_spill] sm:$0xff]  ;;  %v16034_v10 = vld [vmem:[#allocation107_spill] sm:$0xff] }
 0x369   : > { %v5072_v26 = vadd.f32 %v6786_v5, %v4768_v60  ;;  %v5074_v58 = vadd.f32 %v6788_v40, %v4770_v1  ;;  %v6787_v22 = vsel %vm4881_vm13, 1.0, %v15223_v30  ;;  %v6363_v27 = vsel %vm2777_vm8, 1.0, %v15223_v30  ;;  %v16035_v53 = vld [vmem:[#allocation85_spill] sm:$0xff]  ;;  %v16037_v5 = vld [vmem:[#allocation18_spill] sm:$0xff]  ;;  %v16038_v40 = vld [vmem:[#allocation39_spill] sm:$0xff] }
 0x36a   : > { %v6364_v15 = vsel %vm2778_vm10, 1.0, %v15223_v30  ;;  %v5071_v31 = vadd.f32 %v6785_v9, %v4767_v19  ;;  %v5073_v57 = vadd.f32 %v6787_v22, %v4769_v62  ;;  %v13969_v59 = vsel %vm3681_vm2, 1.0, %v15223_v30  ;;  %v16040_v62 = vld [vmem:[#allocation38_spill] sm:$0xff]  ;;  %v16042_v22 = vld [vmem:[#allocation11_spill] sm:$0xff] }
 0x36b   : > { %v2666_v44 = vadd.f32 %v16018_v17, %v16017_v25  ;;  %vm4579_vm11 = vcmp.eq.s32.totalorder %v16019_v63, %v7672_v34  ;;  %vm4580_vm12 = vcmp.eq.s32.totalorder %v16019_v63, %v7681_v37  ;;  %5272 = vmatprep.mubr.f32.mxu0 %v5072_v26  ;;  %5417 = vmatprep.mubr.f32.mxu1 %v5074_v58  ;;  %v13983_v2 = vsel %vm3682_vm0, 1.0, %v15223_v30  ;;  %v16041_v26 = vld [vmem:[#allocation127_spill] sm:$0xff]  ;;  %v16044_v17 = vld [vmem:[#allocation70_spill] sm:$0xff] }
 0x36c   : > { %v13987_v45 = vadd.f32 %v16021_v14, %v16020_v18  ;;  %v13991_v28 = vadd.f32 %v16023_v49, %v16022_v7  ;;  %v13995_v61 = vadd.f32 %v16025_v56, %v16024_v20  ;;  %5273 = vmatmul.mubr.f32.gmra.mrb[18].mxu0 %v5071_v31  ;;  %5418 = vmatmul.mubr.f32.gmra.mrb[18].mxu1 %v5073_v57  ;;  %v14016_v47 = vsel %vm4579_vm11, 1.0, %v15223_v30  ;;  %v14048_v60 = vpop.permute.xlu1 %3917 }
 0x36d   : > { %v13998_v24 = vadd.f32 %v6361_v23, %v16026_v0  ;;  %v14001_v55 = vadd.f32 %v6362_v11, %v16027_v42  ;;  %v14004_v52 = vadd.f32 %v6363_v27, %v16028_v32  ;;  %v14006_v13 = vadd.f32 %v6364_v15, %v2666_v44  ;;  %v16036_v23 = vld [vmem:[#allocation140_spill] sm:$0xff]  ;;  %v16045_v44 = vld [vmem:[#allocation129_spill] sm:$0xff] }
 0x36e   : > { %vm4581_vm5 = vcmp.eq.s32.totalorder %v16019_v63, %v7684_v38  ;;  %vm4582_vm6 = vcmp.eq.s32.totalorder %v16019_v63, %v7688_v39  ;;  %v14022_v51 = vsel %vm4580_vm12, 1.0, %v15223_v30  ;;  %vm3063_vm9 = vcmp.eq.s32.totalorder %v13671_v3, %v7672_v34  ;;  %v16043_v27 = vld [vmem:[#allocation128_spill] sm:$0xff] }
 0x36f   : > { %v14028_v43 = vadd.f32 %v16030_v16, %v16029_v35  ;;  %v14032_v21 = vadd.f32 %v16032_v8, %v16031_v29  ;;  %v14036_v48 = vadd.f32 %v16034_v10, %v16033_v12  ;;  %vm3064_vm7 = vcmp.eq.s32.totalorder %v13671_v3, %v7681_v37  ;;  %v16046_v12 = vld [vmem:[#allocation119_spill] sm:$0xff] }
 0x370   : > { %vm3065_vm1 = vcmp.eq.s32.totalorder %v13671_v3, %v7684_v38  ;;  %vm3066_vm13 = vcmp.eq.s32.totalorder %v13671_v3, %v7688_v39  ;;  %v14046_v11 = vadd.f32 %v16036_v23, %v16035_v53  ;;  %v14051_v1 = vsel %vm4581_vm5, 1.0, %v15223_v30  ;;  %v16039_v3 = vld [vmem:[#allocation125_spill] sm:$0xff]  ;;  %v14091_v0 = vpop.permute.xlu1 %3011  ;;  %v16048_v23 = vld [vmem:[#allocation122_spill] sm:$0xff] }
 0x371   : > { %vm4587_vm2 = vcmp.eq.s32.totalorder %v16037_v5, %v7672_v34  ;;  %vm4588_vm14 = vcmp.eq.s32.totalorder %v16037_v5, %v7681_v37  ;;  %vm3971_vm0 = vcmp.eq.s32.totalorder %v13795_v4, %v7672_v34  ;;  %v2951_v19 = vadd.f32 %v16039_v3, %v16038_v40 }
 0x372   : > { %v2952_v58 = vadd.f32 %v16041_v26, %v16040_v62  ;;  %v6409_v9 = vsel %vm3063_vm9, 1.0, %v15223_v30  ;;  %vm3972_vm15 = vcmp.eq.s32.totalorder %v13795_v4, %v7681_v37  ;;  %v2953_v15 = vadd.f32 %v16043_v27, %v16042_v22  ;;  %v16049_v62 = vld [vmem:[#allocation123_spill] sm:$0xff] }
 0x373   : > { %v6410_v31 = vsel %vm3064_vm7, 1.0, %v15223_v30  ;;  %v6411_v57 = vsel %vm3065_vm1, 1.0, %v15223_v30  ;;  %v6412_v25 = vsel %vm3066_vm13, 1.0, %v15223_v30  ;;  %v2954_v18 = vadd.f32 %v16045_v44, %v16044_v17 }
 0x374   : > { %vm3973_vm3 = vcmp.eq.s32.totalorder %v13795_v4, %v7684_v38  ;;  %vm3974_vm4 = vcmp.eq.s32.totalorder %v13795_v4, %v7688_v39  ;;  %v6597_v14 = vsel %vm3971_vm0, 1.0, %v15223_v30  ;;  %v14082_v7 = vsel %vm4582_vm6, 1.0, %v15223_v30 }
 0x375   : > { %v14088_v49 = vsel %vm4587_vm2, 1.0, %v15223_v30  ;;  %v3255_v20 = vadd.f32 %v6409_v9, %v2951_v19  ;;  %v6598_v56 = vsel %vm3972_vm15, 1.0, %v15223_v30  ;;  %v14097_v4 = vsel %vm4588_vm14, 1.0, %v15223_v30  ;;  %v14125_v19 = vpop.permute.xlu1 %3616 }
 0x376   : > { %v3256_v63 = vadd.f32 %v6410_v31, %v2952_v58  ;;  %v3257_v42 = vadd.f32 %v6411_v57, %v2953_v15  ;;  %v3258_v32 = vadd.f32 %v6412_v25, %v2954_v18  ;;  %v6599_v35 = vsel %vm3973_vm3, 1.0, %v15223_v30 }
 0x377   : > { %v6600_v16 = vsel %vm3974_vm4, 1.0, %v15223_v30  ;;  %v4163_v29 = vadd.f32 %v6597_v14, %v13799_v6  ;;  %vm3671_vm8 = vcmp.eq.s32.totalorder %v13893_v54, %v7672_v34  ;;  %v4164_v8 = vadd.f32 %v6598_v56, %v13802_v36  ;;  %v14118_v6 = vpop.permute.xlu0 %3920  ;;  %v16047_v36 = vld [vmem:[#allocation120_spill] sm:$0xff] }
 0x378   : > { %vm3672_vm10 = vcmp.eq.s32.totalorder %v13893_v54, %v7681_v37  ;;  %vm3673_vm11 = vcmp.eq.s32.totalorder %v13893_v54, %v7684_v38  ;;  %vm3674_vm12 = vcmp.eq.s32.totalorder %v13893_v54, %v7688_v39  ;;  %v3559_v10 = vadd.f32 %v16046_v12, %v3255_v20  ;;  %v6853_v54 = vpop.f32.mrb[0].mxu0 }
 0x379   : > { %vm4275_vm5 = vcmp.eq.s32.totalorder %v13927_v50, %v7672_v34  ;;  %vm4276_vm6 = vcmp.eq.s32.totalorder %v13927_v50, %v7681_v37  ;;  %vm4277_vm9 = vcmp.eq.s32.totalorder %v13927_v50, %v7684_v38  ;;  %v3560_v53 = vadd.f32 %v16047_v36, %v3256_v63  ;;  %v6854_v27 = vpop.f32.mrb[1].mxu0  ;;  %v6933_v63 = vpop.f32.mrb[0].mxu1 }
 0x37a   : > { %v3561_v40 = vadd.f32 %v16048_v23, %v3257_v42  ;;  %v6537_v3 = vsel %vm3671_vm8, 1.0, %v15223_v30  ;;  %vm4278_vm7 = vcmp.eq.s32.totalorder %v13927_v50, %v7688_v39  ;;  %v3562_v26 = vadd.f32 %v16049_v62, %v3258_v32  ;;  %v16050_v23 = vld [vmem:[#allocation73_spill] sm:$0xff]  ;;  %v16053_v62 = vld [vmem:[#allocation136_spill] sm:$0xff] }
 0x37b   : > { %v6538_v58 = vsel %vm3672_vm10, 1.0, %v15223_v30  ;;  %v6539_v9 = vsel %vm3673_vm11, 1.0, %v15223_v30  ;;  %v6540_v22 = vsel %vm3674_vm12, 1.0, %v15223_v30  ;;  %v6661_v15 = vsel %vm4275_vm5, 1.0, %v15223_v30 }
 0x37c   : > { %v6662_v31 = vsel %vm4276_vm6, 1.0, %v15223_v30  ;;  %v6663_v57 = vsel %vm4277_vm9, 1.0, %v15223_v30  ;;  %v6855_v25 = vadd.f32 %v6854_v27, %v6853_v54  ;;  %v4165_v50 = vadd.f32 %v6599_v35, %v13805_v46  ;;  %v6934_v46 = vpop.f32.mrb[1].mxu1  ;;  %v16052_v54 = vld [vmem:[#allocation75_spill] sm:$0xff] }
 0x37d   : > { %v4166_v17 = vadd.f32 %v6600_v16, %v13808_v33  ;;  %v14136_v44 = vadd.f32 %v6537_v3, %v3559_v10  ;;  %v6664_v18 = vsel %vm4278_vm7, 1.0, %v15223_v30  ;;  %v14139_v14 = vadd.f32 %v6538_v58, %v3560_v53  ;;  %v4827_v33 = vpop.permute.xlu1 %4826  ;;  %v14151_v10 = vpop.permute.xlu0 %3926 }
 0x37e   : > { %v14141_v20 = vadd.f32 %v6539_v9, %v3561_v40  ;;  %v14143_v56 = vadd.f32 %v6540_v22, %v3562_v26  ;;  %vm3371_vm1 = vcmp.eq.s32.totalorder %v13977_v41, %v7672_v34  ;;  %v4467_v42 = vadd.f32 %v6661_v15, %v4163_v29  ;;  %v16051_v40 = vld [vmem:[#allocation134_spill] sm:$0xff] }
 0x37f   : > { %v4468_v32 = vadd.f32 %v6662_v31, %v4164_v8  ;;  %v4469_v12 = vadd.f32 %v6663_v57, %v4165_v50  ;;  %vm3975_vm13 = vcmp.eq.s32.totalorder %v14048_v60, %v7672_v34  ;;  %v4470_v35 = vadd.f32 %v6664_v18, %v4166_v17 }
 0x380   : > { %v6935_v16 = vadd.f32 %v6934_v46, %v6933_v63  ;;  %vm3372_vm2 = vcmp.eq.s32.totalorder %v13977_v41, %v7681_v37  ;;  %vm3976_vm14 = vcmp.eq.s32.totalorder %v14048_v60, %v7681_v37  ;;  %vm3373_vm0 = vcmp.eq.s32.totalorder %v13977_v41, %v7684_v38 }
 0x381   : > { %vm3374_vm15 = vcmp.eq.s32.totalorder %v13977_v41, %v7688_v39  ;;  %v14160_v29 = vsel %vm3371_vm1, 1.0, %v15223_v30  ;;  %vm3071_vm3 = vcmp.eq.s32.totalorder %v14091_v0, %v7672_v34  ;;  %vm3073_vm4 = vcmp.eq.s32.totalorder %v14091_v0, %v7684_v38  ;;  %v14198_v22 = vpop.permute.xlu1 %3315  ;;  %v4222_v57 = vpop.permute.xlu0 %4221 }
 0x382   : > { %v14166_v8 = vadd.f32 %v6935_v16, %v6855_v25  ;;  %vm3977_vm8 = vcmp.eq.s32.totalorder %v14048_v60, %v7684_v38  ;;  %vm3978_vm10 = vcmp.eq.s32.totalorder %v14048_v60, %v7688_v39  ;;  %v6601_v36 = vsel %vm3975_vm13, 1.0, %v15223_v30 }
 0x383   : > { %v6602_v53 = vsel %vm3976_vm14, 1.0, %v15223_v30  ;;  %v2959_v3 = vadd.f32 %v16051_v40, %v16050_v23  ;;  %vm4884_vm11 = vcmp.eq.s32.totalorder %v4827_v33, %v7681_v37  ;;  %vm4886_vm12 = vcmp.eq.s32.totalorder %v4827_v33, %v7688_v39 }
 0x384   : > { %vm4589_vm5 = vcmp.eq.s32.totalorder %v16037_v5, %v7684_v38  ;;  %vm4590_vm6 = vcmp.eq.s32.totalorder %v16037_v5, %v7688_v39  ;;  %vm3979_vm9 = vcmp.eq.s32.totalorder %v14118_v6, %v7672_v34  ;;  %vm3980_vm7 = vcmp.eq.s32.totalorder %v14118_v6, %v7681_v37  ;;  %5453 = vadd.xlane.f32.xlu0 %v14166_v8 }
 0x385   : > { %v2961_v26 = vadd.f32 %v16053_v62, %v16052_v54  ;;  %v6417_v58 = vsel %vm3071_vm3, 1.0, %v15223_v30  ;;  %v6419_v9 = vsel %vm3073_vm4, 1.0, %v15223_v30  ;;  %vm4883_vm1 = vcmp.eq.s32.totalorder %v4827_v33, %v7672_v34 }
 0x386   : > { %vm3375_vm13 = vcmp.eq.s32.totalorder %v14198_v22, %v7672_v34  ;;  %vm3377_vm14 = vcmp.eq.s32.totalorder %v14198_v22, %v7684_v38  ;;  %v6790_v27 = vsel %vm4884_vm11, 1.0, %v15223_v30  ;;  %v6792_v15 = vsel %vm4886_vm12, 1.0, %v15223_v30 }
 0x387   : > { %v6603_v31 = vsel %vm3977_vm8, 1.0, %v15223_v30  ;;  %vm4885_vm3 = vcmp.eq.s32.totalorder %v4827_v33, %v7684_v38  ;;  %v4772_v25 = vadd.f32 %v14022_v51, %v4468_v32  ;;  %v4774_v50 = vadd.f32 %v14082_v7, %v4470_v35  ;;  %v4526_v32 = vpop.permute.xlu1 %4525 }
 0x388   : > { %v3263_v17 = vadd.f32 %v6417_v58, %v2959_v3  ;;  %v3265_v18 = vadd.f32 %v6419_v9, %v2961_v26  ;;  %v6481_v63 = vsel %vm3375_vm13, 1.0, %v15223_v30  ;;  %v6483_v46 = vsel %vm3377_vm14, 1.0, %v15223_v30 }
 0x389   : > { %v5076_v16 = vadd.f32 %v6790_v27, %v4772_v25  ;;  %v5078_v23 = vadd.f32 %v6792_v15, %v4774_v50  ;;  %v4771_v40 = vadd.f32 %v14016_v47, %v4467_v42  ;;  %v6789_v54 = vsel %vm4883_vm1, 1.0, %v15223_v30 }
 0x38a   : > { %vm4279_vm4 = vcmp.eq.s32.totalorder %v4222_v57, %v7672_v34  ;;  %vm4280_vm8 = vcmp.eq.s32.totalorder %v4222_v57, %v7681_v37  ;;  %v4773_v51 = vadd.f32 %v14051_v1, %v4469_v12  ;;  %v6791_v7 = vsel %vm4885_vm3, 1.0, %v15223_v30 }
 0x38b   : > { %v6604_v35 = vsel %vm3978_vm10, 1.0, %v15223_v30  ;;  %v3567_v3 = vadd.f32 %v6481_v63, %v3263_v17  ;;  %v3569_v47 = vadd.f32 %v6483_v46, %v3265_v18  ;;  %5277 = vmatprep.mubr.f32.mxu0 %v5076_v16  ;;  %5422 = vmatprep.mubr.f32.mxu1 %v5078_v23  ;;  %v5075_v42 = vadd.f32 %v6789_v54, %v4771_v40  ;;  %v16058_v23 = vld [vmem:[#allocation139_spill] sm:$0xff] }
 0x38c   : > { %v6478_v33 = vsel %vm3372_vm2, 1.0, %v15223_v30  ;;  %vm4281_vm11 = vcmp.eq.s32.totalorder %v4222_v57, %v7684_v38  ;;  %vm4282_vm12 = vcmp.eq.s32.totalorder %v4222_v57, %v7688_v39  ;;  %v5077_v1 = vadd.f32 %v6791_v7, %v4773_v51 }
 0x38d   : > { %v6479_v60 = vsel %vm3373_vm0, 1.0, %v15223_v30  ;;  %v6480_v12 = vsel %vm3374_vm15, 1.0, %v15223_v30  ;;  %v4167_v62 = vadd.f32 %v6601_v36, %v14136_v44  ;;  %v4168_v26 = vadd.f32 %v6602_v53, %v14139_v14  ;;  %5278 = vmatmul.mubr.f32.gmra.mrb[20].mxu0 %v5075_v42  ;;  %v14253_v36 = vpop.permute.xlu1 %3014  ;;  %v16054_v14 = vld [vmem:[#allocation35_spill] sm:$0xff] }
 0x38e   : > { %v4169_v58 = vadd.f32 %v6603_v31, %v14141_v20  ;;  %v4170_v9 = vadd.f32 %v6604_v35, %v14143_v56  ;;  %v6665_v27 = vsel %vm4279_vm4, 1.0, %v15223_v30  ;;  %v6666_v15 = vsel %vm4280_vm8, 1.0, %v15223_v30  ;;  %5423 = vmatmul.mubr.f32.gmra.mrb[20].mxu1 %v5077_v1 }
 0x38f   : > { %v6667_v41 = vsel %vm4281_vm11, 1.0, %v15223_v30  ;;  %v6668_v44 = vsel %vm4282_vm12, 1.0, %v15223_v30  ;;  %v14256_v53 = vadd.f32 %v16054_v14, %v3567_v3  ;;  %v14259_v20 = vadd.f32 %v13969_v59, %v3569_v47 }
 0x390   : > { %v14265_v56 = vsel %vm4589_vm5, 1.0, %v15223_v30  ;;  %v14271_v31 = vsel %vm4590_vm6, 1.0, %v15223_v30  ;;  %v14277_v57 = vsel %vm3979_vm9, 1.0, %v15223_v30  ;;  %v14283_v59 = vsel %vm3980_vm7, 1.0, %v15223_v30 }
 0x391   : > { %v3563_v25 = vadd.f32 %v14160_v29, %v14028_v43  ;;  %v3564_v50 = vadd.f32 %v6478_v33, %v14032_v21  ;;  %v3565_v5 = vadd.f32 %v6479_v60, %v14036_v48  ;;  %v14290_v17 = vadd.f32 %v6480_v12, %v14046_v11  ;;  %v14304_v43 = vpop.permute.xlu1 %4224  ;;  %v16055_v21 = vld [vmem:[#allocation74_spill] sm:$0xff]  ;;  %v16056_v48 = vld [vmem:[#allocation135_spill] sm:$0xff]  ;;  %v16057_v29 = vld [vmem:[#allocation76_spill] sm:$0xff] }
 0x392   : > { %v4471_v18 = vadd.f32 %v6665_v27, %v4167_v62  ;;  %v4472_v63 = vadd.f32 %v6666_v15, %v4168_v26  ;;  %v4473_v46 = vadd.f32 %v6667_v41, %v4169_v58  ;;  %v4474_v16 = vadd.f32 %v6668_v44, %v4170_v9 }
 0x393   : > { %vm4583_vm2 = vcmp.eq.s32.totalorder %v4526_v32, %v7672_v34  ;;  %vm4584_vm0 = vcmp.eq.s32.totalorder %v4526_v32, %v7681_v37  ;;  %vm4585_vm15 = vcmp.eq.s32.totalorder %v4526_v32, %v7684_v38  ;;  %vm4586_vm10 = vcmp.eq.s32.totalorder %v4526_v32, %v7688_v39 }
 0x394   : > { %vm3072_vm5 = vcmp.eq.s32.totalorder %v14091_v0, %v7681_v37  ;;  %vm3074_vm6 = vcmp.eq.s32.totalorder %v14091_v0, %v7688_v39  ;;  %vm3675_vm9 = vcmp.eq.s32.totalorder %v14125_v19, %v7672_v34  ;;  %vm3676_vm7 = vcmp.eq.s32.totalorder %v14125_v19, %v7681_v37 }
 0x395   : > { %vm3981_vm1 = vcmp.eq.s32.totalorder %v14118_v6, %v7684_v38  ;;  %vm3982_vm13 = vcmp.eq.s32.totalorder %v14118_v6, %v7688_v39  ;;  %vm3987_vm14 = vcmp.eq.s32.totalorder %v14151_v10, %v7672_v34  ;;  %v2960_v11 = vadd.f32 %v16056_v48, %v16055_v21  ;;  %v4830_v0 = vpop.permute.xlu1 %4829 }
 0x396   : > { %v2962_v40 = vadd.f32 %v16058_v23, %v16057_v29  ;;  %vm3677_vm3 = vcmp.eq.s32.totalorder %v14125_v19, %v7684_v38  ;;  %vm3678_vm4 = vcmp.eq.s32.totalorder %v14125_v19, %v7688_v39  ;;  %vm3988_vm8 = vcmp.eq.s32.totalorder %v14151_v10, %v7681_v37 }
 0x397   : > { %vm3989_vm11 = vcmp.eq.s32.totalorder %v14151_v10, %v7684_v38  ;;  %v6729_v54 = vsel %vm4583_vm2, 1.0, %v15223_v30  ;;  %v6730_v51 = vsel %vm4584_vm0, 1.0, %v15223_v30  ;;  %v6731_v7 = vsel %vm4585_vm15, 1.0, %v15223_v30 }
 0x398   : > { %v6732_v35 = vsel %vm4586_vm10, 1.0, %v15223_v30  ;;  %vm3990_vm12 = vcmp.eq.s32.totalorder %v14151_v10, %v7688_v39  ;;  %v6418_v3 = vsel %vm3072_vm5, 1.0, %v15223_v30  ;;  %v6420_v47 = vsel %vm3074_vm6, 1.0, %v15223_v30 }
 0x399   : > { %v6541_v42 = vsel %vm3675_vm9, 1.0, %v15223_v30  ;;  %v6542_v32 = vsel %vm3676_vm7, 1.0, %v15223_v30  ;;  %v6543_v33 = vsel %vm3677_vm3, 1.0, %v15223_v30  ;;  %v6544_v1 = vsel %vm3678_vm4, 1.0, %v15223_v30  ;;  %v3319_v23 = vpop.permute.xlu1 %3318 }
 0x39a   : > { %vm3376_vm2 = vcmp.eq.s32.totalorder %v14198_v22, %v7681_v37  ;;  %vm3378_vm0 = vcmp.eq.s32.totalorder %v14198_v22, %v7688_v39  ;;  %v4776_v60 = vadd.f32 %v6730_v51, %v4472_v63  ;;  %v4778_v12 = vadd.f32 %v6732_v35, %v4474_v16  ;;  %v4228_v51 = vpop.permute.xlu0 %4227 }
 0x39b   : > { %v4775_v62 = vadd.f32 %v6729_v54, %v4471_v18  ;;  %v4777_v26 = vadd.f32 %v6731_v7, %v4473_v46  ;;  %vm4887_vm15 = vcmp.eq.s32.totalorder %v4830_v0, %v7672_v34  ;;  %vm4888_vm10 = vcmp.eq.s32.totalorder %v4830_v0, %v7681_v37 }
 0x39c   : > { %vm4889_vm5 = vcmp.eq.s32.totalorder %v4830_v0, %v7684_v38  ;;  %vm4890_vm6 = vcmp.eq.s32.totalorder %v4830_v0, %v7688_v39  ;;  %v6794_v19 = vsel %vm4888_vm10, 1.0, %v15223_v30  ;;  %v6793_v9 = vsel %vm4887_vm15, 1.0, %v15223_v30  ;;  %v16059_v0 = vld [vmem:[#allocation131_spill] sm:$0xff] }
 0x39d   : > { %v6796_v58 = vsel %vm4890_vm6, 1.0, %v15223_v30  ;;  %v6795_v27 = vsel %vm4889_vm5, 1.0, %v15223_v30  ;;  %v5080_v15 = vadd.f32 %v6794_v19, %v4776_v60  ;;  %v5079_v44 = vadd.f32 %v6793_v9, %v4775_v62 }
 0x39e   : > { %v5082_v41 = vadd.f32 %v6796_v58, %v4778_v12  ;;  %v5081_v14 = vadd.f32 %v6795_v27, %v4777_v26  ;;  %v3264_v18 = vadd.f32 %v6418_v3, %v2960_v11  ;;  %v3266_v63 = vadd.f32 %v6420_v47, %v2962_v40  ;;  %v16060_v12 = vld [vmem:[#allocation45_spill] sm:$0xff] }
 0x39f   : > { %v3867_v46 = vadd.f32 %v6541_v42, %v3563_v25  ;;  %v6482_v16 = vsel %vm3376_vm2, 1.0, %v15223_v30  ;;  %v3868_v21 = vadd.f32 %v6542_v32, %v3564_v50  ;;  %v3869_v48 = vadd.f32 %v6543_v33, %v3565_v5  ;;  %5282 = vmatprep.mubr.f32.mxu0 %v5080_v15 }
 0x3a0   : > { %v6484_v29 = vsel %vm3378_vm0, 1.0, %v15223_v30  ;;  %vm3075_vm9 = vcmp.eq.s32.totalorder %v14253_v36, %v7672_v34  ;;  %5427 = vmatprep.mubr.f32.mxu1 %v5082_v41  ;;  %v3870_v25 = vadd.f32 %v6544_v1, %v14290_v17  ;;  %vm3076_vm7 = vcmp.eq.s32.totalorder %v14253_v36, %v7681_v37  ;;  %5283 = vmatmul.mubr.f32.gmra.mrb[22].mxu0 %v5079_v44  ;;  %v14426_v1 = vpop.permute.xlu1 %3923 }
 0x3a1   : > { %vm3077_vm3 = vcmp.eq.s32.totalorder %v14253_v36, %v7684_v38  ;;  %vm3078_vm4 = vcmp.eq.s32.totalorder %v14253_v36, %v7688_v39  ;;  %v6607_v22 = vsel %vm3981_vm1, 1.0, %v15223_v30  ;;  %v6608_v50 = vsel %vm3982_vm13, 1.0, %v15223_v30  ;;  %5428 = vmatmul.mubr.f32.gmra.mrb[22].mxu1 %v5081_v14 }
 0x3a2   : > { %v14397_v5 = vsel %vm3987_vm14, 1.0, %v15223_v30  ;;  %v3568_v17 = vadd.f32 %v6482_v16, %v3264_v18  ;;  %v14403_v11 = vsel %vm3988_vm8, 1.0, %v15223_v30  ;;  %v14409_v6 = vsel %vm3989_vm11, 1.0, %v15223_v30 }
 0x3a3   : > { %v3570_v40 = vadd.f32 %v6484_v29, %v3266_v63  ;;  %v6421_v54 = vsel %vm3075_vm9, 1.0, %v15223_v30  ;;  %v14419_v7 = vsel %vm3990_vm12, 1.0, %v15223_v30  ;;  %v6422_v35 = vsel %vm3076_vm7, 1.0, %v15223_v30 }
 0x3a4   : > { %v6423_v3 = vsel %vm3077_vm3, 1.0, %v15223_v30  ;;  %v6424_v47 = vsel %vm3078_vm4, 1.0, %v15223_v30  ;;  %v4171_v42 = vadd.f32 %v14277_v57, %v3867_v46  ;;  %v4172_v32 = vadd.f32 %v14283_v59, %v3868_v21  ;;  %v14466_v9 = vpop.permute.xlu1 %3017 }
 0x3a5   : > { %v4173_v33 = vadd.f32 %v6607_v22, %v3869_v48  ;;  %v4174_v36 = vadd.f32 %v6608_v50, %v3870_v25  ;;  %v3267_v60 = vadd.f32 %v6421_v54, %v16059_v0  ;;  %v14430_v10 = vadd.f32 %v16060_v12, %v3568_v17 }
 0x3a6   : > { %vm4287_vm1 = vcmp.eq.s32.totalorder %v4228_v51, %v7672_v34  ;;  %vm4288_vm13 = vcmp.eq.s32.totalorder %v4228_v51, %v7681_v37  ;;  %v3268_v62 = vadd.f32 %v6422_v35, %v13987_v45  ;;  %v3269_v26 = vadd.f32 %v6423_v3, %v13991_v28  ;;  %v14460_v28 = vpop.permute.xlu0 %4230 }
 0x3a7   : > { %v3270_v57 = vadd.f32 %v6424_v47, %v13995_v61  ;;  %v14438_v59 = vadd.f32 %v13983_v2, %v3570_v40  ;;  %vm4283_vm14 = vcmp.eq.s32.totalorder %v14304_v43, %v7672_v34  ;;  %vm4284_vm8 = vcmp.eq.s32.totalorder %v14304_v43, %v7681_v37 }
 0x3a8   : > { %vm4285_vm11 = vcmp.eq.s32.totalorder %v14304_v43, %v7684_v38  ;;  %vm4286_vm12 = vcmp.eq.s32.totalorder %v14304_v43, %v7688_v39  ;;  %vm4289_vm2 = vcmp.eq.s32.totalorder %v4228_v51, %v7684_v38  ;;  %vm4290_vm0 = vcmp.eq.s32.totalorder %v4228_v51, %v7688_v39  ;;  %v3623_v40 = vpop.permute.xlu1 %3622 }
 0x3a9   : > { %v14451_v45 = vsel %vm4287_vm1, 1.0, %v15223_v30  ;;  %v14454_v2 = vsel %vm4288_vm13, 1.0, %v15223_v30  ;;  %vm3379_vm15 = vcmp.eq.s32.totalorder %v3319_v23, %v7672_v34  ;;  %vm3380_vm10 = vcmp.eq.s32.totalorder %v3319_v23, %v7681_v37 }
 0x3aa   : > { %vm3381_vm5 = vcmp.eq.s32.totalorder %v3319_v23, %v7684_v38  ;;  %vm3382_vm6 = vcmp.eq.s32.totalorder %v3319_v23, %v7688_v39  ;;  %v6669_v61 = vsel %vm4283_vm14, 1.0, %v15223_v30  ;;  %v6670_v43 = vsel %vm4284_vm8, 1.0, %v15223_v30  ;;  %v14495_v54 = vpop.permute.xlu0 %4534  ;;  %v6856_v0 = vpop.f32.mrb[2].mxu0 }
 0x3ab   : > { %v6671_v19 = vsel %vm4285_vm11, 1.0, %v15223_v30  ;;  %v6672_v58 = vsel %vm4286_vm12, 1.0, %v15223_v30  ;;  %v14469_v27 = vsel %vm4289_vm2, 1.0, %v15223_v30  ;;  %vm4291_vm9 = vcmp.eq.s32.totalorder %v14460_v28, %v7672_v34 }
 0x3ac   : > { %vm4292_vm7 = vcmp.eq.s32.totalorder %v14460_v28, %v7681_v37  ;;  %vm4293_vm3 = vcmp.eq.s32.totalorder %v14460_v28, %v7684_v38  ;;  %v6485_v15 = vsel %vm3379_vm15, 1.0, %v15223_v30  ;;  %v6486_v41 = vsel %vm3380_vm10, 1.0, %v15223_v30 }
 0x3ad   : > { %v6487_v44 = vsel %vm3381_vm5, 1.0, %v15223_v30  ;;  %v6488_v14 = vsel %vm3382_vm6, 1.0, %v15223_v30  ;;  %v4475_v18 = vadd.f32 %v6669_v61, %v4171_v42  ;;  %v4476_v63 = vadd.f32 %v6670_v43, %v4172_v32  ;;  %v4833_v61 = vpop.permute.xlu1 %4832 }
 0x3ae   : > { %v4477_v46 = vadd.f32 %v6671_v19, %v4173_v33  ;;  %v4478_v16 = vadd.f32 %v6672_v58, %v4174_v36  ;;  %v14484_v21 = vsel %vm4290_vm0, 1.0, %v15223_v30  ;;  %v14487_v48 = vsel %vm4291_vm9, 1.0, %v15223_v30 }
 0x3af   : > { %v14490_v29 = vsel %vm4292_vm7, 1.0, %v15223_v30  ;;  %v14493_v23 = vsel %vm4293_vm3, 1.0, %v15223_v30  ;;  %v3571_v25 = vadd.f32 %v6485_v15, %v3267_v60  ;;  %v3572_v22 = vadd.f32 %v6486_v41, %v3268_v62  ;;  %v6936_v15 = vpop.f32.mrb[2].mxu1 }
 0x3b0   : > { %v3573_v50 = vadd.f32 %v6487_v44, %v3269_v26  ;;  %v3574_v17 = vadd.f32 %v6488_v14, %v3270_v57  ;;  %vm3683_vm4 = vcmp.eq.s32.totalorder %v3623_v40, %v7672_v34  ;;  %vm3684_vm1 = vcmp.eq.s32.totalorder %v3623_v40, %v7681_v37  ;;  %v6857_v57 = vpop.f32.mrb[3].mxu0  ;;  %v14553_v44 = vpop.permute.xlu0 %4537 }
 0x3b1   : > { %vm3685_vm13 = vcmp.eq.s32.totalorder %v3623_v40, %v7684_v38  ;;  %vm3686_vm14 = vcmp.eq.s32.totalorder %v3623_v40, %v7688_v39  ;;  %v6549_v51 = vsel %vm3683_vm4, 1.0, %v15223_v30  ;;  %v6550_v35 = vsel %vm3684_vm1, 1.0, %v15223_v30 }
 0x3b2   : > { %v6551_v3 = vsel %vm3685_vm13, 1.0, %v15223_v30  ;;  %v6552_v47 = vsel %vm3686_vm14, 1.0, %v15223_v30  ;;  %vm4294_vm8 = vcmp.eq.s32.totalorder %v14460_v28, %v7688_v39  ;;  %v3875_v42 = vadd.f32 %v6549_v51, %v3571_v25 }
 0x3b3   : > { %v3876_v32 = vadd.f32 %v6550_v35, %v3572_v22  ;;  %v3877_v33 = vadd.f32 %v6551_v3, %v3573_v50  ;;  %v3878_v36 = vadd.f32 %v6552_v47, %v3574_v17  ;;  %vm4595_vm11 = vcmp.eq.s32.totalorder %v14495_v54, %v7672_v34  ;;  %v14563_v22 = vpop.permute.xlu1 %3321 }
 0x3b4   : > { %vm3983_vm12 = vcmp.eq.s32.totalorder %v14426_v1, %v7672_v34  ;;  %vm3984_vm2 = vcmp.eq.s32.totalorder %v14426_v1, %v7681_v37  ;;  %vm3985_vm0 = vcmp.eq.s32.totalorder %v14426_v1, %v7684_v38  ;;  %vm4596_vm15 = vcmp.eq.s32.totalorder %v14495_v54, %v7681_v37 }
 0x3b5   : > { %v14518_v60 = vadd.f32 %v14397_v5, %v3875_v42  ;;  %v14521_v12 = vadd.f32 %v14403_v11, %v3876_v32  ;;  %v14524_v62 = vadd.f32 %v14409_v6, %v3877_v33  ;;  %v14527_v26 = vadd.f32 %v14419_v7, %v3878_v36 }
 0x3b6   : > { %v4780_v43 = vadd.f32 %v14097_v4, %v4476_v63  ;;  %v4782_v19 = vadd.f32 %v14271_v31, %v4478_v16  ;;  %v4779_v58 = vadd.f32 %v14088_v49, %v4475_v18  ;;  %v4781_v5 = vadd.f32 %v14265_v56, %v4477_v46  ;;  %v6937_v31 = vpop.f32.mrb[3].mxu1 }
 0x3b7   : > { %v6858_v41 = vadd.f32 %v6857_v57, %v6856_v0  ;;  %vm3986_vm10 = vcmp.eq.s32.totalorder %v14426_v1, %v7688_v39  ;;  %v6609_v11 = vsel %vm3983_vm12, 1.0, %v15223_v30  ;;  %v6610_v4 = vsel %vm3984_vm2, 1.0, %v15223_v30  ;;  %v4532_v28 = vpop.permute.xlu1 %4531 }
 0x3b8   : > { %v6611_v49 = vsel %vm3985_vm0, 1.0, %v15223_v30  ;;  %vm4891_vm5 = vcmp.eq.s32.totalorder %v4833_v61, %v7672_v34  ;;  %vm4892_vm6 = vcmp.eq.s32.totalorder %v4833_v61, %v7681_v37  ;;  %vm4893_vm9 = vcmp.eq.s32.totalorder %v4833_v61, %v7684_v38 }
 0x3b9   : > { %v6938_v56 = vadd.f32 %v6937_v31, %v6936_v15  ;;  %vm4894_vm7 = vcmp.eq.s32.totalorder %v4833_v61, %v7688_v39  ;;  %v6798_v6 = vsel %vm4892_vm6, 1.0, %v15223_v30  ;;  %v6797_v7 = vsel %vm4891_vm5, 1.0, %v15223_v30  ;;  %v6859_v0 = vpop.f32.mrb[4].mxu0 }
 0x3ba   : > { %v5084_v14 = vadd.f32 %v6798_v6, %v4780_v43  ;;  %v6800_v18 = vsel %vm4894_vm7, 1.0, %v15223_v30  ;;  %v5083_v63 = vadd.f32 %v6797_v7, %v4779_v58  ;;  %v6799_v46 = vsel %vm4893_vm9, 1.0, %v15223_v30 }
 0x3bb   : > { %v14557_v16 = vadd.f32 %v6938_v56, %v6858_v41  ;;  %v6612_v25 = vsel %vm3986_vm10, 1.0, %v15223_v30  ;;  %v5086_v50 = vadd.f32 %v6800_v18, %v4782_v19  ;;  %v5085_v17 = vadd.f32 %v6799_v46, %v4781_v5 }
 0x3bc   : > { %vm4597_vm3 = vcmp.eq.s32.totalorder %v14495_v54, %v7684_v38  ;;  %vm4598_vm4 = vcmp.eq.s32.totalorder %v14495_v54, %v7688_v39  ;;  %5287 = vmatprep.mubr.f32.mxu0 %v5084_v14  ;;  %vm4599_vm1 = vcmp.eq.s32.totalorder %v14553_v44, %v7672_v34  ;;  %vm4600_vm13 = vcmp.eq.s32.totalorder %v14553_v44, %v7681_v37  ;;  %v6939_v19 = vpop.f32.mrb[4].mxu1  ;;  %v3626_v5 = vpop.permute.xlu1 %3625 }
 0x3bd   : > { %5455 = vadd.xlane.f32.xlu1 %v14557_v16  ;;  %v4175_v1 = vadd.f32 %v6609_v11, %v14256_v53  ;;  %v4176_v40 = vadd.f32 %v6610_v4, %v14430_v10  ;;  %v14580_v51 = vsel %vm4294_vm8, 1.0, %v15223_v30  ;;  %5432 = vmatprep.mubr.f32.mxu1 %v5086_v50  ;;  %vm4601_vm14 = vcmp.eq.s32.totalorder %v14553_v44, %v7684_v38  ;;  %v6940_v15 = vpop.f32.mrb[5].mxu1 }
 0x3be   : > { %v4177_v35 = vadd.f32 %v6611_v49, %v14259_v20  ;;  %v4178_v3 = vadd.f32 %v6612_v25, %v14438_v59  ;;  %vm3079_vm12 = vcmp.eq.s32.totalorder %v14466_v9, %v7672_v34  ;;  %v14592_v53 = vsel %vm4595_vm11, 1.0, %v15223_v30  ;;  %5288 = vmatmul.mubr.f32.gmra.mrb[24].mxu0 %v5083_v63  ;;  %5433 = vmatmul.mubr.f32.gmra.mrb[24].mxu1 %v5085_v17 }
 0x3bf   : > { %vm3080_vm8 = vcmp.eq.s32.totalorder %v14466_v9, %v7681_v37  ;;  %v14600_v20 = vsel %vm4596_vm15, 1.0, %v15223_v30  ;;  %v14606_v10 = vsel %vm4597_vm3, 1.0, %v15223_v30  ;;  %v14612_v59 = vsel %vm4598_vm4, 1.0, %v15223_v30 }
 0x3c0   : > { %vm3081_vm11 = vcmp.eq.s32.totalorder %v14466_v9, %v7684_v38  ;;  %v14620_v47 = vsel %vm4599_vm1, 1.0, %v15223_v30  ;;  %v14626_v42 = vsel %vm4600_vm13, 1.0, %v15223_v30  ;;  %v14629_v54 = vsel %vm4601_vm14, 1.0, %v15223_v30 }
 0x3c1   : > { %v4479_v32 = vadd.f32 %v14451_v45, %v4175_v1  ;;  %v4480_v33 = vadd.f32 %v14454_v2, %v4176_v40  ;;  %vm3082_vm2 = vcmp.eq.s32.totalorder %v14466_v9, %v7688_v39  ;;  %v6425_v36 = vsel %vm3079_vm12, 1.0, %v15223_v30  ;;  %v6860_v2 = vpop.f32.mrb[5].mxu0 }
 0x3c2   : > { %v4481_v57 = vadd.f32 %v14469_v27, %v4177_v35  ;;  %v4482_v61 = vadd.f32 %v14484_v21, %v4178_v3  ;;  %v6426_v45 = vsel %vm3080_vm8, 1.0, %v15223_v30  ;;  %vm4592_vm0 = vcmp.eq.s32.totalorder %v4532_v28, %v7681_v37 }
 0x3c3   : > { %v6427_v43 = vsel %vm3081_vm11, 1.0, %v15223_v30  ;;  %vm4591_vm15 = vcmp.eq.s32.totalorder %v4532_v28, %v7672_v34  ;;  %vm4593_vm10 = vcmp.eq.s32.totalorder %v4532_v28, %v7684_v38  ;;  %vm4594_vm5 = vcmp.eq.s32.totalorder %v4532_v28, %v7688_v39 }
 0x3c4   : > { %vm4602_vm6 = vcmp.eq.s32.totalorder %v14553_v44, %v7688_v39  ;;  %v6861_v27 = vadd.f32 %v6860_v2, %v6859_v0  ;;  %v6428_v21 = vsel %vm3082_vm2, 1.0, %v15223_v30  ;;  %v3271_v9 = vadd.f32 %v6425_v36, %v13998_v24 }
 0x3c5   : > { %vm3383_vm9 = vcmp.eq.s32.totalorder %v14563_v22, %v7672_v34  ;;  %vm3384_vm7 = vcmp.eq.s32.totalorder %v14563_v22, %v7681_v37  ;;  %vm3385_vm3 = vcmp.eq.s32.totalorder %v14563_v22, %v7684_v38  ;;  %vm3386_vm4 = vcmp.eq.s32.totalorder %v14563_v22, %v7688_v39 }
 0x3c6   : > { %v6738_v58 = vsel %vm4592_vm0, 1.0, %v15223_v30  ;;  %v3272_v41 = vadd.f32 %v6426_v45, %v14001_v55  ;;  %v6737_v24 = vsel %vm4591_vm15, 1.0, %v15223_v30  ;;  %v6739_v11 = vsel %vm4593_vm10, 1.0, %v15223_v30 }
 0x3c7   : > { %v6740_v4 = vsel %vm4594_vm5, 1.0, %v15223_v30  ;;  %v6941_v31 = vadd.f32 %v6940_v15, %v6939_v19  ;;  %v3273_v49 = vadd.f32 %v6427_v43, %v14004_v52  ;;  %v3274_v56 = vadd.f32 %v6428_v21, %v14006_v13  ;;  %v4836_v52 = vpop.permute.xlu1 %4835 }
 0x3c8   : > { %v6489_v6 = vsel %vm3383_vm9, 1.0, %v15223_v30  ;;  %v6490_v55 = vsel %vm3384_vm7, 1.0, %v15223_v30  ;;  %v6491_v7 = vsel %vm3385_vm3, 1.0, %v15223_v30  ;;  %v6492_v14 = vsel %vm3386_vm4, 1.0, %v15223_v30  ;;  %v6942_v21 = vpop.f32.mrb[6].mxu1 }
 0x3c9   : > { %v4784_v18 = vadd.f32 %v6738_v58, %v4480_v33  ;;  %v14679_v63 = vadd.f32 %v6941_v31, %v6861_v27  ;;  %v4786_v46 = vadd.f32 %v6740_v4, %v4482_v61  ;;  %v4783_v25 = vadd.f32 %v6737_v24, %v4479_v32  ;;  %v6943_v58 = vpop.f32.mrb[7].mxu1 }
 0x3ca   : > { %v4785_v22 = vadd.f32 %v6739_v11, %v4481_v57  ;;  %vm3687_vm1 = vcmp.eq.s32.totalorder %v3626_v5, %v7672_v34  ;;  %vm3688_vm13 = vcmp.eq.s32.totalorder %v3626_v5, %v7681_v37  ;;  %vm3689_vm14 = vcmp.eq.s32.totalorder %v3626_v5, %v7684_v38  ;;  %v6862_v57 = vpop.f32.mrb[6].mxu0 }
 0x3cb   : > { %vm3690_vm12 = vcmp.eq.s32.totalorder %v3626_v5, %v7688_v39  ;;  %5457 = vadd.xlane.f32.xlu0 %v14679_v63  ;;  %vm4895_vm8 = vcmp.eq.s32.totalorder %v4836_v52, %v7672_v34  ;;  %vm4896_vm11 = vcmp.eq.s32.totalorder %v4836_v52, %v7681_v37  ;;  %vm4897_vm2 = vcmp.eq.s32.totalorder %v4836_v52, %v7684_v38 }
 0x3cc   : > { %vm4898_vm0 = vcmp.eq.s32.totalorder %v4836_v52, %v7688_v39  ;;  %v6802_v13 = vsel %vm4896_vm11, 1.0, %v15223_v30  ;;  %v6801_v17 = vsel %vm4895_vm8, 1.0, %v15223_v30  ;;  %v6803_v1 = vsel %vm4897_vm2, 1.0, %v15223_v30 }
 0x3cd   : > { %v6804_v50 = vsel %vm4898_vm0, 1.0, %v15223_v30  ;;  %v5088_v40 = vadd.f32 %v6802_v13, %v4784_v18  ;;  %v5087_v3 = vadd.f32 %v6801_v17, %v4783_v25  ;;  %v5089_v28 = vadd.f32 %v6803_v1, %v4785_v22 }
 0x3ce   : > { %v5090_v35 = vadd.f32 %v6804_v50, %v4786_v46  ;;  %v4483_v32 = vadd.f32 %v14487_v48, %v14518_v60  ;;  %v3575_v33 = vadd.f32 %v6489_v6, %v3271_v9  ;;  %v3576_v36 = vadd.f32 %v6490_v55, %v3272_v41  ;;  %v3930_v48 = vpop.permute.xlu1 %3929  ;;  %v6863_v60 = vpop.f32.mrb[7].mxu0 }
 0x3cf   : > { %v14700_v0 = vsel %vm4602_vm6, 1.0, %v15223_v30  ;;  %v3577_v61 = vadd.f32 %v6491_v7, %v3273_v49  ;;  %v3578_v45 = vadd.f32 %v6492_v14, %v3274_v56  ;;  %v6553_v2 = vsel %vm3687_vm1, 1.0, %v15223_v30  ;;  %5292 = vmatprep.mubr.f32.mxu0 %v5088_v40 }
 0x3d0   : > { %v6554_v43 = vsel %vm3688_vm13, 1.0, %v15223_v30  ;;  %5437 = vmatprep.mubr.f32.mxu1 %v5090_v35  ;;  %v6555_v44 = vsel %vm3689_vm14, 1.0, %v15223_v30  ;;  %v6556_v27 = vsel %vm3690_vm12, 1.0, %v15223_v30  ;;  %vm3991_vm15 = vcmp.eq.s32.totalorder %v3930_v48, %v7672_v34  ;;  %5293 = vmatmul.mubr.f32.gmra.mrb[26].mxu0 %v5087_v3 }
 0x3d1   : > { %vm3992_vm10 = vcmp.eq.s32.totalorder %v3930_v48, %v7681_v37  ;;  %v6864_v9 = vadd.f32 %v6863_v60, %v6862_v57  ;;  %vm3993_vm5 = vcmp.eq.s32.totalorder %v3930_v48, %v7684_v38  ;;  %vm3994_vm6 = vcmp.eq.s32.totalorder %v3930_v48, %v7688_v39  ;;  %5438 = vmatmul.mubr.f32.gmra.mrb[26].mxu1 %v5089_v28 }
 0x3d2   : > { %v6617_v19 = vsel %vm3991_vm15, 1.0, %v15223_v30  ;;  %v4484_v15 = vadd.f32 %v14490_v29, %v14521_v12  ;;  %v4485_v5 = vadd.f32 %v14493_v23, %v14524_v62  ;;  %v4486_v41 = vadd.f32 %v14580_v51, %v14527_v26  ;;  %v4234_v12 = vpop.permute.xlu1 %4233 }
 0x3d3   : > { %v3879_v24 = vadd.f32 %v6553_v2, %v3575_v33  ;;  %v6944_v11 = vadd.f32 %v6943_v58, %v6942_v21  ;;  %v3880_v4 = vadd.f32 %v6554_v43, %v3576_v36  ;;  %v3881_v31 = vadd.f32 %v6555_v44, %v3577_v61 }
 0x3d4   : > { %v3882_v49 = vadd.f32 %v6556_v27, %v3578_v45  ;;  %v6618_v56 = vsel %vm3992_vm10, 1.0, %v15223_v30  ;;  %v6619_v6 = vsel %vm3993_vm5, 1.0, %v15223_v30  ;;  %v6620_v55 = vsel %vm3994_vm6, 1.0, %v15223_v30 }
 0x3d5   : > { %v4183_v29 = vadd.f32 %v6617_v19, %v3879_v24  ;;  %v14730_v7 = vadd.f32 %v6944_v11, %v6864_v9  ;;  %vm4295_vm9 = vcmp.eq.s32.totalorder %v4234_v12, %v7672_v34  ;;  %vm4296_vm7 = vcmp.eq.s32.totalorder %v4234_v12, %v7681_v37 }
 0x3d6   : > { %vm4297_vm3 = vcmp.eq.s32.totalorder %v4234_v12, %v7684_v38  ;;  %vm4298_vm4 = vcmp.eq.s32.totalorder %v4234_v12, %v7688_v39  ;;  %v6681_v23 = vsel %vm4295_vm9, 1.0, %v15223_v30  ;;  %v6682_v62 = vsel %vm4296_vm7, 1.0, %v15223_v30  ;;  %v4839_v35 = vpop.permute.xlu1 %4838 }
 0x3d7   : > { %v6683_v26 = vsel %vm4297_vm3, 1.0, %v15223_v30  ;;  %5459 = vadd.xlane.f32.xlu0 %v14730_v7  ;;  %v4184_v51 = vadd.f32 %v6618_v56, %v3880_v4  ;;  %v4185_v14 = vadd.f32 %v6619_v6, %v3881_v31  ;;  %v4186_v18 = vadd.f32 %v6620_v55, %v3882_v49 }
 0x3d8   : > { %v6684_v46 = vsel %vm4298_vm4, 1.0, %v15223_v30  ;;  %v4788_v25 = vadd.f32 %v14600_v20, %v4484_v15  ;;  %v4790_v22 = vadd.f32 %v14612_v59, %v4486_v41  ;;  %v4787_v52 = vadd.f32 %v14592_v53, %v4483_v32 }
 0x3d9   : > { %v4789_v13 = vadd.f32 %v14606_v10, %v4485_v5  ;;  %v4487_v50 = vadd.f32 %v6681_v23, %v4183_v29  ;;  %v4488_v17 = vadd.f32 %v6682_v62, %v4184_v51  ;;  %v4489_v1 = vadd.f32 %v6683_v26, %v4185_v14 }
 0x3da   : > { %v4490_v40 = vadd.f32 %v6684_v46, %v4186_v18  ;;  %vm4899_vm1 = vcmp.eq.s32.totalorder %v4839_v35, %v7672_v34  ;;  %vm4900_vm13 = vcmp.eq.s32.totalorder %v4839_v35, %v7681_v37  ;;  %vm4901_vm14 = vcmp.eq.s32.totalorder %v4839_v35, %v7684_v38  ;;  %v4842_v36 = vpop.permute.xlu1 %4841 }
 0x3db   : > { %vm4902_vm12 = vcmp.eq.s32.totalorder %v4839_v35, %v7688_v39  ;;  %v6806_v20 = vsel %vm4900_vm13, 1.0, %v15223_v30  ;;  %v6805_v53 = vsel %vm4899_vm1, 1.0, %v15223_v30  ;;  %v6807_v10 = vsel %vm4901_vm14, 1.0, %v15223_v30 }
 0x3dc   : > { %v6808_v59 = vsel %vm4902_vm12, 1.0, %v15223_v30  ;;  %v5092_v3 = vadd.f32 %v6806_v20, %v4788_v25  ;;  %v5091_v32 = vadd.f32 %v6805_v53, %v4787_v52  ;;  %v5093_v33 = vadd.f32 %v6807_v10, %v4789_v13 }
 0x3dd   : > { %v5094_v28 = vadd.f32 %v6808_v59, %v4790_v22  ;;  %v4792_v57 = vadd.f32 %v14626_v42, %v4488_v17  ;;  %v4794_v61 = vadd.f32 %v14700_v0, %v4490_v40  ;;  %v4791_v45 = vadd.f32 %v14620_v47, %v4487_v50 }
 0x3de   : > { %v4793_v2 = vadd.f32 %v14629_v54, %v4489_v1  ;;  %vm4903_vm8 = vcmp.eq.s32.totalorder %v4842_v36, %v7672_v34  ;;  %vm4904_vm11 = vcmp.eq.s32.totalorder %v4842_v36, %v7681_v37  ;;  %vm4905_vm2 = vcmp.eq.s32.totalorder %v4842_v36, %v7684_v38  ;;  %5297 = vmatprep.mubr.f32.mxu0 %v5092_v3 }
 0x3df   : > { %vm4906_vm0 = vcmp.eq.s32.totalorder %v4842_v36, %v7688_v39  ;;  %5442 = vmatprep.mubr.f32.mxu1 %v5094_v28  ;;  %5298 = vmatmul.mubr.f32.gmra.mrb[28].mxu0 %v5091_v32  ;;  %v6810_v43 = vsel %vm4904_vm11, 1.0, %v15223_v30  ;;  %v6809_v0 = vsel %vm4903_vm8, 1.0, %v15223_v30  ;;  %v6811_v47 = vsel %vm4905_vm2, 1.0, %v15223_v30 }
 0x3e0   : > { %v6812_v42 = vsel %vm4906_vm0, 1.0, %v15223_v30  ;;  %5443 = vmatmul.mubr.f32.gmra.mrb[28].mxu1 %v5093_v33  ;;  %v5096_v54 = vadd.f32 %v6810_v43, %v4792_v57  ;;  %v5095_v48 = vadd.f32 %v6809_v0, %v4791_v45  ;;  %v5097_v37 = vadd.f32 %v6811_v47, %v4793_v2 }
 0x3e1   : > { %v5098_v34 = vadd.f32 %v6812_v42, %v4794_v61 }
 0x3e2   : > { %5302 = vmatprep.mubr.f32.mxu0 %v5096_v54 }
 0x3e3   : > { %5447 = vmatprep.mubr.f32.mxu1 %v5098_v34  ;;  %5303 = vmatmul.mubr.f32.gmra.mrb[30].mxu0 %v5095_v48 }
 0x3e4   : > { %5448 = vmatmul.mubr.f32.gmra.mrb[30].mxu1 %v5097_v37 }
 0x3ea   : > { %v6865_v38 = vpop.f32.mrb[8].mxu0 }
 0x3eb   : > { %v6866_v39 = vpop.f32.mrb[9].mxu0 }
 0x3ec   : > { %v6945_v60 = vpop.f32.mrb[8].mxu1  ;;  %v6867_v44 = vadd.f32 %v6866_v39, %v6865_v38 }
 0x3ed   : > { %v6946_v27 = vpop.f32.mrb[9].mxu1 }
 0x3ee   : > { %v6947_v21 = vadd.f32 %v6946_v27, %v6945_v60 }
 0x3f0   : > { %v14765_v9 = vadd.f32 %v6947_v21, %v6867_v44 }
 0x3f2   : > { %5461 = vadd.xlane.f32.xlu1 %v14765_v9 }
 0x3f8   : > { %v6868_v30 = vpop.f32.mrb[10].mxu0 }
 0x3f9   : > { %v6869_v19 = vpop.f32.mrb[11].mxu0 }
 0x3fa   : > { %v6870_v58 = vadd.f32 %v6869_v19, %v6868_v30 }
 0x3fc   : > { %v6948_v15 = vpop.f32.mrb[10].mxu1 }
 0x3fd   : > { %v6949_v5 = vpop.f32.mrb[11].mxu1 }
 0x3fe   : > { %v6950_v41 = vadd.f32 %v6949_v5, %v6948_v15 }
 0x400   : > { %v14768_v24 = vadd.f32 %v6950_v41, %v6870_v58 }
 0x402   : > { %5463 = vadd.xlane.f32.xlu0 %v14768_v24 }
 0x404   : > { %v6871_v11 = vpop.f32.mrb[12].mxu0 }
 0x405   : > { %v6872_v4 = vpop.f32.mrb[13].mxu0 }
 0x406   : > { %v6873_v49 = vadd.f32 %v6872_v4, %v6871_v11 }
 0x407   : > { %v6951_v31 = vpop.f32.mrb[12].mxu1 }
 0x408   : > { %v6952_v56 = vpop.f32.mrb[13].mxu1 }
 0x409   : > { %v6953_v6 = vadd.f32 %v6952_v56, %v6951_v31 }
 0x40b   : > { %v14771_v55 = vadd.f32 %v6953_v6, %v6873_v49 }
 0x40d   : > { %5465 = vadd.xlane.f32.xlu1 %v14771_v55 }
 0x411   : > { %v5454_v5 = vpop.xlane.xlu0 %5453 }
 0x412   : > { %v5486_v31 = vmul.f32 0.0078125, %v5454_v5 }
 0x421   : > { %v6874_v29 = vpop.f32.mrb[14].mxu0 }
 0x422   : > { %v6954_v12 = vpop.f32.mrb[14].mxu1  ;;  %v6875_v23 = vpop.f32.mrb[15].mxu0 }
 0x423   : > { %v6876_v62 = vadd.f32 %v6875_v23, %v6874_v29  ;;  %v6955_v26 = vpop.f32.mrb[15].mxu1 }
 0x424   : > { %v6956_v51 = vadd.f32 %v6955_v26, %v6954_v12 }
 0x426   : > { %v14774_v14 = vadd.f32 %v6956_v51, %v6876_v62  ;;  %v14796_v51 = vsub.f32 %v14166_v8, %v5486_v31 }
 0x428   : > { %5467 = vadd.xlane.f32.xlu0 %v14774_v14 }
 0x437   : > { %v6877_v18 = vpop.f32.mrb[16].mxu0 }
 0x438   : > { %v6957_v46 = vpop.f32.mrb[16].mxu1  ;;  %v6878_v25 = vpop.f32.mrb[17].mxu0 }
 0x439   : > { %v6879_v22 = vadd.f32 %v6878_v25, %v6877_v18  ;;  %v6958_v52 = vpop.f32.mrb[17].mxu1 }
 0x43a   : > { %v6959_v13 = vadd.f32 %v6958_v52, %v6957_v46 }
 0x43c   : > { %v14777_v50 = vadd.f32 %v6959_v13, %v6879_v22 }
 0x43e   : > { %5469 = vadd.xlane.f32.xlu1 %v14777_v50 }
 0x43f   : > { %v6880_v17 = vpop.f32.mrb[18].mxu0  ;;  %v6960_v1 = vpop.f32.mrb[18].mxu1 }
 0x440   : > { %v6881_v40 = vpop.f32.mrb[19].mxu0  ;;  %v6961_v35 = vpop.f32.mrb[19].mxu1 }
 0x441   : > { %v6882_v20 = vadd.f32 %v6881_v40, %v6880_v17  ;;  %v6962_v59 = vadd.f32 %v6961_v35, %v6960_v1 }
 0x443   : > { %v14780_v53 = vadd.f32 %v6962_v59, %v6882_v20 }
 0x445   : > { %5471 = vadd.xlane.f32.xlu0 %v14780_v53 }
 0x44a   : > { %v5456_v41 = vpop.xlane.xlu1 %5455 }
 0x44b   : > { %v5487_v23 = vmul.f32 0.0078125, %v5456_v41 }
 0x44d   : > { %v14802_v40 = vsub.f32 %v14557_v16, %v5487_v23 }
 0x44f   : > { %v5519_v16 = vmul.f32 %v14802_v40, %v14802_v40 }
 0x458   : > { %v5458_v11 = vpop.xlane.xlu0 %5457 }
 0x459   : > { %v5488_v18 = vmul.f32 0.0078125, %v5458_v11 }
 0x45b   : > { %v14805_v20 = vsub.f32 %v14679_v63, %v5488_v18 }
 0x460   : > { %v6883_v10 = vpop.f32.mrb[20].mxu0 }
 0x461   : > { %v6963_v3 = vpop.f32.mrb[20].mxu1  ;;  %v6884_v28 = vpop.f32.mrb[21].mxu0 }
 0x462   : > { %v6885_v32 = vadd.f32 %v6884_v28, %v6883_v10  ;;  %v6964_v33 = vpop.f32.mrb[21].mxu1  ;;  %v5518_v10 = vmul.f32 %v14796_v51, %v14796_v51 }
 0x463   : > { %v6965_v36 = vadd.f32 %v6964_v33, %v6963_v3 }
 0x464   : > { %v5460_v62 = vpop.xlane.xlu0 %5459 }
 0x465   : > { %v14783_v57 = vadd.f32 %v6965_v36, %v6885_v32  ;;  %v5489_v35 = vmul.f32 0.0078125, %v5460_v62 }
 0x467   : > { %5473 = vadd.xlane.f32.xlu1 %v14783_v57  ;;  %v14813_v32 = vsub.f32 %v14730_v7, %v5489_v35 }
 0x473   : > { %v6886_v61 = vpop.f32.mrb[22].mxu0 }
 0x474   : > { %v6966_v45 = vpop.f32.mrb[22].mxu1  ;;  %v6887_v2 = vpop.f32.mrb[23].mxu0 }
 0x475   : > { %v6888_v43 = vadd.f32 %v6887_v2, %v6886_v61  ;;  %v6967_v42 = vpop.f32.mrb[23].mxu1  ;;  %v5520_v61 = vmul.f32 %v14805_v20, %v14805_v20  ;;  %v5521_v2 = vmul.f32 %v14813_v32, %v14813_v32 }
 0x476   : > { %v6968_v0 = vadd.f32 %v6967_v42, %v6966_v45 }
 0x478   : > { %v14786_v47 = vadd.f32 %v6968_v0, %v6888_v43 }
 0x47a   : > { %5475 = vadd.xlane.f32.xlu0 %v14786_v47 }
 0x47f   : > { %v5462_v52 = vpop.xlane.xlu1 %5461 }
 0x480   : > { %v5490_v8 = vmul.f32 0.0078125, %v5462_v52 }
 0x482   : > { %v14818_v63 = vsub.f32 %v14765_v9, %v5490_v8 }
 0x484   : > { %v5522_v9 = vmul.f32 %v14818_v63, %v14818_v63 }
 0x48f   : > { %v5464_v3 = vpop.xlane.xlu0 %5463 }
 0x490   : > { %v5491_v33 = vmul.f32 0.0078125, %v5464_v3 }
 0x491   : > { %v6889_v54 = vpop.f32.mrb[24].mxu0  ;;  %v6969_v34 = vpop.f32.mrb[24].mxu1 }
 0x492   : > { %v6890_v48 = vpop.f32.mrb[25].mxu0  ;;  %v6970_v38 = vpop.f32.mrb[25].mxu1  ;;  %v14825_v7 = vsub.f32 %v14768_v24, %v5491_v33 }
 0x493   : > { %v6891_v37 = vadd.f32 %v6890_v48, %v6889_v54  ;;  %v6971_v39 = vadd.f32 %v6970_v38, %v6969_v34 }
 0x494   : > { %v5523_v34 = vmul.f32 %v14825_v7, %v14825_v7 }
 0x495   : > { %v14789_v60 = vadd.f32 %v6971_v39, %v6891_v37 }
 0x497   : > { %5477 = vadd.xlane.f32.xlu1 %v14789_v60 }
 0x49a   : > { %v5466_v28 = vpop.xlane.xlu1 %5465 }
 0x49b   : > { %v5492_v36 = vmul.f32 0.0078125, %v5466_v28 }
 0x49d   : > { %v14828_v43 = vsub.f32 %v14771_v55, %v5492_v36 }
 0x49f   : > { %v5524_v54 = vmul.f32 %v14828_v43, %v14828_v43 }
 0x4a3   : > { %v6892_v44 = vpop.f32.mrb[26].mxu0 }
 0x4a4   : > { %v6972_v27 = vpop.f32.mrb[26].mxu1  ;;  %v6893_v21 = vpop.f32.mrb[27].mxu0 }
 0x4a5   : > { %v6894_v30 = vadd.f32 %v6893_v21, %v6892_v44  ;;  %v6973_v19 = vpop.f32.mrb[27].mxu1 }
 0x4a6   : > { %v6974_v58 = vadd.f32 %v6973_v19, %v6972_v27 }
 0x4a8   : > { %v14792_v15 = vadd.f32 %v6974_v58, %v6894_v30 }
 0x4aa   : > { %5479 = vadd.xlane.f32.xlu0 %v14792_v15 }
 0x4b2   : > { %v6895_v4 = vpop.f32.mrb[28].mxu0 }
 0x4b3   : > { %v6975_v49 = vpop.f32.mrb[28].mxu1  ;;  %v6896_v56 = vpop.f32.mrb[29].mxu0 }
 0x4b4   : > { %v6897_v6 = vadd.f32 %v6896_v56, %v6895_v4  ;;  %v6976_v29 = vpop.f32.mrb[29].mxu1 }
 0x4b5   : > { %v6977_v12 = vadd.f32 %v6976_v29, %v6975_v49  ;;  %v5468_v45 = vpop.xlane.xlu0 %5467 }
 0x4b6   : > { %v6898_v26 = vpop.f32.mrb[30].mxu0  ;;  %v5493_v42 = vmul.f32 0.0078125, %v5468_v45 }
 0x4b7   : > { %v14798_v46 = vadd.f32 %v6977_v12, %v6897_v6  ;;  %v6978_v25 = vpop.f32.mrb[30].mxu1  ;;  %v6899_v22 = vpop.f32.mrb[31].mxu0 }
 0x4b8   : > { %v6900_v13 = vadd.f32 %v6899_v22, %v6898_v26  ;;  %v6979_v17 = vpop.f32.mrb[31].mxu1  ;;  %v14833_v0 = vsub.f32 %v14774_v14, %v5493_v42 }
 0x4b9   : > { %v6980_v1 = vadd.f32 %v6979_v17, %v6978_v25  ;;  %5481 = vadd.xlane.f32.xlu1 %v14798_v46 }
 0x4ba   : > { %v5525_v24 = vmul.f32 %v14833_v0, %v14833_v0 }
 0x4bb   : > { %v14807_v59 = vadd.f32 %v6980_v1, %v6900_v13 }
 0x4bd   : > { %5483 = vadd.xlane.f32.xlu0 %v14807_v59  ;;  %5534 = vadd.xlane.f32.xlu1 %v5518_v10 }
 0x4c1   : > { %5536 = vadd.xlane.f32.xlu0 %v5519_v16  ;;  %5538 = vadd.xlane.f32.xlu1 %v5520_v61 }
 0x4c5   : > { %5542 = vadd.xlane.f32.xlu1 %v5522_v9  ;;  %5540 = vadd.xlane.f32.xlu0 %v5521_v2  ;;  %v14885_v9 = vld [vmem:[%s15014_s2] ss:$0 sm:$0xff] }
 0x4c9   : > { %5546 = vadd.xlane.f32.xlu1 %v5524_v54  ;;  %5544 = vadd.xlane.f32.xlu0 %v5523_v34 }
 0x4cb   : > { %v5470_v55 = vpop.xlane.xlu1 %5469 }
 0x4cc   : > { %v5494_v48 = vmul.f32 0.0078125, %v5470_v55 }
 0x4cd   : > { %5548 = vadd.xlane.f32.xlu0 %v5525_v24 }
 0x4ce   : > { %v14842_v37 = vsub.f32 %v14777_v50, %v5494_v48  ;;  %v14893_v48 = vld [vmem:[%s15015_s3] ss:$0 sm:$0xff] }
 0x4d0   : > { %v5526_v14 = vmul.f32 %v14842_v37, %v14842_v37 }
 0x4d2   : > { %5550 = vadd.xlane.f32.xlu1 %v5526_v14  ;;  %v5472_v38 = vpop.xlane.xlu0 %5471 }
 0x4d3   : > { %v5495_v39 = vmul.f32 0.0078125, %v5472_v38 }
 0x4d5   : > { %v14847_v44 = vsub.f32 %v14780_v53, %v5495_v39 }
 0x4d7   : > { %v5527_v27 = vmul.f32 %v14847_v44, %v14847_v44 }
 0x4d9   : > { %5552 = vadd.xlane.f32.xlu0 %v5527_v27 }
 0x4f4   : > { %v5474_v21 = vpop.xlane.xlu1 %5473 }
 0x4f5   : > { %v5496_v30 = vmul.f32 0.0078125, %v5474_v21 }
 0x4f7   : > { %v14852_v19 = vsub.f32 %v14783_v57, %v5496_v30 }
 0x4f9   : > { %v5528_v50 = vmul.f32 %v14852_v19, %v14852_v19 }
 0x4fb   : > { %5554 = vadd.xlane.f32.xlu1 %v5528_v50 }
 0x507   : > { %v5476_v58 = vpop.xlane.xlu0 %5475 }
 0x508   : > { %v5497_v5 = vmul.f32 0.0078125, %v5476_v58 }
 0x50a   : > { %v14857_v41 = vsub.f32 %v14786_v47, %v5497_v5 }
 0x50c   : > { %v5529_v53 = vmul.f32 %v14857_v41, %v14857_v41 }
 0x50e   : > { %5556 = vadd.xlane.f32.xlu0 %v5529_v53 }
 0x524   : > { %v5478_v11 = vpop.xlane.xlu1 %5477 }
 0x525   : > { %v5498_v4 = vmul.f32 0.0078125, %v5478_v11 }
 0x527   : > { %v14862_v31 = vsub.f32 %v14789_v60, %v5498_v4 }
 0x529   : > { %v5530_v57 = vmul.f32 %v14862_v31, %v14862_v31 }
 0x52b   : > { %5558 = vadd.xlane.f32.xlu1 %v5530_v57 }
 0x537   : > { %v5480_v49 = vpop.xlane.xlu0 %5479 }
 0x538   : > { %v5499_v56 = vmul.f32 0.0078125, %v5480_v49 }
 0x53a   : > { %v14867_v6 = vsub.f32 %v14792_v15, %v5499_v56 }
 0x53c   : > { %v5531_v47 = vmul.f32 %v14867_v6, %v14867_v6 }
 0x53e   : > { %5560 = vadd.xlane.f32.xlu0 %v5531_v47 }
 0x546   : > { %v5482_v29 = vpop.xlane.xlu1 %5481 }
 0x547   : > { %v5500_v12 = vmul.f32 0.0078125, %v5482_v29 }
 0x549   : > { %v14872_v23 = vsub.f32 %v14798_v46, %v5500_v12 }
 0x54a   : > { %v5535_v60 = vpop.xlane.xlu1 %5534  ;;  %v5484_v62 = vpop.xlane.xlu0 %5483 }
 0x54b   : > { %v5566_v26 = vmul.f32 0.0078125, %v5535_v60  ;;  %v5501_v18 = vmul.f32 0.0078125, %v5484_v62  ;;  %v5532_v25 = vmul.f32 %v14872_v23, %v14872_v23 }
 0x54d   : > { %v5582_v22 = vadd.f32 0.00256, %v5566_v26  ;;  %v14877_v15 = vsub.f32 %v14807_v59, %v5501_v18  ;;  %5562 = vadd.xlane.f32.xlu1 %v5532_v25 }
 0x54e   : > { %v5539_v52 = vpop.xlane.xlu1 %5538  ;;  %v5537_v13 = vpop.xlane.xlu0 %5536 }
 0x54f   : > { %7218 = vrsqrt.f32 %v5582_v22  ;;  %v5568_v17 = vmul.f32 0.0078125, %v5539_v52  ;;  %v5567_v1 = vmul.f32 0.0078125, %v5537_v13  ;;  %v5533_v46 = vmul.f32 %v14877_v15, %v14877_v15 }
 0x551   : > { %v5584_v35 = vadd.f32 0.00256, %v5568_v17  ;;  %v5583_v8 = vadd.f32 0.00256, %v5567_v1  ;;  %5564 = vadd.xlane.f32.xlu0 %v5533_v46 }
 0x552   : > { %v5543_v10 = vpop.xlane.xlu1 %5542  ;;  %v5541_v3 = vpop.xlane.xlu0 %5540 }
 0x553   : > { %7220 = vrsqrt.f32 %v5584_v35  ;;  %v5570_v28 = vmul.f32 0.0078125, %v5543_v10  ;;  %v5569_v59 = vmul.f32 0.0078125, %v5541_v3 }
 0x554   : > { %7222 = vrsqrt.f32 %v5583_v8 }
 0x555   : > { %v5586_v16 = vadd.f32 0.00256, %v5570_v28  ;;  %v5585_v33 = vadd.f32 0.00256, %v5569_v59 }
 0x556   : > { %v5547_v36 = vpop.xlane.xlu1 %5546  ;;  %v5545_v61 = vpop.xlane.xlu0 %5544 }
 0x557   : > { %7224 = vrsqrt.f32 %v5586_v16  ;;  %v5572_v45 = vmul.f32 0.0078125, %v5547_v36  ;;  %v5571_v2 = vmul.f32 0.0078125, %v5545_v61 }
 0x558   : > { %7226 = vrsqrt.f32 %v5585_v33 }
 0x559   : > { %v7219_v42 = vpop.eup %7218  ;;  %v5588_v54 = vadd.f32 0.00256, %v5572_v45  ;;  %v5587_v34 = vadd.f32 0.00256, %v5571_v2 }
 0x55a   : > { %v5614_v24 = vmul.f32 %v7219_v42, %v14796_v51  ;;  %v5549_v55 = vpop.xlane.xlu0 %5548 }
 0x55b   : > { %7228 = vrsqrt.f32 %v5588_v54  ;;  %v5573_v14 = vmul.f32 0.0078125, %v5549_v55 }
 0x55c   : > { %v5637_v38 = vmul.f32 %v14885_v9, %v5614_v24  ;;  %7230 = vrsqrt.f32 %v5587_v34 }
 0x55d   : > { %v7221_v39 = vpop.eup %7220  ;;  %v5589_v27 = vadd.f32 0.00256, %v5573_v14 }
 0x55e   : > { %v7223_v21 = vpop.eup %7222  ;;  %v5660_v30 = vadd.f32 %v14893_v48, %v5637_v38  ;;  %v5616_v50 = vmul.f32 %v7221_v39, %v14805_v20 }
 0x55f   : > { %v5615_v51 = vmul.f32 %v7223_v21, %v14802_v40  ;;  %7232 = vrsqrt.f32 %v5589_v27  ;;  %v5551_v20 = vpop.xlane.xlu1 %5550 }
 0x560   : > { %5676 = vst [vmem:[%s14899_s11] sm:$0xff] %v5660_v30  ;;  %v5639_v58 = vmul.f32 %v14885_v9, %v5616_v50  ;;  %v5574_v56 = vmul.f32 0.0078125, %v5551_v20 }
 0x561   : > { %v7225_v5 = vpop.eup %7224  ;;  %v5638_v53 = vmul.f32 %v14885_v9, %v5615_v51 }
 0x562   : > { %v7227_v11 = vpop.eup %7226  ;;  %v5662_v4 = vadd.f32 %v14893_v48, %v5639_v58  ;;  %v5618_v57 = vmul.f32 %v7225_v5, %v14818_v63  ;;  %v5590_v60 = vadd.f32 0.00256, %v5574_v56 }
 0x563   : > { %v5661_v40 = vadd.f32 %v14893_v48, %v5638_v53  ;;  %v5617_v49 = vmul.f32 %v7227_v11, %v14813_v32 }
 0x564   : > { %5678 = vst [vmem:[%s14899_s11 + $0x10] sm:$0xff] %v5662_v4  ;;  %v5641_v47 = vmul.f32 %v14885_v9, %v5618_v57  ;;  %7234 = vrsqrt.f32 %v5590_v60 }
 0x565   : > { %v7229_v29 = vpop.eup %7228  ;;  %5677 = vst [vmem:[%s14899_s11 + $0x8] sm:$0xff] %v5661_v40  ;;  %v5640_v12 = vmul.f32 %v14885_v9, %v5617_v49 }
 0x566   : > { %v7231_v62 = vpop.eup %7230  ;;  %v5664_v63 = vadd.f32 %v14893_v48, %v5641_v47  ;;  %v5620_v26 = vmul.f32 %v7229_v29, %v14828_v43  ;;  %v5553_v13 = vpop.xlane.xlu0 %5552 }
 0x567   : > { %v5663_v18 = vadd.f32 %v14893_v48, %v5640_v12  ;;  %v5619_v32 = vmul.f32 %v7231_v62, %v14825_v7  ;;  %v5575_v1 = vmul.f32 0.0078125, %v5553_v13 }
 0x568   : > { %5680 = vst [vmem:[%s14899_s11 + $0x20] sm:$0xff] %v5664_v63  ;;  %v5643_v25 = vmul.f32 %v14885_v9, %v5620_v26 }
 0x569   : > { %v7233_v22 = vpop.eup %7232  ;;  %5679 = vst [vmem:[%s14899_s11 + $0x18] sm:$0xff] %v5663_v18  ;;  %v5642_v52 = vmul.f32 %v14885_v9, %v5619_v32  ;;  %v5591_v35 = vadd.f32 0.00256, %v5575_v1 }
 0x56a   : > { %v5666_v17 = vadd.f32 %v14893_v48, %v5643_v25  ;;  %v5621_v43 = vmul.f32 %v7233_v22, %v14833_v0 }
 0x56b   : > { %v5665_v46 = vadd.f32 %v14893_v48, %v5642_v52  ;;  %7236 = vrsqrt.f32 %v5591_v35 }
 0x56c   : > { %5682 = vst [vmem:[%s14899_s11 + $0x30] sm:$0xff] %v5666_v17  ;;  %v5644_v7 = vmul.f32 %v14885_v9, %v5621_v43 }
 0x56d   : > { %5681 = vst [vmem:[%s14899_s11 + $0x28] sm:$0xff] %v5665_v46 }
 0x56e   : > { %v5667_v8 = vadd.f32 %v14893_v48, %v5644_v7  ;;  %v7235_v10 = vpop.eup %7234 }
 0x56f   : > { %v5622_v3 = vmul.f32 %v7235_v10, %v14842_v37 }
 0x570   : > { %5683 = vst [vmem:[%s14899_s11 + $0x38] sm:$0xff] %v5667_v8 }
 0x571   : > { %v5645_v28 = vmul.f32 %v14885_v9, %v5622_v3 }
 0x573   : > { %v5668_v0 = vadd.f32 %v14893_v48, %v5645_v28 }
 0x575   : > { %v7237_v59 = vpop.eup %7236  ;;  %5684 = vst [vmem:[%s14899_s11 + $0x40] sm:$0xff] %v5668_v0 }
 0x576   : > { %v5623_v16 = vmul.f32 %v7237_v59, %v14847_v44 }
 0x578   : > { %v5646_v33 = vmul.f32 %v14885_v9, %v5623_v16 }
 0x57a   : > { %v5669_v36 = vadd.f32 %v14893_v48, %v5646_v33 }
 0x57c   : > { %5685 = vst [vmem:[%s14899_s11 + $0x48] sm:$0xff] %v5669_v36 }
 0x588   : > { %v5555_v61 = vpop.xlane.xlu1 %5554 }
 0x589   : > { %v5576_v45 = vmul.f32 0.0078125, %v5555_v61 }
 0x58b   : > { %v5592_v2 = vadd.f32 0.00256, %v5576_v45 }
 0x58d   : > { %7238 = vrsqrt.f32 %v5592_v2 }
 0x597   : > { %v7239_v37 = vpop.eup %7238 }
 0x598   : > { %v5624_v42 = vmul.f32 %v7239_v37, %v14852_v19 }
 0x59a   : > { %v5647_v54 = vmul.f32 %v14885_v9, %v5624_v42 }
 0x59b   : > { %v5557_v34 = vpop.xlane.xlu0 %5556 }
 0x59c   : > { %v5577_v24 = vmul.f32 0.0078125, %v5557_v34  ;;  %v5670_v55 = vadd.f32 %v14893_v48, %v5647_v54 }
 0x59e   : > { %v5593_v44 = vadd.f32 0.00256, %v5577_v24  ;;  %5686 = vst [vmem:[%s14899_s11 + $0x50] sm:$0xff] %v5670_v55 }
 0x5a0   : > { %7240 = vrsqrt.f32 %v5593_v44 }
 0x5aa   : > { %v7241_v14 = vpop.eup %7240 }
 0x5ab   : > { %v5625_v38 = vmul.f32 %v7241_v14, %v14857_v41 }
 0x5ad   : > { %v5648_v39 = vmul.f32 %v14885_v9, %v5625_v38 }
 0x5af   : > { %v5671_v27 = vadd.f32 %v14893_v48, %v5648_v39 }
 0x5b1   : > { %5687 = vst [vmem:[%s14899_s11 + $0x58] sm:$0xff] %v5671_v27 }
 0x5b8   : > { %v5559_v21 = vpop.xlane.xlu1 %5558 }
 0x5b9   : > { %v5578_v19 = vmul.f32 0.0078125, %v5559_v21 }
 0x5bb   : > { %v5594_v30 = vadd.f32 0.00256, %v5578_v19 }
 0x5bd   : > { %7242 = vrsqrt.f32 %v5594_v30 }
 0x5c7   : > { %v7243_v50 = vpop.eup %7242 }
 0x5c8   : > { %v5626_v51 = vmul.f32 %v7243_v50, %v14862_v31 }
 0x5ca   : > { %v5649_v58 = vmul.f32 %v14885_v9, %v5626_v51 }
 0x5cb   : > { %v5561_v5 = vpop.xlane.xlu0 %5560 }
 0x5cc   : > { %v5579_v53 = vmul.f32 0.0078125, %v5561_v5  ;;  %v5672_v11 = vadd.f32 %v14893_v48, %v5649_v58 }
 0x5ce   : > { %v5595_v41 = vadd.f32 0.00256, %v5579_v53  ;;  %5688 = vst [vmem:[%s14899_s11 + $0x60] sm:$0xff] %v5672_v11 }
 0x5d0   : > { %7244 = vrsqrt.f32 %v5595_v41 }
 0x5da   : > { %v7245_v4 = vpop.eup %7244  ;;  %v5563_v57 = vpop.xlane.xlu1 %5562 }
 0x5db   : > { %v5627_v20 = vmul.f32 %v7245_v4, %v14867_v6  ;;  %v5580_v40 = vmul.f32 0.0078125, %v5563_v57 }
 0x5dd   : > { %v5650_v49 = vmul.f32 %v14885_v9, %v5627_v20  ;;  %v5596_v31 = vadd.f32 0.00256, %v5580_v40 }
 0x5de   : > { %v5565_v56 = vpop.xlane.xlu0 %5564 }
 0x5df   : > { %v5673_v47 = vadd.f32 %v14893_v48, %v5650_v49  ;;  %7246 = vrsqrt.f32 %v5596_v31  ;;  %v5581_v29 = vmul.f32 0.0078125, %v5565_v56 }
 0x5e1   : > { %5689 = vst [vmem:[%s14899_s11 + $0x68] sm:$0xff] %v5673_v47  ;;  %v5597_v12 = vadd.f32 0.00256, %v5581_v29 }
 0x5e3   : > { %7248 = vrsqrt.f32 %v5597_v12 }
 0x5e9   : > { %v7247_v60 = vpop.eup %7246 }
 0x5ea   : > { %v5628_v6 = vmul.f32 %v7247_v60, %v14872_v23 }
 0x5ec   : > { %v5651_v62 = vmul.f32 %v14885_v9, %v5628_v6 }
 0x5ed   : > { %v7249_v63 = vpop.eup %7248 }
 0x5ee   : > { %v5674_v26 = vadd.f32 %v14893_v48, %v5651_v62  ;;  %v5629_v18 = vmul.f32 %v7249_v63, %v14877_v15 }
 0x5f0   : > { %5690 = vst [vmem:[%s14899_s11 + $0x70] sm:$0xff] %v5674_v26  ;;  %v5652_v32 = vmul.f32 %v14885_v9, %v5629_v18 }
 0x5f2   : > { %v5675_v23 = vadd.f32 %v14893_v48, %v5652_v32 }
 0x5f4   : > { %5691 = vst [vmem:[%s14899_s11 + $0x78] sm:$0xff] %v5675_v23 }
 0x5f5   : > { %7340 = shalt.err (!%p7337_p7)
}
 0x5f6   : > { %s7341_s29 = scalar_lea.hbm %s14963_s22, 2048  ;;  %s7345_s7 = scalar_lea.hbm %s15016_s4, 4096 }
 0x5f7   : > { %p7342_p8 = scmp.ne.s32.totalorder %s14963_s22, %s7341_s29  ;;  %p7346_p1 = scmp.lt.u32.totalorder %s14963_s22, %s15016_s4 }
 0x5f8   : > { %p7347_p0 = scmp.lt.u32.totalorder %s7345_s7, %s7341_s29  ;;  %p7349_p6 = scmp.lt.u32.totalorder %s7341_s29, %s14963_s22 }
 0x5f9   : > { %p7343_p11 = pnand %p7342_p8, %p16061_p9 }
 0x5fa   : > { %p7348_p5 = por %p7347_p0, %p7346_p1 }
 0x5fb   : > { %p7344_p13 = pneg %p7343_p11 }
 0x5fc   : > { %p7350_p10 = por %p7349_p6, %p7348_p5 }
 0x5fe   : > { %p7351_p12 = pnand %p7350_p10, %p7344_p13 }
 0x600   : > { %7354 = shalt.err (!%p7351_p12)
}
 0x601   : > { %s7416_s10 = smov 128   ;;  %s7417_s11 = smov 8  }
 0x602   : > { %7049 = dma.vmem_to_hbm [thread:$0]  (%p16061_p9), %s14965_s13, 2048, %s14963_s22, %s14971_s23, %s7416_s10, %s7416_s10, %s7417_s11  }
 0x603 PF: > { %p7061_p2 = scmp.ge.s32.totalorder %s7393_s18, 2  ;;  %s5721_s12 = sand.u32 1, %s7381_s15  }
 0x604   : > { %p16062_p3 = scmp.ne.s32.totalorder %s15149_s26, 0  ;;  %s5722_s14 = scalar_lea.sflag [#allocation4], %s5721_s12 }
 0x606   : > { %p7056_p4 = pnand %p7061_p2, %p16062_p3 }
 0x608   : > { %7376 = dma.done.wait (!%p7056_p4), %s5722_s14, 2048  }
 0x609   : > { %7378 = vsyncadd (!%p7056_p4), %s5722_s14, 4294965248  ;;  %p15_p7 = scmp.ge.s32.totalorder %s7468_s21, 4   ;;  %s16063_s15 = smov %s7385_s16 }
 0x60a   : > { %s16064_s16 = smov %s7389_s17  ;;  %s16065_s17 = smov %s7479_s24 }
 0x60b   : > { %s16066_s18 = smov %s7468_s21  ;;  %17 = sbr.rel (!%p15_p7) target bundleno = 4 (0x4), region = 76 }
 0x612   :  { %5727 = vsyncpa [#allocation3], 1 }
 0x613   :  { %5729 = vsyncpa [#allocation3 + $0x1], 1 }
 0x614   :  { %5730 = vsyncpa [#allocation4], 1 }
 0x615   :  { %5732 = vsyncpa [#allocation4 + $0x1], 1 }

</bundles_post_ra>
